<compile_context>
chip_gen: v7x
topology: tpu7x:2x2x1
jax: 0.10.0
libtpu: 0.0.40
codegen_flags: <defaults>
</compile_context>

<pallas_src>
import numpy as np

import jax
import jax.numpy as jnp
from jax import lax
from jax.experimental import pallas as pl
from jax.experimental.pallas import tpu as pltpu


_BN_EPS = 1e-5


def _round_up(x, m):
    return (x + m - 1) // m * m


def _vmem_limit_bytes():
    """Chip-aware scoped-VMEM budget: 96 MiB on 128-MiB parts, ~3/4 on v7x."""
    default = 32 * 1024 * 1024
    try:
        cap = getattr(pltpu.get_tpu_info(), "vmem_capacity_bytes", None)
    except Exception:
        return default
    if not cap:
        return default
    return max(default, min(96 * 1024 * 1024, int(cap) * 3 // 4))


# ------------------------- conv3x3 + BN + ReLU block --------------------------
def _conv3x3_bn_relu(x_nhwc, w_hwio, gamma, beta, *, out_dtype=jnp.float32):
    """Conv2d(3x3, pad=1, bias=False) + BatchNorm2d (batch stats) + ReLU, NHWC."""
    n, h, w, cin = x_nhwc.shape
    assert w_hwio.shape[:3] == (3, 3, cin), w_hwio.shape
    cout = w_hwio.shape[3]
    cout_pad = _round_up(cout, 128)            # lane-dense output dim
    k = 9 * cin
    vmem_limit = _vmem_limit_bytes()

    # Row tile: target ~512-row matmul M per grid step (amortizes the ~0.35us
    # per-step overhead and keeps the MXU fed), clamped to the image height.
    th = max(1, min(h, -(-512 // w)))
    h_pad = _round_up(h, th)
    n_tiles = h_pad // th
    thw = th * w
    num_blocks = n * n_tiles

    # Spatial zero pad (+1 halo each side; bottom also padded to a tile
    # multiple).  The halo lives in HBM once, not 9x.
    xp = jnp.pad(x_nhwc.astype(jnp.bfloat16),
                 ((0, 0), (1, 1 + (h_pad - h)), (1, 1), (0, 0)))
    if n_tiles == 1:
        win = xp                                        # (n, th+2, w+2, cin)
    else:
        # Overlapping row windows: ~(th+2)/th duplication instead of 9x im2col.
        win = jnp.stack([xp[:, i * th:i * th + th + 2] for i in range(n_tiles)],
                        axis=1).reshape(num_blocks, th + 2, w + 2, cin)

    # Weight (ky, kx, ci, co) -> (9*Cin, Cout_pad); bf16 MXU operand.
    wmat = jnp.pad(w_hwio.reshape(k, cout).astype(jnp.bfloat16),
                   ((0, 0), (0, cout_pad - cout)))

    def conv_stats_kernel(x_ref, w_ref, raw_ref, stats_ref):
        # Assemble the (thw, 9*Cin) im2col tile in VMEM (9 static halo slices),
        # then one MXU matmul with f32 accumulation.
        pieces = [x_ref[0, dy:dy + th, dx:dx + w, :].reshape(thw, cin)
                  for dy in range(3) for dx in range(3)]
        lhs = jnp.concatenate(pieces, axis=-1)                  # (thw, 9*cin)
        acc = jnp.dot(lhs, w_ref[...], preferred_element_type=jnp.float32)
        if h_pad != h:
            # Rows >= h are bottom padding; zero them so the batch statistics
            # only see the true N*H*W samples.
            row = lax.broadcasted_iota(jnp.int32, (thw, 1), 0) // w
            tile = pl.program_id(0) % n_tiles
            acc = jnp.where(row + tile * th < h, acc, 0.0)
        raw_ref[0] = acc.astype(raw_ref.dtype)                  # bf16 store
        # Partial stats from the f32 accumulator (before the bf16 cast),
        # written row-by-row (no concat / relayout).
        stats_ref[0, 0:1, :] = jnp.sum(acc, axis=0, keepdims=True)
        stats_ref[0, 1:2, :] = jnp.sum(acc * acc, axis=0, keepdims=True)

    # Keep a single VMEM copy of a large weight (matters on v7x's 64 MiB
    # VMEM); small weights keep the default double buffer.
    # TODO(synk): for extremely large 9*Cin, add a K grid axis ("arbitrary")
    # with a VMEM f32 accumulator instead of holding all of K in one block.
    w_spec_kwargs = {}
    if k * cout_pad * 2 > 4 * 1024 * 1024:
        w_spec_kwargs["pipeline_mode"] = pl.Buffered(1)
    w_spec = pl.BlockSpec((k, cout_pad), lambda i: (0, 0), **w_spec_kwargs)

    raw, part = pl.pallas_call(
        conv_stats_kernel,
        out_shape=(jax.ShapeDtypeStruct((num_blocks, thw, cout_pad), jnp.bfloat16),
                   jax.ShapeDtypeStruct((num_blocks, 2, cout_pad), jnp.float32)),
        grid=(num_blocks,),
        in_specs=[pl.BlockSpec((1, th + 2, w + 2, cin), lambda i: (i, 0, 0, 0)),
                  w_spec],
        out_specs=(pl.BlockSpec((1, thw, cout_pad), lambda i: (i, 0, 0)),
                   pl.BlockSpec((1, 2, cout_pad), lambda i: (i, 0, 0))),
        compiler_params=pltpu.CompilerParams(
            dimension_semantics=("parallel",),     # megacore-shardable M tiles
            vmem_limit_bytes=vmem_limit),
    )(win, wmat)

    # O(Cout) cross-tile reduction + BN coefficients in plain JAX.  Training-
    # mode BatchNorm2d: biased batch stats over the true N*H*W samples (the
    # zero-masked padding rows contribute nothing).  One-pass E[x^2]-mean^2
    # form; adequate at these magnitudes/tolerances.
    m_true = jnp.float32(n * h * w)
    stats = jnp.sum(part, axis=0)                               # (2, cout_pad)
    mean = stats[0] / m_true
    var = jnp.maximum(stats[1] / m_true - mean * mean, 0.0)
    gamma_p = jnp.pad(gamma.astype(jnp.float32).reshape(-1), (0, cout_pad - cout))
    beta_p = jnp.pad(beta.astype(jnp.float32).reshape(-1), (0, cout_pad - cout))
    scale = gamma_p * lax.rsqrt(var + _BN_EPS)
    shift = beta_p - mean * scale

    # BN affine + ReLU: pure elementwise pass with large row tiles (chosen to
    # divide M exactly) and in-place aliasing when dtypes match.
    m2 = num_blocks * thw
    raw2 = raw.reshape(m2, cout_pad)
    g = max(1, min(num_blocks, max(1, 2048 // thw)))
    while num_blocks % g:
        g -= 1
    tm_b = g * thw

    def bn_relu_kernel(raw_ref, scale_ref, shift_ref, o_ref):
        y = raw_ref[...].astype(jnp.float32) * scale_ref[...] + shift_ref[...]
        o_ref[...] = jnp.maximum(y, 0.0).astype(o_ref.dtype)

    alias = {"input_output_aliases": {0: 0}} if out_dtype == raw.dtype else {}
    y = pl.pallas_call(
        bn_relu_kernel,
        out_shape=jax.ShapeDtypeStruct((m2, cout_pad), out_dtype),
        grid=(m2 // tm_b,),
        in_specs=[pl.BlockSpec((tm_b, cout_pad), lambda i: (i, 0)),
                  pl.BlockSpec((1, cout_pad), lambda i: (0, 0)),
                  pl.BlockSpec((1, cout_pad), lambda i: (0, 0))],
        out_specs=pl.BlockSpec((tm_b, cout_pad), lambda i: (i, 0)),
        compiler_params=pltpu.CompilerParams(
            dimension_semantics=("parallel",),
            vmem_limit_bytes=vmem_limit),
        **alias,
    )(raw2, scale.reshape(1, cout_pad), shift.reshape(1, cout_pad))

    return y.reshape(n, h_pad, w, cout_pad)[:, :h, :, :cout]


# ------------------------------- JAX glue -------------------------------------
def _interp_matrix_np(n_in, n_out):
    """Bilinear interpolation matrix (align_corners=True), built at trace time."""
    if n_in == 1:
        return np.ones((n_out, 1), np.float32)
    src = np.arange(n_out, dtype=np.float64) * (n_in - 1) / (n_out - 1)
    i0 = np.clip(np.floor(src).astype(np.int64), 0, n_in - 1)
    i1 = np.minimum(i0 + 1, n_in - 1)
    f = src - i0
    a = np.zeros((n_out, n_in), np.float64)
    a[np.arange(n_out), i0] += 1.0 - f
    a[np.arange(n_out), i1] += f
    return a.astype(np.float32)


def _up_glue(x1, x2):
    """Upsample x1 (x2 bilinear, align_corners=True), pad to x2's spatial size,
    concat channels.  Everything in NHWC; no gathers, no big-tensor transposes."""
    x1 = jnp.transpose(x1, (0, 2, 3, 1))
    x2 = jnp.transpose(x2, (0, 2, 3, 1))
    _, h, w, _ = x1.shape
    ah = jnp.asarray(_interp_matrix_np(h, 2 * h))
    aw = jnp.asarray(_interp_matrix_np(w, 2 * w))
    # Static-stencil upsample as two tiny constant matmuls.
    xu = jnp.einsum("ph,nhwc->npwc", ah, x1, precision=lax.Precision.HIGHEST)
    xu = jnp.einsum("qw,npwc->npqc", aw, xu, precision=lax.Precision.HIGHEST)
    diff_y = x2.shape[1] - xu.shape[1]
    diff_x = x2.shape[2] - xu.shape[2]
    # Literal translation of the reference:
    #   F.pad(x1, [dx//2, dy//2, dx - dx//2, dy - dy//2])
    # => W gets (dx//2, dy//2) and H gets (dx - dx//2, dy - dy//2).
    pad_w = (diff_x // 2, diff_y // 2)
    pad_h = (diff_x - diff_x // 2, diff_y - diff_y // 2)
    xu = jnp.pad(xu, ((0, 0), pad_h, pad_w, (0, 0)))
    return jnp.concatenate([x2, xu], axis=-1)        # NHWC, C = in_channels


def up_forward(params, x1, x2):
    """Forward of _Up(in_channels, out_channels, bilinear=True).  NCHW in/out."""
    x = _up_glue(x1, x2)
    y1 = _conv3x3_bn_relu(x, params["w1"], params["g1"], params["b1"],
                          out_dtype=jnp.bfloat16)    # feeds the next bf16 matmul
    y2 = _conv3x3_bn_relu(y1, params["w2"], params["g2"], params["b2"],
                          out_dtype=jnp.float32)
    return jnp.transpose(y2, (0, 3, 1, 2))


def init_up_params(key, in_channels, out_channels):
    """bilinear=True => mid_channels = in_channels // 2.  Weights stored HWIO."""
    mid = in_channels // 2
    k1, k2 = jax.random.split(key, 2)
    w1 = 0.1 * jax.random.normal(k1, (3, 3, in_channels, mid), jnp.float32)
    w2 = 0.1 * jax.random.normal(k2, (3, 3, mid, out_channels), jnp.float32)
    return {
        "w1": w1,
        "g1": jnp.ones((mid,), jnp.float32),
        "b1": jnp.zeros((mid,), jnp.float32),
        "w2": w2,
        "g2": jnp.ones((out_channels,), jnp.float32),
        "b2": jnp.zeros((out_channels,), jnp.float32),
    }


# ---------------------- pure-JAX reference (self-check) ------------------------
def ref_up_forward(params, x1, x2):
    """Same math / dtype policy (bf16 matmul operands, f32 accum/BN), no Pallas."""
    x = _up_glue(x1, x2)

    def block(xin, w, g, b):
        y = lax.conv_general_dilated(
            xin.astype(jnp.bfloat16), w.astype(jnp.bfloat16),
            window_strides=(1, 1), padding="SAME",
            dimension_numbers=("NHWC", "HWIO", "NHWC"),
            preferred_element_type=jnp.float32)
        mean = jnp.mean(y, axis=(0, 1, 2))
        var = jnp.mean(jnp.square(y - mean), axis=(0, 1, 2))
        yn = (y - mean) * lax.rsqrt(var + _BN_EPS) * g + b
        return jnp.maximum(yn, 0.0)

    y1 = block(x, params["w1"], params["g1"], params["b1"]).astype(jnp.bfloat16)
    y2 = block(y1, params["w2"], params["g2"], params["b2"])
    return jnp.transpose(y2, (0, 3, 1, 2))


if __name__ == "__main__":
    key = jax.random.PRNGKey(0)
    kx1, kx2, kp = jax.random.split(key, 3)

    N = 2
    in_channels = 8          # concat channel count fed to _DoubleConv
    out_channels = 8
    H1, W1 = 8, 8            # x1 spatial (bilinear x2 -> 16x16)

    # Standard UNet skip: x1 and x2 each carry in_channels // 2 channels.
    x1 = jax.random.normal(kx1, (N, in_channels // 2, H1, W1), jnp.float32)
    x2 = jax.random.normal(kx2, (N, in_channels // 2, 2 * H1, 2 * W1), jnp.float32)
    params = init_up_params(kp, in_channels, out_channels)

    out = jax.block_until_ready(jax.jit(up_forward)(params, x1, x2))
    assert out.shape == (N, out_channels, 2 * H1, 2 * W1), out.shape
    assert out.dtype == jnp.float32

    ref = jax.block_until_ready(jax.jit(ref_up_forward)(params, x1, x2))
    err = float(jnp.max(jnp.abs(out - ref)))
    assert err < 2e-2, f"max |pallas - ref| = {err}"

    print("KERNEL_OK")
</pallas_src>

<mosaic_0001>
module attributes {stable_mosaic.version = 11 : i64} {
  func.func @conv_stats_kernel(%arg0: i32, %arg1: memref<1x18x18x8xbf16, #tpu.memory_space<vmem>>, %arg2: memref<72x128xbf16, #tpu.memory_space<vmem>>, %arg3: memref<1x256x128xbf16, #tpu.memory_space<vmem>>, %arg4: memref<1x2x128xf32, #tpu.memory_space<vmem>>) attributes {dimension_semantics = [#tpu.dimension_semantics<parallel>], iteration_bounds = array<i64: 2>, scalar_prefetch = 0 : i64, scratch_operands = 0 : i64, tpu.core_type = #tpu.core_type<tc>, window_params = [{transform_indices = @transform_0, window_bounds = array<i64: 1, 18, 18, 8>}, {pipeline_mode = #tpu.pipeline_mode<synchronous>, transform_indices = @transform_1, window_bounds = array<i64: 72, 128>}, {transform_indices = @transform_2, window_bounds = array<i64: 1, 256, 128>}, {transform_indices = @transform_3, window_bounds = array<i64: 1, 2, 128>}]} {
    %c0 = arith.constant 0 : index
    %c0_0 = arith.constant 0 : index
    %c0_1 = arith.constant 0 : index
    %c0_2 = arith.constant 0 : index
    %0 = vector.load %arg1[%c0, %c0_0, %c0_1, %c0_2] : memref<1x18x18x8xbf16, #tpu.memory_space<vmem>>, vector<1x16x16x8xbf16>
    %1 = vector.shape_cast %0 : vector<1x16x16x8xbf16> to vector<16x16x8xbf16>
    %2 = vector.shape_cast %1 : vector<16x16x8xbf16> to vector<256x8xbf16>
    %c0_3 = arith.constant 0 : index
    %c0_4 = arith.constant 0 : index
    %c1 = arith.constant 1 : index
    %c0_5 = arith.constant 0 : index
    %3 = vector.load %arg1[%c0_3, %c0_4, %c1, %c0_5] : memref<1x18x18x8xbf16, #tpu.memory_space<vmem>>, vector<1x16x16x8xbf16>
    %4 = vector.shape_cast %3 : vector<1x16x16x8xbf16> to vector<16x16x8xbf16>
    %5 = vector.shape_cast %4 : vector<16x16x8xbf16> to vector<256x8xbf16>
    %c0_6 = arith.constant 0 : index
    %c0_7 = arith.constant 0 : index
    %c2 = arith.constant 2 : index
    %c0_8 = arith.constant 0 : index
    %6 = vector.load %arg1[%c0_6, %c0_7, %c2, %c0_8] : memref<1x18x18x8xbf16, #tpu.memory_space<vmem>>, vector<1x16x16x8xbf16>
    %7 = vector.shape_cast %6 : vector<1x16x16x8xbf16> to vector<16x16x8xbf16>
    %8 = vector.shape_cast %7 : vector<16x16x8xbf16> to vector<256x8xbf16>
    %c0_9 = arith.constant 0 : index
    %c1_10 = arith.constant 1 : index
    %c0_11 = arith.constant 0 : index
    %c0_12 = arith.constant 0 : index
    %9 = vector.load %arg1[%c0_9, %c1_10, %c0_11, %c0_12] : memref<1x18x18x8xbf16, #tpu.memory_space<vmem>>, vector<1x16x16x8xbf16>
    %10 = vector.shape_cast %9 : vector<1x16x16x8xbf16> to vector<16x16x8xbf16>
    %11 = vector.shape_cast %10 : vector<16x16x8xbf16> to vector<256x8xbf16>
    %c0_13 = arith.constant 0 : index
    %c1_14 = arith.constant 1 : index
    %c1_15 = arith.constant 1 : index
    %c0_16 = arith.constant 0 : index
    %12 = vector.load %arg1[%c0_13, %c1_14, %c1_15, %c0_16] : memref<1x18x18x8xbf16, #tpu.memory_space<vmem>>, vector<1x16x16x8xbf16>
    %13 = vector.shape_cast %12 : vector<1x16x16x8xbf16> to vector<16x16x8xbf16>
    %14 = vector.shape_cast %13 : vector<16x16x8xbf16> to vector<256x8xbf16>
    %c0_17 = arith.constant 0 : index
    %c1_18 = arith.constant 1 : index
    %c2_19 = arith.constant 2 : index
    %c0_20 = arith.constant 0 : index
    %15 = vector.load %arg1[%c0_17, %c1_18, %c2_19, %c0_20] : memref<1x18x18x8xbf16, #tpu.memory_space<vmem>>, vector<1x16x16x8xbf16>
    %16 = vector.shape_cast %15 : vector<1x16x16x8xbf16> to vector<16x16x8xbf16>
    %17 = vector.shape_cast %16 : vector<16x16x8xbf16> to vector<256x8xbf16>
    %c0_21 = arith.constant 0 : index
    %c2_22 = arith.constant 2 : index
    %c0_23 = arith.constant 0 : index
    %c0_24 = arith.constant 0 : index
    %18 = vector.load %arg1[%c0_21, %c2_22, %c0_23, %c0_24] : memref<1x18x18x8xbf16, #tpu.memory_space<vmem>>, vector<1x16x16x8xbf16>
    %19 = vector.shape_cast %18 : vector<1x16x16x8xbf16> to vector<16x16x8xbf16>
    %20 = vector.shape_cast %19 : vector<16x16x8xbf16> to vector<256x8xbf16>
    %c0_25 = arith.constant 0 : index
    %c2_26 = arith.constant 2 : index
    %c1_27 = arith.constant 1 : index
    %c0_28 = arith.constant 0 : index
    %21 = vector.load %arg1[%c0_25, %c2_26, %c1_27, %c0_28] : memref<1x18x18x8xbf16, #tpu.memory_space<vmem>>, vector<1x16x16x8xbf16>
    %22 = vector.shape_cast %21 : vector<1x16x16x8xbf16> to vector<16x16x8xbf16>
    %23 = vector.shape_cast %22 : vector<16x16x8xbf16> to vector<256x8xbf16>
    %c0_29 = arith.constant 0 : index
    %c2_30 = arith.constant 2 : index
    %c2_31 = arith.constant 2 : index
    %c0_32 = arith.constant 0 : index
    %24 = vector.load %arg1[%c0_29, %c2_30, %c2_31, %c0_32] : memref<1x18x18x8xbf16, #tpu.memory_space<vmem>>, vector<1x16x16x8xbf16>
    %25 = vector.shape_cast %24 : vector<1x16x16x8xbf16> to vector<16x16x8xbf16>
    %26 = vector.shape_cast %25 : vector<16x16x8xbf16> to vector<256x8xbf16>
    %27 = tpu.concatenate %2, %5, %8, %11, %14, %17, %20, %23, %26 in 1 : vector<256x8xbf16>, vector<256x8xbf16>, vector<256x8xbf16>, vector<256x8xbf16>, vector<256x8xbf16>, vector<256x8xbf16>, vector<256x8xbf16>, vector<256x8xbf16>, vector<256x8xbf16> -> vector<256x72xbf16>
    %c0_33 = arith.constant 0 : index
    %c0_34 = arith.constant 0 : index
    %28 = vector.load %arg2[%c0_33, %c0_34] : memref<72x128xbf16, #tpu.memory_space<vmem>>, vector<72x128xbf16>
    %cst = arith.constant dense<0.000000e+00> : vector<256x128xf32>
    %29 = tpu.matmul %27, %28, %cst {dimension_numbers = #tpu.dot_dimension_numbers<[1], [0], [0], [1], [0, 0, 1, 1], [], []>} : vector<256x72xbf16>, vector<72x128xbf16>, vector<256x128xf32> -> vector<256x128xf32>
    %30 = arith.truncf %29 : vector<256x128xf32> to vector<256x128xbf16>
    %c0_35 = arith.constant 0 : index
    %c0_36 = arith.constant 0 : index
    %c0_37 = arith.constant 0 : index
    %31 = vector.load %arg3[%c0_35, %c0_36, %c0_37] : memref<1x256x128xbf16, #tpu.memory_space<vmem>>, vector<1x256x128xbf16>
    %32 = vector.shape_cast %31 : vector<1x256x128xbf16> to vector<256x128xbf16>
    %33 = vector.shape_cast %30 : vector<256x128xbf16> to vector<1x256x128xbf16>
    tpu.vector_store %arg3[%c0_35, %c0_36, %c0_37], %33 {strides = array<i32>} : memref<1x256x128xbf16, #tpu.memory_space<vmem>>, vector<1x256x128xbf16>,
    %cst_38 = arith.constant dense<0.000000e+00> : vector<128xf32>
    %34 = vector.multi_reduction <add>, %29, %cst_38 [0] : vector<256x128xf32> to vector<128xf32>
    %35 = vector.shape_cast %34 : vector<128xf32> to vector<1x128xf32>
    %c0_39 = arith.constant 0 : index
    %c0_40 = arith.constant 0 : index
    %c0_41 = arith.constant 0 : index
    %36 = vector.load %arg4[%c0_39, %c0_40, %c0_41] : memref<1x2x128xf32, #tpu.memory_space<vmem>>, vector<1x1x128xf32>
    %37 = vector.shape_cast %36 : vector<1x1x128xf32> to vector<1x128xf32>
    %38 = vector.shape_cast %35 : vector<1x128xf32> to vector<1x1x128xf32>
    tpu.vector_store %arg4[%c0_39, %c0_40, %c0_41], %38 {strides = array<i32>} : memref<1x2x128xf32, #tpu.memory_space<vmem>>, vector<1x1x128xf32>,
    %39 = arith.mulf %29, %29 : vector<256x128xf32>
    %cst_42 = arith.constant dense<0.000000e+00> : vector<128xf32>
    %40 = vector.multi_reduction <add>, %39, %cst_42 [0] : vector<256x128xf32> to vector<128xf32>
    %41 = vector.shape_cast %40 : vector<128xf32> to vector<1x128xf32>
    %c0_43 = arith.constant 0 : index
    %c1_44 = arith.constant 1 : index
    %c0_45 = arith.constant 0 : index
    %42 = vector.load %arg4[%c0_43, %c1_44, %c0_45] : memref<1x2x128xf32, #tpu.memory_space<vmem>>, vector<1x1x128xf32>
    %43 = vector.shape_cast %42 : vector<1x1x128xf32> to vector<1x128xf32>
    %44 = vector.shape_cast %41 : vector<1x128xf32> to vector<1x1x128xf32>
    tpu.vector_store %arg4[%c0_43, %c1_44, %c0_45], %44 {strides = array<i32>} : memref<1x2x128xf32, #tpu.memory_space<vmem>>, vector<1x1x128xf32>,
    return
  }
  func.func @transform_0(%arg0: i32) -> (i32, i32, i32, i32) {
    %c0_i32 = arith.constant 0 : i32
    %c0_i32_0 = arith.constant 0 : i32
    %c0_i32_1 = arith.constant 0 : i32
    %c0_i32_2 = arith.constant 0 : i32
    return %arg0, %c0_i32, %c0_i32_0, %c0_i32_1 : i32, i32, i32, i32
  }
  func.func @transform_1(%arg0: i32) -> (i32, i32) {
    %c0_i32 = arith.constant 0 : i32
    %c0_i32_0 = arith.constant 0 : i32
    %c0_i32_1 = arith.constant 0 : i32
    return %c0_i32, %c0_i32_0 : i32, i32
  }
  func.func @transform_2(%arg0: i32) -> (i32, i32, i32) {
    %c0_i32 = arith.constant 0 : i32
    %c0_i32_0 = arith.constant 0 : i32
    %c0_i32_1 = arith.constant 0 : i32
    return %arg0, %c0_i32, %c0_i32_0 : i32, i32, i32
  }
  func.func @transform_3(%arg0: i32) -> (i32, i32, i32) {
    %c0_i32 = arith.constant 0 : i32
    %c0_i32_0 = arith.constant 0 : i32
    %c0_i32_1 = arith.constant 0 : i32
    return %arg0, %c0_i32, %c0_i32_0 : i32, i32, i32
  }
}

module attributes {stable_mosaic.version = 11 : i64} {
  func.func @bn_relu_kernel(%arg0: i32, %arg1: memref<512x128xbf16, #tpu.memory_space<vmem>>, %arg2: memref<1x128xf32, #tpu.memory_space<vmem>>, %arg3: memref<1x128xf32, #tpu.memory_space<vmem>>, %arg4: memref<512x128xbf16, #tpu.memory_space<vmem>>) attributes {dimension_semantics = [#tpu.dimension_semantics<parallel>], iteration_bounds = array<i64: 1>, scalar_prefetch = 0 : i64, scratch_operands = 0 : i64, tpu.core_type = #tpu.core_type<tc>, window_params = [{transform_indices = @transform_0, window_bounds = array<i64: 512, 128>}, {pipeline_mode = #tpu.pipeline_mode<synchronous>, transform_indices = @transform_1, window_bounds = array<i64: 1, 128>}, {pipeline_mode = #tpu.pipeline_mode<synchronous>, transform_indices = @transform_2, window_bounds = array<i64: 1, 128>}, {transform_indices = @transform_3, window_bounds = array<i64: 512, 128>}]} {
    %c0 = arith.constant 0 : index
    %c0_0 = arith.constant 0 : index
    %0 = vector.load %arg1[%c0, %c0_0] : memref<512x128xbf16, #tpu.memory_space<vmem>>, vector<512x128xbf16>
    %1 = arith.extf %0 : vector<512x128xbf16> to vector<512x128xf32>
    %c0_1 = arith.constant 0 : index
    %c0_2 = arith.constant 0 : index
    %2 = vector.load %arg2[%c0_1, %c0_2] : memref<1x128xf32, #tpu.memory_space<vmem>>, vector<1x128xf32>
    %3 = vector.broadcast %2 : vector<1x128xf32> to vector<512x128xf32>
    %4 = arith.mulf %1, %3 : vector<512x128xf32>
    %c0_3 = arith.constant 0 : index
    %c0_4 = arith.constant 0 : index
    %5 = vector.load %arg3[%c0_3, %c0_4] : memref<1x128xf32, #tpu.memory_space<vmem>>, vector<1x128xf32>
    %6 = vector.broadcast %5 : vector<1x128xf32> to vector<512x128xf32>
    %7 = arith.addf %4, %6 : vector<512x128xf32>
    %cst = arith.constant 0.000000e+00 : f32
    %8 = vector.broadcast %cst : f32 to vector<512x128xf32>
    %9 = arith.maximumf %7, %8 : vector<512x128xf32>
    %10 = arith.truncf %9 : vector<512x128xf32> to vector<512x128xbf16>
    %c0_5 = arith.constant 0 : index
    %c0_6 = arith.constant 0 : index
    %11 = vector.load %arg4[%c0_5, %c0_6] : memref<512x128xbf16, #tpu.memory_space<vmem>>, vector<512x128xbf16>
    tpu.vector_store %arg4[%c0_5, %c0_6], %10 {strides = array<i32>} : memref<512x128xbf16, #tpu.memory_space<vmem>>, vector<512x128xbf16>,
    return
  }
  func.func @transform_0(%arg0: i32) -> (i32, i32) {
    %c0_i32 = arith.constant 0 : i32
    %c0_i32_0 = arith.constant 0 : i32
    return %arg0, %c0_i32 : i32, i32
  }
  func.func @transform_1(%arg0: i32) -> (i32, i32) {
    %c0_i32 = arith.constant 0 : i32
    %c0_i32_0 = arith.constant 0 : i32
    %c0_i32_1 = arith.constant 0 : i32
    return %c0_i32, %c0_i32_0 : i32, i32
  }
  func.func @transform_2(%arg0: i32) -> (i32, i32) {
    %c0_i32 = arith.constant 0 : i32
    %c0_i32_0 = arith.constant 0 : i32
    %c0_i32_1 = arith.constant 0 : i32
    return %c0_i32, %c0_i32_0 : i32, i32
  }
  func.func @transform_3(%arg0: i32) -> (i32, i32) {
    %c0_i32 = arith.constant 0 : i32
    %c0_i32_0 = arith.constant 0 : i32
    return %arg0, %c0_i32 : i32, i32
  }
}

module attributes {stable_mosaic.version = 11 : i64} {
  func.func @conv_stats_kernel(%arg0: i32, %arg1: memref<1x18x18x4xbf16, #tpu.memory_space<vmem>>, %arg2: memref<36x128xbf16, #tpu.memory_space<vmem>>, %arg3: memref<1x256x128xbf16, #tpu.memory_space<vmem>>, %arg4: memref<1x2x128xf32, #tpu.memory_space<vmem>>) attributes {dimension_semantics = [#tpu.dimension_semantics<parallel>], iteration_bounds = array<i64: 2>, scalar_prefetch = 0 : i64, scratch_operands = 0 : i64, tpu.core_type = #tpu.core_type<tc>, window_params = [{transform_indices = @transform_0, window_bounds = array<i64: 1, 18, 18, 4>}, {pipeline_mode = #tpu.pipeline_mode<synchronous>, transform_indices = @transform_1, window_bounds = array<i64: 36, 128>}, {transform_indices = @transform_2, window_bounds = array<i64: 1, 256, 128>}, {transform_indices = @transform_3, window_bounds = array<i64: 1, 2, 128>}]} {
    %c0 = arith.constant 0 : index
    %c0_0 = arith.constant 0 : index
    %c0_1 = arith.constant 0 : index
    %c0_2 = arith.constant 0 : index
    %0 = vector.load %arg1[%c0, %c0_0, %c0_1, %c0_2] : memref<1x18x18x4xbf16, #tpu.memory_space<vmem>>, vector<1x16x16x4xbf16>
    %1 = vector.shape_cast %0 : vector<1x16x16x4xbf16> to vector<16x16x4xbf16>
    %2 = vector.shape_cast %1 : vector<16x16x4xbf16> to vector<256x4xbf16>
    %c0_3 = arith.constant 0 : index
    %c0_4 = arith.constant 0 : index
    %c1 = arith.constant 1 : index
    %c0_5 = arith.constant 0 : index
    %3 = vector.load %arg1[%c0_3, %c0_4, %c1, %c0_5] : memref<1x18x18x4xbf16, #tpu.memory_space<vmem>>, vector<1x16x16x4xbf16>
    %4 = vector.shape_cast %3 : vector<1x16x16x4xbf16> to vector<16x16x4xbf16>
    %5 = vector.shape_cast %4 : vector<16x16x4xbf16> to vector<256x4xbf16>
    %c0_6 = arith.constant 0 : index
    %c0_7 = arith.constant 0 : index
    %c2 = arith.constant 2 : index
    %c0_8 = arith.constant 0 : index
    %6 = vector.load %arg1[%c0_6, %c0_7, %c2, %c0_8] : memref<1x18x18x4xbf16, #tpu.memory_space<vmem>>, vector<1x16x16x4xbf16>
    %7 = vector.shape_cast %6 : vector<1x16x16x4xbf16> to vector<16x16x4xbf16>
    %8 = vector.shape_cast %7 : vector<16x16x4xbf16> to vector<256x4xbf16>
    %c0_9 = arith.constant 0 : index
    %c1_10 = arith.constant 1 : index
    %c0_11 = arith.constant 0 : index
    %c0_12 = arith.constant 0 : index
    %9 = vector.load %arg1[%c0_9, %c1_10, %c0_11, %c0_12] : memref<1x18x18x4xbf16, #tpu.memory_space<vmem>>, vector<1x16x16x4xbf16>
    %10 = vector.shape_cast %9 : vector<1x16x16x4xbf16> to vector<16x16x4xbf16>
    %11 = vector.shape_cast %10 : vector<16x16x4xbf16> to vector<256x4xbf16>
    %c0_13 = arith.constant 0 : index
    %c1_14 = arith.constant 1 : index
    %c1_15 = arith.constant 1 : index
    %c0_16 = arith.constant 0 : index
    %12 = vector.load %arg1[%c0_13, %c1_14, %c1_15, %c0_16] : memref<1x18x18x4xbf16, #tpu.memory_space<vmem>>, vector<1x16x16x4xbf16>
    %13 = vector.shape_cast %12 : vector<1x16x16x4xbf16> to vector<16x16x4xbf16>
    %14 = vector.shape_cast %13 : vector<16x16x4xbf16> to vector<256x4xbf16>
    %c0_17 = arith.constant 0 : index
    %c1_18 = arith.constant 1 : index
    %c2_19 = arith.constant 2 : index
    %c0_20 = arith.constant 0 : index
    %15 = vector.load %arg1[%c0_17, %c1_18, %c2_19, %c0_20] : memref<1x18x18x4xbf16, #tpu.memory_space<vmem>>, vector<1x16x16x4xbf16>
    %16 = vector.shape_cast %15 : vector<1x16x16x4xbf16> to vector<16x16x4xbf16>
    %17 = vector.shape_cast %16 : vector<16x16x4xbf16> to vector<256x4xbf16>
    %c0_21 = arith.constant 0 : index
    %c2_22 = arith.constant 2 : index
    %c0_23 = arith.constant 0 : index
    %c0_24 = arith.constant 0 : index
    %18 = vector.load %arg1[%c0_21, %c2_22, %c0_23, %c0_24] : memref<1x18x18x4xbf16, #tpu.memory_space<vmem>>, vector<1x16x16x4xbf16>
    %19 = vector.shape_cast %18 : vector<1x16x16x4xbf16> to vector<16x16x4xbf16>
    %20 = vector.shape_cast %19 : vector<16x16x4xbf16> to vector<256x4xbf16>
    %c0_25 = arith.constant 0 : index
    %c2_26 = arith.constant 2 : index
    %c1_27 = arith.constant 1 : index
    %c0_28 = arith.constant 0 : index
    %21 = vector.load %arg1[%c0_25, %c2_26, %c1_27, %c0_28] : memref<1x18x18x4xbf16, #tpu.memory_space<vmem>>, vector<1x16x16x4xbf16>
    %22 = vector.shape_cast %21 : vector<1x16x16x4xbf16> to vector<16x16x4xbf16>
    %23 = vector.shape_cast %22 : vector<16x16x4xbf16> to vector<256x4xbf16>
    %c0_29 = arith.constant 0 : index
    %c2_30 = arith.constant 2 : index
    %c2_31 = arith.constant 2 : index
    %c0_32 = arith.constant 0 : index
    %24 = vector.load %arg1[%c0_29, %c2_30, %c2_31, %c0_32] : memref<1x18x18x4xbf16, #tpu.memory_space<vmem>>, vector<1x16x16x4xbf16>
    %25 = vector.shape_cast %24 : vector<1x16x16x4xbf16> to vector<16x16x4xbf16>
    %26 = vector.shape_cast %25 : vector<16x16x4xbf16> to vector<256x4xbf16>
    %27 = tpu.concatenate %2, %5, %8, %11, %14, %17, %20, %23, %26 in 1 : vector<256x4xbf16>, vector<256x4xbf16>, vector<256x4xbf16>, vector<256x4xbf16>, vector<256x4xbf16>, vector<256x4xbf16>, vector<256x4xbf16>, vector<256x4xbf16>, vector<256x4xbf16> -> vector<256x36xbf16>
    %c0_33 = arith.constant 0 : index
    %c0_34 = arith.constant 0 : index
    %28 = vector.load %arg2[%c0_33, %c0_34] : memref<36x128xbf16, #tpu.memory_space<vmem>>, vector<36x128xbf16>
    %cst = arith.constant dense<0.000000e+00> : vector<256x128xf32>
    %29 = tpu.matmul %27, %28, %cst {dimension_numbers = #tpu.dot_dimension_numbers<[1], [0], [0], [1], [0, 0, 1, 1], [], []>} : vector<256x36xbf16>, vector<36x128xbf16>, vector<256x128xf32> -> vector<256x128xf32>
    %30 = arith.truncf %29 : vector<256x128xf32> to vector<256x128xbf16>
    %c0_35 = arith.constant 0 : index
    %c0_36 = arith.constant 0 : index
    %c0_37 = arith.constant 0 : index
    %31 = vector.load %arg3[%c0_35, %c0_36, %c0_37] : memref<1x256x128xbf16, #tpu.memory_space<vmem>>, vector<1x256x128xbf16>
    %32 = vector.shape_cast %31 : vector<1x256x128xbf16> to vector<256x128xbf16>
    %33 = vector.shape_cast %30 : vector<256x128xbf16> to vector<1x256x128xbf16>
    tpu.vector_store %arg3[%c0_35, %c0_36, %c0_37], %33 {strides = array<i32>} : memref<1x256x128xbf16, #tpu.memory_space<vmem>>, vector<1x256x128xbf16>,
    %cst_38 = arith.constant dense<0.000000e+00> : vector<128xf32>
    %34 = vector.multi_reduction <add>, %29, %cst_38 [0] : vector<256x128xf32> to vector<128xf32>
    %35 = vector.shape_cast %34 : vector<128xf32> to vector<1x128xf32>
    %c0_39 = arith.constant 0 : index
    %c0_40 = arith.constant 0 : index
    %c0_41 = arith.constant 0 : index
    %36 = vector.load %arg4[%c0_39, %c0_40, %c0_41] : memref<1x2x128xf32, #tpu.memory_space<vmem>>, vector<1x1x128xf32>
    %37 = vector.shape_cast %36 : vector<1x1x128xf32> to vector<1x128xf32>
    %38 = vector.shape_cast %35 : vector<1x128xf32> to vector<1x1x128xf32>
    tpu.vector_store %arg4[%c0_39, %c0_40, %c0_41], %38 {strides = array<i32>} : memref<1x2x128xf32, #tpu.memory_space<vmem>>, vector<1x1x128xf32>,
    %39 = arith.mulf %29, %29 : vector<256x128xf32>
    %cst_42 = arith.constant dense<0.000000e+00> : vector<128xf32>
    %40 = vector.multi_reduction <add>, %39, %cst_42 [0] : vector<256x128xf32> to vector<128xf32>
    %41 = vector.shape_cast %40 : vector<128xf32> to vector<1x128xf32>
    %c0_43 = arith.constant 0 : index
    %c1_44 = arith.constant 1 : index
    %c0_45 = arith.constant 0 : index
    %42 = vector.load %arg4[%c0_43, %c1_44, %c0_45] : memref<1x2x128xf32, #tpu.memory_space<vmem>>, vector<1x1x128xf32>
    %43 = vector.shape_cast %42 : vector<1x1x128xf32> to vector<1x128xf32>
    %44 = vector.shape_cast %41 : vector<1x128xf32> to vector<1x1x128xf32>
    tpu.vector_store %arg4[%c0_43, %c1_44, %c0_45], %44 {strides = array<i32>} : memref<1x2x128xf32, #tpu.memory_space<vmem>>, vector<1x1x128xf32>,
    return
  }
  func.func @transform_0(%arg0: i32) -> (i32, i32, i32, i32) {
    %c0_i32 = arith.constant 0 : i32
    %c0_i32_0 = arith.constant 0 : i32
    %c0_i32_1 = arith.constant 0 : i32
    %c0_i32_2 = arith.constant 0 : i32
    return %arg0, %c0_i32, %c0_i32_0, %c0_i32_1 : i32, i32, i32, i32
  }
  func.func @transform_1(%arg0: i32) -> (i32, i32) {
    %c0_i32 = arith.constant 0 : i32
    %c0_i32_0 = arith.constant 0 : i32
    %c0_i32_1 = arith.constant 0 : i32
    return %c0_i32, %c0_i32_0 : i32, i32
  }
  func.func @transform_2(%arg0: i32) -> (i32, i32, i32) {
    %c0_i32 = arith.constant 0 : i32
    %c0_i32_0 = arith.constant 0 : i32
    %c0_i32_1 = arith.constant 0 : i32
    return %arg0, %c0_i32, %c0_i32_0 : i32, i32, i32
  }
  func.func @transform_3(%arg0: i32) -> (i32, i32, i32) {
    %c0_i32 = arith.constant 0 : i32
    %c0_i32_0 = arith.constant 0 : i32
    %c0_i32_1 = arith.constant 0 : i32
    return %arg0, %c0_i32, %c0_i32_0 : i32, i32, i32
  }
}

module attributes {stable_mosaic.version = 11 : i64} {
  func.func @bn_relu_kernel(%arg0: i32, %arg1: memref<512x128xbf16, #tpu.memory_space<vmem>>, %arg2: memref<1x128xf32, #tpu.memory_space<vmem>>, %arg3: memref<1x128xf32, #tpu.memory_space<vmem>>, %arg4: memref<512x128xf32, #tpu.memory_space<vmem>>) attributes {dimension_semantics = [#tpu.dimension_semantics<parallel>], iteration_bounds = array<i64: 1>, scalar_prefetch = 0 : i64, scratch_operands = 0 : i64, tpu.core_type = #tpu.core_type<tc>, window_params = [{transform_indices = @transform_0, window_bounds = array<i64: 512, 128>}, {pipeline_mode = #tpu.pipeline_mode<synchronous>, transform_indices = @transform_1, window_bounds = array<i64: 1, 128>}, {pipeline_mode = #tpu.pipeline_mode<synchronous>, transform_indices = @transform_2, window_bounds = array<i64: 1, 128>}, {transform_indices = @transform_3, window_bounds = array<i64: 512, 128>}]} {
    %c0 = arith.constant 0 : index
    %c0_0 = arith.constant 0 : index
    %0 = vector.load %arg1[%c0, %c0_0] : memref<512x128xbf16, #tpu.memory_space<vmem>>, vector<512x128xbf16>
    %1 = arith.extf %0 : vector<512x128xbf16> to vector<512x128xf32>
    %c0_1 = arith.constant 0 : index
    %c0_2 = arith.constant 0 : index
    %2 = vector.load %arg2[%c0_1, %c0_2] : memref<1x128xf32, #tpu.memory_space<vmem>>, vector<1x128xf32>
    %3 = vector.broadcast %2 : vector<1x128xf32> to vector<512x128xf32>
    %4 = arith.mulf %1, %3 : vector<512x128xf32>
    %c0_3 = arith.constant 0 : index
    %c0_4 = arith.constant 0 : index
    %5 = vector.load %arg3[%c0_3, %c0_4] : memref<1x128xf32, #tpu.memory_space<vmem>>, vector<1x128xf32>
    %6 = vector.broadcast %5 : vector<1x128xf32> to vector<512x128xf32>
    %7 = arith.addf %4, %6 : vector<512x128xf32>
    %cst = arith.constant 0.000000e+00 : f32
    %8 = vector.broadcast %cst : f32 to vector<512x128xf32>
    %9 = arith.maximumf %7, %8 : vector<512x128xf32>
    %c0_5 = arith.constant 0 : index
    %c0_6 = arith.constant 0 : index
    %10 = vector.load %arg4[%c0_5, %c0_6] : memref<512x128xf32, #tpu.memory_space<vmem>>, vector<512x128xf32>
    tpu.vector_store %arg4[%c0_5, %c0_6], %9 {strides = array<i32>} : memref<512x128xf32, #tpu.memory_space<vmem>>, vector<512x128xf32>,
    return
  }
  func.func @transform_0(%arg0: i32) -> (i32, i32) {
    %c0_i32 = arith.constant 0 : i32
    %c0_i32_0 = arith.constant 0 : i32
    return %arg0, %c0_i32 : i32, i32
  }
  func.func @transform_1(%arg0: i32) -> (i32, i32) {
    %c0_i32 = arith.constant 0 : i32
    %c0_i32_0 = arith.constant 0 : i32
    %c0_i32_1 = arith.constant 0 : i32
    return %c0_i32, %c0_i32_0 : i32, i32
  }
  func.func @transform_2(%arg0: i32) -> (i32, i32) {
    %c0_i32 = arith.constant 0 : i32
    %c0_i32_0 = arith.constant 0 : i32
    %c0_i32_1 = arith.constant 0 : i32
    return %c0_i32, %c0_i32_0 : i32, i32
  }
  func.func @transform_3(%arg0: i32) -> (i32, i32) {
    %c0_i32 = arith.constant 0 : i32
    %c0_i32_0 = arith.constant 0 : i32
    return %arg0, %c0_i32 : i32, i32
  }
}

</mosaic_0001>

<bundles_post_ra>
// kernel: up_forward.5
= control target key start
LH: loop header
LB: loop body
LE: loop exit
PB: predicated region body
PF: predicated region fallthrough
CT: control target
= control target key end

     0   :  { %s1502_s0 = inlined_call_operand.vmem [shape: bf16[512,128], index: 0, kind: input, shape index: {}, may-alias: {0,3}]   ;;  %s1503_s1 = inlined_call_operand.vmem [shape: f32[1,128], index: 1, kind: input, shape index: {}]   ;;  %s1504_s2 = inlined_call_operand.vmem [shape: f32[1,128], index: 2, kind: input, shape index: {}]   ;;  %s1505_s3 = inlined_call_operand.vmem [shape: bf16[512,128], index: 3, kind: output, shape index: {}, may-alias: {0,3}]  }
   0x1   :  { %v803_v0 = vld [vmem:[%s1502_s0] sm:$0xff]   ;;  %v1090_v4 = vld [vmem:[%s1502_s0 + $0x8] sm:$0xff]   ;;  %v1091_v5 = vld [vmem:[%s1502_s0 + $0x10] sm:$0xff]  }
   0x2   :  { %v1178_v1 = vld [vmem:[%s1503_s1] ss:$0 sm:$0xff]  ;;  %v804_v2 = vunpack.c.l.bf16 %v803_v0  ;;  %v805_v3 = vunpack.c.h.bf16 %v803_v0  ;;  %v1092_v6 = vld [vmem:[%s1502_s0 + $0x18] sm:$0xff]   ;;  %v808_v8 = vunpack.c.l.bf16 %v1090_v4  ;;  %v809_v9 = vunpack.c.h.bf16 %v1090_v4  ;;  %v1094_v33 = vld [vmem:[%s1502_s0 + $0x28] sm:$0xff]  }
   0x3   :  { %v1192_v7 = vld [vmem:[%s1504_s2] ss:$0 sm:$0xff]  ;;  %v812_v10 = vunpack.c.l.bf16 %v1091_v5  ;;  %v813_v11 = vunpack.c.h.bf16 %v1091_v5  ;;  %v816_v14 = vunpack.c.l.bf16 %v1092_v6  ;;  %v817_v15 = vunpack.c.h.bf16 %v1092_v6  ;;  %v1095_v38 = vld [vmem:[%s1502_s0 + $0x30] sm:$0xff]   ;;  %v1096_v43 = vld [vmem:[%s1502_s0 + $0x38] sm:$0xff]  }
   0x4   :  { %v149_v12 = vmul.f32 %v804_v2, %v1178_v1  ;;  %v150_v13 = vmul.f32 %v805_v3, %v1178_v1  ;;  %v151_v16 = vmul.f32 %v808_v8, %v1178_v1  ;;  %v152_v17 = vmul.f32 %v809_v9, %v1178_v1  ;;  %v1093_v28 = vld [vmem:[%s1502_s0 + $0x20] sm:$0xff]  }
   0x5   :  { %v153_v18 = vmul.f32 %v812_v10, %v1178_v1  ;;  %v154_v19 = vmul.f32 %v813_v11, %v1178_v1  ;;  %v155_v22 = vmul.f32 %v816_v14, %v1178_v1  ;;  %v156_v23 = vmul.f32 %v817_v15, %v1178_v1 }
   0x6   :  { %v220_v20 = vadd.f32 %v1192_v7, %v149_v12  ;;  %v221_v21 = vadd.f32 %v1192_v7, %v150_v13  ;;  %v222_v24 = vadd.f32 %v1192_v7, %v151_v16  ;;  %v223_v25 = vadd.f32 %v1192_v7, %v152_v17 }
   0x7   :  { %v224_v26 = vadd.f32 %v1192_v7, %v153_v18  ;;  %v225_v27 = vadd.f32 %v1192_v7, %v154_v19  ;;  %v226_v31 = vadd.f32 %v1192_v7, %v155_v22  ;;  %v227_v32 = vadd.f32 %v1192_v7, %v156_v23 }
   0x8   :  { %v284_v29 = vmax.f32 %v220_v20, 0.0  ;;  %v285_v30 = vmax.f32 %v221_v21, 0.0  ;;  %v286_v34 = vmax.f32 %v222_v24, 0.0  ;;  %v287_v35 = vmax.f32 %v223_v25, 0.0 }
   0x9   :  { %v288_v36 = vmax.f32 %v224_v26, 0.0  ;;  %v289_v37 = vmax.f32 %v225_v27, 0.0  ;;  %v290_v40 = vmax.f32 %v226_v31, 0.0  ;;  %v291_v41 = vmax.f32 %v227_v32, 0.0 }
   0xa   :  { %v933_v39 = vpack.c.bf16 %v285_v30, %v284_v29  ;;  %v820_v42 = vunpack.c.l.bf16 %v1093_v28  ;;  %v938_v44 = vpack.c.bf16 %v287_v35, %v286_v34  ;;  %v821_v46 = vunpack.c.h.bf16 %v1093_v28 }
   0xb   :  { %v943_v45 = vpack.c.bf16 %v289_v37, %v288_v36  ;;  %v824_v47 = vunpack.c.l.bf16 %v1094_v33  ;;  %v948_v48 = vpack.c.bf16 %v291_v41, %v290_v40  ;;  %v825_v50 = vunpack.c.h.bf16 %v1094_v33 }
   0xc   :  { %934 = vst [vmem:[%s1505_s3] sm:$0xff] %v933_v39   ;;  %v157_v49 = vmul.f32 %v820_v42, %v1178_v1  ;;  %v828_v51 = vunpack.c.l.bf16 %v1095_v38  ;;  %1121 = vst [vmem:[%s1505_s3 + $0x8] sm:$0xff] %v938_v44   ;;  %v158_v52 = vmul.f32 %v821_v46, %v1178_v1  ;;  %v829_v54 = vunpack.c.h.bf16 %v1095_v38 }
   0xd   :  { %1122 = vst [vmem:[%s1505_s3 + $0x10] sm:$0xff] %v943_v45   ;;  %v159_v53 = vmul.f32 %v824_v47, %v1178_v1  ;;  %v832_v55 = vunpack.c.l.bf16 %v1096_v43  ;;  %1123 = vst [vmem:[%s1505_s3 + $0x18] sm:$0xff] %v948_v48   ;;  %v160_v57 = vmul.f32 %v825_v50, %v1178_v1  ;;  %v833_v59 = vunpack.c.h.bf16 %v1096_v43 }
   0xe   :  { %v228_v56 = vadd.f32 %v1192_v7, %v157_v49  ;;  %v161_v58 = vmul.f32 %v828_v51, %v1178_v1  ;;  %v229_v60 = vadd.f32 %v1192_v7, %v158_v52  ;;  %v162_v62 = vmul.f32 %v829_v54, %v1178_v1 }
   0xf   :  { %v230_v61 = vadd.f32 %v1192_v7, %v159_v53  ;;  %v163_v63 = vmul.f32 %v832_v55, %v1178_v1  ;;  %v231_v3 = vadd.f32 %v1192_v7, %v160_v57  ;;  %v164_v5 = vmul.f32 %v833_v59, %v1178_v1 }
  0x10   :  { %v292_v2 = vmax.f32 %v228_v56, 0.0  ;;  %v232_v4 = vadd.f32 %v1192_v7, %v161_v58  ;;  %v293_v6 = vmax.f32 %v229_v60, 0.0  ;;  %v233_v9 = vadd.f32 %v1192_v7, %v162_v62 }
  0x11   :  { %v294_v8 = vmax.f32 %v230_v61, 0.0  ;;  %v234_v10 = vadd.f32 %v1192_v7, %v163_v63  ;;  %v295_v12 = vmax.f32 %v231_v3, 0.0  ;;  %v235_v14 = vadd.f32 %v1192_v7, %v164_v5 }
  0x12   :  { %v296_v13 = vmax.f32 %v232_v4, 0.0  ;;  %v953_v17 = vpack.c.bf16 %v293_v6, %v292_v2  ;;  %v297_v18 = vmax.f32 %v233_v9, 0.0 }
  0x13   :  { %v298_v19 = vmax.f32 %v234_v10, 0.0  ;;  %v958_v21 = vpack.c.bf16 %v295_v12, %v294_v8  ;;  %v299_v22 = vmax.f32 %v235_v14, 0.0 }
  0x14   :  { %v1097_v0 = vld [vmem:[%s1502_s0 + $0x40] sm:$0xff]   ;;  %v1098_v11 = vld [vmem:[%s1502_s0 + $0x48] sm:$0xff]   ;;  %v1099_v16 = vld [vmem:[%s1502_s0 + $0x50] sm:$0xff]   ;;  %v963_v26 = vpack.c.bf16 %v297_v18, %v296_v13 }
  0x15   :  { %v836_v15 = vunpack.c.l.bf16 %v1097_v0  ;;  %v837_v20 = vunpack.c.h.bf16 %v1097_v0  ;;  %v840_v24 = vunpack.c.l.bf16 %v1098_v11  ;;  %v1100_v25 = vld [vmem:[%s1502_s0 + $0x58] sm:$0xff]   ;;  %v841_v28 = vunpack.c.h.bf16 %v1098_v11 }
  0x16   :  { %1124 = vst [vmem:[%s1505_s3 + $0x20] sm:$0xff] %v953_v17   ;;  %v844_v29 = vunpack.c.l.bf16 %v1099_v16  ;;  %1125 = vst [vmem:[%s1505_s3 + $0x28] sm:$0xff] %v958_v21   ;;  %v968_v30 = vpack.c.bf16 %v299_v22, %v298_v19  ;;  %v845_v33 = vunpack.c.h.bf16 %v1099_v16  ;;  %v848_v37 = vunpack.c.l.bf16 %v1100_v25 }
  0x17   :  { %v165_v23 = vmul.f32 %v836_v15, %v1178_v1  ;;  %v166_v27 = vmul.f32 %v837_v20, %v1178_v1  ;;  %v167_v32 = vmul.f32 %v840_v24, %v1178_v1  ;;  %1126 = vst [vmem:[%s1505_s3 + $0x30] sm:$0xff] %v963_v26   ;;  %v168_v35 = vmul.f32 %v841_v28, %v1178_v1 }
  0x18   :  { %v169_v36 = vmul.f32 %v844_v29, %v1178_v1  ;;  %v170_v41 = vmul.f32 %v845_v33, %v1178_v1  ;;  %v849_v42 = vunpack.c.h.bf16 %v1100_v25  ;;  %v171_v46 = vmul.f32 %v848_v37, %v1178_v1 }
  0x19   :  { %v236_v31 = vadd.f32 %v1192_v7, %v165_v23  ;;  %v237_v34 = vadd.f32 %v1192_v7, %v166_v27  ;;  %v238_v40 = vadd.f32 %v1192_v7, %v167_v32  ;;  %v239_v44 = vadd.f32 %v1192_v7, %v168_v35 }
  0x1a   :  { %v240_v45 = vadd.f32 %v1192_v7, %v169_v36  ;;  %v241_v48 = vadd.f32 %v1192_v7, %v170_v41  ;;  %v172_v49 = vmul.f32 %v849_v42, %v1178_v1  ;;  %v242_v55 = vadd.f32 %v1192_v7, %v171_v46 }
  0x1b   :  { %v300_v39 = vmax.f32 %v236_v31, 0.0  ;;  %v301_v43 = vmax.f32 %v237_v34, 0.0  ;;  %v302_v47 = vmax.f32 %v238_v40, 0.0  ;;  %v303_v53 = vmax.f32 %v239_v44, 0.0 }
  0x1c   :  { %v304_v54 = vmax.f32 %v240_v45, 0.0  ;;  %v305_v56 = vmax.f32 %v241_v48, 0.0  ;;  %v243_v57 = vadd.f32 %v1192_v7, %v172_v49  ;;  %v306_v62 = vmax.f32 %v242_v55, 0.0 }
  0x1d   :  { %v973_v52 = vpack.c.bf16 %v301_v43, %v300_v39  ;;  %v978_v61 = vpack.c.bf16 %v303_v53, %v302_v47 }
  0x1e   :  { %v1101_v38 = vld [vmem:[%s1502_s0 + $0x60] sm:$0xff]   ;;  %v983_v3 = vpack.c.bf16 %v305_v56, %v304_v54  ;;  %v307_v4 = vmax.f32 %v243_v57, 0.0 }
  0x1f   :  { %1127 = vst [vmem:[%s1505_s3 + $0x38] sm:$0xff] %v968_v30   ;;  %v852_v50 = vunpack.c.l.bf16 %v1101_v38  ;;  %v853_v58 = vunpack.c.h.bf16 %v1101_v38 }
  0x20   :  { %v988_v13 = vpack.c.bf16 %v307_v4, %v306_v62 }
  0x21   :  { %v173_v59 = vmul.f32 %v852_v50, %v1178_v1  ;;  %v174_v5 = vmul.f32 %v853_v58, %v1178_v1 }
  0x23   :  { %v244_v6 = vadd.f32 %v1192_v7, %v173_v59  ;;  %v245_v14 = vadd.f32 %v1192_v7, %v174_v5 }
  0x25   :  { %v308_v15 = vmax.f32 %v244_v6, 0.0  ;;  %v309_v21 = vmax.f32 %v245_v14, 0.0 }
  0x26   :  { %v1102_v51 = vld [vmem:[%s1502_s0 + $0x68] sm:$0xff]   ;;  %v1103_v60 = vld [vmem:[%s1502_s0 + $0x70] sm:$0xff]  }
  0x27   :  { %1128 = vst [vmem:[%s1505_s3 + $0x40] sm:$0xff] %v973_v52   ;;  %v856_v63 = vunpack.c.l.bf16 %v1102_v51  ;;  %v857_v0 = vunpack.c.h.bf16 %v1102_v51  ;;  %v860_v10 = vunpack.c.l.bf16 %v1103_v60  ;;  %v861_v11 = vunpack.c.h.bf16 %v1103_v60 }
  0x28   :  { %v993_v30 = vpack.c.bf16 %v309_v21, %v308_v15 }
  0x29   :  { %v175_v8 = vmul.f32 %v856_v63, %v1178_v1  ;;  %v176_v9 = vmul.f32 %v857_v0, %v1178_v1  ;;  %v177_v19 = vmul.f32 %v860_v10, %v1178_v1  ;;  %v178_v20 = vmul.f32 %v861_v11, %v1178_v1 }
  0x2b   :  { %v246_v17 = vadd.f32 %v1192_v7, %v175_v8  ;;  %v247_v18 = vadd.f32 %v1192_v7, %v176_v9  ;;  %v248_v27 = vadd.f32 %v1192_v7, %v177_v19  ;;  %v249_v28 = vadd.f32 %v1192_v7, %v178_v20 }
  0x2d   :  { %v310_v25 = vmax.f32 %v246_v17, 0.0  ;;  %v311_v26 = vmax.f32 %v247_v18, 0.0  ;;  %v312_v36 = vmax.f32 %v248_v27, 0.0  ;;  %v313_v37 = vmax.f32 %v249_v28, 0.0 }
  0x2e   :  { %v1104_v2 = vld [vmem:[%s1502_s0 + $0x78] sm:$0xff]  }
  0x2f   :  { %1129 = vst [vmem:[%s1505_s3 + $0x48] sm:$0xff] %v978_v61   ;;  %v864_v16 = vunpack.c.l.bf16 %v1104_v2  ;;  %v865_v22 = vunpack.c.h.bf16 %v1104_v2  ;;  %v998_v35 = vpack.c.bf16 %v311_v26, %v310_v25  ;;  %v1003_v44 = vpack.c.bf16 %v313_v37, %v312_v36 }
  0x31   :  { %v179_v23 = vmul.f32 %v864_v16, %v1178_v1  ;;  %v180_v31 = vmul.f32 %v865_v22, %v1178_v1 }
  0x33   :  { %v250_v32 = vadd.f32 %v1192_v7, %v179_v23  ;;  %v251_v39 = vadd.f32 %v1192_v7, %v180_v31 }
  0x35   :  { %v314_v40 = vmax.f32 %v250_v32, 0.0  ;;  %v315_v48 = vmax.f32 %v251_v39, 0.0 }
  0x36   :  { %v1105_v12 = vld [vmem:[%s1502_s0 + $0x80] sm:$0xff]  }
  0x37   :  { %1130 = vst [vmem:[%s1505_s3 + $0x50] sm:$0xff] %v983_v3   ;;  %1131 = vst [vmem:[%s1505_s3 + $0x58] sm:$0xff] %v988_v13   ;;  %v868_v24 = vunpack.c.l.bf16 %v1105_v12  ;;  %v869_v33 = vunpack.c.h.bf16 %v1105_v12  ;;  %v1008_v57 = vpack.c.bf16 %v315_v48, %v314_v40 }
  0x39   :  { %v181_v38 = vmul.f32 %v868_v24, %v1178_v1  ;;  %v182_v41 = vmul.f32 %v869_v33, %v1178_v1 }
  0x3b   :  { %v252_v45 = vadd.f32 %v1192_v7, %v181_v38  ;;  %v253_v49 = vadd.f32 %v1192_v7, %v182_v41 }
  0x3d   :  { %v316_v52 = vmax.f32 %v252_v45, 0.0  ;;  %v317_v58 = vmax.f32 %v253_v49, 0.0 }
  0x3e   :  { %v1106_v29 = vld [vmem:[%s1502_s0 + $0x88] sm:$0xff]   ;;  %v1107_v34 = vld [vmem:[%s1502_s0 + $0x90] sm:$0xff]  }
  0x3f   :  { %1132 = vst [vmem:[%s1505_s3 + $0x60] sm:$0xff] %v993_v30   ;;  %v872_v42 = vunpack.c.l.bf16 %v1106_v29  ;;  %v873_v46 = vunpack.c.h.bf16 %v1106_v29  ;;  %v876_v47 = vunpack.c.l.bf16 %v1107_v34  ;;  %v877_v51 = vunpack.c.h.bf16 %v1107_v34 }
  0x40   :  { %v1013_v3 = vpack.c.bf16 %v317_v58, %v316_v52 }
  0x41   :  { %v183_v50 = vmul.f32 %v872_v42, %v1178_v1  ;;  %v184_v53 = vmul.f32 %v873_v46, %v1178_v1  ;;  %v185_v54 = vmul.f32 %v876_v47, %v1178_v1  ;;  %v186_v60 = vmul.f32 %v877_v51, %v1178_v1 }
  0x43   :  { %v254_v59 = vadd.f32 %v1192_v7, %v183_v50  ;;  %v255_v61 = vadd.f32 %v1192_v7, %v184_v53  ;;  %v256_v62 = vadd.f32 %v1192_v7, %v185_v54  ;;  %v257_v5 = vadd.f32 %v1192_v7, %v186_v60 }
  0x45   :  { %v318_v4 = vmax.f32 %v254_v59, 0.0  ;;  %v319_v8 = vmax.f32 %v255_v61, 0.0  ;;  %v320_v9 = vmax.f32 %v256_v62, 0.0  ;;  %v321_v12 = vmax.f32 %v257_v5, 0.0 }
  0x46   :  { %v1108_v43 = vld [vmem:[%s1502_s0 + $0x98] sm:$0xff]  }
  0x47   :  { %1133 = vst [vmem:[%s1505_s3 + $0x68] sm:$0xff] %v998_v35   ;;  %1134 = vst [vmem:[%s1505_s3 + $0x70] sm:$0xff] %v1003_v44   ;;  %v880_v55 = vunpack.c.l.bf16 %v1108_v43  ;;  %v881_v63 = vunpack.c.h.bf16 %v1108_v43  ;;  %v1018_v17 = vpack.c.bf16 %v319_v8, %v318_v4  ;;  %v1023_v22 = vpack.c.bf16 %v321_v12, %v320_v9 }
  0x49   :  { %v187_v0 = vmul.f32 %v880_v55, %v1178_v1  ;;  %v188_v10 = vmul.f32 %v881_v63, %v1178_v1 }
  0x4b   :  { %v258_v11 = vadd.f32 %v1192_v7, %v187_v0  ;;  %v259_v18 = vadd.f32 %v1192_v7, %v188_v10 }
  0x4d   :  { %v322_v19 = vmax.f32 %v258_v11, 0.0  ;;  %v323_v26 = vmax.f32 %v259_v18, 0.0 }
  0x4e   :  { %v1109_v56 = vld [vmem:[%s1502_s0 + $0xa0] sm:$0xff]   ;;  %v1110_v2 = vld [vmem:[%s1502_s0 + $0xa8] sm:$0xff]  }
  0x4f   :  { %1135 = vst [vmem:[%s1505_s3 + $0x78] sm:$0xff] %v1008_v57   ;;  %v884_v6 = vunpack.c.l.bf16 %v1109_v56  ;;  %1136 = vst [vmem:[%s1505_s3 + $0x80] sm:$0xff] %v1013_v3   ;;  %v885_v13 = vunpack.c.h.bf16 %v1109_v56  ;;  %v888_v15 = vunpack.c.l.bf16 %v1110_v2  ;;  %v889_v20 = vunpack.c.h.bf16 %v1110_v2 }
  0x50   :  { %v1028_v35 = vpack.c.bf16 %v323_v26, %v322_v19 }
  0x51   :  { %v189_v14 = vmul.f32 %v884_v6, %v1178_v1  ;;  %v190_v23 = vmul.f32 %v885_v13, %v1178_v1  ;;  %v191_v25 = vmul.f32 %v888_v15, %v1178_v1  ;;  %v192_v27 = vmul.f32 %v889_v20, %v1178_v1 }
  0x53   :  { %v260_v24 = vadd.f32 %v1192_v7, %v189_v14  ;;  %v261_v30 = vadd.f32 %v1192_v7, %v190_v23  ;;  %v262_v32 = vadd.f32 %v1192_v7, %v191_v25  ;;  %v263_v36 = vadd.f32 %v1192_v7, %v192_v27 }
  0x55   :  { %v324_v31 = vmax.f32 %v260_v24, 0.0  ;;  %v325_v39 = vmax.f32 %v261_v30, 0.0  ;;  %v326_v40 = vmax.f32 %v262_v32, 0.0  ;;  %v327_v43 = vmax.f32 %v263_v36, 0.0 }
  0x56   :  { %v1111_v16 = vld [vmem:[%s1502_s0 + $0xb0] sm:$0xff]   ;;  %v1112_v21 = vld [vmem:[%s1502_s0 + $0xb8] sm:$0xff]  }
  0x57   :  { %1137 = vst [vmem:[%s1505_s3 + $0x88] sm:$0xff] %v1018_v17   ;;  %v892_v28 = vunpack.c.l.bf16 %v1111_v16  ;;  %v893_v29 = vunpack.c.h.bf16 %v1111_v16  ;;  %1138 = vst [vmem:[%s1505_s3 + $0x90] sm:$0xff] %v1023_v22   ;;  %v896_v33 = vunpack.c.l.bf16 %v1112_v21  ;;  %v897_v41 = vunpack.c.h.bf16 %v1112_v21 }
  0x58   :  { %v1033_v48 = vpack.c.bf16 %v325_v39, %v324_v31  ;;  %v1038_v53 = vpack.c.bf16 %v327_v43, %v326_v40 }
  0x59   :  { %v193_v37 = vmul.f32 %v892_v28, %v1178_v1  ;;  %v194_v38 = vmul.f32 %v893_v29, %v1178_v1  ;;  %v195_v42 = vmul.f32 %v896_v33, %v1178_v1  ;;  %v196_v49 = vmul.f32 %v897_v41, %v1178_v1 }
  0x5b   :  { %v264_v44 = vadd.f32 %v1192_v7, %v193_v37  ;;  %v265_v45 = vadd.f32 %v1192_v7, %v194_v38  ;;  %v266_v50 = vadd.f32 %v1192_v7, %v195_v42  ;;  %v267_v57 = vadd.f32 %v1192_v7, %v196_v49 }
  0x5d   :  { %v328_v54 = vmax.f32 %v264_v44, 0.0  ;;  %v329_v55 = vmax.f32 %v265_v45, 0.0  ;;  %v330_v58 = vmax.f32 %v266_v50, 0.0  ;;  %v331_v3 = vmax.f32 %v267_v57, 0.0 }
  0x5e   :  { %v1113_v34 = vld [vmem:[%s1502_s0 + $0xc0] sm:$0xff]  }
  0x5f   :  { %1139 = vst [vmem:[%s1505_s3 + $0x98] sm:$0xff] %v1028_v35   ;;  %v900_v46 = vunpack.c.l.bf16 %v1113_v34  ;;  %v901_v51 = vunpack.c.h.bf16 %v1113_v34  ;;  %v1043_v62 = vpack.c.bf16 %v329_v55, %v328_v54  ;;  %v1048_v13 = vpack.c.bf16 %v331_v3, %v330_v58 }
  0x61   :  { %v197_v56 = vmul.f32 %v900_v46, %v1178_v1  ;;  %v198_v59 = vmul.f32 %v901_v51, %v1178_v1 }
  0x63   :  { %v268_v63 = vadd.f32 %v1192_v7, %v197_v56  ;;  %v269_v4 = vadd.f32 %v1192_v7, %v198_v59 }
  0x65   :  { %v332_v8 = vmax.f32 %v268_v63, 0.0  ;;  %v333_v14 = vmax.f32 %v269_v4, 0.0 }
  0x66   :  { %v1114_v47 = vld [vmem:[%s1502_s0 + $0xc8] sm:$0xff]   ;;  %v1115_v52 = vld [vmem:[%s1502_s0 + $0xd0] sm:$0xff]  }
  0x67   :  { %1140 = vst [vmem:[%s1505_s3 + $0xa0] sm:$0xff] %v1033_v48   ;;  %v904_v60 = vunpack.c.l.bf16 %v1114_v47  ;;  %v905_v0 = vunpack.c.h.bf16 %v1114_v47  ;;  %v908_v2 = vunpack.c.l.bf16 %v1115_v52  ;;  %v909_v6 = vunpack.c.h.bf16 %v1115_v52 }
  0x68   :  { %v1053_v22 = vpack.c.bf16 %v333_v14, %v332_v8 }
  0x69   :  { %v199_v5 = vmul.f32 %v904_v60, %v1178_v1  ;;  %v200_v9 = vmul.f32 %v905_v0, %v1178_v1  ;;  %v201_v10 = vmul.f32 %v908_v2, %v1178_v1  ;;  %v202_v16 = vmul.f32 %v909_v6, %v1178_v1 }
  0x6b   :  { %v270_v15 = vadd.f32 %v1192_v7, %v199_v5  ;;  %v271_v17 = vadd.f32 %v1192_v7, %v200_v9  ;;  %v272_v18 = vadd.f32 %v1192_v7, %v201_v10  ;;  %v273_v24 = vadd.f32 %v1192_v7, %v202_v16 }
  0x6d   :  { %v334_v23 = vmax.f32 %v270_v15, 0.0  ;;  %v335_v26 = vmax.f32 %v271_v17, 0.0  ;;  %v336_v27 = vmax.f32 %v272_v18, 0.0  ;;  %v337_v30 = vmax.f32 %v273_v24, 0.0 }
  0x6e   :  { %v1116_v61 = vld [vmem:[%s1502_s0 + $0xd8] sm:$0xff]  }
  0x6f   :  { %1141 = vst [vmem:[%s1505_s3 + $0xa8] sm:$0xff] %v1038_v53   ;;  %1142 = vst [vmem:[%s1505_s3 + $0xb0] sm:$0xff] %v1043_v62   ;;  %v912_v11 = vunpack.c.l.bf16 %v1116_v61  ;;  %v913_v19 = vunpack.c.h.bf16 %v1116_v61  ;;  %v1058_v35 = vpack.c.bf16 %v335_v26, %v334_v23  ;;  %v1063_v40 = vpack.c.bf16 %v337_v30, %v336_v27 }
  0x71   :  { %v203_v20 = vmul.f32 %v912_v11, %v1178_v1  ;;  %v204_v28 = vmul.f32 %v913_v19, %v1178_v1 }
  0x73   :  { %v274_v29 = vadd.f32 %v1192_v7, %v203_v20  ;;  %v275_v36 = vadd.f32 %v1192_v7, %v204_v28 }
  0x75   :  { %v338_v37 = vmax.f32 %v274_v29, 0.0  ;;  %v339_v44 = vmax.f32 %v275_v36, 0.0 }
  0x76   :  { %v1117_v12 = vld [vmem:[%s1502_s0 + $0xe0] sm:$0xff]   ;;  %v1118_v21 = vld [vmem:[%s1502_s0 + $0xe8] sm:$0xff]  }
  0x77   :  { %1143 = vst [vmem:[%s1505_s3 + $0xb8] sm:$0xff] %v1048_v13   ;;  %v916_v25 = vunpack.c.l.bf16 %v1117_v12  ;;  %1144 = vst [vmem:[%s1505_s3 + $0xc0] sm:$0xff] %v1053_v22   ;;  %v917_v31 = vunpack.c.h.bf16 %v1117_v12  ;;  %v920_v33 = vunpack.c.l.bf16 %v1118_v21  ;;  %v921_v38 = vunpack.c.h.bf16 %v1118_v21 }
  0x78   :  { %v1068_v52 = vpack.c.bf16 %v339_v44, %v338_v37 }
  0x79   :  { %v205_v32 = vmul.f32 %v916_v25, %v1178_v1  ;;  %v206_v41 = vmul.f32 %v917_v31, %v1178_v1  ;;  %v207_v43 = vmul.f32 %v920_v33, %v1178_v1  ;;  %v208_v45 = vmul.f32 %v921_v38, %v1178_v1 }
  0x7b   :  { %v276_v42 = vadd.f32 %v1192_v7, %v205_v32  ;;  %v277_v48 = vadd.f32 %v1192_v7, %v206_v41  ;;  %v278_v50 = vadd.f32 %v1192_v7, %v207_v43  ;;  %v279_v53 = vadd.f32 %v1192_v7, %v208_v45 }
  0x7d   :  { %v340_v49 = vmax.f32 %v276_v42, 0.0  ;;  %v341_v56 = vmax.f32 %v277_v48, 0.0  ;;  %v342_v57 = vmax.f32 %v278_v50, 0.0  ;;  %v343_v60 = vmax.f32 %v279_v53, 0.0 }
  0x7e   :  { %v1119_v34 = vld [vmem:[%s1502_s0 + $0xf0] sm:$0xff]   ;;  %v1120_v39 = vld [vmem:[%s1502_s0 + $0xf8] sm:$0xff]  }
  0x7f   :  { %1145 = vst [vmem:[%s1505_s3 + $0xc8] sm:$0xff] %v1058_v35   ;;  %v924_v46 = vunpack.c.l.bf16 %v1119_v34  ;;  %v925_v47 = vunpack.c.h.bf16 %v1119_v34  ;;  %1146 = vst [vmem:[%s1505_s3 + $0xd0] sm:$0xff] %v1063_v40   ;;  %v928_v51 = vunpack.c.l.bf16 %v1120_v39  ;;  %v929_v58 = vunpack.c.h.bf16 %v1120_v39 }
  0x80   :  { %1147 = vst [vmem:[%s1505_s3 + $0xd8] sm:$0xff] %v1068_v52   ;;  %v1073_v63 = vpack.c.bf16 %v341_v56, %v340_v49  ;;  %v1078_v3 = vpack.c.bf16 %v343_v60, %v342_v57 }
  0x81   :  { %v209_v54 = vmul.f32 %v924_v46, %v1178_v1  ;;  %v210_v55 = vmul.f32 %v925_v47, %v1178_v1  ;;  %v211_v59 = vmul.f32 %v928_v51, %v1178_v1  ;;  %v212_v0 = vmul.f32 %v929_v58, %v1178_v1 }
  0x82   :  { %1148 = vst [vmem:[%s1505_s3 + $0xe0] sm:$0xff] %v1073_v63   ;;  %1149 = vst [vmem:[%s1505_s3 + $0xe8] sm:$0xff] %v1078_v3  }
  0x83   :  { %v280_v61 = vadd.f32 %v1192_v7, %v209_v54  ;;  %v281_v62 = vadd.f32 %v1192_v7, %v210_v55  ;;  %v282_v2 = vadd.f32 %v1192_v7, %v211_v59  ;;  %v283_v6 = vadd.f32 %v1192_v7, %v212_v0 }
  0x85   :  { %v344_v4 = vmax.f32 %v280_v61, 0.0  ;;  %v345_v5 = vmax.f32 %v281_v62, 0.0  ;;  %v346_v8 = vmax.f32 %v282_v2, 0.0  ;;  %v347_v10 = vmax.f32 %v283_v6, 0.0 }
  0x87   :  { %v1083_v9 = vpack.c.bf16 %v345_v5, %v344_v4  ;;  %v1088_v1 = vpack.c.bf16 %v347_v10, %v346_v8 }
  0x89   :  { %1150 = vst [vmem:[%s1505_s3 + $0xf0] sm:$0xff] %v1083_v9   ;;  %1151 = vst [vmem:[%s1505_s3 + $0xf8] sm:$0xff] %v1088_v1  }

// kernel: up_forward.7
= control target key start
LH: loop header
LB: loop body
LE: loop exit
PB: predicated region body
PF: predicated region fallthrough
CT: control target
= control target key end

     0   :  { %s1023_s0 = inlined_call_operand.vmem [shape: bf16[512,128], index: 0, kind: input, shape index: {}]   ;;  %s1024_s1 = inlined_call_operand.vmem [shape: f32[1,128], index: 1, kind: input, shape index: {}]   ;;  %s1025_s2 = inlined_call_operand.vmem [shape: f32[1,128], index: 2, kind: input, shape index: {}]   ;;  %s1026_s3 = inlined_call_operand.vmem [shape: f32[512,128], index: 3, kind: output, shape index: {}]  }
   0x1   :  { %v419_v0 = vld [vmem:[%s1023_s0] sm:$0xff]   ;;  %v546_v4 = vld [vmem:[%s1023_s0 + $0x8] sm:$0xff]   ;;  %v547_v5 = vld [vmem:[%s1023_s0 + $0x10] sm:$0xff]  }
   0x2   :  { %v603_v1 = vld [vmem:[%s1024_s1] ss:$0 sm:$0xff]  ;;  %v420_v2 = vunpack.c.l.bf16 %v419_v0  ;;  %v421_v3 = vunpack.c.h.bf16 %v419_v0  ;;  %v548_v6 = vld [vmem:[%s1023_s0 + $0x18] sm:$0xff]   ;;  %v424_v8 = vunpack.c.l.bf16 %v546_v4  ;;  %v425_v9 = vunpack.c.h.bf16 %v546_v4  ;;  %v550_v33 = vld [vmem:[%s1023_s0 + $0x28] sm:$0xff]  }
   0x3   :  { %v617_v7 = vld [vmem:[%s1025_s2] ss:$0 sm:$0xff]  ;;  %v428_v10 = vunpack.c.l.bf16 %v547_v5  ;;  %v429_v11 = vunpack.c.h.bf16 %v547_v5  ;;  %v432_v14 = vunpack.c.l.bf16 %v548_v6  ;;  %v433_v15 = vunpack.c.h.bf16 %v548_v6  ;;  %v551_v34 = vld [vmem:[%s1023_s0 + $0x30] sm:$0xff]   ;;  %v552_v39 = vld [vmem:[%s1023_s0 + $0x38] sm:$0xff]  }
   0x4   :  { %v149_v12 = vmul.f32 %v420_v2, %v603_v1  ;;  %v150_v13 = vmul.f32 %v421_v3, %v603_v1  ;;  %v151_v16 = vmul.f32 %v424_v8, %v603_v1  ;;  %v152_v17 = vmul.f32 %v425_v9, %v603_v1  ;;  %v549_v28 = vld [vmem:[%s1023_s0 + $0x20] sm:$0xff]   ;;  %v554_v6 = vld [vmem:[%s1023_s0 + $0x48] sm:$0xff]   ;;  %v555_v8 = vld [vmem:[%s1023_s0 + $0x50] sm:$0xff]  }
   0x5   :  { %v153_v18 = vmul.f32 %v428_v10, %v603_v1  ;;  %v154_v19 = vmul.f32 %v429_v11, %v603_v1  ;;  %v155_v22 = vmul.f32 %v432_v14, %v603_v1  ;;  %v156_v23 = vmul.f32 %v433_v15, %v603_v1  ;;  %v553_v0 = vld [vmem:[%s1023_s0 + $0x40] sm:$0xff]  }
   0x6   :  { %v220_v20 = vadd.f32 %v617_v7, %v149_v12  ;;  %v221_v21 = vadd.f32 %v617_v7, %v150_v13  ;;  %v222_v24 = vadd.f32 %v617_v7, %v151_v16  ;;  %v223_v25 = vadd.f32 %v617_v7, %v152_v17  ;;  %v556_v13 = vld [vmem:[%s1023_s0 + $0x58] sm:$0xff]  }
   0x7   :  { %v224_v26 = vadd.f32 %v617_v7, %v153_v18  ;;  %v225_v27 = vadd.f32 %v617_v7, %v154_v19  ;;  %v226_v31 = vadd.f32 %v617_v7, %v155_v22  ;;  %v227_v32 = vadd.f32 %v617_v7, %v156_v23 }
   0x8   :  { %v284_v29 = vmax.f32 %v220_v20, 0.0  ;;  %v285_v30 = vmax.f32 %v221_v21, 0.0  ;;  %v286_v35 = vmax.f32 %v222_v24, 0.0  ;;  %v287_v36 = vmax.f32 %v223_v25, 0.0 }
   0x9   :  { %v288_v37 = vmax.f32 %v224_v26, 0.0  ;;  %v289_v38 = vmax.f32 %v225_v27, 0.0  ;;  %v290_v40 = vmax.f32 %v226_v31, 0.0  ;;  %v291_v41 = vmax.f32 %v227_v32, 0.0 }
   0xa   :  { %348 = vst [vmem:[%s1026_s3] sm:$0xff] %v284_v29  ;;  %349 = vst [vmem:[%s1026_s3 + $0x8] sm:$0xff] %v285_v30  ;;  %v436_v42 = vunpack.c.l.bf16 %v549_v28  ;;  %v437_v43 = vunpack.c.h.bf16 %v549_v28  ;;  %v440_v44 = vunpack.c.l.bf16 %v550_v33  ;;  %v441_v45 = vunpack.c.h.bf16 %v550_v33 }
   0xb   :  { %350 = vst [vmem:[%s1026_s3 + $0x10] sm:$0xff] %v286_v35  ;;  %351 = vst [vmem:[%s1026_s3 + $0x18] sm:$0xff] %v287_v36  ;;  %v444_v46 = vunpack.c.l.bf16 %v551_v34  ;;  %v445_v47 = vunpack.c.h.bf16 %v551_v34  ;;  %v448_v50 = vunpack.c.l.bf16 %v552_v39  ;;  %v449_v51 = vunpack.c.h.bf16 %v552_v39 }
   0xc   :  { %352 = vst [vmem:[%s1026_s3 + $0x20] sm:$0xff] %v288_v37  ;;  %353 = vst [vmem:[%s1026_s3 + $0x28] sm:$0xff] %v289_v38  ;;  %v157_v48 = vmul.f32 %v436_v42, %v603_v1  ;;  %v158_v49 = vmul.f32 %v437_v43, %v603_v1  ;;  %v159_v52 = vmul.f32 %v440_v44, %v603_v1  ;;  %v452_v16 = vunpack.c.l.bf16 %v553_v0  ;;  %v557_v38 = vld [vmem:[%s1023_s0 + $0x60] sm:$0xff]   ;;  %v558_v43 = vld [vmem:[%s1023_s0 + $0x68] sm:$0xff]  }
   0xd   :  { %354 = vst [vmem:[%s1026_s3 + $0x30] sm:$0xff] %v290_v40  ;;  %355 = vst [vmem:[%s1026_s3 + $0x38] sm:$0xff] %v291_v41  ;;  %v160_v53 = vmul.f32 %v441_v45, %v603_v1  ;;  %v161_v54 = vmul.f32 %v444_v46, %v603_v1  ;;  %v162_v55 = vmul.f32 %v445_v47, %v603_v1  ;;  %v453_v17 = vunpack.c.h.bf16 %v553_v0  ;;  %v559_v44 = vld [vmem:[%s1023_s0 + $0x70] sm:$0xff]  }
   0xe   :  { %v228_v56 = vadd.f32 %v617_v7, %v157_v48  ;;  %v229_v57 = vadd.f32 %v617_v7, %v158_v49  ;;  %v163_v58 = vmul.f32 %v448_v50, %v603_v1  ;;  %v164_v59 = vmul.f32 %v449_v51, %v603_v1  ;;  %v560_v49 = vld [vmem:[%s1023_s0 + $0x78] sm:$0xff]  }
   0xf   :  { %v230_v60 = vadd.f32 %v617_v7, %v159_v52  ;;  %v231_v61 = vadd.f32 %v617_v7, %v160_v53  ;;  %v232_v62 = vadd.f32 %v617_v7, %v161_v54  ;;  %v233_v63 = vadd.f32 %v617_v7, %v162_v55 }
  0x10   :  { %v292_v2 = vmax.f32 %v228_v56, 0.0  ;;  %v293_v3 = vmax.f32 %v229_v57, 0.0  ;;  %v234_v4 = vadd.f32 %v617_v7, %v163_v58  ;;  %v235_v5 = vadd.f32 %v617_v7, %v164_v59 }
  0x11   :  { %v294_v9 = vmax.f32 %v230_v60, 0.0  ;;  %v295_v10 = vmax.f32 %v231_v61, 0.0  ;;  %v296_v11 = vmax.f32 %v232_v62, 0.0  ;;  %v297_v12 = vmax.f32 %v233_v63, 0.0 }
  0x12   :  { %356 = vst [vmem:[%s1026_s3 + $0x40] sm:$0xff] %v292_v2  ;;  %357 = vst [vmem:[%s1026_s3 + $0x48] sm:$0xff] %v293_v3  ;;  %v298_v14 = vmax.f32 %v234_v4, 0.0  ;;  %v299_v15 = vmax.f32 %v235_v5, 0.0  ;;  %v456_v18 = vunpack.c.l.bf16 %v554_v6  ;;  %v457_v19 = vunpack.c.h.bf16 %v554_v6 }
  0x13   :  { %358 = vst [vmem:[%s1026_s3 + $0x50] sm:$0xff] %v294_v9  ;;  %359 = vst [vmem:[%s1026_s3 + $0x58] sm:$0xff] %v295_v10  ;;  %v460_v20 = vunpack.c.l.bf16 %v555_v8  ;;  %v461_v21 = vunpack.c.h.bf16 %v555_v8  ;;  %v165_v22 = vmul.f32 %v452_v16, %v603_v1  ;;  %v166_v23 = vmul.f32 %v453_v17, %v603_v1  ;;  %v562_v17 = vld [vmem:[%s1023_s0 + $0x88] sm:$0xff]  }
  0x14   :  { %360 = vst [vmem:[%s1026_s3 + $0x60] sm:$0xff] %v296_v11  ;;  %361 = vst [vmem:[%s1026_s3 + $0x68] sm:$0xff] %v297_v12  ;;  %v464_v24 = vunpack.c.l.bf16 %v556_v13  ;;  %v465_v25 = vunpack.c.h.bf16 %v556_v13  ;;  %v167_v26 = vmul.f32 %v456_v18, %v603_v1  ;;  %v168_v27 = vmul.f32 %v457_v19, %v603_v1  ;;  %v561_v12 = vld [vmem:[%s1023_s0 + $0x80] sm:$0xff]   ;;  %v563_v18 = vld [vmem:[%s1023_s0 + $0x90] sm:$0xff]  }
  0x15   :  { %362 = vst [vmem:[%s1026_s3 + $0x70] sm:$0xff] %v298_v14  ;;  %363 = vst [vmem:[%s1026_s3 + $0x78] sm:$0xff] %v299_v15  ;;  %v169_v28 = vmul.f32 %v460_v20, %v603_v1  ;;  %v170_v29 = vmul.f32 %v461_v21, %v603_v1  ;;  %v236_v30 = vadd.f32 %v617_v7, %v165_v22  ;;  %v468_v52 = vunpack.c.l.bf16 %v557_v38 }
  0x16   :  { %v237_v31 = vadd.f32 %v617_v7, %v166_v23  ;;  %v171_v32 = vmul.f32 %v464_v24, %v603_v1  ;;  %v172_v33 = vmul.f32 %v465_v25, %v603_v1  ;;  %v238_v34 = vadd.f32 %v617_v7, %v167_v26  ;;  %v564_v23 = vld [vmem:[%s1023_s0 + $0x98] sm:$0xff]  }
  0x17   :  { %v239_v35 = vadd.f32 %v617_v7, %v168_v27  ;;  %v240_v36 = vadd.f32 %v617_v7, %v169_v28  ;;  %v241_v37 = vadd.f32 %v617_v7, %v170_v29  ;;  %v300_v39 = vmax.f32 %v236_v30, 0.0 }
  0x18   :  { %v301_v40 = vmax.f32 %v237_v31, 0.0  ;;  %v242_v41 = vadd.f32 %v617_v7, %v171_v32  ;;  %v243_v42 = vadd.f32 %v617_v7, %v172_v33  ;;  %v302_v45 = vmax.f32 %v238_v34, 0.0 }
  0x19   :  { %v303_v46 = vmax.f32 %v239_v35, 0.0  ;;  %v304_v47 = vmax.f32 %v240_v36, 0.0  ;;  %v305_v48 = vmax.f32 %v241_v37, 0.0  ;;  %364 = vst [vmem:[%s1026_s3 + $0x80] sm:$0xff] %v300_v39  ;;  %v469_v53 = vunpack.c.h.bf16 %v557_v38 }
  0x1a   :  { %365 = vst [vmem:[%s1026_s3 + $0x88] sm:$0xff] %v301_v40  ;;  %v306_v50 = vmax.f32 %v242_v41, 0.0  ;;  %v307_v51 = vmax.f32 %v243_v42, 0.0  ;;  %366 = vst [vmem:[%s1026_s3 + $0x90] sm:$0xff] %v302_v45  ;;  %v472_v54 = vunpack.c.l.bf16 %v558_v43  ;;  %v473_v55 = vunpack.c.h.bf16 %v558_v43 }
  0x1b   :  { %367 = vst [vmem:[%s1026_s3 + $0x98] sm:$0xff] %v303_v46  ;;  %368 = vst [vmem:[%s1026_s3 + $0xa0] sm:$0xff] %v304_v47  ;;  %v476_v56 = vunpack.c.l.bf16 %v559_v44  ;;  %v477_v57 = vunpack.c.h.bf16 %v559_v44  ;;  %v173_v58 = vmul.f32 %v468_v52, %v603_v1  ;;  %v174_v59 = vmul.f32 %v469_v53, %v603_v1  ;;  %v566_v53 = vld [vmem:[%s1023_s0 + $0xa8] sm:$0xff]  }
  0x1c   :  { %369 = vst [vmem:[%s1026_s3 + $0xa8] sm:$0xff] %v305_v48  ;;  %370 = vst [vmem:[%s1026_s3 + $0xb0] sm:$0xff] %v306_v50  ;;  %v480_v60 = vunpack.c.l.bf16 %v560_v49  ;;  %v481_v61 = vunpack.c.h.bf16 %v560_v49  ;;  %v175_v62 = vmul.f32 %v472_v54, %v603_v1  ;;  %v176_v63 = vmul.f32 %v473_v55, %v603_v1  ;;  %v565_v48 = vld [vmem:[%s1023_s0 + $0xa0] sm:$0xff]   ;;  %v567_v54 = vld [vmem:[%s1023_s0 + $0xb0] sm:$0xff]  }
  0x1d   :  { %371 = vst [vmem:[%s1026_s3 + $0xb8] sm:$0xff] %v307_v51  ;;  %v177_v0 = vmul.f32 %v476_v56, %v603_v1  ;;  %v178_v2 = vmul.f32 %v477_v57, %v603_v1  ;;  %v244_v3 = vadd.f32 %v617_v7, %v173_v58  ;;  %v245_v4 = vadd.f32 %v617_v7, %v174_v59  ;;  %v568_v59 = vld [vmem:[%s1023_s0 + $0xb8] sm:$0xff]  }
  0x1e   :  { %v179_v5 = vmul.f32 %v480_v60, %v603_v1  ;;  %v180_v6 = vmul.f32 %v481_v61, %v603_v1  ;;  %v246_v8 = vadd.f32 %v617_v7, %v175_v62  ;;  %v247_v9 = vadd.f32 %v617_v7, %v176_v63 }
  0x1f   :  { %v248_v10 = vadd.f32 %v617_v7, %v177_v0  ;;  %v249_v11 = vadd.f32 %v617_v7, %v178_v2  ;;  %v308_v13 = vmax.f32 %v244_v3, 0.0  ;;  %v309_v14 = vmax.f32 %v245_v4, 0.0 }
  0x20   :  { %v250_v15 = vadd.f32 %v617_v7, %v179_v5  ;;  %v251_v16 = vadd.f32 %v617_v7, %v180_v6  ;;  %v310_v19 = vmax.f32 %v246_v8, 0.0  ;;  %v311_v20 = vmax.f32 %v247_v9, 0.0 }
  0x21   :  { %v312_v21 = vmax.f32 %v248_v10, 0.0  ;;  %v313_v22 = vmax.f32 %v249_v11, 0.0  ;;  %372 = vst [vmem:[%s1026_s3 + $0xc0] sm:$0xff] %v308_v13  ;;  %373 = vst [vmem:[%s1026_s3 + $0xc8] sm:$0xff] %v309_v14  ;;  %v484_v26 = vunpack.c.l.bf16 %v561_v12  ;;  %v485_v27 = vunpack.c.h.bf16 %v561_v12 }
  0x22   :  { %v314_v24 = vmax.f32 %v250_v15, 0.0  ;;  %v315_v25 = vmax.f32 %v251_v16, 0.0  ;;  %374 = vst [vmem:[%s1026_s3 + $0xd0] sm:$0xff] %v310_v19  ;;  %375 = vst [vmem:[%s1026_s3 + $0xd8] sm:$0xff] %v311_v20  ;;  %v488_v28 = vunpack.c.l.bf16 %v562_v17  ;;  %v489_v29 = vunpack.c.h.bf16 %v562_v17 }
  0x23   :  { %376 = vst [vmem:[%s1026_s3 + $0xe0] sm:$0xff] %v312_v21  ;;  %377 = vst [vmem:[%s1026_s3 + $0xe8] sm:$0xff] %v313_v22  ;;  %v492_v30 = vunpack.c.l.bf16 %v563_v18  ;;  %v493_v31 = vunpack.c.h.bf16 %v563_v18  ;;  %v181_v32 = vmul.f32 %v484_v26, %v603_v1  ;;  %v182_v33 = vmul.f32 %v485_v27, %v603_v1  ;;  %v569_v22 = vld [vmem:[%s1023_s0 + $0xc0] sm:$0xff]   ;;  %v570_v27 = vld [vmem:[%s1023_s0 + $0xc8] sm:$0xff]  }
  0x24   :  { %378 = vst [vmem:[%s1026_s3 + $0xf0] sm:$0xff] %v314_v24  ;;  %379 = vst [vmem:[%s1026_s3 + $0xf8] sm:$0xff] %v315_v25  ;;  %v496_v34 = vunpack.c.l.bf16 %v564_v23  ;;  %v497_v35 = vunpack.c.h.bf16 %v564_v23  ;;  %v183_v36 = vmul.f32 %v488_v28, %v603_v1  ;;  %v184_v37 = vmul.f32 %v489_v29, %v603_v1  ;;  %v571_v28 = vld [vmem:[%s1023_s0 + $0xd0] sm:$0xff]  }
  0x25   :  { %v185_v38 = vmul.f32 %v492_v30, %v603_v1  ;;  %v186_v39 = vmul.f32 %v493_v31, %v603_v1  ;;  %v252_v40 = vadd.f32 %v617_v7, %v181_v32  ;;  %v253_v41 = vadd.f32 %v617_v7, %v182_v33  ;;  %v572_v33 = vld [vmem:[%s1023_s0 + $0xd8] sm:$0xff]  }
  0x26   :  { %v187_v42 = vmul.f32 %v496_v34, %v603_v1  ;;  %v188_v43 = vmul.f32 %v497_v35, %v603_v1  ;;  %v254_v44 = vadd.f32 %v617_v7, %v183_v36  ;;  %v255_v45 = vadd.f32 %v617_v7, %v184_v37 }
  0x27   :  { %v256_v46 = vadd.f32 %v617_v7, %v185_v38  ;;  %v257_v47 = vadd.f32 %v617_v7, %v186_v39  ;;  %v316_v49 = vmax.f32 %v252_v40, 0.0  ;;  %v317_v50 = vmax.f32 %v253_v41, 0.0 }
  0x28   :  { %v258_v51 = vadd.f32 %v617_v7, %v187_v42  ;;  %v259_v52 = vadd.f32 %v617_v7, %v188_v43  ;;  %v318_v55 = vmax.f32 %v254_v44, 0.0  ;;  %v319_v56 = vmax.f32 %v255_v45, 0.0 }
  0x29   :  { %v320_v57 = vmax.f32 %v256_v46, 0.0  ;;  %v321_v58 = vmax.f32 %v257_v47, 0.0  ;;  %380 = vst [vmem:[%s1026_s3 + $0x100] sm:$0xff] %v316_v49  ;;  %381 = vst [vmem:[%s1026_s3 + $0x108] sm:$0xff] %v317_v50  ;;  %v500_v62 = vunpack.c.l.bf16 %v565_v48  ;;  %v501_v63 = vunpack.c.h.bf16 %v565_v48 }
  0x2a   :  { %v322_v60 = vmax.f32 %v258_v51, 0.0  ;;  %v323_v61 = vmax.f32 %v259_v52, 0.0  ;;  %382 = vst [vmem:[%s1026_s3 + $0x110] sm:$0xff] %v318_v55  ;;  %383 = vst [vmem:[%s1026_s3 + $0x118] sm:$0xff] %v319_v56  ;;  %v504_v0 = vunpack.c.l.bf16 %v566_v53  ;;  %v505_v2 = vunpack.c.h.bf16 %v566_v53 }
  0x2b   :  { %384 = vst [vmem:[%s1026_s3 + $0x120] sm:$0xff] %v320_v57  ;;  %385 = vst [vmem:[%s1026_s3 + $0x128] sm:$0xff] %v321_v58  ;;  %v508_v3 = vunpack.c.l.bf16 %v567_v54  ;;  %v509_v4 = vunpack.c.h.bf16 %v567_v54  ;;  %v189_v5 = vmul.f32 %v500_v62, %v603_v1  ;;  %v190_v6 = vmul.f32 %v501_v63, %v603_v1  ;;  %v573_v58 = vld [vmem:[%s1023_s0 + $0xe0] sm:$0xff]   ;;  %v574_v63 = vld [vmem:[%s1023_s0 + $0xe8] sm:$0xff]  }
  0x2c   :  { %386 = vst [vmem:[%s1026_s3 + $0x130] sm:$0xff] %v322_v60  ;;  %387 = vst [vmem:[%s1026_s3 + $0x138] sm:$0xff] %v323_v61  ;;  %v512_v8 = vunpack.c.l.bf16 %v568_v59  ;;  %v513_v9 = vunpack.c.h.bf16 %v568_v59  ;;  %v191_v10 = vmul.f32 %v504_v0, %v603_v1  ;;  %v192_v11 = vmul.f32 %v505_v2, %v603_v1  ;;  %v575_v0 = vld [vmem:[%s1023_s0 + $0xf0] sm:$0xff]  }
  0x2d   :  { %v193_v12 = vmul.f32 %v508_v3, %v603_v1  ;;  %v194_v13 = vmul.f32 %v509_v4, %v603_v1  ;;  %v260_v14 = vadd.f32 %v617_v7, %v189_v5  ;;  %v261_v15 = vadd.f32 %v617_v7, %v190_v6  ;;  %v576_v6 = vld [vmem:[%s1023_s0 + $0xf8] sm:$0xff]  }
  0x2e   :  { %v195_v16 = vmul.f32 %v512_v8, %v603_v1  ;;  %v196_v17 = vmul.f32 %v513_v9, %v603_v1  ;;  %v262_v18 = vadd.f32 %v617_v7, %v191_v10  ;;  %v263_v19 = vadd.f32 %v617_v7, %v192_v11 }
  0x2f   :  { %v264_v20 = vadd.f32 %v617_v7, %v193_v12  ;;  %v265_v21 = vadd.f32 %v617_v7, %v194_v13  ;;  %v324_v23 = vmax.f32 %v260_v14, 0.0  ;;  %v325_v24 = vmax.f32 %v261_v15, 0.0 }
  0x30   :  { %v266_v25 = vadd.f32 %v617_v7, %v195_v16  ;;  %v267_v26 = vadd.f32 %v617_v7, %v196_v17  ;;  %v326_v29 = vmax.f32 %v262_v18, 0.0  ;;  %v327_v30 = vmax.f32 %v263_v19, 0.0 }
  0x31   :  { %v328_v31 = vmax.f32 %v264_v20, 0.0  ;;  %v329_v32 = vmax.f32 %v265_v21, 0.0  ;;  %388 = vst [vmem:[%s1026_s3 + $0x140] sm:$0xff] %v324_v23  ;;  %389 = vst [vmem:[%s1026_s3 + $0x148] sm:$0xff] %v325_v24  ;;  %v516_v36 = vunpack.c.l.bf16 %v569_v22  ;;  %v517_v37 = vunpack.c.h.bf16 %v569_v22 }
  0x32   :  { %v330_v34 = vmax.f32 %v266_v25, 0.0  ;;  %v331_v35 = vmax.f32 %v267_v26, 0.0  ;;  %390 = vst [vmem:[%s1026_s3 + $0x150] sm:$0xff] %v326_v29  ;;  %391 = vst [vmem:[%s1026_s3 + $0x158] sm:$0xff] %v327_v30  ;;  %v520_v38 = vunpack.c.l.bf16 %v570_v27  ;;  %v521_v39 = vunpack.c.h.bf16 %v570_v27 }
  0x33   :  { %392 = vst [vmem:[%s1026_s3 + $0x160] sm:$0xff] %v328_v31  ;;  %393 = vst [vmem:[%s1026_s3 + $0x168] sm:$0xff] %v329_v32  ;;  %v524_v40 = vunpack.c.l.bf16 %v571_v28  ;;  %v525_v41 = vunpack.c.h.bf16 %v571_v28  ;;  %v197_v42 = vmul.f32 %v516_v36, %v603_v1  ;;  %v198_v43 = vmul.f32 %v517_v37, %v603_v1 }
  0x34   :  { %394 = vst [vmem:[%s1026_s3 + $0x170] sm:$0xff] %v330_v34  ;;  %395 = vst [vmem:[%s1026_s3 + $0x178] sm:$0xff] %v331_v35  ;;  %v528_v44 = vunpack.c.l.bf16 %v572_v33  ;;  %v529_v45 = vunpack.c.h.bf16 %v572_v33  ;;  %v199_v46 = vmul.f32 %v520_v38, %v603_v1  ;;  %v200_v47 = vmul.f32 %v521_v39, %v603_v1 }
  0x35   :  { %v201_v48 = vmul.f32 %v524_v40, %v603_v1  ;;  %v202_v49 = vmul.f32 %v525_v41, %v603_v1  ;;  %v268_v50 = vadd.f32 %v617_v7, %v197_v42  ;;  %v269_v51 = vadd.f32 %v617_v7, %v198_v43 }
  0x36   :  { %v203_v52 = vmul.f32 %v528_v44, %v603_v1  ;;  %v204_v53 = vmul.f32 %v529_v45, %v603_v1  ;;  %v270_v54 = vadd.f32 %v617_v7, %v199_v46  ;;  %v271_v55 = vadd.f32 %v617_v7, %v200_v47 }
  0x37   :  { %v272_v56 = vadd.f32 %v617_v7, %v201_v48  ;;  %v273_v57 = vadd.f32 %v617_v7, %v202_v49  ;;  %v332_v59 = vmax.f32 %v268_v50, 0.0  ;;  %v333_v60 = vmax.f32 %v269_v51, 0.0 }
  0x38   :  { %v274_v61 = vadd.f32 %v617_v7, %v203_v52  ;;  %v275_v62 = vadd.f32 %v617_v7, %v204_v53  ;;  %v334_v2 = vmax.f32 %v270_v54, 0.0  ;;  %v335_v3 = vmax.f32 %v271_v55, 0.0 }
  0x39   :  { %v336_v4 = vmax.f32 %v272_v56, 0.0  ;;  %v337_v5 = vmax.f32 %v273_v57, 0.0  ;;  %396 = vst [vmem:[%s1026_s3 + $0x180] sm:$0xff] %v332_v59  ;;  %397 = vst [vmem:[%s1026_s3 + $0x188] sm:$0xff] %v333_v60  ;;  %v532_v10 = vunpack.c.l.bf16 %v573_v58  ;;  %v533_v11 = vunpack.c.h.bf16 %v573_v58 }
  0x3a   :  { %v338_v8 = vmax.f32 %v274_v61, 0.0  ;;  %v339_v9 = vmax.f32 %v275_v62, 0.0  ;;  %398 = vst [vmem:[%s1026_s3 + $0x190] sm:$0xff] %v334_v2  ;;  %399 = vst [vmem:[%s1026_s3 + $0x198] sm:$0xff] %v335_v3  ;;  %v536_v12 = vunpack.c.l.bf16 %v574_v63  ;;  %v537_v13 = vunpack.c.h.bf16 %v574_v63 }
  0x3b   :  { %400 = vst [vmem:[%s1026_s3 + $0x1a0] sm:$0xff] %v336_v4  ;;  %401 = vst [vmem:[%s1026_s3 + $0x1a8] sm:$0xff] %v337_v5  ;;  %v540_v14 = vunpack.c.l.bf16 %v575_v0  ;;  %v541_v15 = vunpack.c.h.bf16 %v575_v0  ;;  %v205_v16 = vmul.f32 %v532_v10, %v603_v1  ;;  %v206_v17 = vmul.f32 %v533_v11, %v603_v1 }
  0x3c   :  { %402 = vst [vmem:[%s1026_s3 + $0x1b0] sm:$0xff] %v338_v8  ;;  %403 = vst [vmem:[%s1026_s3 + $0x1b8] sm:$0xff] %v339_v9  ;;  %v544_v18 = vunpack.c.l.bf16 %v576_v6  ;;  %v545_v19 = vunpack.c.h.bf16 %v576_v6  ;;  %v207_v20 = vmul.f32 %v536_v12, %v603_v1  ;;  %v208_v21 = vmul.f32 %v537_v13, %v603_v1 }
  0x3d   :  { %v209_v22 = vmul.f32 %v540_v14, %v603_v1  ;;  %v210_v23 = vmul.f32 %v541_v15, %v603_v1  ;;  %v276_v24 = vadd.f32 %v617_v7, %v205_v16  ;;  %v277_v25 = vadd.f32 %v617_v7, %v206_v17 }
  0x3e   :  { %v211_v26 = vmul.f32 %v544_v18, %v603_v1  ;;  %v212_v27 = vmul.f32 %v545_v19, %v603_v1  ;;  %v278_v28 = vadd.f32 %v617_v7, %v207_v20  ;;  %v279_v29 = vadd.f32 %v617_v7, %v208_v21 }
  0x3f   :  { %v280_v30 = vadd.f32 %v617_v7, %v209_v22  ;;  %v281_v31 = vadd.f32 %v617_v7, %v210_v23  ;;  %v340_v32 = vmax.f32 %v276_v24, 0.0  ;;  %v341_v33 = vmax.f32 %v277_v25, 0.0 }
  0x40   :  { %v282_v34 = vadd.f32 %v617_v7, %v211_v26  ;;  %v283_v35 = vadd.f32 %v617_v7, %v212_v27  ;;  %v342_v36 = vmax.f32 %v278_v28, 0.0  ;;  %v343_v37 = vmax.f32 %v279_v29, 0.0 }
  0x41   :  { %v344_v38 = vmax.f32 %v280_v30, 0.0  ;;  %v345_v39 = vmax.f32 %v281_v31, 0.0  ;;  %404 = vst [vmem:[%s1026_s3 + $0x1c0] sm:$0xff] %v340_v32  ;;  %405 = vst [vmem:[%s1026_s3 + $0x1c8] sm:$0xff] %v341_v33 }
  0x42   :  { %v346_v1 = vmax.f32 %v282_v34, 0.0  ;;  %v347_v40 = vmax.f32 %v283_v35, 0.0  ;;  %406 = vst [vmem:[%s1026_s3 + $0x1d0] sm:$0xff] %v342_v36  ;;  %407 = vst [vmem:[%s1026_s3 + $0x1d8] sm:$0xff] %v343_v37 }
  0x43   :  { %408 = vst [vmem:[%s1026_s3 + $0x1e0] sm:$0xff] %v344_v38  ;;  %409 = vst [vmem:[%s1026_s3 + $0x1e8] sm:$0xff] %v345_v39 }
  0x44   :  { %410 = vst [vmem:[%s1026_s3 + $0x1f0] sm:$0xff] %v346_v1  ;;  %411 = vst [vmem:[%s1026_s3 + $0x1f8] sm:$0xff] %v347_v40 }

// kernel: up_forward.4
= control target key start
LH: loop header
LB: loop body
LE: loop exit
PB: predicated region body
PF: predicated region fallthrough
CT: control target
= control target key end

     0   :  { %s4340_s12 = smov 0   ;;  %s5991_s0 = inlined_call_operand.vmem [shape: bf16[2,18,18,8], index: 0, kind: input, shape index: {}]   ;;  %s5992_s1 = inlined_call_operand.vmem [shape: bf16[72,128], index: 1, kind: input, shape index: {}]   ;;  %s5993_s2 = inlined_call_operand.vmem [shape: bf16[2,256,128], index: 2, kind: output, shape index: {0}]   ;;  %s5994_s3 = inlined_call_operand.vmem [shape: f32[2,2,128], index: 3, kind: output, shape index: {1}]  }
   0x1 LB: > { %s3619_s13 = sadd.s32 4294967295, %s4310_s12   ;;  %p3623_p0 = scmp.ge.s32.totalorder %s4310_s12, 1  ;;  %s4310_s12 = sphi %s4340_s12, %s14_s12  }
   0x2   : > { %p140_p1 = scmp.lt.s32.totalorder %s4310_s12, 3 }
   0x4   : > { %p141_p2 = pnand %p3623_p0, %p140_p1 }
   0x5   : > { %p168_p3 = scmp.lt.s32.totalorder (!%p141_p2), %s3619_s13, 1  ;;  %vm682_vm0 = vcmask (!%p141_p2), 1042432   ;;  %vm683_vm1 = vcmask (!%p141_p2), 1046532   ;;  %s4312_s18 = smov (!%p141_p2), 24   ;;  %vm231_vm3 = vsmask.f32 (!%p141_p2), 3328 }
   0x6   : > { %144 = sbr.rel (%p141_p2) target bundleno = 693 (0x2b5), region = 28  ;;  %vm4378_vm2 = vmor (!%p141_p2), %vm682_vm0, %vm683_vm1  ;;  %vm232_vm4 = vsmask.f32 (!%p141_p2), 7440  ;;  %s4313_s19 = smov (!%p141_p2), 40   ;;  %vm2751_vm6 = vcmask (!%p141_p2), 64512   ;;  %vm2800_vm7 = vcmask (!%p141_p2), 130048  }
   0x7   : > { %s4314_s20 = smov (!%p141_p2), 16   ;;  %vm4422_vm5 = vmor (!%p141_p2), %vm231_vm3, %vm232_vm4  ;;  %s4315_s21 = smov (!%p141_p2), 8   ;;  %vm2833_vm8 = vcmask (!%p141_p2), 195584   ;;  %vm2866_vm9 = vcmask (!%p141_p2), 261120   ;;  %vm2899_vm10 = vcmask (!%p141_p2), 326656   ;;  %vm2932_vm11 = vcmask (!%p141_p2), 392192  }
   0x8   : > { %s4316_s22 = smov (!%p141_p2), 32   ;;  %s4317_s25 = smov (!%p141_p2), 48   ;;  %vm2965_vm12 = vcmask (!%p141_p2), 457728   ;;  %vm3100_vm13 = vcmask (!%p141_p2), 1043456   ;;  %vm2998_vm14 = vcmask (!%p141_p2), 523264   ;;  %vm3067_vm15 = vcmask (!%p141_p2), 588800  }
   0x9   : > { %s4318_s26 = smov (!%p141_p2), 56   ;;  %s4319_s4 = smov (!%p141_p2), 64  }
   0xd   : > { %s6000_s13 = smov (!%p168_p3, %s3619_s13), 1 }
   0xe   : > { %s4206_s14 = smul.u32 216, %s6000_s13  ;;  %s4003_s9 = sshll.u32 %s6000_s13, 7 }
   0xf   : > { %s3627_s15 = sshll.u32 %s6000_s13, 1 }
  0x10   : > { %s4354_s17 = scalar_lea.vmem %s5991_s0, %s4206_s14  ;;  %s5930_s14 = scalar_lea.vmem %s5993_s2, %s4003_s9 }
  0x11   : > { %v3646_v0 = vld [vmem:[%s4354_s17 + $0x18] sm:$0xf]  ;;  %v4358_v1 = vld [vmem:[%s4354_s17 + $0x1c] sm:$0xf]  ;;  %v3644_v2 = vld [vmem:[%s4354_s17 + $0xc] sm:$0xf] }
  0x12   : > { %v880_v3 = vshll.u32 %v4358_v1, 16  ;;  %v884_v4 = vshrl.u32 %v4358_v1, 16  ;;  %v3853_v5 = vcombine.low %v3646_v0, %v4358_v1  ;;  %v871_v6 = vshrl.u32 %v3646_v0, 16  ;;  %v4365_v7 = vld [vmem:[%s4354_s17 + $0x10] sm:$0xf] }
  0x13   : > { %v874_v8 = vshll.u32 %v3646_v0, 16  ;;  %v856_v9 = vshll.u32 %v4365_v7, 16  ;;  %v860_v10 = vshrl.u32 %v4365_v7, 16  ;;  %v3852_v11 = vcombine.low %v3644_v2, %v4365_v7  ;;  %v4371_v12 = vld [vmem:[%s4354_s17 + $0x14] sm:$0x1] }
  0x14   : > { %v4373_v13 = vrot.slane %v884_v4, 4  ;;  %2305 = vrot.lane.b32.xlu1 %v3853_v5, %s4312_s18  ;;  %v873_v14 = vrot.slane %v871_v6, 4  ;;  %v847_v15 = vshrl.u32 %v3644_v2, 16  ;;  %v850_v16 = vshll.u32 %v3644_v2, 16  ;;  %v3692_v18 = vld [vmem:[%s4354_s17 + $0xc] sm:$0xe] }
  0x15   : > { %v876_v19 = vrot.slane %v874_v8, 5  ;;  %v4383_v20 = vrot.slane %v860_v10, 4  ;;  %2303 = vrot.lane.b32.xlu0 %v3852_v11, %s4312_s18  ;;  %v3708_v21 = vrot.slane %v3692_v18, 9  ;;  %v1296_v22 = vrot.slane %v4365_v7, 5  ;;  %v184_v23 = vld [vmem:[%s4354_s17 + $0x4] sm:$0xf] }
  0x16   : > { %v849_v24 = vrot.slane %v847_v15, 4  ;;  %v852_v25 = vrot.slane %v850_v16, 5  ;;  %v1299_v26 = vrot.slane %v4371_v12, 5  ;;  %v215_v27 = vld [vmem:[%s4354_s17 + $0x8] sm:$0x1]  ;;  %v687_v28 = vrot.slane %v184_v23, 5 }
  0x17   : > { %v877_v29 = vor.u32 %v876_v19, %v873_v14  ;;  %v1297_v30 = vsel %vm4378_vm2, %v3708_v21, %v1296_v22  ;;  %v1298_v31 = vrot.slane %v1296_v22, 4  ;;  %v618_v32 = vld [vmem:[%s4354_s17] sm:$0xe]  ;;  %v690_v33 = vrot.slane %v215_v27, 5  ;;  %v186_v34 = vld [vmem:[%s4354_s17 + $0x10] sm:$0xf] }
  0x18   : > { %v853_v35 = vor.u32 %v852_v25, %v849_v24  ;;  %v3628_v36 = vrot.slane %v618_v32, 9  ;;  %v689_v37 = vrot.slane %v687_v28, 4  ;;  %v216_v38 = vld [vmem:[%s4354_s17 + $0x14] sm:$0x1]  ;;  %v619_v39 = vld [vmem:[%s4354_s17 + $0xc] sm:$0xe] }
  0x19   : > { %v4396_v40 = vrot.slane %v877_v29, 4  ;;  %v1300_v41 = vsel %vm4378_vm2, %v1298_v31, %v1299_v26  ;;  %v3629_v42 = vrot.slane %v619_v39, 9  ;;  %v694_v43 = vrot.slane %v186_v34, 5  ;;  %v183_v44 = vld [vmem:[%s4354_s17] sm:$0xf] }
  0x1a   : > { %v4401_v45 = vrot.slane %v853_v35, 4  ;;  %v3884_v46 = vcombine.low %v1297_v30, %v1300_v41  ;;  %v688_v47 = vsel %vm4378_vm2, %v3628_v36, %v687_v28  ;;  %v691_v48 = vsel %vm4378_vm2, %v689_v37, %v690_v33  ;;  %v3693_v49 = vld [vmem:[%s4354_s17 + $0x18] sm:$0xe]  ;;  %v3677_v58 = vld [vmem:[%s4354_s17 + $0x20] sm:$0x1] }
  0x1b   : > { %v3836_v50 = vcombine.low %v688_v47, %v691_v48  ;;  %v695_v51 = vsel %vm4378_vm2, %v3629_v42, %v694_v43  ;;  %v696_v52 = vrot.slane %v694_v43, 4  ;;  %v697_v53 = vrot.slane %v216_v38, 5  ;;  %v185_v63 = vld [vmem:[%s4354_s17 + $0xc] sm:$0xf]  ;;  %v3726_v42 = vld [vmem:[%s4354_s17 + $0x24] sm:$0xf] }
  0x1c   : > { %2463 = vrot.lane.b32.xlu0 %v3884_v46, %s4313_s19  ;;  %v235_v54 = vshrl.u32 %v183_v44, 16  ;;  %v238_v55 = vshll.u32 %v183_v44, 16  ;;  %v244_v56 = vshll.u32 %v184_v23, 16  ;;  %v248_v57 = vshrl.u32 %v184_v23, 16 }
  0x1d   : > { %2207 = vrot.lane.b32.xlu1 %v3836_v50, %s4314_s20  ;;  %v698_v59 = vsel %vm4378_vm2, %v696_v52, %v697_v53  ;;  %v254_v60 = vshll.u32 %v215_v27, 16  ;;  %v3709_v61 = vrot.slane %v3693_v49, 9  ;;  %v1303_v62 = vrot.slane %v4358_v1, 5 }
  0x1e   : > { %v3837_v0 = vcombine.low %v695_v51, %v698_v59  ;;  %v237_v2 = vrot.slane %v235_v54, 4  ;;  %v240_v4 = vrot.slane %v238_v55, 5  ;;  %v246_v5 = vrot.slane %v244_v56, 5  ;;  %v4454_v51 = vld [vmem:[%s4354_s17 + $0x18] sm:$0xf] }
  0x1f   : > { %v250_v6 = vrot.slane %v248_v57, 4  ;;  %v256_v8 = vrot.slane %v254_v60, 5  ;;  %v1304_v10 = vsel %vm4378_vm2, %v3709_v61, %v1303_v62  ;;  %v1305_v11 = vrot.slane %v1303_v62, 4  ;;  %v4460_v54 = vld [vmem:[%s4354_s17 + $0x1c] sm:$0xf] }
  0x20   : > { %v241_v14 = vor.u32 %v240_v4, %v237_v2  ;;  %v1306_v15 = vrot.slane %v3677_v58, 5  ;;  %v259_v16 = vshrl.u32 %v185_v63, 16  ;;  %v262_v18 = vshll.u32 %v185_v63, 16  ;;  %v4467_v62 = vld [vmem:[%s4354_s17 + $0x2c] sm:$0x1] }
  0x21   : > { %2209 = vrot.lane.b32.xlu1 %v3837_v0, %s4314_s20  ;;  %v251_v21 = vor.u32 %v250_v6, %v246_v5  ;;  %v268_v22 = vshll.u32 %v186_v34, 16  ;;  %v272_v23 = vshrl.u32 %v186_v34, 16  ;;  %v278_v24 = vshll.u32 %v216_v38, 16 }
  0x22   : > { %v242_v25 = vrot.slane %v241_v14, 4  ;;  %v1307_v26 = vsel %vm4378_vm2, %v1305_v11, %v1306_v15  ;;  %v261_v27 = vrot.slane %v259_v16, 4  ;;  %v264_v28 = vrot.slane %v262_v18, 5  ;;  %v187_v14 = vld [vmem:[%s4354_s17 + $0x18] sm:$0xf] }
  0x23   : > { %v252_v29 = vrot.slane %v251_v21, 4  ;;  %v3885_v30 = vcombine.low %v1304_v10, %v1307_v26  ;;  %v270_v31 = vrot.slane %v268_v22, 5  ;;  %v274_v32 = vrot.slane %v272_v23, 4  ;;  %v4486_v26 = vld [vmem:[%s4354_s17 + $0x1c] sm:$0xf] }
  0x24   : > { %v247_v33 = vsel %vm4422_vm5, %v242_v25, %v246_v5  ;;  %v265_v35 = vor.u32 %v264_v28, %v261_v27  ;;  %v280_v36 = vrot.slane %v278_v24, 5  ;;  %v882_v34 = vrot.slane %v880_v3, 5  ;;  %v4443_v3 = vld [vmem:[%s4354_s17 + $0x28] sm:$0xf]  ;;  %v4477_v5 = vld [vmem:[%s4354_s17 + $0x20] sm:$0x1] }
  0x25   : > { %v257_v37 = vsel %vm4422_vm5, %v252_v29, %v256_v8  ;;  %2465 = vrot.lane.b32.xlu1 %v3885_v30, %s4313_s19  ;;  %v275_v38 = vor.u32 %v274_v32, %v270_v31  ;;  %v890_v39 = vshll.u32 %v3677_v58, 16  ;;  %v858_v41 = vrot.slane %v856_v9, 5  ;;  %v4490_v30 = vld [vmem:[%s4354_s17 + $0x20] sm:$0x1] }
  0x26   : > { %v3820_v43 = vcombine.low %v247_v33, %v257_v37  ;;  %v266_v44 = vrot.slane %v265_v35, 4  ;;  %v883_v46 = vsel %vm4422_vm5, %v4396_v40, %v882_v34  ;;  %v887_v1 = vor.u32 %v4373_v13, %v882_v34  ;;  %v4241_v32 = vld [vmem:[%s5992_s1] sm:$0xff]   ;;  %v3772_v37 = vld [vmem:[%s4354_s17 + $0x18] sm:$0xe] }
  0x27   : > { %v276_v47 = vrot.slane %v275_v38, 4  ;;  %v892_v48 = vrot.slane %v890_v39, 5  ;;  %v859_v7 = vsel %vm4422_vm5, %v4401_v45, %v858_v41  ;;  %v863_v9 = vor.u32 %v4383_v20, %v858_v41  ;;  %4152 = vmatprep.subr.bf16.mxu0 %v4241_v32  ;;  %4194 = vmatprep.subr.bf16.mxu1 %v4241_v32 }
  0x28   : > { %2127 = vrot.lane.b32.xlu0 %v3820_v43, %s4315_s21  ;;  %v271_v49 = vsel %vm4422_vm5, %v266_v44, %v270_v31  ;;  %v888_v40 = vrot.slane %v887_v1, 4  ;;  %v866_v13 = vshll.u32 %v4371_v12, 16  ;;  %v1480_v50 = vshrl.u32 %v3726_v42, 16  ;;  %4153 = vmatpush3.bf16.msra.mxu0 %v4241_v32 }
  0x29   : > { %v281_v52 = vsel %vm4422_vm5, %v276_v47, %v280_v36  ;;  %v864_v53 = vrot.slane %v863_v9, 4  ;;  %v1483_v45 = vshll.u32 %v3726_v42, 16  ;;  %v1493_v20 = vshrl.u32 %v4443_v3, 16  ;;  %4199 = vmatpush3.bf16.msra.mxu1 %v4241_v32 }
  0x2a   : > { %v3821_v55 = vcombine.low %v271_v49, %v281_v52  ;;  %v893_v56 = vsel %vm4422_vm5, %v888_v40, %v892_v48  ;;  %v868_v57 = vrot.slane %v866_v13, 5  ;;  %v1482_v12 = vrot.slane %v1480_v50, 4  ;;  %v189_v49 = vld [vmem:[%s4354_s17 + $0x24] sm:$0xf]  ;;  %v190_v52 = vld [vmem:[%s4354_s17 + $0x28] sm:$0xf] }
  0x2b   : > { %v3869_v58 = vcombine.low %v883_v46, %v893_v56  ;;  %v1485_v59 = vrot.slane %v1483_v45, 5  ;;  %v3901_v60 = vcombine.low %v3726_v42, %v4443_v3  ;;  %v1456_v61 = vshrl.u32 %v4454_v51, 16 }
  0x2c   : > { %2129 = vrot.lane.b32.xlu0 %v3821_v55, %s4315_s21  ;;  %v869_v63 = vsel %vm4422_vm5, %v864_v53, %v868_v57  ;;  %v1459_v0 = vshll.u32 %v4454_v51, 16  ;;  %v1469_v2 = vshrl.u32 %v4460_v54, 16  ;;  %v3900_v4 = vcombine.low %v4454_v51, %v4460_v54 }
  0x2d   : > { %2385 = vrot.lane.b32.xlu1 %v3869_v58, %s4316_s22  ;;  %v3868_v6 = vcombine.low %v859_v7, %v869_v63  ;;  %v1458_v8 = vrot.slane %v1456_v61, 4  ;;  %v1486_v10 = vor.u32 %v1485_v59, %v1482_v12  ;;  %v1489_v11 = vshll.u32 %v4443_v3, 16  ;;  %v4514_v58 = vld [vmem:[%s4354_s17 + $0x2c] sm:$0x1] }
  0x2e   : > { %v1461_v15 = vrot.slane %v1459_v0, 5  ;;  %v1495_v16 = vrot.slane %v1493_v20, 4  ;;  %v1499_v18 = vshll.u32 %v4467_v62, 16  ;;  %v1465_v21 = vshll.u32 %v4460_v54, 16 }
  0x2f   : > { %v1487_v22 = vrot.slane %v1486_v10, 4  ;;  %v1491_v23 = vrot.slane %v1489_v11, 5  ;;  %v1471_v24 = vrot.slane %v1469_v2, 4  ;;  %v1475_v25 = vshll.u32 %v4477_v5, 16  ;;  %v3773_v2 = vld [vmem:[%s4354_s17 + $0x24] sm:$0xe] }
  0x30   : > { %2383 = vrot.lane.b32.xlu0 %v3868_v6, %s4316_s22  ;;  %v1501_v27 = vrot.slane %v1499_v18, 5  ;;  %v1462_v28 = vor.u32 %v1461_v15, %v1458_v8  ;;  %v1467_v29 = vrot.slane %v1465_v21, 5  ;;  %v283_v31 = vshrl.u32 %v187_v14, 16  ;;  %v4243_v18 = vld [vmem:[%s5992_s1 + $0x10] sm:$0xff]  }
  0x31   : > { %2561 = vrot.lane.b32.xlu1 %v3901_v60, %s4317_s25  ;;  %v1492_v33 = vsel %vm4422_vm5, %v1487_v22, %v1491_v23  ;;  %v1496_v35 = vor.u32 %v1495_v16, %v1491_v23  ;;  %v1477_v36 = vrot.slane %v1475_v25, 5  ;;  %v286_v34 = vshll.u32 %v187_v14, 16  ;;  %v621_v16 = vld [vmem:[%s4354_s17 + $0x24] sm:$0xe] }
  0x32   : > { %v1463_v38 = vrot.slane %v1462_v28, 4  ;;  %v1472_v39 = vor.u32 %v1471_v24, %v1467_v29  ;;  %v285_v41 = vrot.slane %v283_v31, 4  ;;  %v292_v42 = vshll.u32 %v4486_v26, 16  ;;  %v620_v31 = vld [vmem:[%s4354_s17 + $0x18] sm:$0xe] }
  0x33   : > { %v1497_v43 = vrot.slane %v1496_v35, 4  ;;  %v288_v44 = vrot.slane %v286_v34, 5  ;;  %v296_v46 = vshrl.u32 %v4486_v26, 16  ;;  %v302_v1 = vshll.u32 %v4490_v30, 16 }
  0x34   : > { %2559 = vrot.lane.b32.xlu0 %v3900_v4, %s4317_s25  ;;  %v1468_v47 = vsel %vm4422_vm5, %v1463_v38, %v1467_v29  ;;  %v1473_v48 = vrot.slane %v1472_v39, 4  ;;  %v294_v7 = vrot.slane %v292_v42, 5  ;;  %v3788_v9 = vrot.slane %v3772_v37, 9  ;;  %v4544_v39 = vld [vmem:[%s4354_s17 + $0x30] sm:$0xf] }
  0x35   : > { %v1502_v40 = vsel %vm4422_vm5, %v1497_v43, %v1501_v27  ;;  %v289_v13 = vor.u32 %v288_v44, %v285_v41  ;;  %v298_v50 = vrot.slane %v296_v46, 4  ;;  %v304_v51 = vrot.slane %v302_v1, 5  ;;  %v4246_v41 = vld [vmem:[%s5992_s1 + $0x18] sm:$0xff]  }
  0x36   : > { %v3917_v53 = vcombine.low %v1492_v33, %v1502_v40  ;;  %v1478_v45 = vsel %vm4422_vm5, %v1473_v48, %v1477_v36  ;;  %v1905_v20 = vrot.slane %v4460_v54, 5  ;;  %v1908_v55 = vrot.slane %v4477_v5, 5  ;;  %v4242_v54 = vld [vmem:[%s5992_s1 + $0x8] sm:$0xff]  }
  0x37   : > { %v3916_v56 = vcombine.low %v1468_v47, %v1478_v45  ;;  %v290_v57 = vrot.slane %v289_v13, 4  ;;  %v299_v12 = vor.u32 %v298_v50, %v294_v7  ;;  %v307_v59 = vshrl.u32 %v189_v49, 16  ;;  %4154 = vmatprep.subr.bf16.mxu0 %v4242_v54  ;;  %4195 = vmatprep.subr.bf16.mxu1 %v4242_v54  ;;  %v3648_v50 = vld [vmem:[%s4354_s17 + $0x24] sm:$0xf] }
  0x38   : > { %2641 = vrot.lane.b32.xlu1 %v3917_v53, %s4318_s26  ;;  %v1906_v60 = vsel %vm4378_vm2, %v3788_v9, %v1905_v20  ;;  %v1907_v61 = vrot.slane %v1905_v20, 4  ;;  %v310_v63 = vshll.u32 %v189_v49, 16  ;;  %v316_v0 = vshll.u32 %v190_v52, 16  ;;  %4155 = vmatpush3.bf16.msra.mxu0 %v4242_v54 }
  0x39   : > { %2639 = vrot.lane.b32.xlu0 %v3916_v56, %s4318_s26  ;;  %v295_v4 = vsel %vm4422_vm5, %v290_v57, %v294_v7  ;;  %v300_v5 = vrot.slane %v299_v12, 4  ;;  %v309_v6 = vrot.slane %v307_v59, 4  ;;  %v320_v8 = vshrl.u32 %v190_v52, 16  ;;  %4200 = vmatpush3.bf16.msra.mxu1 %v4242_v54  ;;  %v4558_v7 = vld [vmem:[%s4354_s17 + $0x34] sm:$0xf] }
  0x3a   : > { %v1909_v10 = vsel %vm4378_vm2, %v1907_v61, %v1908_v55  ;;  %v312_v11 = vrot.slane %v310_v63, 5  ;;  %v318_v14 = vrot.slane %v316_v0, 5  ;;  %v326_v15 = vshll.u32 %v4514_v58, 16  ;;  %4156 = vmatprep.subr.bf16.mxu0 %v4243_v18  ;;  %4196 = vmatprep.subr.bf16.mxu1 %v4243_v18  ;;  %v3679_v57 = vld [vmem:[%s4354_s17 + $0x38] sm:$0x1] }
  0x3b   : > { %v305_v21 = vsel %vm4422_vm5, %v300_v5, %v304_v51  ;;  %v3932_v22 = vcombine.low %v1906_v60, %v1909_v10  ;;  %v322_v23 = vrot.slane %v320_v8, 4  ;;  %v3789_v24 = vrot.slane %v3773_v2, 9  ;;  %v4567_v51 = vld [vmem:[%s4354_s17 + $0x28] sm:$0xf]  ;;  %v3678_v54 = vld [vmem:[%s4354_s17 + $0x2c] sm:$0x1] }
  0x3c   : > { %v3822_v25 = vcombine.low %v295_v4, %v305_v21  ;;  %v313_v27 = vor.u32 %v312_v11, %v309_v6  ;;  %v328_v28 = vrot.slane %v326_v15, 5  ;;  %v1912_v29 = vrot.slane %v4443_v3, 5  ;;  %4157 = vmatpush3.bf16.msra.mxu0 %v4243_v18  ;;  %v3695_v4 = vld [vmem:[%s4354_s17 + $0x30] sm:$0xe] }
  0x3d   : > { %2719 = vrot.lane.b32.xlu0 %v3932_v22, %s4319_s4  ;;  %v323_v32 = vor.u32 %v322_v23, %v318_v14  ;;  %v1915_v33 = vrot.slane %v4467_v62, 5  ;;  %v3631_v35 = vrot.slane %v621_v16, 9  ;;  %v708_v36 = vrot.slane %v190_v52, 5  ;;  %4201 = vmatpush3.bf16.msra.mxu1 %v4243_v18  ;;  %v3694_v18 = vld [vmem:[%s4354_s17 + $0x24] sm:$0xe] }
  0x3e   : > { %2131 = vrot.lane.b32.xlu1 %v3822_v25, %s4315_s21  ;;  %v314_v34 = vrot.slane %v313_v27, 4  ;;  %v1913_v37 = vsel %vm4378_vm2, %v3789_v24, %v1912_v29  ;;  %v1914_v38 = vrot.slane %v1912_v29, 4  ;;  %v711_v3 = vrot.slane %v4514_v58, 5  ;;  %4158 = vmatprep.subr.bf16.mxu0 %v4246_v41 }
  0x3f   : > { %v324_v42 = vrot.slane %v323_v32, 4  ;;  %v709_v62 = vsel %vm4378_vm2, %v3631_v35, %v708_v36  ;;  %v710_v43 = vrot.slane %v708_v36, 4  ;;  %v3630_v44 = vrot.slane %v620_v31, 9  ;;  %4197 = vmatprep.subr.bf16.mxu1 %v4246_v41  ;;  %v4591_v36 = vld [vmem:[%s4354_s17 + $0x3c] sm:$0xf] }
  0x40   : > { %v319_v46 = vsel %vm4422_vm5, %v314_v34, %v318_v14  ;;  %v1916_v1 = vsel %vm4378_vm2, %v1914_v38, %v1915_v33  ;;  %v701_v47 = vrot.slane %v4486_v26, 5  ;;  %v704_v48 = vrot.slane %v4490_v30, 5  ;;  %4159 = vmatpush3.bf16.msra.mxu0 %v4246_v41 }
  0x41   : > { %v329_v9 = vsel %vm4422_vm5, %v324_v42, %v328_v28  ;;  %v3933_v49 = vcombine.low %v1913_v37, %v1916_v1  ;;  %v712_v40 = vsel %vm4378_vm2, %v710_v43, %v711_v3  ;;  %v919_v13 = vshrl.u32 %v4544_v39, 16  ;;  %4202 = vmatpush3.bf16.msra.mxu1 %v4246_v41 }
  0x42   : > { %v3823_v26 = vcombine.low %v319_v46, %v329_v9  ;;  %v3839_v52 = vcombine.low %v709_v62, %v712_v40  ;;  %v702_v30 = vsel %vm4378_vm2, %v3630_v44, %v701_v47  ;;  %v703_v53 = vrot.slane %v701_v47, 4  ;;  %v4605_v46 = vld [vmem:[%s4354_s17 + $0x40] sm:$0xf]  ;;  %v3728_v40 = vld [vmem:[%s4354_s17 + $0x30] sm:$0xf] }
  0x43   : > { %2721 = vrot.lane.b32.xlu0 %v3933_v49, %s4319_s4  ;;  %v921_v45 = vrot.slane %v919_v13, 4  ;;  %v922_v20 = vshll.u32 %v4544_v39, 16  ;;  %v932_v55 = vshrl.u32 %v4558_v7, 16  ;;  %v3855_v56 = vcombine.low %v4544_v39, %v4558_v7  ;;  %v4615_v13 = vld [vmem:[%s4354_s17 + $0x34] sm:$0xf] }
  0x44   : > { %2133 = vrot.lane.b32.xlu1 %v3823_v26, %s4315_s21  ;;  %v705_v12 = vsel %vm4378_vm2, %v703_v53, %v704_v48  ;;  %v895_v58 = vshrl.u32 %v3648_v50, 16  ;;  %v898_v59 = vshll.u32 %v3648_v50, 16  ;;  %v908_v60 = vshrl.u32 %v4567_v51, 16 }
  0x45   : > { %v3838_v61 = vcombine.low %v702_v30, %v705_v12  ;;  %v924_v63 = vrot.slane %v922_v20, 5  ;;  %v3854_v0 = vcombine.low %v3648_v50, %v4567_v51  ;;  %v928_v2 = vshll.u32 %v4558_v7, 16 }
  0x46   : > { %v897_v5 = vrot.slane %v895_v58, 4  ;;  %v900_v6 = vrot.slane %v898_v59, 5  ;;  %v934_v8 = vrot.slane %v932_v55, 4  ;;  %v938_v10 = vshll.u32 %v3679_v57, 16  ;;  %v4626_v55 = vld [vmem:[%s4354_s17 + $0x44] sm:$0x1] }
  0x47   : > { %2211 = vrot.lane.b32.xlu0 %v3838_v61, %s4314_s20  ;;  %v925_v11 = vor.u32 %v924_v63, %v921_v45  ;;  %v930_v14 = vrot.slane %v928_v2, 5  ;;  %v904_v15 = vshll.u32 %v4567_v51, 16  ;;  %v910_v16 = vrot.slane %v908_v60, 4  ;;  %v4630_v59 = vld [vmem:[%s4354_s17 + $0x38] sm:$0x1] }
  0x48   : > { %2213 = vrot.lane.b32.xlu1 %v3839_v52, %s4314_s20  ;;  %v940_v21 = vrot.slane %v938_v10, 5  ;;  %v901_v22 = vor.u32 %v900_v6, %v897_v5  ;;  %v914_v23 = vshll.u32 %v3678_v54, 16  ;;  %v3711_v24 = vrot.slane %v3695_v4, 9  ;;  %v191_v2 = vld [vmem:[%s4354_s17 + $0x30] sm:$0xf] }
  0x49   : > { %v926_v25 = vrot.slane %v925_v11, 4  ;;  %v935_v27 = vor.u32 %v934_v8, %v930_v14  ;;  %v906_v28 = vrot.slane %v904_v15, 5  ;;  %v1317_v29 = vrot.slane %v4558_v7, 5  ;;  %v4641_v15 = vld [vmem:[%s4354_s17 + $0x34] sm:$0xf] }
  0x4a   : > { %v902_v31 = vrot.slane %v901_v22, 4  ;;  %v916_v32 = vrot.slane %v914_v23, 5  ;;  %v1320_v33 = vrot.slane %v3679_v57, 5  ;;  %v3710_v35 = vrot.slane %v3694_v18, 9  ;;  %v4644_v22 = vld [vmem:[%s4354_s17 + $0x38] sm:$0x1] }
  0x4b   : > { %2307 = vrot.lane.b32.xlu0 %v3854_v0, %s4312_s18  ;;  %v931_v34 = vsel %vm4422_vm5, %v926_v25, %v930_v14  ;;  %v936_v37 = vrot.slane %v935_v27, 4  ;;  %v911_v38 = vor.u32 %v910_v16, %v906_v28  ;;  %v1318_v3 = vsel %vm4378_vm2, %v3711_v24, %v1317_v29 }
  0x4c   : > { %2309 = vrot.lane.b32.xlu1 %v3855_v56, %s4312_s18  ;;  %v907_v39 = vsel %vm4422_vm5, %v902_v31, %v906_v28  ;;  %v1319_v41 = vrot.slane %v1317_v29, 4  ;;  %v1310_v42 = vrot.slane %v4567_v51, 5  ;;  %v1313_v62 = vrot.slane %v3678_v54, 5  ;;  %v3774_v29 = vld [vmem:[%s4354_s17 + $0x30] sm:$0xe] }
  0x4d   : > { %v941_v43 = vsel %vm4422_vm5, %v936_v37, %v940_v21  ;;  %v912_v44 = vrot.slane %v911_v38, 4  ;;  %v1528_v1 = vshrl.u32 %v4591_v36, 16  ;;  %v1531_v47 = vshll.u32 %v4591_v36, 16 }
  0x4e   : > { %v3871_v48 = vcombine.low %v931_v34, %v941_v43  ;;  %v1321_v7 = vsel %vm4378_vm2, %v1319_v41, %v1320_v33  ;;  %v1311_v9 = vsel %vm4378_vm2, %v3710_v35, %v1310_v42  ;;  %v1312_v49 = vrot.slane %v1310_v42, 4 }
  0x4f   : > { %v917_v50 = vsel %vm4422_vm5, %v912_v44, %v916_v32  ;;  %v3887_v51 = vcombine.low %v1318_v3, %v1321_v7  ;;  %v1530_v26 = vrot.slane %v1528_v1, 4  ;;  %v1533_v52 = vrot.slane %v1531_v47, 5 }
  0x50   : > { %2389 = vrot.lane.b32.xlu1 %v3871_v48, %s4316_s22  ;;  %v3870_v30 = vcombine.low %v907_v39, %v917_v50  ;;  %v1314_v53 = vsel %vm4378_vm2, %v1312_v49, %v1313_v62  ;;  %v1541_v45 = vshrl.u32 %v4605_v46, 16  ;;  %v3903_v20 = vcombine.low %v4591_v36, %v4605_v46  ;;  %v193_v62 = vld [vmem:[%s4354_s17 + $0x3c] sm:$0xf]  ;;  %v194_v48 = vld [vmem:[%s4354_s17 + $0x40] sm:$0xf] }
  0x51   : > { %v3886_v56 = vcombine.low %v1311_v9, %v1314_v53  ;;  %v1504_v57 = vshrl.u32 %v3728_v40, 16  ;;  %v1507_v12 = vshll.u32 %v3728_v40, 16  ;;  %v1517_v58 = vshrl.u32 %v4615_v13, 16 }
  0x52   : > { %2387 = vrot.lane.b32.xlu0 %v3870_v30, %s4316_s22  ;;  %v3902_v60 = vcombine.low %v3728_v40, %v4615_v13  ;;  %v1534_v61 = vor.u32 %v1533_v52, %v1530_v26  ;;  %v1537_v63 = vshll.u32 %v4605_v46, 16  ;;  %v1543_v0 = vrot.slane %v1541_v45, 4  ;;  %v220_v52 = vld [vmem:[%s4354_s17 + $0x44] sm:$0x1] }
  0x53   : > { %v1506_v54 = vrot.slane %v1504_v57, 4  ;;  %v1509_v4 = vrot.slane %v1507_v12, 5  ;;  %v1547_v5 = vshll.u32 %v4626_v55, 16  ;;  %v1513_v6 = vshll.u32 %v4615_v13, 16  ;;  %v3775_v57 = vld [vmem:[%s4354_s17 + $0x3c] sm:$0xe] }
  0x54   : > { %2469 = vrot.lane.b32.xlu1 %v3887_v51, %s4313_s19  ;;  %v1535_v8 = vrot.slane %v1534_v61, 4  ;;  %v1539_v10 = vrot.slane %v1537_v63, 5  ;;  %v1519_v11 = vrot.slane %v1517_v58, 4  ;;  %v1523_v14 = vshll.u32 %v4630_v59, 16 }
  0x55   : > { %v1549_v16 = vrot.slane %v1547_v5, 5  ;;  %v1510_v18 = vor.u32 %v1509_v4, %v1506_v54  ;;  %v1515_v21 = vrot.slane %v1513_v6, 5  ;;  %v331_v23 = vshrl.u32 %v191_v2, 16 }
  0x56   : > { %2467 = vrot.lane.b32.xlu0 %v3886_v56, %s4313_s19  ;;  %v1540_v24 = vsel %vm4422_vm5, %v1535_v8, %v1539_v10  ;;  %v1544_v25 = vor.u32 %v1543_v0, %v1539_v10  ;;  %v1525_v27 = vrot.slane %v1523_v14, 5  ;;  %v334_v28 = vshll.u32 %v191_v2, 16  ;;  %v623_v2 = vld [vmem:[%s4354_s17 + $0x3c] sm:$0xe] }
  0x57   : > { %v1511_v31 = vrot.slane %v1510_v18, 4  ;;  %v1520_v32 = vor.u32 %v1519_v11, %v1515_v21  ;;  %v333_v33 = vrot.slane %v331_v23, 4  ;;  %v340_v35 = vshll.u32 %v4641_v15, 16 }
  0x58   : > { %2565 = vrot.lane.b32.xlu1 %v3903_v20, %s4317_s25  ;;  %v1545_v36 = vrot.slane %v1544_v25, 4  ;;  %v336_v34 = vrot.slane %v334_v28, 5  ;;  %v344_v37 = vshrl.u32 %v4641_v15, 16  ;;  %v350_v38 = vshll.u32 %v4644_v22, 16 }
  0x59   : > { %v1516_v3 = vsel %vm4422_vm5, %v1511_v31, %v1515_v21  ;;  %v1521_v39 = vrot.slane %v1520_v32, 4  ;;  %v342_v41 = vrot.slane %v340_v35, 5  ;;  %v3790_v42 = vrot.slane %v3774_v29, 9 }
  0x5a   : > { %2563 = vrot.lane.b32.xlu0 %v3902_v60, %s4317_s25  ;;  %v1550_v43 = vsel %vm4422_vm5, %v1545_v36, %v1549_v16  ;;  %v337_v44 = vor.u32 %v336_v34, %v333_v33  ;;  %v346_v1 = vrot.slane %v344_v37, 4  ;;  %v352_v47 = vrot.slane %v350_v38, 5  ;;  %v622_v16 = vld [vmem:[%s4354_s17 + $0x30] sm:$0xe]  ;;  %v3655_v38 = vld [vmem:[%s4354_s17 + $0x4c] sm:$0xf] }
  0x5b   : > { %v3919_v7 = vcombine.low %v1540_v24, %v1550_v43  ;;  %v1526_v9 = vsel %vm4422_vm5, %v1521_v39, %v1525_v27  ;;  %v1919_v49 = vrot.slane %v4615_v13, 5  ;;  %v1922_v40 = vrot.slane %v4630_v59, 5  ;;  %v4704_v43 = vld [vmem:[%s4354_s17 + $0x40] sm:$0xf] }
  0x5c   : > { %v3918_v50 = vcombine.low %v1516_v3, %v1526_v9  ;;  %v338_v51 = vrot.slane %v337_v44, 4  ;;  %v347_v26 = vor.u32 %v346_v1, %v342_v41  ;;  %v355_v30 = vshrl.u32 %v193_v62, 16 }
  0x5d   : > { %2645 = vrot.lane.b32.xlu1 %v3919_v7, %s4318_s26  ;;  %v1920_v53 = vsel %vm4378_vm2, %v3790_v42, %v1919_v49  ;;  %v1921_v45 = vrot.slane %v1919_v49, 4  ;;  %v358_v20 = vshll.u32 %v193_v62, 16  ;;  %v364_v56 = vshll.u32 %v194_v48, 16  ;;  %v3652_v62 = vld [vmem:[%s4354_s17 + $0x3c] sm:$0xf] }
  0x5e   : > { %2643 = vrot.lane.b32.xlu0 %v3918_v50, %s4318_s26  ;;  %v343_v13 = vsel %vm4422_vm5, %v338_v51, %v342_v41  ;;  %v348_v12 = vrot.slane %v347_v26, 4  ;;  %v357_v58 = vrot.slane %v355_v30, 4  ;;  %v368_v59 = vshrl.u32 %v194_v48, 16  ;;  %v3681_v49 = vld [vmem:[%s4354_s17 + $0x50] sm:$0x1] }
  0x5f   : > { %v1923_v60 = vsel %vm4378_vm2, %v1921_v45, %v1922_v40  ;;  %v360_v61 = vrot.slane %v358_v20, 5  ;;  %v366_v63 = vrot.slane %v364_v56, 5  ;;  %v374_v0 = vshll.u32 %v220_v52, 16  ;;  %v3680_v20 = vld [vmem:[%s4354_s17 + $0x44] sm:$0x1] }
  0x60   : > { %v353_v54 = vsel %vm4422_vm5, %v348_v12, %v352_v47  ;;  %v3934_v4 = vcombine.low %v1920_v53, %v1923_v60  ;;  %v370_v5 = vrot.slane %v368_v59, 4  ;;  %v3791_v6 = vrot.slane %v3775_v57, 9  ;;  %v3697_v56 = vld [vmem:[%s4354_s17 + $0x48] sm:$0xe] }
  0x61   : > { %v3824_v8 = vcombine.low %v343_v13, %v353_v54  ;;  %v361_v10 = vor.u32 %v360_v61, %v357_v58  ;;  %v376_v11 = vrot.slane %v374_v0, 5  ;;  %v1926_v14 = vrot.slane %v4605_v46, 5  ;;  %v4686_v46 = vld [vmem:[%s4354_s17 + $0x48] sm:$0xf]  ;;  %v3696_v0 = vld [vmem:[%s4354_s17 + $0x3c] sm:$0xe] }
  0x62   : > { %2723 = vrot.lane.b32.xlu0 %v3934_v4, %s4319_s4  ;;  %v371_v18 = vor.u32 %v370_v5, %v366_v63  ;;  %v1929_v21 = vrot.slane %v4626_v55, 5  ;;  %v3633_v23 = vrot.slane %v623_v2, 9  ;;  %v722_v24 = vrot.slane %v194_v48, 5 }
  0x63   : > { %2135 = vrot.lane.b32.xlu1 %v3824_v8, %s4315_s21  ;;  %v362_v25 = vrot.slane %v361_v10, 4  ;;  %v1927_v27 = vsel %vm4378_vm2, %v3791_v6, %v1926_v14  ;;  %v1928_v28 = vrot.slane %v1926_v14, 4  ;;  %v725_v29 = vrot.slane %v220_v52, 5 }
  0x64   : > { %v372_v31 = vrot.slane %v371_v18, 4  ;;  %v723_v32 = vsel %vm4378_vm2, %v3633_v23, %v722_v24  ;;  %v724_v55 = vrot.slane %v722_v24, 4  ;;  %v3632_v33 = vrot.slane %v622_v16, 9  ;;  %v4724_v23 = vld [vmem:[%s4354_s17 + $0x54] sm:$0xf] }
  0x65   : > { %v367_v35 = vsel %vm4422_vm5, %v362_v25, %v366_v63  ;;  %v1930_v36 = vsel %vm4378_vm2, %v1928_v28, %v1929_v21  ;;  %v715_v34 = vrot.slane %v4641_v15, 5  ;;  %v718_v37 = vrot.slane %v4644_v22, 5 }
  0x66   : > { %v377_v3 = vsel %vm4422_vm5, %v372_v31, %v376_v11  ;;  %v3935_v39 = vcombine.low %v1927_v27, %v1930_v36  ;;  %v726_v41 = vsel %vm4378_vm2, %v724_v55, %v725_v29  ;;  %v967_v42 = vshrl.u32 %v4686_v46, 16 }
  0x67   : > { %v3825_v44 = vcombine.low %v367_v35, %v377_v3  ;;  %v3841_v1 = vcombine.low %v723_v32, %v726_v41  ;;  %v716_v15 = vsel %vm4378_vm2, %v3632_v33, %v715_v34  ;;  %v717_v22 = vrot.slane %v715_v34, 4  ;;  %v4738_v35 = vld [vmem:[%s4354_s17 + $0x58] sm:$0xf]  ;;  %v3732_v41 = vld [vmem:[%s4354_s17 + $0x48] sm:$0xf] }
  0x68   : > { %2725 = vrot.lane.b32.xlu0 %v3935_v39, %s4319_s4  ;;  %v969_v47 = vrot.slane %v967_v42, 4  ;;  %v970_v48 = vshll.u32 %v4686_v46, 16  ;;  %v980_v7 = vshrl.u32 %v3655_v38, 16  ;;  %v3857_v9 = vcombine.low %v4686_v46, %v3655_v38  ;;  %v4748_v42 = vld [vmem:[%s4354_s17 + $0x4c] sm:$0xf] }
  0x69   : > { %2137 = vrot.lane.b32.xlu1 %v3825_v44, %s4315_s21  ;;  %v719_v40 = vsel %vm4378_vm2, %v717_v22, %v718_v37  ;;  %v943_v50 = vshrl.u32 %v3652_v62, 16  ;;  %v946_v51 = vshll.u32 %v3652_v62, 16  ;;  %v956_v26 = vshrl.u32 %v4704_v43, 16 }
  0x6a   : > { %v3840_v52 = vcombine.low %v716_v15, %v719_v40  ;;  %v972_v30 = vrot.slane %v970_v48, 5  ;;  %v3856_v53 = vcombine.low %v3652_v62, %v4704_v43  ;;  %v976_v45 = vshll.u32 %v3655_v38, 16 }
  0x6b   : > { %v945_v57 = vrot.slane %v943_v50, 4  ;;  %v948_v13 = vrot.slane %v946_v51, 5  ;;  %v982_v12 = vrot.slane %v980_v7, 4  ;;  %v986_v58 = vshll.u32 %v3681_v49, 16  ;;  %v4759_v7 = vld [vmem:[%s4354_s17 + $0x5c] sm:$0x1] }
  0x6c   : > { %2215 = vrot.lane.b32.xlu0 %v3840_v52, %s4314_s20  ;;  %v973_v59 = vor.u32 %v972_v30, %v969_v47  ;;  %v978_v60 = vrot.slane %v976_v45, 5  ;;  %v952_v61 = vshll.u32 %v4704_v43, 16  ;;  %v958_v63 = vrot.slane %v956_v26, 4  ;;  %v4763_v51 = vld [vmem:[%s4354_s17 + $0x50] sm:$0x1] }
  0x6d   : > { %2217 = vrot.lane.b32.xlu1 %v3841_v1, %s4314_s20  ;;  %v988_v2 = vrot.slane %v986_v58, 5  ;;  %v949_v54 = vor.u32 %v948_v13, %v945_v57  ;;  %v962_v4 = vshll.u32 %v3680_v20, 16  ;;  %v3713_v5 = vrot.slane %v3697_v56, 9  ;;  %v195_v45 = vld [vmem:[%s4354_s17 + $0x48] sm:$0xf] }
  0x6e   : > { %v974_v6 = vrot.slane %v973_v59, 4  ;;  %v983_v8 = vor.u32 %v982_v12, %v978_v60  ;;  %v954_v10 = vrot.slane %v952_v61, 5  ;;  %v1331_v11 = vrot.slane %v3655_v38, 5  ;;  %v4774_v61 = vld [vmem:[%s4354_s17 + $0x4c] sm:$0xf] }
  0x6f   : > { %v950_v14 = vrot.slane %v949_v54, 4  ;;  %v964_v16 = vrot.slane %v962_v4, 5  ;;  %v1334_v18 = vrot.slane %v3681_v49, 5  ;;  %v3712_v21 = vrot.slane %v3696_v0, 9  ;;  %v4777_v54 = vld [vmem:[%s4354_s17 + $0x50] sm:$0x1] }
  0x70   : > { %2311 = vrot.lane.b32.xlu0 %v3856_v53, %s4312_s18  ;;  %v979_v24 = vsel %vm4422_vm5, %v974_v6, %v978_v60  ;;  %v984_v25 = vrot.slane %v983_v8, 4  ;;  %v959_v27 = vor.u32 %v958_v63, %v954_v10  ;;  %v1332_v28 = vsel %vm4378_vm2, %v3713_v5, %v1331_v11 }
  0x71   : > { %2313 = vrot.lane.b32.xlu1 %v3857_v9, %s4312_s18  ;;  %v955_v29 = vsel %vm4422_vm5, %v950_v14, %v954_v10  ;;  %v1333_v46 = vrot.slane %v1331_v11, 4  ;;  %v1324_v31 = vrot.slane %v4704_v43, 5  ;;  %v1327_v32 = vrot.slane %v3680_v20, 5  ;;  %v3776_v11 = vld [vmem:[%s4354_s17 + $0x48] sm:$0xe] }
  0x72   : > { %v989_v55 = vsel %vm4422_vm5, %v984_v25, %v988_v2  ;;  %v960_v33 = vrot.slane %v959_v27, 4  ;;  %v1576_v36 = vshrl.u32 %v4724_v23, 16  ;;  %v1579_v34 = vshll.u32 %v4724_v23, 16 }
  0x73   : > { %v3873_v37 = vcombine.low %v979_v24, %v989_v55  ;;  %v1335_v38 = vsel %vm4378_vm2, %v1333_v46, %v1334_v18  ;;  %v1325_v3 = vsel %vm4378_vm2, %v3712_v21, %v1324_v31  ;;  %v1326_v39 = vrot.slane %v1324_v31, 4 }
  0x74   : > { %v965_v62 = vsel %vm4422_vm5, %v960_v33, %v964_v16  ;;  %v3889_v43 = vcombine.low %v1332_v28, %v1335_v38  ;;  %v1578_v44 = vrot.slane %v1576_v36, 4  ;;  %v1581_v1 = vrot.slane %v1579_v34, 5 }
  0x75   : > { %2393 = vrot.lane.b32.xlu1 %v3873_v37, %s4316_s22  ;;  %v3872_v15 = vcombine.low %v955_v29, %v965_v62  ;;  %v1328_v22 = vsel %vm4378_vm2, %v1326_v39, %v1327_v32  ;;  %v1589_v47 = vshrl.u32 %v4738_v35, 16  ;;  %v3905_v48 = vcombine.low %v4724_v23, %v4738_v35  ;;  %v197_v32 = vld [vmem:[%s4354_s17 + $0x54] sm:$0xf]  ;;  %v198_v37 = vld [vmem:[%s4354_s17 + $0x58] sm:$0xf] }
  0x76   : > { %v3888_v9 = vcombine.low %v1325_v3, %v1328_v22  ;;  %v1552_v49 = vshrl.u32 %v3732_v41, 16  ;;  %v1555_v40 = vshll.u32 %v3732_v41, 16  ;;  %v1565_v50 = vshrl.u32 %v4748_v42, 16 }
  0x77   : > { %2391 = vrot.lane.b32.xlu0 %v3872_v15, %s4316_s22  ;;  %v3904_v26 = vcombine.low %v3732_v41, %v4748_v42  ;;  %v1582_v52 = vor.u32 %v1581_v1, %v1578_v44  ;;  %v1585_v30 = vshll.u32 %v4738_v35, 16  ;;  %v1591_v53 = vrot.slane %v1589_v47, 4  ;;  %v222_v1 = vld [vmem:[%s4354_s17 + $0x5c] sm:$0x1] }
  0x78   : > { %v1554_v20 = vrot.slane %v1552_v49, 4  ;;  %v1557_v56 = vrot.slane %v1555_v40, 5  ;;  %v1595_v57 = vshll.u32 %v4759_v7, 16  ;;  %v1561_v13 = vshll.u32 %v4748_v42, 16  ;;  %v3777_v49 = vld [vmem:[%s4354_s17 + $0x54] sm:$0xe] }
  0x79   : > { %2473 = vrot.lane.b32.xlu1 %v3889_v43, %s4313_s19  ;;  %v1583_v12 = vrot.slane %v1582_v52, 4  ;;  %v1587_v58 = vrot.slane %v1585_v30, 5  ;;  %v1567_v59 = vrot.slane %v1565_v50, 4  ;;  %v1571_v60 = vshll.u32 %v4763_v51, 16 }
  0x7a   : > { %v1597_v63 = vrot.slane %v1595_v57, 5  ;;  %v1558_v0 = vor.u32 %v1557_v56, %v1554_v20  ;;  %v1563_v2 = vrot.slane %v1561_v13, 5  ;;  %v379_v4 = vshrl.u32 %v195_v45, 16 }
  0x7b   : > { %2471 = vrot.lane.b32.xlu0 %v3888_v9, %s4313_s19  ;;  %v1588_v5 = vsel %vm4422_vm5, %v1583_v12, %v1587_v58  ;;  %v1592_v6 = vor.u32 %v1591_v53, %v1587_v58  ;;  %v1573_v8 = vrot.slane %v1571_v60, 5  ;;  %v382_v10 = vshll.u32 %v195_v45, 16  ;;  %v625_v45 = vld [vmem:[%s4354_s17 + $0x54] sm:$0xe] }
  0x7c   : > { %v1559_v14 = vrot.slane %v1558_v0, 4  ;;  %v1568_v16 = vor.u32 %v1567_v59, %v1563_v2  ;;  %v381_v18 = vrot.slane %v379_v4, 4  ;;  %v388_v21 = vshll.u32 %v4774_v61, 16 }
  0x7d   : > { %2569 = vrot.lane.b32.xlu1 %v3905_v48, %s4317_s25  ;;  %v1593_v23 = vrot.slane %v1592_v6, 4  ;;  %v384_v24 = vrot.slane %v382_v10, 5  ;;  %v392_v25 = vshrl.u32 %v4774_v61, 16  ;;  %v398_v27 = vshll.u32 %v4777_v54, 16 }
  0x7e   : > { %v1564_v28 = vsel %vm4422_vm5, %v1559_v14, %v1563_v2  ;;  %v1569_v29 = vrot.slane %v1568_v16, 4  ;;  %v390_v46 = vrot.slane %v388_v21, 5  ;;  %v3792_v31 = vrot.slane %v3776_v11, 9  ;;  %v4819_v14 = vld [vmem:[%s4354_s17 + $0x60] sm:$0xf] }
  0x7f   : > { %2567 = vrot.lane.b32.xlu0 %v3904_v26, %s4317_s25  ;;  %v1598_v55 = vsel %vm4422_vm5, %v1593_v23, %v1597_v63  ;;  %v385_v33 = vor.u32 %v384_v24, %v381_v18  ;;  %v394_v36 = vrot.slane %v392_v25, 4  ;;  %v400_v34 = vrot.slane %v398_v27, 5  ;;  %v624_v63 = vld [vmem:[%s4354_s17 + $0x48] sm:$0xe] }
  0x80   : > { %v3921_v38 = vcombine.low %v1588_v5, %v1598_v55  ;;  %v1574_v3 = vsel %vm4422_vm5, %v1569_v29, %v1573_v8  ;;  %v1933_v39 = vrot.slane %v4748_v42, 5  ;;  %v1936_v41 = vrot.slane %v4763_v51, 5  ;;  %v3656_v55 = vld [vmem:[%s4354_s17 + $0x54] sm:$0xf] }
  0x81   : > { %v3920_v62 = vcombine.low %v1564_v28, %v1574_v3  ;;  %v386_v43 = vrot.slane %v385_v33, 4  ;;  %v395_v44 = vor.u32 %v394_v36, %v390_v46  ;;  %v403_v15 = vshrl.u32 %v197_v32, 16  ;;  %v4832_v28 = vld [vmem:[%s4354_s17 + $0x64] sm:$0xf]  ;;  %v4841_v33 = vld [vmem:[%s4354_s17 + $0x58] sm:$0xf] }
  0x82   : > { %2649 = vrot.lane.b32.xlu1 %v3921_v38, %s4318_s26  ;;  %v1934_v22 = vsel %vm4378_vm2, %v3792_v31, %v1933_v39  ;;  %v1935_v47 = vrot.slane %v1933_v39, 4  ;;  %v406_v48 = vshll.u32 %v197_v32, 16  ;;  %v412_v9 = vshll.u32 %v198_v37, 16 }
  0x83   : > { %2647 = vrot.lane.b32.xlu0 %v3920_v62, %s4318_s26  ;;  %v391_v42 = vsel %vm4422_vm5, %v386_v43, %v390_v46  ;;  %v396_v40 = vrot.slane %v395_v44, 4  ;;  %v405_v50 = vrot.slane %v403_v15, 4  ;;  %v416_v51 = vshrl.u32 %v198_v37, 16 }
  0x84   : > { %v1937_v26 = vsel %vm4378_vm2, %v1935_v47, %v1936_v41  ;;  %v408_v52 = vrot.slane %v406_v48, 5  ;;  %v414_v30 = vrot.slane %v412_v9, 5  ;;  %v422_v53 = vshll.u32 %v222_v1, 16  ;;  %v3683_v41 = vld [vmem:[%s4354_s17 + $0x68] sm:$0x1] }
  0x85   : > { %v401_v20 = vsel %vm4422_vm5, %v396_v40, %v400_v34  ;;  %v3936_v56 = vcombine.low %v1934_v22, %v1937_v26  ;;  %v418_v57 = vrot.slane %v416_v51, 4  ;;  %v3793_v13 = vrot.slane %v3777_v49, 9  ;;  %v3682_v49 = vld [vmem:[%s4354_s17 + $0x5c] sm:$0x1] }
  0x86   : > { %v3826_v12 = vcombine.low %v391_v42, %v401_v20  ;;  %v409_v58 = vor.u32 %v408_v52, %v405_v50  ;;  %v424_v59 = vrot.slane %v422_v53, 5  ;;  %v1940_v60 = vrot.slane %v4738_v35, 5  ;;  %v4823_v21 = vpop.permute.xlu1 %2305  ;;  %v3699_v42 = vld [vmem:[%s4354_s17 + $0x60] sm:$0xe] }
  0x87   : > { %2727 = vrot.lane.b32.xlu0 %v3936_v56, %s4319_s4  ;;  %v419_v0 = vor.u32 %v418_v57, %v414_v30  ;;  %v1943_v2 = vrot.slane %v4759_v7, 5  ;;  %v3635_v4 = vrot.slane %v625_v45, 9  ;;  %v736_v5 = vrot.slane %v198_v37, 5  ;;  %v4855_v15 = vpop.permute.xlu0 %2303  ;;  %v3698_v56 = vld [vmem:[%s4354_s17 + $0x54] sm:$0xe] }
  0x88   : > { %2139 = vrot.lane.b32.xlu1 %v3826_v12, %s4315_s21  ;;  %v410_v6 = vrot.slane %v409_v58, 4  ;;  %v1941_v8 = vsel %vm4378_vm2, %v3793_v13, %v1940_v60  ;;  %v1942_v10 = vrot.slane %v1940_v60, 4  ;;  %v739_v11 = vrot.slane %v222_v1, 5 }
  0x89   : > { %v420_v35 = vrot.slane %v419_v0, 4  ;;  %v737_v16 = vsel %vm4378_vm2, %v3635_v4, %v736_v5  ;;  %v738_v7 = vrot.slane %v736_v5, 4  ;;  %v3634_v18 = vrot.slane %v624_v63, 9 }
  0x8a   : > { %v415_v23 = vsel %vm4422_vm5, %v410_v6, %v414_v30  ;;  %v1944_v24 = vsel %vm4378_vm2, %v1942_v10, %v1943_v2  ;;  %v729_v25 = vrot.slane %v4774_v61, 5  ;;  %v732_v27 = vrot.slane %v4777_v54, 5  ;;  %v4871_v10 = vld [vmem:[%s4354_s17 + $0x6c] sm:$0xf] }
  0x8b   : > { %v425_v29 = vsel %vm4422_vm5, %v420_v35, %v424_v59  ;;  %v3937_v46 = vcombine.low %v1941_v8, %v1944_v24  ;;  %v740_v31 = vsel %vm4378_vm2, %v738_v7, %v739_v11  ;;  %v1015_v32 = vshrl.u32 %v4819_v14, 16 }
  0x8c   : > { %v3827_v36 = vcombine.low %v415_v23, %v425_v29  ;;  %v3843_v34 = vcombine.low %v737_v16, %v740_v31  ;;  %v730_v61 = vsel %vm4378_vm2, %v3634_v18, %v729_v25  ;;  %v731_v54 = vrot.slane %v729_v25, 4  ;;  %v4887_v29 = vld [vmem:[%s4354_s17 + $0x70] sm:$0xf] }
  0x8d   : > { %2729 = vrot.lane.b32.xlu0 %v3937_v46, %s4319_s4  ;;  %v1017_v37 = vrot.slane %v1015_v32, 4  ;;  %v1018_v38 = vshll.u32 %v4819_v14, 16  ;;  %v1028_v3 = vshrl.u32 %v4832_v28, 16  ;;  %v3859_v39 = vcombine.low %v4819_v14, %v4832_v28 }
  0x8e   : > { %2141 = vrot.lane.b32.xlu1 %v3827_v36, %s4315_s21  ;;  %v733_v62 = vsel %vm4378_vm2, %v731_v54, %v732_v27  ;;  %v991_v43 = vshrl.u32 %v3656_v55, 16  ;;  %v994_v44 = vshll.u32 %v3656_v55, 16  ;;  %v1004_v1 = vshrl.u32 %v4841_v33, 16  ;;  %v4873_v11 = vpop.permute.xlu0 %2463 }
  0x8f   : > { %v3842_v22 = vcombine.low %v730_v61, %v733_v62  ;;  %v1020_v47 = vrot.slane %v1018_v38, 5  ;;  %v3858_v48 = vcombine.low %v3656_v55, %v4841_v33  ;;  %v1024_v9 = vshll.u32 %v4832_v28, 16  ;;  %v4861_v40 = vpop.permute.xlu1 %2207  ;;  %v4899_v61 = vld [vmem:[%s4354_s17 + $0x64] sm:$0xf] }
  0x90   : > { %v993_v50 = vrot.slane %v991_v43, 4  ;;  %v996_v51 = vrot.slane %v994_v44, 5  ;;  %v1030_v26 = vrot.slane %v1028_v3, 4  ;;  %v1034_v52 = vshll.u32 %v3683_v41, 16 }
  0x91   : > { %2219 = vrot.lane.b32.xlu0 %v3842_v22, %s4314_s20  ;;  %v1021_v30 = vor.u32 %v1020_v47, %v1017_v37  ;;  %v1026_v53 = vrot.slane %v1024_v9, 5  ;;  %v1000_v45 = vshll.u32 %v4841_v33, 16  ;;  %v1006_v20 = vrot.slane %v1004_v1, 4  ;;  %v4912_v1 = vld [vmem:[%s4354_s17 + $0x74] sm:$0x1] }
  0x92   : > { %2221 = vrot.lane.b32.xlu1 %v3843_v34, %s4314_s20  ;;  %v1036_v57 = vrot.slane %v1034_v52, 5  ;;  %v997_v13 = vor.u32 %v996_v51, %v993_v50  ;;  %v1010_v12 = vshll.u32 %v3682_v49, 16  ;;  %v3715_v58 = vrot.slane %v3699_v42, 9  ;;  %v4896_v34 = vld [vmem:[%s4354_s17 + $0x60] sm:$0xf] }
  0x93   : > { %v1022_v59 = vrot.slane %v1021_v30, 4  ;;  %v1031_v60 = vor.u32 %v1030_v26, %v1026_v53  ;;  %v1002_v63 = vrot.slane %v1000_v45, 5  ;;  %v1345_v0 = vrot.slane %v4832_v28, 5  ;;  %v4868_v2 = vpop.permute.xlu1 %2209  ;;  %v4918_v42 = vld [vmem:[%s4354_s17 + $0x68] sm:$0x1] }
  0x94   : > { %v998_v4 = vrot.slane %v997_v13, 4  ;;  %v1012_v5 = vrot.slane %v1010_v12, 5  ;;  %v1348_v6 = vrot.slane %v3683_v41, 5  ;;  %v3714_v8 = vrot.slane %v3698_v56, 9 }
  0x95   : > { %2315 = vrot.lane.b32.xlu0 %v3858_v48, %s4312_s18  ;;  %v1027_v14 = vsel %vm4422_vm5, %v1022_v59, %v1026_v53  ;;  %v1032_v35 = vrot.slane %v1031_v60, 4  ;;  %v1007_v16 = vor.u32 %v1006_v20, %v1002_v63  ;;  %v1346_v7 = vsel %vm4378_vm2, %v3715_v58, %v1345_v0 }
  0x96   : > { %2317 = vrot.lane.b32.xlu1 %v3859_v39, %s4312_s18  ;;  %v1003_v18 = vsel %vm4422_vm5, %v998_v4, %v1002_v63  ;;  %v1347_v23 = vrot.slane %v1345_v0, 4  ;;  %v1338_v24 = vrot.slane %v4841_v33, 5  ;;  %v1341_v25 = vrot.slane %v3682_v49, 5  ;;  %v4276_v0 = vld [vmem:[%s4354_s17 + $0x4] sm:$0xf] }
  0x97   : > { %v1037_v27 = vsel %vm4422_vm5, %v1032_v35, %v1036_v57  ;;  %v1008_v28 = vrot.slane %v1007_v16, 4  ;;  %v1624_v46 = vshrl.u32 %v4871_v10, 16  ;;  %v1627_v31 = vshll.u32 %v4871_v10, 16  ;;  %v4903_v39 = vpop.permute.xlu1 %2465  ;;  %v4277_v4 = vld [vmem:[%s4354_s17] sm:$0xf] }
  0x98   : > { %v3875_v32 = vcombine.low %v1027_v14, %v1037_v27  ;;  %v1349_v55 = vsel %vm4378_vm2, %v1347_v23, %v1348_v6  ;;  %v1339_v36 = vsel %vm4378_vm2, %v3714_v8, %v1338_v24  ;;  %v1340_v33 = vrot.slane %v1338_v24, 4  ;;  %v199_v6 = vld [vmem:[%s4354_s17 + $0x60] sm:$0xf]  ;;  %v4939_v16 = vld [vmem:[%s4354_s17 + $0x64] sm:$0xf] }
  0x99   : > { %v1013_v54 = vsel %vm4422_vm5, %v1008_v28, %v1012_v5  ;;  %v3891_v37 = vcombine.low %v1346_v7, %v1349_v55  ;;  %v1626_v38 = vrot.slane %v1624_v46, 4  ;;  %v1629_v3 = vrot.slane %v1627_v31, 5  ;;  %v4943_v24 = vld [vmem:[%s4354_s17 + $0x68] sm:$0x1] }
  0x9a   : > { %2397 = vrot.lane.b32.xlu1 %v3875_v32, %s4316_s22  ;;  %v3874_v41 = vcombine.low %v1003_v18, %v1013_v54  ;;  %v1342_v62 = vsel %vm4378_vm2, %v1340_v33, %v1341_v25  ;;  %v1637_v43 = vshrl.u32 %v4887_v29, 16  ;;  %v3907_v44 = vcombine.low %v4871_v10, %v4887_v29  ;;  %v2128_v22 = vpop.permute.xlu0 %2127 }
  0x9b   : > { %v3890_v47 = vcombine.low %v1339_v36, %v1342_v62  ;;  %v1600_v48 = vshrl.u32 %v4896_v34, 16  ;;  %v1603_v9 = vshll.u32 %v4896_v34, 16  ;;  %v1613_v49 = vshrl.u32 %v4899_v61, 16 }
  0x9c   : > { %2395 = vrot.lane.b32.xlu0 %v3874_v41, %s4316_s22  ;;  %v3906_v50 = vcombine.low %v4896_v34, %v4899_v61  ;;  %v1630_v51 = vor.u32 %v1629_v3, %v1626_v38  ;;  %v1633_v26 = vshll.u32 %v4887_v29, 16  ;;  %v1639_v52 = vrot.slane %v1637_v43, 4  ;;  %v3778_v34 = vld [vmem:[%s4354_s17 + $0x60] sm:$0xe] }
  0x9d   : > { %v1602_v30 = vrot.slane %v1600_v48, 4  ;;  %v1605_v53 = vrot.slane %v1603_v9, 5  ;;  %v1643_v45 = vshll.u32 %v4912_v1, 16  ;;  %v1609_v20 = vshll.u32 %v4899_v61, 16 }
  0x9e   : > { %2477 = vrot.lane.b32.xlu1 %v3891_v37, %s4313_s19  ;;  %v1631_v56 = vrot.slane %v1630_v51, 4  ;;  %v1635_v57 = vrot.slane %v1633_v26, 5  ;;  %v1615_v13 = vrot.slane %v1613_v49, 4  ;;  %v1619_v12 = vshll.u32 %v4918_v42, 16  ;;  %v4928_v58 = vpop.permute.xlu0 %2129 }
  0x9f   : > { %v1645_v59 = vrot.slane %v1643_v45, 5  ;;  %v1606_v60 = vor.u32 %v1605_v53, %v1602_v30  ;;  %v1611_v63 = vrot.slane %v1609_v20, 5  ;;  %v3804_v5 = vcombine.low %v4277_v4, %v4276_v0  ;;  %v4933_v8 = vpop.permute.xlu1 %2385  ;;  %v4278_v53 = vld [vmem:[%s4354_s17 + $0x10] sm:$0xf]  ;;  %v4279_v45 = vld [vmem:[%s4354_s17 + $0xc] sm:$0xf] }
  0xa0   : > { %2475 = vrot.lane.b32.xlu0 %v3890_v47, %s4313_s19  ;;  %v1636_v10 = vsel %vm4422_vm5, %v1631_v56, %v1635_v57  ;;  %v1640_v14 = vor.u32 %v1639_v52, %v1635_v57  ;;  %v1621_v35 = vrot.slane %v1619_v12, 5  ;;  %v427_v28 = vshrl.u32 %v199_v6, 16  ;;  %v4967_v47 = vld [vmem:[%s4354_s17 + $0x70] sm:$0xf] }
  0xa1   : > { %v1607_v7 = vrot.slane %v1606_v60, 4  ;;  %v1616_v18 = vor.u32 %v1615_v13, %v1611_v63  ;;  %v2754_v23 = vsel %vm2751_vm6, %v3804_v5, %v2128_v22  ;;  %v430_v46 = vshll.u32 %v199_v6, 16  ;;  %v201_v22 = vld [vmem:[%s4354_s17 + $0x6c] sm:$0xf] }
  0xa2   : > { %2573 = vrot.lane.b32.xlu1 %v3907_v44, %s4317_s25  ;;  %v1641_v25 = vrot.slane %v1640_v14, 4  ;;  %v4948_v27 = vsel %vm2800_vm7, %v2754_v23, %v4861_v40  ;;  %v4950_v31 = vpop.permute.xlu0 %2383  ;;  %v436_v36 = vshll.u32 %v4939_v16, 16  ;;  %v440_v33 = vshrl.u32 %v4939_v16, 16 }
  0xa3   : > { %v1612_v32 = vsel %vm4422_vm5, %v1607_v7, %v1611_v63  ;;  %v1617_v55 = vrot.slane %v1616_v18, 4  ;;  %v429_v54 = vrot.slane %v427_v28, 4  ;;  %v432_v37 = vrot.slane %v430_v46, 5  ;;  %v4961_v3 = vpop.permute.xlu1 %2561 }
  0xa4   : > { %2571 = vrot.lane.b32.xlu0 %v3906_v50, %s4317_s25  ;;  %v1646_v40 = vsel %vm4422_vm5, %v1641_v25, %v1645_v59  ;;  %v446_v38 = vshll.u32 %v4943_v24, 16  ;;  %v438_v43 = vrot.slane %v436_v36, 5  ;;  %v442_v44 = vrot.slane %v440_v33, 4 }
  0xa5   : > { %v3923_v41 = vcombine.low %v1636_v10, %v1646_v40  ;;  %v1622_v62 = vsel %vm4422_vm5, %v1617_v55, %v1621_v35  ;;  %v433_v9 = vor.u32 %v432_v37, %v429_v54  ;;  %v3794_v50 = vrot.slane %v3778_v34, 9  ;;  %v3779_v10 = vld [vmem:[%s4354_s17 + $0x6c] sm:$0xe] }
  0xa6   : > { %v3922_v48 = vcombine.low %v1612_v32, %v1622_v62  ;;  %v448_v49 = vrot.slane %v446_v38, 5  ;;  %v4969_v51 = vpop.permute.xlu0 %2559  ;;  %v443_v26 = vor.u32 %v442_v44, %v438_v43  ;;  %v1947_v52 = vrot.slane %v4899_v61, 5  ;;  %v627_v34 = vld [vmem:[%s4354_s17 + $0x6c] sm:$0xe] }
  0xa7   : > { %2653 = vrot.lane.b32.xlu1 %v3923_v41, %s4318_s26  ;;  %v1950_v30 = vrot.slane %v4918_v42, 5  ;;  %v3805_v20 = vcombine.low %v4279_v45, %v4278_v53  ;;  %v434_v56 = vrot.slane %v433_v9, 4  ;;  %v451_v57 = vshrl.u32 %v201_v22, 16  ;;  %v224_v42 = vld [vmem:[%s4354_s17 + $0x74] sm:$0x1] }
  0xa8   : > { %2651 = vrot.lane.b32.xlu0 %v3922_v48, %s4318_s26  ;;  %v454_v13 = vshll.u32 %v201_v22, 16  ;;  %v460_v12 = vshll.u32 %v4967_v47, 16  ;;  %v444_v59 = vrot.slane %v443_v26, 4  ;;  %v1948_v60 = vsel %vm4378_vm2, %v3794_v50, %v1947_v52 }
  0xa9   : > { %v1949_v63 = vrot.slane %v1947_v52, 4  ;;  %v2757_v61 = vsel %vm2751_vm6, %v3805_v20, %v4928_v58  ;;  %v439_v0 = vsel %vm4422_vm5, %v434_v56, %v438_v43  ;;  %v453_v5 = vrot.slane %v451_v57, 4  ;;  %v3662_v57 = vld [vmem:[%s4354_s17 + $0x78] sm:$0xf] }
  0xaa   : > { %v2804_v4 = vsel %vm2800_vm7, %v2757_v61, %v4868_v2  ;;  %v456_v6 = vrot.slane %v454_v13, 5  ;;  %v4988_v14 = vpop.permute.xlu1 %2641  ;;  %v449_v35 = vsel %vm4422_vm5, %v444_v59, %v448_v49  ;;  %v462_v58 = vrot.slane %v460_v12, 5  ;;  %v3660_v59 = vld [vmem:[%s4354_s17 + $0x6c] sm:$0xf] }
  0xab   : > { %v1951_v7 = vsel %vm4378_vm2, %v1949_v63, %v1950_v30  ;;  %v464_v18 = vshrl.u32 %v4967_v47, 16  ;;  %v4995_v23 = vpop.permute.xlu0 %2639  ;;  %v3828_v25 = vcombine.low %v439_v0, %v449_v35  ;;  %v470_v46 = vshll.u32 %v224_v42, 16 }
  0xac   : > { %v3938_v28 = vcombine.low %v1948_v60, %v1951_v7  ;;  %v457_v2 = vor.u32 %v456_v6, %v453_v5  ;;  %v3795_v55 = vrot.slane %v3779_v10, 9  ;;  %v1954_v36 = vrot.slane %v4887_v29, 5  ;;  %v626_v29 = vld [vmem:[%s4354_s17 + $0x60] sm:$0xe] }
  0xad   : > { %v466_v32 = vrot.slane %v464_v18, 4  ;;  %v1957_v33 = vrot.slane %v4912_v1, 5  ;;  %2143 = vrot.lane.b32.xlu1 %v3828_v25, %s4315_s21  ;;  %v472_v54 = vrot.slane %v470_v46, 5  ;;  %v2837_v62 = vsel %vm2833_vm8, %v2804_v4, %v4823_v21  ;;  %v5060_v25 = vld [vmem:[%s4354_s17 + $0x80] sm:$0x1] }
  0xae   : > { %2731 = vrot.lane.b32.xlu0 %v3938_v28, %s4319_s4  ;;  %v458_v40 = vrot.slane %v457_v2, 4  ;;  %v1955_v38 = vsel %vm4378_vm2, %v3795_v55, %v1954_v36  ;;  %v1956_v41 = vrot.slane %v1954_v36, 4  ;;  %v2870_v44 = vsel %vm2866_vm9, %v2837_v62, %v4933_v8  ;;  %v5065_v2 = vld [vmem:[%s4354_s17 + $0x74] sm:$0x1] }
  0xaf   : > { %v467_v37 = vor.u32 %v466_v32, %v462_v58  ;;  %v5007_v43 = vpop.permute.xlu0 %2719  ;;  %v2835_v22 = vsel %vm2833_vm8, %v4948_v27, %v4855_v15  ;;  %v3637_v48 = vrot.slane %v627_v34, 9  ;;  %v750_v26 = vrot.slane %v4967_v47, 5 }
  0xb0   : > { %v463_v1 = vsel %vm4422_vm5, %v458_v40, %v462_v58  ;;  %v5016_v9 = vpop.permute.xlu1 %2131  ;;  %v1958_v21 = vsel %vm4378_vm2, %v1956_v41, %v1957_v33  ;;  %v2868_v50 = vsel %vm2866_vm9, %v2835_v22, %v4950_v31  ;;  %v753_v8 = vrot.slane %v224_v42, 5 }
  0xb1   : > { %v468_v49 = vrot.slane %v467_v37, 4  ;;  %v3939_v52 = vcombine.low %v1955_v38, %v1958_v21  ;;  %v3636_v30 = vrot.slane %v626_v29, 9  ;;  %v743_v15 = vrot.slane %v4939_v16, 5  ;;  %v5034_v16 = vld [vmem:[%s4354_s17 + $0x7c] sm:$0xf] }
  0xb2   : > { %v751_v53 = vsel %vm4378_vm2, %v3637_v48, %v750_v26  ;;  %v752_v45 = vrot.slane %v750_v26, 4  ;;  %v746_v20 = vrot.slane %v4943_v24, 5  ;;  %v2903_v12 = vsel %vm2899_vm10, %v2870_v44, %v4903_v39  ;;  %v5042_v24 = vld [vmem:[%s4354_s17 + $0x70] sm:$0xf]  ;;  %v4248_v38 = vld [vmem:[%s5992_s1 + $0x20] ss:$0 sps:$4 sm:$0xff]  }
  0xb3   : > { %v473_v27 = vsel %vm4422_vm5, %v468_v49, %v472_v54  ;;  %2733 = vrot.lane.b32.xlu0 %v3939_v52, %s4319_s4  ;;  %v744_v47 = vsel %vm4378_vm2, %v3636_v30, %v743_v15  ;;  %v745_v56 = vrot.slane %v743_v15, 4  ;;  %v2936_v42 = vsel %vm2932_vm11, %v2903_v12, %v4961_v3  ;;  %v4280_v26 = vld [vmem:[%s4354_s17 + $0x18] sm:$0xf]  ;;  %v4281_v52 = vld [vmem:[%s4354_s17 + $0x1c] sm:$0xf]  ;;  %4204 = vmatprep.subr.msk.bf16.mxu0 %vm3100_vm13, %v4248_v38 }
  0xb4   : > { %v3829_v31 = vcombine.low %v463_v1, %v473_v27  ;;  %v754_v13 = vsel %vm4378_vm2, %v752_v45, %v753_v8  ;;  %v2901_v0 = vsel %vm2899_vm10, %v2868_v50, %v4873_v11  ;;  %v1063_v5 = vshrl.u32 %v3662_v57, 16  ;;  %v3701_v1 = vld [vmem:[%s4354_s17 + $0x78] sm:$0xe]  ;;  %v3700_v30 = vld [vmem:[%s4354_s17 + $0x6c] sm:$0xe]  ;;  %4205 = vmatprep.subr.msk.bf16.mxu1 %vm3100_vm13, %v4248_v38 }
  0xb5   : > { %v5044_v60 = vpop.permute.xlu0 %2721  ;;  %v3845_v63 = vcombine.low %v751_v53, %v754_v13  ;;  %v747_v61 = vsel %vm4378_vm2, %v745_v56, %v746_v20  ;;  %v1066_v6 = vshll.u32 %v3662_v57, 16  ;;  %v1076_v10 = vshrl.u32 %v5034_v16, 16 }
  0xb6   : > { %2145 = vrot.lane.b32.xlu1 %v3829_v31, %s4315_s21  ;;  %v5053_v39 = vpop.permute.xlu1 %2133  ;;  %v3844_v4 = vcombine.low %v744_v47, %v747_v61  ;;  %v2934_v35 = vsel %vm2932_vm11, %v2901_v0, %v4969_v51  ;;  %v1039_v7 = vshrl.u32 %v3660_v59, 16  ;;  %v1042_v58 = vshll.u32 %v3660_v59, 16 }
  0xb7   : > { %v1052_v18 = vshrl.u32 %v5042_v24, 16  ;;  %v1065_v11 = vrot.slane %v1063_v5, 4  ;;  %v1068_v3 = vrot.slane %v1066_v6, 5  ;;  %v3860_v28 = vcombine.low %v3660_v59, %v5042_v24 }
  0xb8   : > { %2223 = vrot.lane.b32.xlu0 %v3844_v4, %s4314_s20  ;;  %v3861_v51 = vcombine.low %v3662_v57, %v5034_v16  ;;  %v1041_v32 = vrot.slane %v1039_v7, 4  ;;  %v1044_v55 = vrot.slane %v1042_v58, 5  ;;  %v5073_v36 = vsel %vm2965_vm12, %v2936_v42, %v4988_v14 }
  0xb9   : > { %v5067_v46 = vpop.permute.xlu0 %2211  ;;  %v1069_v34 = vor.u32 %v1068_v3, %v1065_v11  ;;  %v1072_v40 = vshll.u32 %v5034_v16, 16  ;;  %v1078_v54 = vrot.slane %v1076_v10, 4  ;;  %v1082_v37 = vshll.u32 %v5060_v25, 16  ;;  %v5117_v10 = vld [vmem:[%s4354_s17 + $0x84] sm:$0xf] }
  0xba   : > { %2225 = vrot.lane.b32.xlu1 %v3845_v63, %s4314_s20  ;;  %v5075_v33 = vpop.permute.xlu1 %2213  ;;  %v1045_v41 = vor.u32 %v1044_v55, %v1041_v32  ;;  %v1048_v62 = vshll.u32 %v5042_v24, 16  ;;  %v1054_v14 = vrot.slane %v1052_v18, 4  ;;  %v1058_v29 = vshll.u32 %v5065_v2, 16  ;;  %v5124_v18 = vld [vmem:[%s4354_s17 + $0x88] sm:$0xf] }
  0xbb   : > { %v2967_v44 = vsel %vm2965_vm12, %v2934_v35, %v4995_v23  ;;  %v1070_v22 = vrot.slane %v1069_v34, 4  ;;  %v1074_v48 = vrot.slane %v1072_v40, 5  ;;  %v1084_v49 = vrot.slane %v1082_v37, 5  ;;  %v4282_v55 = vld [vmem:[%s4354_s17 + $0x24] sm:$0xf] }
  0xbc   : > { %2319 = vrot.lane.b32.xlu0 %v3860_v28, %s4312_s18  ;;  %v1046_v21 = vrot.slane %v1045_v41, 4  ;;  %v1050_v50 = vrot.slane %v1048_v62, 5  ;;  %v3806_v8 = vcombine.low %v4280_v26, %v4281_v52  ;;  %v1060_v45 = vrot.slane %v1058_v29, 5  ;;  %v4283_v34 = vld [vmem:[%s4354_s17 + $0x28] sm:$0xf] }
  0xbd   : > { %v5094_v27 = vpop.permute.xlu0 %2307  ;;  %v1075_v53 = vsel %vm4422_vm5, %v1070_v22, %v1074_v48  ;;  %v1079_v23 = vor.u32 %v1078_v54, %v1074_v48  ;;  %v3717_v20 = vrot.slane %v3701_v1, 9  ;;  %v1359_v56 = vrot.slane %v5034_v16, 5  ;;  %v5168_v26 = vld [vmem:[%s4354_s17 + $0x80] sm:$0x1] }
  0xbe   : > { %2321 = vrot.lane.b32.xlu1 %v3861_v51, %s4312_s18  ;;  %v5092_v15 = vpop.permute.xlu1 %2309  ;;  %v1051_v31 = vsel %vm4422_vm5, %v1046_v21, %v1050_v50  ;;  %v1055_v47 = vor.u32 %v1054_v14, %v1050_v50  ;;  %v1362_v57 = vrot.slane %v5060_v25, 5  ;;  %v3716_v12 = vrot.slane %v3700_v30, 9  ;;  %v5127_v25 = vld [vmem:[%s4354_s17 + $0x78] sm:$0xf]  ;;  %v5138_v51 = vld [vmem:[%s4354_s17 + $0x7c] sm:$0xf] }
  0xbf   : > { %v1080_v13 = vrot.slane %v1079_v23, 4  ;;  %v1352_v59 = vrot.slane %v5042_v24, 5  ;;  %v1355_v63 = vrot.slane %v5065_v2, 5  ;;  %v1360_v42 = vsel %vm4378_vm2, %v3717_v20, %v1359_v56 }
  0xc0   : > { %v1056_v61 = vrot.slane %v1055_v47, 4  ;;  %v1361_v0 = vrot.slane %v1359_v56, 4  ;;  %v3000_v6 = vsel %vm2998_vm14, %v2967_v44, %v5007_v43  ;;  %v2760_v43 = vsel %vm2751_vm6, %v3806_v8, %v5016_v9  ;;  %v5158_v44 = vld [vmem:[%s4354_s17 + $0x8c] sm:$0x1]  ;;  %v203_v47 = vld [vmem:[%s4354_s17 + $0x78] sm:$0xf] }
  0xc1   : > { %v1085_v16 = vsel %vm4422_vm5, %v1080_v13, %v1084_v49  ;;  %v1353_v5 = vsel %vm4378_vm2, %v3716_v12, %v1352_v59  ;;  %v1354_v24 = vrot.slane %v1352_v59, 4  ;;  %4162 = vmatprep.mubr.msk.bf16.mxu0 %vm3067_vm15, %v3000_v6  ;;  %v3102_v2 = vsel %vm3100_vm13, %v4248_v38, 0  ;;  %v5184_v12 = vld [vmem:[%s4354_s17 + $0x7c] sm:$0xf] }
  0xc2   : > { %v5108_v4 = vpop.permute.xlu1 %2389  ;;  %v3877_v35 = vcombine.low %v1075_v53, %v1085_v16  ;;  %v1061_v7 = vsel %vm4422_vm5, %v1056_v61, %v1060_v45  ;;  %v1363_v58 = vsel %vm4378_vm2, %v1361_v0, %v1362_v57  ;;  %4161 = vmatpush3.bf16.msra.mxu0 %v3102_v2  ;;  %v3807_v40 = vcombine.low %v4282_v55, %v4283_v34 }
  0xc3   : > { %v3876_v3 = vcombine.low %v1051_v31, %v1061_v7  ;;  %v1356_v28 = vsel %vm4378_vm2, %v1354_v24, %v1355_v63  ;;  %v3893_v32 = vcombine.low %v1360_v42, %v1363_v58  ;;  %v3002_v9 = vsel %vm2998_vm14, %v5073_v36, %v5044_v60  ;;  %4203 = vmatpush3.bf16.msra.mxu1 %v3102_v2  ;;  %v5192_v24 = vld [vmem:[%s4354_s17 + $0x80] sm:$0x1] }
  0xc4   : > { %v5129_v11 = vpop.permute.xlu0 %2387  ;;  %2401 = vrot.lane.b32.xlu1 %v3877_v35, %s4316_s22  ;;  %v1672_v54 = vshrl.u32 %v5117_v10, 16  ;;  %v3892_v38 = vcombine.low %v1353_v5, %v1356_v28  ;;  %v1675_v41 = vshll.u32 %v5117_v10, 16  ;;  %v1685_v62 = vshrl.u32 %v5124_v18, 16 }
  0xc5   : > { %2399 = vrot.lane.b32.xlu0 %v3876_v3, %s4316_s22  ;;  %v1648_v14 = vshrl.u32 %v5127_v25, 16  ;;  %v3909_v1 = vcombine.low %v5117_v10, %v5124_v18  ;;  %v1651_v60 = vshll.u32 %v5127_v25, 16  ;;  %v1661_v36 = vshrl.u32 %v5138_v51, 16  ;;  %4163 = vmatmul.mubr.msk.bf16.vlgmr.msra.gmra.mrb[0].mxu0 %vm3067_vm15, %v3002_v9 }
  0xc6   : > { %v5147_v37 = vpop.permute.xlu1 %2469  ;;  %v1674_v29 = vrot.slane %v1672_v54, 4  ;;  %v2763_v48 = vsel %vm2751_vm6, %v3807_v40, %v5053_v39  ;;  %v1677_v49 = vrot.slane %v1675_v41, 5  ;;  %v3908_v50 = vcombine.low %v5127_v25, %v5138_v51  ;;  %v3780_v25 = vld [vmem:[%s4354_s17 + $0x78] sm:$0xe] }
  0xc7   : > { %v1650_v21 = vrot.slane %v1648_v14, 4  ;;  %v1653_v52 = vrot.slane %v1651_v60, 5  ;;  %v2808_v8 = vsel %vm2800_vm7, %v2763_v48, %v5075_v33  ;;  %v1681_v30 = vshll.u32 %v5124_v18, 16  ;;  %v206_v48 = vld [vmem:[%s4354_s17 + $0x88] sm:$0xf] }
  0xc8   : > { %v5160_v22 = vpop.permute.xlu0 %2467  ;;  %2481 = vrot.lane.b32.xlu1 %v3893_v32, %s4313_s19  ;;  %v1687_v39 = vrot.slane %v1685_v62, 4  ;;  %v1678_v23 = vor.u32 %v1677_v49, %v1674_v29  ;;  %v1691_v45 = vshll.u32 %v5158_v44, 16  ;;  %v1657_v20 = vshll.u32 %v5138_v51, 16 }
  0xc9   : > { %2479 = vrot.lane.b32.xlu0 %v3892_v38, %s4313_s19  ;;  %v1663_v31 = vrot.slane %v1661_v36, 4  ;;  %v2806_v56 = vsel %vm2800_vm7, %v2760_v43, %v5067_v46  ;;  %v1683_v57 = vrot.slane %v1681_v30, 5  ;;  %v1654_v33 = vor.u32 %v1653_v52, %v1650_v21  ;;  %v205_v36 = vld [vmem:[%s4354_s17 + $0x84] sm:$0xf] }
  0xca   : > { %v5174_v53 = vpop.permute.xlu1 %2565  ;;  %v1667_v13 = vshll.u32 %v5168_v26, 16  ;;  %v1679_v63 = vrot.slane %v1678_v23, 4  ;;  %v1693_v61 = vrot.slane %v1691_v45, 5  ;;  %v1659_v42 = vrot.slane %v1657_v20, 5 }
  0xcb   : > { %v2841_v0 = vsel %vm2833_vm8, %v2808_v8, %v5092_v15  ;;  %v1688_v16 = vor.u32 %v1687_v39, %v1683_v57  ;;  %v1655_v5 = vrot.slane %v1654_v33, 4  ;;  %v475_v6 = vshrl.u32 %v203_v47, 16  ;;  %v5217_v8 = vld [vmem:[%s4354_s17 + $0x8c] sm:$0x1] }
  0xcc   : > { %v5186_v59 = vpop.permute.xlu0 %2563  ;;  %2577 = vrot.lane.b32.xlu1 %v3909_v1, %s4317_s25  ;;  %v1669_v46 = vrot.slane %v1667_v13, 5  ;;  %v1684_v10 = vsel %vm4422_vm5, %v1679_v63, %v1683_v57  ;;  %v1664_v35 = vor.u32 %v1663_v31, %v1659_v42  ;;  %v478_v7 = vshll.u32 %v203_v47, 16 }
  0xcd   : > { %2575 = vrot.lane.b32.xlu0 %v3908_v50, %s4317_s25  ;;  %v484_v58 = vshll.u32 %v5184_v12, 16  ;;  %v1689_v15 = vrot.slane %v1688_v16, 4  ;;  %v1660_v43 = vsel %vm4422_vm5, %v1655_v5, %v1659_v42  ;;  %v477_v28 = vrot.slane %v475_v6, 4  ;;  %v629_v16 = vld [vmem:[%s4354_s17 + $0x84] sm:$0xe] }
  0xce   : > { %v488_v2 = vshrl.u32 %v5184_v12, 16  ;;  %v1665_v55 = vrot.slane %v1664_v35, 4  ;;  %v480_v34 = vrot.slane %v478_v7, 5  ;;  %v494_v9 = vshll.u32 %v5192_v24, 16 }
  0xcf   : > { %v5199_v3 = vpop.permute.xlu1 %2645  ;;  %v486_v40 = vrot.slane %v484_v58, 5  ;;  %v1694_v54 = vsel %vm4422_vm5, %v1689_v15, %v1693_v61  ;;  %v3796_v41 = vrot.slane %v3780_v25, 9  ;;  %v1961_v62 = vrot.slane %v5138_v51, 5  ;;  %v628_v15 = vld [vmem:[%s4354_s17 + $0x78] sm:$0xe] }
  0xd0   : > { %v5204_v32 = vpop.permute.xlu0 %2643  ;;  %v490_v38 = vrot.slane %v488_v2, 4  ;;  %v3925_v14 = vcombine.low %v1684_v10, %v1694_v54  ;;  %v1670_v29 = vsel %vm4422_vm5, %v1665_v55, %v1669_v46  ;;  %v2839_v1 = vsel %vm2833_vm8, %v2806_v56, %v5094_v27 }
  0xd1   : > { %v481_v60 = vor.u32 %v480_v34, %v477_v28  ;;  %v3924_v49 = vcombine.low %v1660_v43, %v1670_v29  ;;  %v496_v50 = vrot.slane %v494_v9, 5  ;;  %v1963_v52 = vrot.slane %v1961_v62, 4 }
  0xd2   : > { %v491_v21 = vor.u32 %v490_v38, %v486_v40  ;;  %2657 = vrot.lane.b32.xlu1 %v3925_v14, %s4318_s26  ;;  %v1962_v39 = vsel %vm4378_vm2, %v3796_v41, %v1961_v62  ;;  %v1964_v27 = vrot.slane %v5168_v26, 5  ;;  %v2874_v23 = vsel %vm2866_vm9, %v2841_v0, %v5108_v4  ;;  %v3781_v4 = vld [vmem:[%s4354_s17 + $0x84] sm:$0xe] }
  0xd3   : > { %v482_v51 = vrot.slane %v481_v60, 4  ;;  %2655 = vrot.lane.b32.xlu0 %v3924_v49, %s4318_s26  ;;  %v499_v31 = vshrl.u32 %v205_v36, 16  ;;  %v502_v47 = vshll.u32 %v205_v36, 16  ;;  %v508_v56 = vshll.u32 %v206_v48, 16  ;;  %v5263_v60 = vld [vmem:[%s4354_s17 + $0x90] sm:$0xf] }
  0xd4   : > { %v5219_v30 = vpop.permute.xlu0 %2723  ;;  %v492_v20 = vrot.slane %v491_v21, 4  ;;  %v1965_v33 = vsel %vm4378_vm2, %v1963_v52, %v1964_v27  ;;  %v512_v13 = vshrl.u32 %v206_v48, 16  ;;  %v518_v26 = vshll.u32 %v5217_v8, 16  ;;  %v3664_v52 = vld [vmem:[%s4354_s17 + $0x84] sm:$0xf] }
  0xd5   : > { %v5227_v45 = vpop.permute.xlu1 %2135  ;;  %v487_v57 = vsel %vm4422_vm5, %v482_v51, %v486_v40  ;;  %v3940_v61 = vcombine.low %v1962_v39, %v1965_v33  ;;  %v501_v42 = vrot.slane %v499_v31, 4  ;;  %v504_v0 = vrot.slane %v502_v47, 5 }
  0xd6   : > { %v497_v63 = vsel %vm4422_vm5, %v492_v20, %v496_v50  ;;  %v2872_v46 = vsel %vm2866_vm9, %v2839_v1, %v5129_v11  ;;  %v510_v6 = vrot.slane %v508_v56, 5  ;;  %v514_v10 = vrot.slane %v512_v13, 4  ;;  %v5272_v50 = vld [vmem:[%s4354_s17 + $0x94] sm:$0xf]  ;;  %v5288_v56 = vld [vmem:[%s4354_s17 + $0x88] sm:$0xf] }
  0xd7   : > { %v3830_v5 = vcombine.low %v487_v57, %v497_v63  ;;  %2735 = vrot.lane.b32.xlu0 %v3940_v61, %s4319_s4  ;;  %v505_v35 = vor.u32 %v504_v0, %v501_v42  ;;  %v3797_v7 = vrot.slane %v3781_v4, 9  ;;  %v1968_v58 = vrot.slane %v5124_v18, 5  ;;  %v5297_v61 = vld [vmem:[%s4354_s17 + $0x98] sm:$0x1] }
  0xd8   : > { %v1971_v25 = vrot.slane %v5158_v44, 5  ;;  %v515_v28 = vor.u32 %v514_v10, %v510_v6  ;;  %v520_v2 = vrot.slane %v518_v26, 5  ;;  %v2907_v11 = vsel %vm2899_vm10, %v2874_v23, %v5147_v37 }
  0xd9   : > { %2147 = vrot.lane.b32.xlu1 %v3830_v5, %s4315_s21  ;;  %v3639_v55 = vrot.slane %v629_v16, 9  ;;  %v506_v40 = vrot.slane %v505_v35, 4  ;;  %v1969_v18 = vsel %vm4378_vm2, %v3797_v7, %v1968_v58  ;;  %v1970_v9 = vrot.slane %v1968_v58, 4 }
  0xda   : > { %v5245_v43 = vpop.permute.xlu0 %2725  ;;  %v764_v44 = vrot.slane %v206_v48, 5  ;;  %v516_v54 = vrot.slane %v515_v28, 4  ;;  %v767_v38 = vrot.slane %v5217_v8, 5  ;;  %v3638_v41 = vrot.slane %v628_v15, 9 }
  0xdb   : > { %v5250_v34 = vpop.permute.xlu1 %2137  ;;  %v757_v62 = vrot.slane %v5184_v12, 5  ;;  %v511_v37 = vsel %vm4422_vm5, %v506_v40, %v510_v6  ;;  %v1972_v14 = vsel %vm4378_vm2, %v1970_v9, %v1971_v25  ;;  %v2905_v12 = vsel %vm2899_vm10, %v2872_v46, %v5160_v22  ;;  %v5308_v6 = vld [vmem:[%s4354_s17 + $0x8c] sm:$0x1] }
  0xdc   : > { %v765_v29 = vsel %vm4378_vm2, %v3639_v55, %v764_v44  ;;  %v766_v1 = vrot.slane %v764_v44, 4  ;;  %v521_v48 = vsel %vm4422_vm5, %v516_v54, %v520_v2  ;;  %v3941_v49 = vcombine.low %v1969_v18, %v1972_v14 }
  0xdd   : > { %v759_v21 = vrot.slane %v757_v62, 4  ;;  %v3831_v51 = vcombine.low %v511_v37, %v521_v48  ;;  %v758_v27 = vsel %vm4378_vm2, %v3638_v41, %v757_v62  ;;  %v760_v23 = vrot.slane %v5192_v24, 5  ;;  %v3702_v62 = vld [vmem:[%s4354_s17 + $0x84] sm:$0xe] }
  0xde   : > { %v5265_v36 = vpop.permute.xlu0 %2215  ;;  %v768_v39 = vsel %vm4378_vm2, %v766_v1, %v767_v38  ;;  %2737 = vrot.lane.b32.xlu0 %v3941_v49, %s4319_s4  ;;  %v2940_v22 = vsel %vm2932_vm11, %v2907_v11, %v5174_v53  ;;  %v1111_v31 = vshrl.u32 %v5263_v60, 16  ;;  %v1114_v47 = vshll.u32 %v5263_v60, 16  ;;  %v4284_v1 = vld [vmem:[%s4354_s17 + $0x30] sm:$0xf] }
  0xdf   : > { %v5275_v8 = vpop.permute.xlu1 %2217  ;;  %v3847_v20 = vcombine.low %v765_v29, %v768_v39  ;;  %2149 = vrot.lane.b32.xlu1 %v3831_v51, %s4315_s21  ;;  %v761_v57 = vsel %vm4378_vm2, %v759_v21, %v760_v23  ;;  %v2938_v24 = vsel %vm2932_vm11, %v2905_v12, %v5186_v59  ;;  %v1124_v33 = vshrl.u32 %v5272_v50, 16 }
  0xe0   : > { %v1087_v13 = vshrl.u32 %v3664_v52, 16  ;;  %v3846_v26 = vcombine.low %v758_v27, %v761_v57  ;;  %v1113_v53 = vrot.slane %v1111_v31, 4  ;;  %v1116_v4 = vrot.slane %v1114_v47, 5 }
  0xe1   : > { %v1090_v63 = vshll.u32 %v3664_v52, 16  ;;  %v3863_v16 = vcombine.low %v5263_v60, %v5272_v50  ;;  %v1100_v46 = vshrl.u32 %v5288_v56, 16  ;;  %v3862_v59 = vcombine.low %v3664_v52, %v5288_v56  ;;  %v4285_v60 = vld [vmem:[%s4354_s17 + $0x34] sm:$0xf] }
  0xe2   : > { %v5301_v0 = vpop.permute.xlu0 %2311  ;;  %v1089_v5 = vrot.slane %v1087_v13, 4  ;;  %2227 = vrot.lane.b32.xlu0 %v3846_v26, %s4314_s20  ;;  %v2971_v35 = vsel %vm2965_vm12, %v2938_v24, %v5204_v32  ;;  %v1117_v7 = vor.u32 %v1116_v4, %v1113_v53  ;;  %v1120_v58 = vshll.u32 %v5272_v50, 16  ;;  %v3703_v32 = vld [vmem:[%s4354_s17 + $0x90] sm:$0xe]  ;;  %v4286_v24 = vld [vmem:[%s4354_s17 + $0x3c] sm:$0xf] }
  0xe3   : > { %v5299_v42 = vpop.permute.xlu1 %2313  ;;  %v1092_v10 = vrot.slane %v1090_v63, 5  ;;  %2229 = vrot.lane.b32.xlu1 %v3847_v20, %s4314_s20  ;;  %v1126_v25 = vrot.slane %v1124_v33, 4  ;;  %v1130_v15 = vshll.u32 %v5297_v61, 16  ;;  %v1096_v28 = vshll.u32 %v5288_v56, 16  ;;  %v4287_v33 = vld [vmem:[%s4354_s17 + $0x40] sm:$0xf] }
  0xe4   : > { %v1102_v2 = vrot.slane %v1100_v46, 4  ;;  %v1118_v11 = vrot.slane %v1117_v7, 4  ;;  %v1122_v55 = vrot.slane %v1120_v58, 5  ;;  %v1106_v18 = vshll.u32 %v5308_v6, 16  ;;  %v3746_v53 = vld [vmem:[%s4354_s17 + $0x9c] sm:$0xf] }
  0xe5   : > { %v1093_v40 = vor.u32 %v1092_v10, %v1089_v5  ;;  %v2973_v44 = vsel %vm2965_vm12, %v2940_v22, %v5199_v3  ;;  %v1132_v54 = vrot.slane %v1130_v15, 5  ;;  %v1098_v38 = vrot.slane %v1096_v28, 5  ;;  %v5353_v4 = vld [vmem:[%s4354_s17 + $0xa0] sm:$0xf]  ;;  %v3744_v46 = vld [vmem:[%s4354_s17 + $0x90] sm:$0xf] }
  0xe6   : > { %v3004_v41 = vsel %vm2998_vm14, %v2971_v35, %v5219_v30  ;;  %2323 = vrot.lane.b32.xlu0 %v3862_v59, %s4312_s18  ;;  %v1123_v37 = vsel %vm4422_vm5, %v1118_v11, %v1122_v55  ;;  %v1127_v14 = vor.u32 %v1126_v25, %v1122_v55  ;;  %v3808_v48 = vcombine.low %v4284_v1, %v4285_v60  ;;  %v5365_v59 = vld [vmem:[%s4354_s17 + $0x94] sm:$0xf] }
  0xe7   : > { %v5319_v9 = vpop.permute.xlu1 %2393  ;;  %v1094_v29 = vrot.slane %v1093_v40, 4  ;;  %4166 = vmatprep.mubr.msk.bf16.mxu0 %vm3067_vm15, %v3004_v41  ;;  %2325 = vrot.lane.b32.xlu1 %v3863_v16, %s4312_s18  ;;  %v1103_v3 = vor.u32 %v1102_v2, %v1098_v38  ;;  %v1108_v30 = vrot.slane %v1106_v18, 5  ;;  %v3719_v12 = vrot.slane %v3703_v32, 9  ;;  %v5381_v40 = vld [vmem:[%s4354_s17 + $0xa4] sm:$0x1] }
  0xe8   : > { %v1373_v21 = vrot.slane %v5272_v50, 5  ;;  %v1128_v52 = vrot.slane %v1127_v14, 4  ;;  %v1376_v39 = vrot.slane %v5297_v61, 5  ;;  %v3718_v27 = vrot.slane %v3702_v62, 9 }
  0xe9   : > { %v5332_v49 = vpop.permute.xlu0 %2391  ;;  %v1099_v51 = vsel %vm4422_vm5, %v1094_v29, %v1098_v38  ;;  %v1104_v20 = vrot.slane %v1103_v3, 4  ;;  %v1366_v50 = vrot.slane %v5288_v56, 5  ;;  %v1369_v57 = vrot.slane %v5308_v6, 5  ;;  %v5387_v38 = vld [vmem:[%s4354_s17 + $0x98] sm:$0x1] }
  0xea   : > { %v1374_v22 = vsel %vm4378_vm2, %v3719_v12, %v1373_v21  ;;  %v1375_v31 = vrot.slane %v1373_v21, 4  ;;  %v1133_v47 = vsel %vm4422_vm5, %v1128_v52, %v1132_v54  ;;  %v3809_v13 = vcombine.low %v4286_v24, %v4287_v33  ;;  %v207_v52 = vld [vmem:[%s4354_s17 + $0x90] sm:$0xf]  ;;  %v5411_v33 = vld [vmem:[%s4354_s17 + $0x98] sm:$0x1] }
  0xeb   : > { %v5339_v23 = vpop.permute.xlu1 %2473  ;;  %v3006_v26 = vsel %vm2998_vm14, %v2973_v44, %v5245_v43  ;;  %v3879_v61 = vcombine.low %v1123_v37, %v1133_v47  ;;  %v1109_v56 = vsel %vm4422_vm5, %v1104_v20, %v1108_v30  ;;  %v2766_v16 = vsel %vm2751_vm6, %v3808_v48, %v5227_v45 }
  0xec   : > { %v1377_v5 = vsel %vm4378_vm2, %v1375_v31, %v1376_v39  ;;  %4167 = vmatmul.mubr.msk.bf16.gmra.mrb[4].mxu0 %vm3067_vm15, %v3006_v26  ;;  %v3878_v43 = vcombine.low %v1099_v51, %v1109_v56  ;;  %v1367_v10 = vsel %vm4378_vm2, %v3718_v27, %v1366_v50  ;;  %v1368_v35 = vrot.slane %v1366_v50, 4  ;;  %v5406_v31 = vld [vmem:[%s4354_s17 + $0x94] sm:$0xf] }
  0xed   : > { %v5355_v63 = vpop.permute.xlu0 %2471  ;;  %v3895_v6 = vcombine.low %v1374_v22, %v1377_v5  ;;  %2405 = vrot.lane.b32.xlu1 %v3879_v61, %s4316_s22  ;;  %v2769_v45 = vsel %vm2751_vm6, %v3809_v13, %v5250_v34  ;;  %v1720_v58 = vshrl.u32 %v3746_v53, 16  ;;  %v1723_v25 = vshll.u32 %v3746_v53, 16  ;;  %v3782_v5 = vld [vmem:[%s4354_s17 + $0x90] sm:$0xe] }
  0xee   : > { %v1733_v15 = vshrl.u32 %v5353_v4, 16  ;;  %2403 = vrot.lane.b32.xlu0 %v3878_v43, %s4316_s22  ;;  %v1370_v28 = vsel %vm4378_vm2, %v1368_v35, %v1369_v57  ;;  %v1696_v2 = vshrl.u32 %v3744_v46, 16  ;;  %v1699_v11 = vshll.u32 %v3744_v46, 16 }
  0xef   : > { %v5370_v7 = vpop.permute.xlu1 %2569  ;;  %v1709_v55 = vshrl.u32 %v5365_v59, 16  ;;  %v3894_v32 = vcombine.low %v1367_v10, %v1370_v28  ;;  %v1722_v44 = vrot.slane %v1720_v58, 4  ;;  %v1725_v34 = vrot.slane %v1723_v25, 5 }
  0xf0   : > { %v3911_v54 = vcombine.low %v3746_v53, %v5353_v4  ;;  %v1698_v41 = vrot.slane %v1696_v2, 4  ;;  %v1701_v62 = vrot.slane %v1699_v11, 5  ;;  %v3910_v37 = vcombine.low %v3744_v46, %v5365_v59 }
  0xf1   : > { %v5383_v18 = vpop.permute.xlu0 %2567  ;;  %v2812_v14 = vsel %vm2800_vm7, %v2769_v45, %v5275_v8  ;;  %2485 = vrot.lane.b32.xlu1 %v3895_v6, %s4313_s19  ;;  %v1726_v29 = vor.u32 %v1725_v34, %v1722_v44  ;;  %v1729_v1 = vshll.u32 %v5353_v4, 16  ;;  %v1735_v60 = vrot.slane %v1733_v15, 4 }
  0xf2   : > { %v1739_v48 = vshll.u32 %v5381_v40, 16  ;;  %2483 = vrot.lane.b32.xlu0 %v3894_v32, %s4313_s19  ;;  %v1702_v30 = vor.u32 %v1701_v62, %v1698_v41  ;;  %v1705_v12 = vshll.u32 %v5365_v59, 16  ;;  %v1711_v21 = vrot.slane %v1709_v55, 4  ;;  %v209_v41 = vld [vmem:[%s4354_s17 + $0x9c] sm:$0xf] }
  0xf3   : > { %v1715_v8 = vshll.u32 %v5387_v38, 16  ;;  %v2810_v39 = vsel %vm2800_vm7, %v2766_v16, %v5265_v36  ;;  %v1727_v27 = vrot.slane %v1726_v29, 4  ;;  %v1731_v20 = vrot.slane %v1729_v1, 5  ;;  %v210_v62 = vld [vmem:[%s4354_s17 + $0xa0] sm:$0xf] }
  0xf4   : > { %v5395_v3 = vpop.permute.xlu1 %2649  ;;  %v1741_v22 = vrot.slane %v1739_v48, 5  ;;  %v1703_v50 = vrot.slane %v1702_v30, 4  ;;  %v1707_v47 = vrot.slane %v1705_v12, 5  ;;  %v2845_v24 = vsel %vm2833_vm8, %v2812_v14, %v5299_v42 }
  0xf5   : > { %v5401_v51 = vpop.permute.xlu0 %2647  ;;  %v1717_v57 = vrot.slane %v1715_v8, 5  ;;  %2581 = vrot.lane.b32.xlu1 %v3911_v54, %s4317_s25  ;;  %v1736_v13 = vor.u32 %v1735_v60, %v1731_v20  ;;  %v2843_v36 = vsel %vm2833_vm8, %v2810_v39, %v5301_v0  ;;  %v523_v26 = vshrl.u32 %v207_v52, 16  ;;  %v5439_v60 = vld [vmem:[%s4354_s17 + $0xa4] sm:$0x1] }
  0xf6   : > { %v526_v53 = vshll.u32 %v207_v52, 16  ;;  %2579 = vrot.lane.b32.xlu0 %v3910_v37, %s4317_s25  ;;  %v1732_v61 = vsel %vm4422_vm5, %v1727_v27, %v1731_v20  ;;  %v1712_v56 = vor.u32 %v1711_v21, %v1707_v47  ;;  %v532_v16 = vshll.u32 %v5406_v31, 16 }
  0xf7   : > { %v536_v42 = vshrl.u32 %v5406_v31, 16  ;;  %v1737_v43 = vrot.slane %v1736_v13, 4  ;;  %v525_v6 = vrot.slane %v523_v26, 4  ;;  %v542_v0 = vshll.u32 %v5411_v33, 16 }
  0xf8   : > { %v528_v10 = vrot.slane %v526_v53, 5  ;;  %v1708_v45 = vsel %vm4422_vm5, %v1703_v50, %v1707_v47  ;;  %v1713_v58 = vrot.slane %v1712_v56, 4  ;;  %v534_v25 = vrot.slane %v532_v16, 5  ;;  %v3783_v47 = vld [vmem:[%s4354_s17 + $0x9c] sm:$0xe] }
  0xf9   : > { %v5422_v46 = vpop.permute.xlu0 %2727  ;;  %v538_v15 = vrot.slane %v536_v42, 4  ;;  %v1742_v28 = vsel %vm4422_vm5, %v1737_v43, %v1741_v22  ;;  %v544_v11 = vrot.slane %v542_v0, 5  ;;  %v3798_v55 = vrot.slane %v3782_v5, 9  ;;  %v631_v53 = vld [vmem:[%s4354_s17 + $0x9c] sm:$0xe] }
  0xfa   : > { %v5425_v35 = vpop.permute.xlu1 %2139  ;;  %v529_v2 = vor.u32 %v528_v10, %v525_v6  ;;  %v3927_v32 = vcombine.low %v1732_v61, %v1742_v28  ;;  %v1718_v44 = vsel %vm4422_vm5, %v1713_v58, %v1717_v57  ;;  %v1975_v54 = vrot.slane %v5365_v59, 5 }
  0xfb   : > { %v539_v34 = vor.u32 %v538_v15, %v534_v25  ;;  %v3926_v37 = vcombine.low %v1708_v45, %v1718_v44  ;;  %v774_v29 = vrot.slane %v5411_v33, 5  ;;  %v1978_v1 = vrot.slane %v5387_v38, 5  ;;  %v630_v45 = vld [vmem:[%s4354_s17 + $0x90] sm:$0xe] }
  0xfc   : > { %v530_v14 = vrot.slane %v529_v2, 4  ;;  %2661 = vrot.lane.b32.xlu1 %v3927_v32, %s4318_s26  ;;  %v1976_v30 = vsel %vm4378_vm2, %v3798_v55, %v1975_v54  ;;  %v1977_v12 = vrot.slane %v1975_v54, 4  ;;  %v2878_v59 = vsel %vm2866_vm9, %v2845_v24, %v5319_v9 }
  0xfd   : > { %v540_v48 = vrot.slane %v539_v34, 4  ;;  %2659 = vrot.lane.b32.xlu0 %v3926_v37, %s4318_s26  ;;  %v547_v8 = vshrl.u32 %v209_v41, 16  ;;  %v550_v52 = vshll.u32 %v209_v41, 16  ;;  %v556_v39 = vshll.u32 %v210_v62, 16  ;;  %v5480_v34 = vld [vmem:[%s4354_s17 + $0xa8] sm:$0xf] }
  0xfe   : > { %v535_v38 = vsel %vm4422_vm5, %v530_v14, %v534_v25  ;;  %v1979_v22 = vsel %vm4378_vm2, %v1977_v12, %v1978_v1  ;;  %v560_v9 = vshrl.u32 %v210_v62, 16  ;;  %v566_v50 = vshll.u32 %v5439_v60, 16  ;;  %v5489_v37 = vld [vmem:[%s4354_s17 + $0xac] sm:$0xf] }
  0xff   : > { %v5446_v21 = vpop.permute.xlu0 %2729  ;;  %v545_v20 = vsel %vm4422_vm5, %v540_v48, %v544_v11  ;;  %v3942_v24 = vcombine.low %v1976_v30, %v1979_v22  ;;  %v549_v13 = vrot.slane %v547_v8, 4  ;;  %v552_v26 = vrot.slane %v550_v52, 5  ;;  %v3668_v30 = vld [vmem:[%s4354_s17 + $0x9c] sm:$0xf]  ;;  %v5506_v52 = vld [vmem:[%s4354_s17 + $0xa0] sm:$0xf] }
 0x100   : > { %v5451_v27 = vpop.permute.xlu1 %2141  ;;  %v3832_v57 = vcombine.low %v535_v38, %v545_v20  ;;  %v2876_v61 = vsel %vm2866_vm9, %v2843_v36, %v5332_v49  ;;  %v558_v56 = vrot.slane %v556_v39, 5  ;;  %v562_v16 = vrot.slane %v560_v9, 4 }
 0x101   : > { %v568_v42 = vrot.slane %v566_v50, 5  ;;  %2739 = vrot.lane.b32.xlu0 %v3942_v24, %s4319_s4  ;;  %v553_v43 = vor.u32 %v552_v26, %v549_v13  ;;  %v3799_v6 = vrot.slane %v3783_v47, 9  ;;  %v1982_v10 = vrot.slane %v5353_v4, 5  ;;  %v5519_v24 = vld [vmem:[%s4354_s17 + $0xb0] sm:$0x1] }
 0x102   : > { %2151 = vrot.lane.b32.xlu1 %v3832_v57, %s4315_s21  ;;  %v1985_v0 = vrot.slane %v5381_v40, 5  ;;  %v563_v49 = vor.u32 %v562_v16, %v558_v56  ;;  %v781_v36 = vrot.slane %v5439_v60, 5  ;;  %v2911_v25 = vsel %vm2899_vm10, %v2878_v59, %v5339_v23 }
 0x103   : > { %v5462_v5 = vpop.permute.xlu0 %2219  ;;  %v3641_v15 = vrot.slane %v631_v53, 9  ;;  %v554_v28 = vrot.slane %v553_v43, 4  ;;  %v1983_v2 = vsel %vm4378_vm2, %v3799_v6, %v1982_v10  ;;  %v1984_v11 = vrot.slane %v1982_v10, 4  ;;  %v5527_v53 = vld [vmem:[%s4354_s17 + $0xa4] sm:$0x1] }
 0x104   : > { %v5469_v58 = vpop.permute.xlu1 %2221  ;;  %v778_v4 = vrot.slane %v210_v62, 5  ;;  %v564_v55 = vrot.slane %v563_v49, 4  ;;  %v2909_v40 = vsel %vm2899_vm10, %v2876_v61, %v5355_v63  ;;  %v3640_v32 = vrot.slane %v630_v45, 9 }
 0x105   : > { %v771_v44 = vrot.slane %v5406_v31, 5  ;;  %v559_v23 = vsel %vm4422_vm5, %v554_v28, %v558_v56  ;;  %v1986_v54 = vsel %vm4378_vm2, %v1984_v11, %v1985_v0  ;;  %v2944_v38 = vsel %vm2932_vm11, %v2911_v25, %v5370_v7 }
 0x106   : > { %v779_v41 = vsel %vm4378_vm2, %v3641_v15, %v778_v4  ;;  %v780_v62 = vrot.slane %v778_v4, 4  ;;  %v569_v31 = vsel %vm4422_vm5, %v564_v55, %v568_v42  ;;  %v3943_v1 = vcombine.low %v1983_v2, %v1986_v54  ;;  %v3705_v15 = vld [vmem:[%s4354_s17 + $0xa8] sm:$0xe] }
 0x107   : > { %v5493_v63 = vpop.permute.xlu0 %2315  ;;  %v772_v60 = vsel %vm4378_vm2, %v3640_v32, %v771_v44  ;;  %v773_v48 = vrot.slane %v771_v44, 4  ;;  %v3833_v12 = vcombine.low %v559_v23, %v569_v31  ;;  %v1159_v8 = vshrl.u32 %v5480_v34, 16  ;;  %v4288_v44 = vld [vmem:[%s4354_s17 + $0x48] sm:$0xf] }
 0x108   : > { %v5491_v14 = vpop.permute.xlu1 %2317  ;;  %v782_v59 = vsel %vm4378_vm2, %v780_v62, %v781_v36  ;;  %2741 = vrot.lane.b32.xlu0 %v3943_v1, %s4319_s4  ;;  %v2942_v20 = vsel %vm2932_vm11, %v2909_v40, %v5383_v18  ;;  %v1162_v22 = vshll.u32 %v5480_v34, 16  ;;  %v1172_v9 = vshrl.u32 %v5489_v37, 16 }
 0x109   : > { %v775_v39 = vsel %vm4378_vm2, %v773_v48, %v774_v29  ;;  %2153 = vrot.lane.b32.xlu1 %v3833_v12, %s4315_s21  ;;  %v3849_v7 = vcombine.low %v779_v41, %v782_v59  ;;  %v1161_v47 = vrot.slane %v1159_v8, 4  ;;  %v1135_v57 = vshrl.u32 %v3668_v30, 16  ;;  %v3704_v41 = vld [vmem:[%s4354_s17 + $0x9c] sm:$0xe] }
 0x10a   : > { %v3848_v50 = vcombine.low %v772_v60, %v775_v39  ;;  %v1164_v13 = vrot.slane %v1162_v22, 5  ;;  %v3865_v29 = vcombine.low %v5480_v34, %v5489_v37  ;;  %v1138_v26 = vshll.u32 %v3668_v30, 16  ;;  %v4289_v34 = vld [vmem:[%s4354_s17 + $0x4c] sm:$0xf] }
 0x10b   : > { %v1148_v18 = vshrl.u32 %v5506_v52, 16  ;;  %v1137_v61 = vrot.slane %v1135_v57, 4  ;;  %v3864_v56 = vcombine.low %v3668_v30, %v5506_v52  ;;  %v2977_v16 = vsel %vm2965_vm12, %v2944_v38, %v5395_v3 }
 0x10c   : > { %v5521_v33 = vpop.permute.xlu1 %2397  ;;  %v1168_v42 = vshll.u32 %v5489_v37, 16  ;;  %2231 = vrot.lane.b32.xlu0 %v3848_v50, %s4314_s20  ;;  %v1140_v6 = vrot.slane %v1138_v26, 5  ;;  %v1165_v10 = vor.u32 %v1164_v13, %v1161_v47  ;;  %v1174_v0 = vrot.slane %v1172_v9, 4  ;;  %v4290_v13 = vld [vmem:[%s4354_s17 + $0x54] sm:$0xf] }
 0x10d   : > { %v1178_v45 = vshll.u32 %v5519_v24, 16  ;;  %2233 = vrot.lane.b32.xlu1 %v3849_v7, %s4314_s20  ;;  %v1144_v36 = vshll.u32 %v5506_v52, 16  ;;  %v1150_v3 = vrot.slane %v1148_v18, 4  ;;  %v1154_v25 = vshll.u32 %v5527_v53, 16  ;;  %v5579_v18 = vld [vmem:[%s4354_s17 + $0xb8] sm:$0xf] }
 0x10e   : > { %v5533_v43 = vpop.permute.xlu0 %2395  ;;  %v1170_v49 = vrot.slane %v1168_v42, 5  ;;  %v2975_v2 = vsel %vm2965_vm12, %v2942_v20, %v5401_v51  ;;  %v1166_v11 = vrot.slane %v1165_v10, 4  ;;  %v1141_v55 = vor.u32 %v1140_v6, %v1137_v61  ;;  %v5564_v20 = vld [vmem:[%s4354_s17 + $0xb4] sm:$0xf]  ;;  %v3748_v6 = vld [vmem:[%s4354_s17 + $0xa8] sm:$0xf] }
 0x10f   : > { %v1180_v4 = vrot.slane %v1178_v45, 5  ;;  %v1146_v32 = vrot.slane %v1144_v36, 5  ;;  %v3810_v23 = vcombine.low %v4288_v44, %v4289_v34  ;;  %v3008_v54 = vsel %vm2998_vm14, %v2975_v2, %v5422_v46  ;;  %v5590_v10 = vld [vmem:[%s4354_s17 + $0xac] sm:$0xf]  ;;  %v5615_v34 = vld [vmem:[%s4354_s17 + $0xb0] sm:$0x1] }
 0x110   : > { %v5541_v28 = vpop.permute.xlu1 %2477  ;;  %v1175_v40 = vor.u32 %v1174_v0, %v1170_v49  ;;  %2327 = vrot.lane.b32.xlu0 %v3864_v56, %s4312_s18  ;;  %v1171_v51 = vsel %vm4422_vm5, %v1166_v11, %v1170_v49  ;;  %v1142_v31 = vrot.slane %v1141_v55, 4  ;;  %v1156_v1 = vrot.slane %v1154_v25, 5  ;;  %4170 = vmatprep.mubr.msk.bf16.mxu0 %vm3067_vm15, %v3008_v54 }
 0x111   : > { %v3721_v60 = vrot.slane %v3705_v15, 9  ;;  %2329 = vrot.lane.b32.xlu1 %v3865_v29, %s4312_s18  ;;  %v1151_v30 = vor.u32 %v1150_v3, %v1146_v32  ;;  %v1387_v46 = vrot.slane %v5489_v37, 5  ;;  %v1390_v12 = vrot.slane %v5519_v24, 5  ;;  %v4291_v29 = vld [vmem:[%s4354_s17 + $0x58] sm:$0xf] }
 0x112   : > { %v5550_v62 = vpop.permute.xlu0 %2475  ;;  %v1176_v48 = vrot.slane %v1175_v40, 4  ;;  %v1147_v59 = vsel %vm4422_vm5, %v1142_v31, %v1146_v32  ;;  %v3720_v38 = vrot.slane %v3704_v41, 9  ;;  %v1380_v8 = vrot.slane %v5506_v52, 5 }
 0x113   : > { %v1383_v39 = vrot.slane %v5527_v53, 5  ;;  %v1152_v9 = vrot.slane %v1151_v30, 4  ;;  %v1388_v37 = vsel %vm4378_vm2, %v3721_v60, %v1387_v46  ;;  %v1389_v7 = vrot.slane %v1387_v46, 4 }
 0x114   : > { %v1181_v22 = vsel %vm4422_vm5, %v1176_v48, %v1180_v4  ;;  %v5570_v50 = vpop.permute.xlu1 %2573  ;;  %v1381_v52 = vsel %vm4378_vm2, %v3720_v38, %v1380_v8  ;;  %v1382_v24 = vrot.slane %v1380_v8, 4  ;;  %v3811_v26 = vcombine.low %v4290_v13, %v4291_v29  ;;  %v5605_v4 = vld [vmem:[%s4354_s17 + $0xbc] sm:$0x1]  ;;  %v5631_v8 = vld [vmem:[%s4354_s17 + $0xac] sm:$0xf] }
 0x115   : > { %v3881_v57 = vcombine.low %v1171_v51, %v1181_v22  ;;  %v1157_v53 = vsel %vm4422_vm5, %v1152_v9, %v1156_v1  ;;  %v1391_v61 = vsel %vm4378_vm2, %v1389_v7, %v1390_v12  ;;  %v3010_v56 = vsel %vm2998_vm14, %v2977_v16, %v5446_v21 }
 0x116   : > { %v5572_v47 = vpop.permute.xlu0 %2571  ;;  %v1768_v42 = vshrl.u32 %v5564_v20, 16  ;;  %v3880_v0 = vcombine.low %v1147_v59, %v1157_v53  ;;  %v2772_v45 = vsel %vm2751_vm6, %v3810_v23, %v5425_v35  ;;  %v3897_v49 = vcombine.low %v1388_v37, %v1391_v61  ;;  %4171 = vmatmul.mubr.msk.bf16.gmra.mrb[8].mxu0 %vm3067_vm15, %v3010_v56 }
 0x117   : > { %2409 = vrot.lane.b32.xlu1 %v3881_v57, %s4316_s22  ;;  %v1384_v36 = vsel %vm4378_vm2, %v1382_v24, %v1383_v39  ;;  %v2775_v3 = vsel %vm2751_vm6, %v3811_v26, %v5451_v27  ;;  %v1771_v16 = vshll.u32 %v5564_v20, 16  ;;  %v1781_v25 = vshrl.u32 %v5579_v18, 16 }
 0x118   : > { %v1770_v21 = vrot.slane %v1768_v42, 4  ;;  %2407 = vrot.lane.b32.xlu0 %v3880_v0, %s4316_s22  ;;  %v3896_v15 = vcombine.low %v1381_v52, %v1384_v36  ;;  %v1744_v2 = vshrl.u32 %v3748_v6, 16  ;;  %v1747_v35 = vshll.u32 %v3748_v6, 16  ;;  %v5637_v52 = vld [vmem:[%s4354_s17 + $0xb0] sm:$0x1] }
 0x119   : > { %v1757_v11 = vshrl.u32 %v5590_v10, 16  ;;  %v1773_v27 = vrot.slane %v1771_v16, 5  ;;  %v3913_v40 = vcombine.low %v5564_v20, %v5579_v18  ;;  %v3912_v32 = vcombine.low %v3748_v6, %v5590_v10  ;;  %v5617_v23 = vpop.permute.xlu1 %2653 }
 0x11a   : > { %v5607_v55 = vpop.permute.xlu0 %2651  ;;  %v2816_v44 = vsel %vm2800_vm7, %v2775_v3, %v5469_v58  ;;  %v1746_v54 = vrot.slane %v1744_v2, 4  ;;  %v1749_v41 = vrot.slane %v1747_v35, 5  ;;  %v1777_v51 = vshll.u32 %v5579_v18, 16  ;;  %v5624_v58 = vld [vmem:[%s4354_s17 + $0xa8] sm:$0xf] }
 0x11b   : > { %2489 = vrot.lane.b32.xlu1 %v3897_v49, %s4313_s19  ;;  %v1783_v31 = vrot.slane %v1781_v25, 4  ;;  %v1774_v1 = vor.u32 %v1773_v27, %v1770_v21  ;;  %v1787_v60 = vshll.u32 %v5605_v4, 16  ;;  %v1753_v48 = vshll.u32 %v5590_v10, 16 }
 0x11c   : > { %v1759_v30 = vrot.slane %v1757_v11, 4  ;;  %2487 = vrot.lane.b32.xlu0 %v3896_v15, %s4313_s19  ;;  %v2814_v46 = vsel %vm2800_vm7, %v2772_v45, %v5462_v5  ;;  %v1779_v12 = vrot.slane %v1777_v51, 5  ;;  %v1750_v59 = vor.u32 %v1749_v41, %v1746_v54 }
 0x11d   : > { %v1763_v38 = vshll.u32 %v5615_v34, 16  ;;  %v1775_v39 = vrot.slane %v1774_v1, 4  ;;  %v1789_v20 = vrot.slane %v1787_v60, 5  ;;  %v1755_v22 = vrot.slane %v1753_v48, 5 }
 0x11e   : > { %v2849_v9 = vsel %vm2833_vm8, %v2816_v44, %v5491_v14  ;;  %v1784_v37 = vor.u32 %v1783_v31, %v1779_v12  ;;  %v1751_v7 = vrot.slane %v1750_v59, 4  ;;  %v571_v5 = vshrl.u32 %v5624_v58, 16  ;;  %v3784_v14 = vld [vmem:[%s4354_s17 + $0xa8] sm:$0xe]  ;;  %v5668_v31 = vld [vmem:[%s4354_s17 + $0xbc] sm:$0x1] }
 0x11f   : > { %2585 = vrot.lane.b32.xlu1 %v3913_v40, %s4317_s25  ;;  %v1765_v57 = vrot.slane %v1763_v38, 5  ;;  %v1780_v13 = vsel %vm4422_vm5, %v1775_v39, %v1779_v12  ;;  %v1760_v29 = vor.u32 %v1759_v30, %v1755_v22  ;;  %v574_v26 = vshll.u32 %v5624_v58, 16  ;;  %v5647_v61 = vpop.permute.xlu1 %2143  ;;  %v5662_v40 = vld [vmem:[%s4354_s17 + $0xb4] sm:$0xf] }
 0x120   : > { %v5640_v24 = vpop.permute.xlu0 %2731  ;;  %v580_v53 = vshll.u32 %v5631_v8, 16  ;;  %2583 = vrot.lane.b32.xlu0 %v3912_v32, %s4317_s25  ;;  %v1785_v56 = vrot.slane %v1784_v37, 4  ;;  %v1756_v42 = vsel %vm4422_vm5, %v1751_v7, %v1755_v22  ;;  %v573_v6 = vrot.slane %v571_v5, 4  ;;  %v5665_v32 = vld [vmem:[%s4354_s17 + $0xb8] sm:$0xf] }
 0x121   : > { %v584_v0 = vshrl.u32 %v5631_v8, 16  ;;  %v1761_v45 = vrot.slane %v1760_v29, 4  ;;  %v576_v49 = vrot.slane %v574_v26, 5  ;;  %v590_v3 = vshll.u32 %v5637_v52, 16  ;;  %v3785_v22 = vld [vmem:[%s4354_s17 + $0xb4] sm:$0xe] }
 0x122   : > { %v582_v36 = vrot.slane %v580_v53, 5  ;;  %v1790_v21 = vsel %vm4422_vm5, %v1785_v56, %v1789_v20  ;;  %v3800_v25 = vrot.slane %v3784_v14, 9  ;;  %v1989_v15 = vrot.slane %v5590_v10, 5  ;;  %v633_v5 = vld [vmem:[%s4354_s17 + $0xb4] sm:$0xe] }
 0x123   : > { %v586_v16 = vrot.slane %v584_v0, 4  ;;  %v3929_v2 = vcombine.low %v1780_v13, %v1790_v21  ;;  %v1766_v35 = vsel %vm4422_vm5, %v1761_v45, %v1765_v57  ;;  %v2847_v11 = vsel %vm2833_vm8, %v2814_v46, %v5493_v63  ;;  %v632_v45 = vld [vmem:[%s4354_s17 + $0xa8] sm:$0xe] }
 0x124   : > { %v577_v27 = vor.u32 %v576_v49, %v573_v6  ;;  %v3928_v44 = vcombine.low %v1756_v42, %v1766_v35  ;;  %v592_v41 = vrot.slane %v590_v3, 5  ;;  %v1991_v51 = vrot.slane %v1989_v15, 4 }
 0x125   : > { %v587_v54 = vor.u32 %v586_v16, %v582_v36  ;;  %v5670_v1 = vpop.permute.xlu0 %2733  ;;  %2665 = vrot.lane.b32.xlu1 %v3929_v2, %s4318_s26  ;;  %v1990_v63 = vsel %vm4378_vm2, %v3800_v25, %v1989_v15  ;;  %v1992_v60 = vrot.slane %v5615_v34, 5  ;;  %v2882_v48 = vsel %vm2866_vm9, %v2849_v9, %v5521_v33 }
 0x126   : > { %v578_v10 = vrot.slane %v577_v27, 4  ;;  %2663 = vrot.lane.b32.xlu0 %v3928_v44, %s4318_s26  ;;  %v595_v12 = vshrl.u32 %v5662_v40, 16  ;;  %v598_v59 = vshll.u32 %v5662_v40, 16  ;;  %v604_v38 = vshll.u32 %v5665_v32, 16 }
 0x127   : > { %v588_v46 = vrot.slane %v587_v54, 4  ;;  %v1993_v34 = vsel %vm4378_vm2, %v1991_v51, %v1992_v60  ;;  %v608_v33 = vshrl.u32 %v5665_v32, 16  ;;  %v614_v20 = vshll.u32 %v5668_v31, 16  ;;  %v5726_v60 = vld [vmem:[%s4354_s17 + $0xc4] sm:$0xf] }
 0x128   : > { %v5678_v30 = vpop.permute.xlu1 %2145  ;;  %v583_v39 = vsel %vm4422_vm5, %v578_v10, %v582_v36  ;;  %v3944_v37 = vcombine.low %v1990_v63, %v1993_v34  ;;  %v597_v7 = vrot.slane %v595_v12, 4  ;;  %v600_v57 = vrot.slane %v598_v59, 5 }
 0x129   : > { %v593_v9 = vsel %vm4422_vm5, %v588_v46, %v592_v41  ;;  %v2880_v29 = vsel %vm2866_vm9, %v2847_v11, %v5533_v43  ;;  %v606_v26 = vrot.slane %v604_v38, 5  ;;  %v610_v53 = vrot.slane %v608_v33, 4  ;;  %v5719_v41 = vld [vmem:[%s4354_s17 + $0xc0] sm:$0xf] }
 0x12a   : > { %v3834_v13 = vcombine.low %v583_v39, %v593_v9  ;;  %2743 = vrot.lane.b32.xlu0 %v3944_v37, %s4319_s4  ;;  %v601_v56 = vor.u32 %v600_v57, %v597_v7  ;;  %v3801_v42 = vrot.slane %v3785_v22, 9  ;;  %v1996_v6 = vrot.slane %v5579_v18, 5  ;;  %v5702_v49 = vpop.permute.xlu0 %2223  ;;  %v5744_v9 = vld [vmem:[%s4354_s17 + $0xb8] sm:$0xf] }
 0x12b   : > { %v1999_v0 = vrot.slane %v5605_v4, 5  ;;  %v611_v36 = vor.u32 %v610_v53, %v606_v26  ;;  %v616_v43 = vrot.slane %v614_v20, 5  ;;  %v2915_v3 = vsel %vm2899_vm10, %v2882_v48, %v5541_v28  ;;  %v3672_v48 = vld [vmem:[%s4354_s17 + $0xb4] sm:$0xf] }
 0x12c   : > { %v5696_v14 = vpop.permute.xlu1 %2225  ;;  %2155 = vrot.lane.b32.xlu1 %v3834_v13, %s4315_s21  ;;  %v3643_v21 = vrot.slane %v633_v5, 9  ;;  %v602_v16 = vrot.slane %v601_v56, 4  ;;  %v1997_v25 = vsel %vm4378_vm2, %v3801_v42, %v1996_v6  ;;  %v1998_v18 = vrot.slane %v1996_v6, 4 }
 0x12d   : > { %v792_v4 = vrot.slane %v5665_v32, 5  ;;  %v612_v15 = vrot.slane %v611_v36, 4  ;;  %v795_v2 = vrot.slane %v5668_v31, 5  ;;  %v3642_v35 = vrot.slane %v632_v45, 9 }
 0x12e   : > { %v785_v11 = vrot.slane %v5631_v8, 5  ;;  %v607_v27 = vsel %vm4422_vm5, %v602_v16, %v606_v26  ;;  %v2000_v28 = vsel %vm4378_vm2, %v1998_v18, %v1999_v0  ;;  %v2913_v31 = vsel %vm2899_vm10, %v2880_v29, %v5550_v62  ;;  %v5736_v34 = vpop.permute.xlu0 %2319  ;;  %v3691_v26 = vld [vmem:[%s4354_s17 + $0xc8] sm:$0x1]  ;;  %v5758_v0 = vld [vmem:[%s4354_s17 + $0xbc] sm:$0x1] }
 0x12f   : > { %v793_v44 = vsel %vm4378_vm2, %v3643_v21, %v792_v4  ;;  %v794_v54 = vrot.slane %v792_v4, 4  ;;  %v617_v51 = vsel %vm4422_vm5, %v612_v15, %v616_v43  ;;  %v3945_v10 = vcombine.low %v1997_v25, %v2000_v28 }
 0x130   : > { %v787_v63 = vrot.slane %v785_v11, 4  ;;  %v5729_v46 = vpop.permute.xlu1 %2321  ;;  %v3835_v12 = vcombine.low %v607_v27, %v617_v51  ;;  %v786_v38 = vsel %vm4378_vm2, %v3642_v35, %v785_v11  ;;  %v788_v39 = vrot.slane %v5637_v52, 5  ;;  %v3707_v11 = vld [vmem:[%s4354_s17 + $0xc0] sm:$0xe] }
 0x131   : > { %v796_v59 = vsel %vm4378_vm2, %v794_v54, %v795_v2  ;;  %2745 = vrot.lane.b32.xlu0 %v3945_v10, %s4319_s4  ;;  %v2948_v33 = vsel %vm2932_vm11, %v2915_v3, %v5570_v50  ;;  %v1207_v20 = vshrl.u32 %v5719_v41, 16  ;;  %v1210_v22 = vshll.u32 %v5719_v41, 16  ;;  %v3706_v54 = vld [vmem:[%s4354_s17 + $0xb4] sm:$0xe] }
 0x132   : > { %v3851_v62 = vcombine.low %v793_v44, %v796_v59  ;;  %2157 = vrot.lane.b32.xlu1 %v3835_v12, %s4315_s21  ;;  %v789_v52 = vsel %vm4378_vm2, %v787_v63, %v788_v39  ;;  %v2946_v37 = vsel %vm2932_vm11, %v2913_v31, %v5572_v47  ;;  %v1220_v7 = vshrl.u32 %v5726_v60, 16  ;;  %v4292_v31 = vld [vmem:[%s4354_s17 + $0x60] sm:$0xf]  ;;  %v4293_v63 = vld [vmem:[%s4354_s17 + $0x64] sm:$0xf] }
 0x133   : > { %v1183_v57 = vshrl.u32 %v3672_v48, 16  ;;  %v3850_v5 = vcombine.low %v786_v38, %v789_v52  ;;  %v1209_v50 = vrot.slane %v1207_v20, 4  ;;  %v1212_v13 = vrot.slane %v1210_v22, 5 }
 0x134   : > { %v1186_v29 = vshll.u32 %v3672_v48, 16  ;;  %v3867_v53 = vcombine.low %v5719_v41, %v5726_v60  ;;  %v1196_v42 = vshrl.u32 %v5744_v9, 16  ;;  %v3866_v6 = vcombine.low %v3672_v48, %v5744_v9 }
 0x135   : > { %v1185_v56 = vrot.slane %v1183_v57, 4  ;;  %2235 = vrot.lane.b32.xlu0 %v3850_v5, %s4314_s20  ;;  %v2979_v45 = vsel %vm2965_vm12, %v2946_v37, %v5607_v55  ;;  %v1213_v36 = vor.u32 %v1212_v13, %v1209_v50  ;;  %v1216_v43 = vshll.u32 %v5726_v60, 16 }
 0x136   : > { %v1188_v47 = vrot.slane %v1186_v29, 5  ;;  %v5764_v3 = vpop.permute.xlu1 %2401  ;;  %2237 = vrot.lane.b32.xlu1 %v3851_v62, %s4314_s20  ;;  %v1222_v21 = vrot.slane %v1220_v7, 4  ;;  %v1226_v16 = vshll.u32 %v3691_v26, 16  ;;  %v1192_v25 = vshll.u32 %v5744_v9, 16  ;;  %v3754_v29 = vld [vmem:[%s4354_s17 + $0xcc] sm:$0xf] }
 0x137   : > { %v1198_v18 = vrot.slane %v1196_v42, 4  ;;  %v5768_v4 = vpop.permute.xlu0 %2399  ;;  %v1214_v15 = vrot.slane %v1213_v36, 4  ;;  %v1218_v2 = vrot.slane %v1216_v43, 5  ;;  %v1202_v35 = vshll.u32 %v5758_v0, 16  ;;  %v4294_v42 = vld [vmem:[%s4354_s17 + $0x6c] sm:$0xf] }
 0x138   : > { %v1189_v55 = vor.u32 %v1188_v47, %v1185_v56  ;;  %v2981_v27 = vsel %vm2965_vm12, %v2948_v33, %v5617_v23  ;;  %v1194_v28 = vrot.slane %v1192_v25, 5  ;;  %v3012_v44 = vsel %vm2998_vm14, %v2979_v45, %v5640_v24  ;;  %v3752_v45 = vld [vmem:[%s4354_s17 + $0xc0] sm:$0xf]  ;;  %v5811_v36 = vld [vmem:[%s4354_s17 + $0xc4] sm:$0xf] }
 0x139   : > { %2331 = vrot.lane.b32.xlu0 %v3866_v6, %s4312_s18  ;;  %v1223_v41 = vor.u32 %v1222_v21, %v1218_v2  ;;  %v1228_v51 = vrot.slane %v1226_v16, 5  ;;  %v3812_v48 = vcombine.low %v4292_v31, %v4293_v63  ;;  %4174 = vmatprep.mubr.msk.bf16.mxu0 %vm3067_vm15, %v3012_v44  ;;  %v1204_v59 = vrot.slane %v1202_v35, 5  ;;  %v4295_v6 = vld [vmem:[%s4354_s17 + $0x70] sm:$0xf] }
 0x13a   : > { %v1190_v10 = vrot.slane %v1189_v55, 4  ;;  %v5781_v12 = vpop.permute.xlu1 %2481  ;;  %2333 = vrot.lane.b32.xlu1 %v3867_v53, %s4312_s18  ;;  %v1199_v23 = vor.u32 %v1198_v18, %v1194_v28  ;;  %v3723_v38 = vrot.slane %v3707_v11, 9  ;;  %v1401_v24 = vrot.slane %v5726_v60, 5  ;;  %s181_s18 = scalar_lea.vmem %s5994_s3, %s3627_s15 }
 0x13b   : > { %v5785_v39 = vpop.permute.xlu0 %2479  ;;  %v1219_v62 = vsel %vm4422_vm5, %v1214_v15, %v1218_v2  ;;  %v1224_v33 = vrot.slane %v1223_v41, 4  ;;  %v1404_v20 = vrot.slane %v3691_v26, 5  ;;  %v3722_v22 = vrot.slane %v3706_v54, 9  ;;  %v5801_v26 = vld [vmem:[%s4354_s17 + $0xd0] sm:$0xf] }
 0x13c   : > { %v1195_v52 = vsel %vm4422_vm5, %v1190_v10, %v1194_v28  ;;  %v1200_v37 = vrot.slane %v1199_v23, 4  ;;  %v1403_v7 = vrot.slane %v1401_v24, 4  ;;  %v1394_v57 = vrot.slane %v5744_v9, 5  ;;  %v3771_v28 = vld [vmem:[%s4354_s17 + $0xd4] sm:$0x1] }
 0x13d   : > { %v1229_v60 = vsel %vm4422_vm5, %v1224_v33, %v1228_v51  ;;  %v1402_v5 = vsel %vm4378_vm2, %v3723_v38, %v1401_v24  ;;  %v1397_v50 = vrot.slane %v5758_v0, 5  ;;  %v3014_v13 = vsel %vm2998_vm14, %v2981_v27, %v5670_v1  ;;  %v3770_v10 = vld [vmem:[%s4354_s17 + $0xc8] sm:$0x1] }
 0x13e   : > { %v3883_v53 = vcombine.low %v1219_v62, %v1229_v60  ;;  %v1205_v56 = vsel %vm4422_vm5, %v1200_v37, %v1204_v59  ;;  %v1405_v9 = vsel %vm4378_vm2, %v1403_v7, %v1404_v20  ;;  %v3813_v47 = vcombine.low %v4294_v42, %v4295_v6  ;;  %4175 = vmatmul.mubr.msk.bf16.gmra.mrb[12].mxu0 %vm3067_vm15, %v3014_v13  ;;  %v5818_v16 = vpop.permute.xlu1 %2577  ;;  %v3786_v13 = vld [vmem:[%s4354_s17 + $0xc0] sm:$0xe] }
 0x13f   : > { %v3882_v0 = vcombine.low %v1195_v52, %v1205_v56  ;;  %v2778_v1 = vsel %vm2751_vm6, %v3812_v48, %v5647_v61  ;;  %v1395_v43 = vsel %vm4378_vm2, %v3722_v22, %v1394_v57  ;;  %v1396_v21 = vrot.slane %v1394_v57, 4  ;;  %v5820_v25 = vpop.permute.xlu0 %2575  ;;  %v3787_v52 = vld [vmem:[%s4354_s17 + $0xcc] sm:$0xe] }
 0x140   : > { %2413 = vrot.lane.b32.xlu1 %v3883_v53, %s4316_s22  ;;  %v3899_v18 = vcombine.low %v1402_v5, %v1405_v9  ;;  %v1816_v15 = vshrl.u32 %v3754_v29, 16  ;;  %v1819_v2 = vshll.u32 %v3754_v29, 16  ;;  %v1829_v55 = vshrl.u32 %v5801_v26, 16 }
 0x141   : > { %2411 = vrot.lane.b32.xlu0 %v3882_v0, %s4316_s22  ;;  %v1398_v61 = vsel %vm4378_vm2, %v1396_v21, %v1397_v50  ;;  %v1792_v35 = vshrl.u32 %v3752_v45, 16  ;;  %v1795_v11 = vshll.u32 %v3752_v45, 16  ;;  %v1805_v27 = vshrl.u32 %v5811_v36, 16 }
 0x142   : > { %v3898_v44 = vcombine.low %v1395_v43, %v1398_v61  ;;  %v2781_v54 = vsel %vm2751_vm6, %v3813_v47, %v5678_v30  ;;  %v1818_v41 = vrot.slane %v1816_v15, 4  ;;  %v1821_v51 = vrot.slane %v1819_v2, 5 }
 0x143   : > { %v3915_v31 = vcombine.low %v3754_v29, %v5801_v26  ;;  %v1794_v63 = vrot.slane %v1792_v35, 4  ;;  %v1797_v48 = vrot.slane %v1795_v11, 5  ;;  %v3914_v23 = vcombine.low %v3752_v45, %v5811_v36 }
 0x144   : > { %2493 = vrot.lane.b32.xlu1 %v3899_v18, %s4313_s19  ;;  %v1822_v59 = vor.u32 %v1821_v51, %v1818_v41  ;;  %v1825_v38 = vshll.u32 %v5801_v26, 16  ;;  %v1831_v24 = vrot.slane %v1829_v55, 4  ;;  %v1835_v62 = vshll.u32 %v3771_v28, 16  ;;  %v2658_v37 = vpop.permute.xlu1 %2657 }
 0x145   : > { %2491 = vrot.lane.b32.xlu0 %v3898_v44, %s4313_s19  ;;  %v1798_v30 = vor.u32 %v1797_v48, %v1794_v63  ;;  %v1801_v33 = vshll.u32 %v5811_v36, 16  ;;  %v1807_v20 = vrot.slane %v1805_v27, 4  ;;  %v1811_v22 = vshll.u32 %v3770_v10, 16  ;;  %v2656_v7 = vpop.permute.xlu0 %2655 }
 0x146   : > { %v2820_v57 = vsel %vm2800_vm7, %v2781_v54, %v5696_v14  ;;  %v2818_v60 = vsel %vm2800_vm7, %v2778_v1, %v5702_v49  ;;  %v1823_v5 = vrot.slane %v1822_v59, 4  ;;  %v1827_v50 = vrot.slane %v1825_v38, 5 }
 0x147   : > { %v1837_v29 = vrot.slane %v1835_v62, 5  ;;  %v1799_v53 = vrot.slane %v1798_v30, 4  ;;  %v1803_v56 = vrot.slane %v1801_v33, 5  ;;  %v2853_v9 = vsel %vm2833_vm8, %v2820_v57, %v5729_v46  ;;  %v4297_v57 = vld [vmem:[%s4354_s17 + $0x7c] sm:$0xf] }
 0x148   : > { %2589 = vrot.lane.b32.xlu1 %v3915_v31, %s4317_s25  ;;  %v1832_v42 = vor.u32 %v1831_v24, %v1827_v50  ;;  %v1813_v6 = vrot.slane %v1811_v22, 5  ;;  %v3803_v47 = vrot.slane %v3787_v52, 9  ;;  %v2010_v45 = vrot.slane %v5801_v26, 5 }
 0x149   : > { %2587 = vrot.lane.b32.xlu0 %v3914_v23, %s4317_s25  ;;  %v1808_v14 = vor.u32 %v1807_v20, %v1803_v56  ;;  %v2851_v49 = vsel %vm2833_vm8, %v2818_v60, %v5736_v34  ;;  %v2013_v0 = vrot.slane %v3771_v28, 5  ;;  %v3802_v1 = vrot.slane %v3786_v13, 9  ;;  %v2736_v15 = vpop.permute.xlu0 %2735 }
 0x14a   : > { %v1828_v43 = vsel %vm4422_vm5, %v1823_v5, %v1827_v50  ;;  %v1833_v21 = vrot.slane %v1832_v42, 4  ;;  %v2012_v46 = vrot.slane %v2010_v45, 4  ;;  %v2003_v18 = vrot.slane %v5811_v36, 5  ;;  %v4298_v42 = vld [vmem:[%s4354_s17 + $0x84] sm:$0xf] }
 0x14b   : > { %v1804_v2 = vsel %vm4422_vm5, %v1799_v53, %v1803_v56  ;;  %v1809_v26 = vrot.slane %v1808_v14, 4  ;;  %v2011_v55 = vsel %vm4378_vm2, %v3803_v47, %v2010_v45  ;;  %v2006_v61 = vrot.slane %v3770_v10, 5  ;;  %v2148_v35 = vpop.permute.xlu1 %2147 }
 0x14c   : > { %v1838_v34 = vsel %vm4422_vm5, %v1833_v21, %v1837_v29  ;;  %v2014_v11 = vsel %vm4378_vm2, %v2012_v46, %v2013_v0  ;;  %v2005_v27 = vrot.slane %v2003_v18, 4  ;;  %v2886_v36 = vsel %vm2866_vm9, %v2853_v9, %v5764_v3 }
 0x14d   : > { %v3931_v28 = vcombine.low %v1828_v43, %v1838_v34  ;;  %v1814_v44 = vsel %vm4422_vm5, %v1809_v26, %v1813_v6  ;;  %v2004_v54 = vsel %vm4378_vm2, %v3802_v1, %v2003_v18  ;;  %v2884_v41 = vsel %vm2866_vm9, %v2851_v49, %v5768_v4  ;;  %v4299_v6 = vld [vmem:[%s4354_s17 + $0x88] sm:$0xf] }
 0x14e   : > { %v3930_v51 = vcombine.low %v1804_v2, %v1814_v44  ;;  %v2007_v10 = vsel %vm4378_vm2, %v2005_v27, %v2006_v61  ;;  %v2919_v31 = vsel %vm2899_vm10, %v2886_v36, %v5781_v12  ;;  %v2917_v3 = vsel %vm2899_vm10, %v2884_v41, %v5785_v39 }
 0x14f   : > { %2669 = vrot.lane.b32.xlu1 %v3931_v28, %s4318_s26  ;;  %v3947_v19 = vcombine.low %v2011_v55, %v2014_v11  ;;  %v2952_v63 = vsel %vm2932_vm11, %v2919_v31, %v5818_v16  ;;  %v2950_v48 = vsel %vm2932_vm11, %v2917_v3, %v5820_v25  ;;  %v3946_v4 = vcombine.low %v2004_v54, %v2007_v10  ;;  %v4300_v31 = vld [vmem:[%s4354_s17 + $0x90] sm:$0xf]  ;;  %v4301_v3 = vld [vmem:[%s4354_s17 + $0x94] sm:$0xf] }
 0x150   : > { %2667 = vrot.lane.b32.xlu0 %v3930_v51, %s4318_s26  ;;  %v2985_v17 = vsel %vm2965_vm12, %v2952_v63, %v2658_v37  ;;  %v2983_v23 = vsel %vm2965_vm12, %v2950_v48, %v2656_v7  ;;  %v2738_v12 = vpop.permute.xlu0 %2737  ;;  %v3818_v16 = vcombine.low %v5624_v58, %v5631_v8  ;;  %v3819_v25 = vcombine.low %v5662_v40, %v5665_v32  ;;  %v4296_v7 = vld [vmem:[%s4354_s17 + $0x78] sm:$0xf] }
 0x151   : > { %v3016_v59 = vsel %vm2998_vm14, %v2983_v23, %v2736_v15  ;;  %v2150_v39 = vpop.permute.xlu1 %2149  ;;  %v3018_v38 = vsel %vm2998_vm14, %v2985_v17, %v2738_v12  ;;  %v3814_v60 = vcombine.low %v4296_v7, %v4297_v57  ;;  %v3815_v47 = vcombine.low %v4298_v42, %v4299_v6  ;;  %v4302_v23 = vld [vmem:[%s4354_s17 + $0x9c] sm:$0xf]  ;;  %v4303_v12 = vld [vmem:[%s4354_s17 + $0xa0] sm:$0xf] }
 0x152   : > { %4178 = vmatprep.mubr.msk.bf16.mxu1 %vm3067_vm15, %v3016_v59  ;;  %v3817_v59 = vcombine.low %v4302_v23, %v4303_v12 }
 0x153   : > { %2749 = vrot.lane.b32.xlu1 %v3947_v19, %s4319_s4  ;;  %4179 = vmatmul.mubr.msk.bf16.vlgmr.msra.gmra.mrb[0].mxu1 %vm3067_vm15, %v3018_v38  ;;  %v2784_v13 = vsel %vm2751_vm6, %v3814_v60, %v2148_v35  ;;  %v2787_v43 = vsel %vm2751_vm6, %v3815_v47, %v2150_v39  ;;  %v3816_v19 = vcombine.low %v4300_v31, %v4301_v3 }
 0x154   : > { %2747 = vrot.lane.b32.xlu0 %v3946_v4, %s4319_s4  ;;  %v2228_v24 = vpop.permute.xlu0 %2227 }
 0x155   : > { %v2230_v62 = vpop.permute.xlu1 %2229  ;;  %v2822_v29 = vsel %vm2800_vm7, %v2784_v13, %v2228_v24 }
 0x156   : > { %v2824_v46 = vsel %vm2800_vm7, %v2787_v43, %v2230_v62 }
 0x158   : > { %v2324_v33 = vpop.permute.xlu0 %2323 }
 0x159   : > { %v2326_v30 = vpop.permute.xlu1 %2325  ;;  %v2855_v53 = vsel %vm2833_vm8, %v2822_v29, %v2324_v33 }
 0x15a   : > { %v2857_v15 = vsel %vm2833_vm8, %v2824_v46, %v2326_v30 }
 0x15f   : > { %v2406_v20 = vpop.permute.xlu1 %2405 }
 0x160   : > { %v2404_v22 = vpop.permute.xlu0 %2403  ;;  %v2890_v2 = vsel %vm2866_vm9, %v2857_v15, %v2406_v20 }
 0x161   : > { %v2888_v45 = vsel %vm2866_vm9, %v2855_v53, %v2404_v22 }
 0x163   : > { %v2486_v52 = vpop.permute.xlu1 %2485 }
 0x164   : > { %v2484_v37 = vpop.permute.xlu0 %2483  ;;  %v2923_v26 = vsel %vm2899_vm10, %v2890_v2, %v2486_v52 }
 0x165   : > { %v2921_v14 = vsel %vm2899_vm10, %v2888_v45, %v2484_v37 }
 0x167   : > { %v2582_v5 = vpop.permute.xlu1 %2581 }
 0x168   : > { %v2580_v50 = vpop.permute.xlu0 %2579  ;;  %v2956_v55 = vsel %vm2932_vm11, %v2923_v26, %v2582_v5 }
 0x169   : > { %v2954_v49 = vsel %vm2932_vm11, %v2921_v14, %v2580_v50 }
 0x16e   : > { %v2662_v56 = vpop.permute.xlu1 %2661 }
 0x16f   : > { %v2660_v9 = vpop.permute.xlu0 %2659  ;;  %v2989_v61 = vsel %vm2965_vm12, %v2956_v55, %v2662_v56 }
 0x170   : > { %v2987_v0 = vsel %vm2965_vm12, %v2954_v49, %v2660_v9 }
 0x173   : > { %v2740_v1 = vpop.permute.xlu0 %2739 }
 0x174   : > { %v3020_v21 = vsel %vm2998_vm14, %v2987_v0, %v2740_v1  ;;  %v2152_v18 = vpop.permute.xlu1 %2151 }
 0x175   : > { %4182 = vmatprep.mubr.msk.bf16.mxu1 %vm3067_vm15, %v3020_v21  ;;  %v2790_v4 = vsel %vm2751_vm6, %v3816_v19, %v2152_v18 }
 0x17a   : > { %v2742_v35 = vpop.permute.xlu0 %2741 }
 0x17b   : > { %v2154_v34 = vpop.permute.xlu1 %2153  ;;  %v3022_v11 = vsel %vm2998_vm14, %v2989_v61, %v2742_v35 }
 0x17c   : > { %4183 = vmatmul.mubr.msk.bf16.gmra.mrb[4].mxu1 %vm3067_vm15, %v3022_v11  ;;  %v2793_v37 = vsel %vm2751_vm6, %v3817_v59, %v2154_v34 }
 0x17e   : > { %v2232_v27 = vpop.permute.xlu0 %2231 }
 0x17f   : > { %v2234_v36 = vpop.permute.xlu1 %2233  ;;  %v2826_v17 = vsel %vm2800_vm7, %v2790_v4, %v2232_v27 }
 0x180   : > { %v2828_v9 = vsel %vm2800_vm7, %v2793_v37, %v2234_v36 }
 0x182   : > { %v2328_v44 = vpop.permute.xlu0 %2327 }
 0x183   : > { %v2330_v28 = vpop.permute.xlu1 %2329  ;;  %v2859_v39 = vsel %vm2833_vm8, %v2826_v17, %v2328_v44 }
 0x184   : > { %v2861_v6 = vsel %vm2833_vm8, %v2828_v9, %v2330_v28 }
 0x189   : > { %v2410_v54 = vpop.permute.xlu1 %2409 }
 0x18a   : > { %v2408_v41 = vpop.permute.xlu0 %2407  ;;  %v2894_v49 = vsel %vm2866_vm9, %v2861_v6, %v2410_v54 }
 0x18b   : > { %v2892_v62 = vsel %vm2866_vm9, %v2859_v39, %v2408_v41 }
 0x18d   : > { %v2490_v51 = vpop.permute.xlu1 %2489 }
 0x18e   : > { %v2488_v10 = vpop.permute.xlu0 %2487  ;;  %v2927_v0 = vsel %vm2899_vm10, %v2894_v49, %v2490_v51 }
 0x18f   : > { %v2925_v33 = vsel %vm2899_vm10, %v2892_v62, %v2488_v10 }
 0x191   : > { %v2586_v63 = vpop.permute.xlu1 %2585 }
 0x192   : > { %v2584_v48 = vpop.permute.xlu0 %2583  ;;  %v2960_v46 = vsel %vm2932_vm11, %v2927_v0, %v2586_v63 }
 0x193   : > { %v2958_v22 = vsel %vm2932_vm11, %v2925_v33, %v2584_v48 }
 0x197   : > { %v2666_v38 = vpop.permute.xlu1 %2665 }
 0x198   : > { %v2664_v24 = vpop.permute.xlu0 %2663  ;;  %v4164_v30 = vpop.f32.mrb[0].mxu0  ;;  %v2993_v18 = vsel %vm2965_vm12, %v2960_v46, %v2666_v38 }
 0x199   : > { %v3138_v20 = vpop.f32.mrb[1].mxu0  ;;  %v2991_v7 = vsel %vm2965_vm12, %v2958_v22, %v2664_v24  ;;  %v3465_v47 = vmul.f32 %v4164_v30, %v4164_v30 }
 0x19a   : > { %v4165_v52 = vpop.f32.mrb[2].mxu0  ;;  %v3463_v60 = vmul.f32 %v3138_v20, %v3138_v20 }
 0x19b   : > { %v4044_v5 = vpack.c.bf16 %v4165_v52, %v4164_v30  ;;  %v3141_v50 = vpop.f32.mrb[3].mxu0  ;;  %v3466_v1 = vmul.f32 %v4165_v52, %v4165_v52 }
 0x19c   : > { %v2744_v57 = vpop.permute.xlu0 %2743  ;;  %v4039_v29 = vpack.c.bf16 %v3141_v50, %v3138_v20  ;;  %v3425_v53 = vadd.f32 %v3141_v50, %v3138_v20  ;;  %v3464_v56 = vmul.f32 %v3141_v50, %v3141_v50 }
 0x19d   : > { %v3024_v13 = vsel %vm2998_vm14, %v2991_v7, %v2744_v57  ;;  %4116 = vst [vmem:[%s5930_s14 + $0x8] sm:$0xff] %v4044_v5  }
 0x19e   : > { %v2156_v42 = vpop.permute.xlu1 %2155  ;;  %4186 = vmatprep.mubr.msk.bf16.mxu1 %vm3067_vm15, %v3024_v13  ;;  %4040 = vst [vmem:[%s5930_s14] sm:$0xff] %v4039_v29   ;;  %v3426_v45 = vadd.f32 %v4164_v30, %v3425_v53  ;;  %v3495_v14 = vadd.f32 %v3464_v56, %v3463_v60 }
 0x19f   : > { %v2796_v10 = vsel %vm2751_vm6, %v3818_v16, %v2156_v42 }
 0x1a0   : > { %v3496_v43 = vadd.f32 %v3495_v14, %v3465_v47  ;;  %v3427_v21 = vadd.f32 %v4165_v52, %v3426_v45 }
 0x1a2   : > { %v3497_v2 = vadd.f32 %v3496_v43, %v3466_v1 }
 0x1a3   : > { %v2746_v15 = vpop.permute.xlu0 %2745 }
 0x1a4   : > { %v2158_v26 = vpop.permute.xlu1 %2157  ;;  %v3026_v55 = vsel %vm2998_vm14, %v2993_v18, %v2746_v15 }
 0x1a5   : > { %4187 = vmatmul.mubr.msk.bf16.gmra.mrb[8].mxu1 %vm3067_vm15, %v3026_v55  ;;  %v2799_v31 = vsel %vm2751_vm6, %v3819_v25, %v2158_v26 }
 0x1a7   : > { %v2236_v61 = vpop.permute.xlu0 %2235 }
 0x1a8   : > { %v2238_v35 = vpop.permute.xlu1 %2237  ;;  %v2830_v63 = vsel %vm2800_vm7, %v2796_v10, %v2236_v61 }
 0x1a9   : > { %v2832_v19 = vsel %vm2800_vm7, %v2799_v31, %v2238_v35 }
 0x1ab   : > { %v2332_v11 = vpop.permute.xlu0 %2331 }
 0x1ac   : > { %v2334_v34 = vpop.permute.xlu1 %2333  ;;  %v2863_v58 = vsel %vm2833_vm8, %v2830_v63, %v2332_v11 }
 0x1ad   : > { %v2865_v23 = vsel %vm2833_vm8, %v2832_v19, %v2334_v34 }
 0x1b2   : > { %v2414_v27 = vpop.permute.xlu1 %2413 }
 0x1b3   : > { %v2412_v36 = vpop.permute.xlu0 %2411  ;;  %v2898_v40 = vsel %vm2866_vm9, %v2865_v23, %v2414_v27 }
 0x1b4   : > { %v2896_v38 = vsel %vm2866_vm9, %v2863_v58, %v2412_v36 }
 0x1b6   : > { %v2494_v28 = vpop.permute.xlu1 %2493 }
 0x1b7   : > { %v2492_v44 = vpop.permute.xlu0 %2491  ;;  %v2931_v24 = vsel %vm2899_vm10, %v2898_v40, %v2494_v28 }
 0x1b8   : > { %v2929_v30 = vsel %vm2899_vm10, %v2896_v38, %v2492_v44 }
 0x1ba   : > { %v2590_v54 = vpop.permute.xlu1 %2589 }
 0x1bb   : > { %v2588_v41 = vpop.permute.xlu0 %2587  ;;  %v2964_v33 = vsel %vm2932_vm11, %v2931_v24, %v2590_v54 }
 0x1bc   : > { %v2962_v22 = vsel %vm2932_vm11, %v2929_v30, %v2588_v41 }
 0x1bf   : > { %v4168_v51 = vpop.f32.mrb[4].mxu0 }
 0x1c0   : > { %v3154_v3 = vpop.f32.mrb[5].mxu0  ;;  %v3469_v7 = vmul.f32 %v4168_v51, %v4168_v51 }
 0x1c1   : > { %v3428_v48 = vadd.f32 %v3427_v21, %v3154_v3  ;;  %v3467_v4 = vmul.f32 %v3154_v3, %v3154_v3  ;;  %v4169_v17 = vpop.f32.mrb[6].mxu0  ;;  %v2670_v8 = vpop.permute.xlu1 %2669 }
 0x1c2   : > { %v4054_v16 = vpack.c.bf16 %v4169_v17, %v4168_v51  ;;  %v3157_v12 = vpop.f32.mrb[7].mxu0  ;;  %v2668_v32 = vpop.permute.xlu0 %2667  ;;  %v2997_v52 = vsel %vm2965_vm12, %v2964_v33, %v2670_v8  ;;  %v3470_v53 = vmul.f32 %v4169_v17, %v4169_v17 }
 0x1c3   : > { %v3498_v25 = vadd.f32 %v3497_v2, %v3467_v4  ;;  %v4049_v59 = vpack.c.bf16 %v3157_v12, %v3154_v3  ;;  %v3429_v39 = vadd.f32 %v3428_v48, %v3157_v12  ;;  %v3468_v62 = vmul.f32 %v3157_v12, %v3157_v12 }
 0x1c4   : > { %4118 = vst [vmem:[%s5930_s14 + $0x18] sm:$0xff] %v4054_v16   ;;  %v2995_v60 = vsel %vm2965_vm12, %v2962_v22, %v2668_v32 }
 0x1c5   : > { %4117 = vst [vmem:[%s5930_s14 + $0x10] sm:$0xff] %v4049_v59   ;;  %v3430_v20 = vadd.f32 %v4168_v51, %v3429_v39  ;;  %v2750_v37 = vpop.permute.xlu1 %2749  ;;  %v3499_v57 = vadd.f32 %v3498_v25, %v3468_v62 }
 0x1c6   : > { %v3030_v5 = vsel %vm2998_vm14, %v2997_v52, %v2750_v37  ;;  %v2748_v50 = vpop.permute.xlu0 %2747 }
 0x1c7   : > { %v3431_v13 = vadd.f32 %v4169_v17, %v3430_v20  ;;  %v3028_v29 = vsel %vm2998_vm14, %v2995_v60, %v2748_v50  ;;  %v3500_v56 = vadd.f32 %v3499_v57, %v3469_v7 }
 0x1c8   : > { %4190 = vmatprep.mubr.msk.bf16.mxu1 %vm3067_vm15, %v3028_v29 }
 0x1c9   : > { %4191 = vmatmul.mubr.msk.bf16.gmra.mrb[12].mxu1 %vm3067_vm15, %v3030_v5  ;;  %v3501_v9 = vadd.f32 %v3500_v56, %v3470_v53 }
 0x1e9   : > { %v4172_v42 = vpop.f32.mrb[8].mxu0 }
 0x1ea   : > { %v3170_v6 = vpop.f32.mrb[9].mxu0  ;;  %v3473_v18 = vmul.f32 %v4172_v42, %v4172_v42 }
 0x1eb   : > { %v3432_v47 = vadd.f32 %v3431_v13, %v3170_v6  ;;  %v3471_v45 = vmul.f32 %v3170_v6, %v3170_v6  ;;  %v4173_v14 = vpop.f32.mrb[10].mxu0 }
 0x1ec   : > { %v4064_v49 = vpack.c.bf16 %v4173_v14, %v4172_v42  ;;  %v3173_v0 = vpop.f32.mrb[11].mxu0  ;;  %v3474_v26 = vmul.f32 %v4173_v14, %v4173_v14 }
 0x1ed   : > { %v3502_v1 = vadd.f32 %v3501_v9, %v3471_v45  ;;  %v4059_v43 = vpack.c.bf16 %v3173_v0, %v3170_v6  ;;  %v3433_v21 = vadd.f32 %v3432_v47, %v3173_v0  ;;  %v3472_v46 = vmul.f32 %v3173_v0, %v3173_v0 }
 0x1ee   : > { %4120 = vst [vmem:[%s5930_s14 + $0x28] sm:$0xff] %v4064_v49  }
 0x1ef   : > { %4119 = vst [vmem:[%s5930_s14 + $0x20] sm:$0xff] %v4059_v43   ;;  %v3434_v15 = vadd.f32 %v4172_v42, %v3433_v21  ;;  %v3503_v2 = vadd.f32 %v3502_v1, %v3472_v46 }
 0x1f1   : > { %v3504_v55 = vadd.f32 %v3503_v2, %v3473_v18  ;;  %v3435_v61 = vadd.f32 %v4173_v14, %v3434_v15 }
 0x1f3   : > { %v3505_v35 = vadd.f32 %v3504_v55, %v3474_v26 }
 0x211   : > { %v4176_v34 = vpop.f32.mrb[12].mxu0 }
 0x212   : > { %v3186_v11 = vpop.f32.mrb[13].mxu0  ;;  %v3477_v3 = vmul.f32 %v4176_v34, %v4176_v34 }
 0x213   : > { %v3436_v27 = vadd.f32 %v3435_v61, %v3186_v11  ;;  %v3475_v36 = vmul.f32 %v3186_v11, %v3186_v11  ;;  %v4177_v28 = vpop.f32.mrb[14].mxu0 }
 0x214   : > { %v4074_v44 = vpack.c.bf16 %v4177_v28, %v4176_v34  ;;  %v3189_v54 = vpop.f32.mrb[15].mxu0  ;;  %v3478_v48 = vmul.f32 %v4177_v28, %v4177_v28 }
 0x215   : > { %v3506_v41 = vadd.f32 %v3505_v35, %v3475_v36  ;;  %v4069_v51 = vpack.c.bf16 %v3189_v54, %v3186_v11  ;;  %v3437_v10 = vadd.f32 %v3436_v27, %v3189_v54  ;;  %v3476_v31 = vmul.f32 %v3189_v54, %v3189_v54 }
 0x216   : > { %4122 = vst [vmem:[%s5930_s14 + $0x38] sm:$0xff] %v4074_v44  }
 0x217   : > { %4121 = vst [vmem:[%s5930_s14 + $0x30] sm:$0xff] %v4069_v51   ;;  %v3438_v19 = vadd.f32 %v4176_v34, %v3437_v10  ;;  %v3507_v63 = vadd.f32 %v3506_v41, %v3476_v31 }
 0x219   : > { %v3508_v4 = vadd.f32 %v3507_v63, %v3477_v3  ;;  %v3439_v17 = vadd.f32 %v4177_v28, %v3438_v19 }
 0x21b   : > { %v3509_v23 = vadd.f32 %v3508_v4, %v3478_v48 }
 0x226   : > { %v4180_v58 = vpop.f32.mrb[0].mxu1 }
 0x227   : > { %v3202_v8 = vpop.f32.mrb[1].mxu1  ;;  %v3481_v62 = vmul.f32 %v4180_v58, %v4180_v58 }
 0x228   : > { %v3440_v16 = vadd.f32 %v3439_v17, %v3202_v8  ;;  %v3479_v12 = vmul.f32 %v3202_v8, %v3202_v8  ;;  %v4181_v40 = vpop.f32.mrb[2].mxu1 }
 0x229   : > { %v4084_v32 = vpack.c.bf16 %v4181_v40, %v4180_v58  ;;  %v3205_v25 = vpop.f32.mrb[3].mxu1  ;;  %v3482_v20 = vmul.f32 %v4181_v40, %v4181_v40 }
 0x22a   : > { %v3510_v59 = vadd.f32 %v3509_v23, %v3479_v12  ;;  %v4079_v39 = vpack.c.bf16 %v3205_v25, %v3202_v8  ;;  %v3441_v38 = vadd.f32 %v3440_v16, %v3205_v25  ;;  %v3480_v24 = vmul.f32 %v3205_v25, %v3205_v25 }
 0x22b   : > { %4124 = vst [vmem:[%s5930_s14 + $0x48] sm:$0xff] %v4084_v32  }
 0x22c   : > { %4123 = vst [vmem:[%s5930_s14 + $0x40] sm:$0xff] %v4079_v39   ;;  %v3442_v30 = vadd.f32 %v4180_v58, %v3441_v38  ;;  %v3511_v33 = vadd.f32 %v3510_v59, %v3480_v24 }
 0x22e   : > { %v3512_v22 = vadd.f32 %v3511_v33, %v3481_v62  ;;  %v3443_v52 = vadd.f32 %v4181_v40, %v3442_v30 }
 0x230   : > { %v3513_v37 = vadd.f32 %v3512_v22, %v3482_v20 }
 0x24f   : > { %v4184_v7 = vpop.f32.mrb[4].mxu1 }
 0x250   : > { %v3218_v57 = vpop.f32.mrb[5].mxu1  ;;  %v3485_v6 = vmul.f32 %v4184_v7, %v4184_v7 }
 0x251   : > { %v3444_v60 = vadd.f32 %v3443_v52, %v3218_v57  ;;  %v3483_v5 = vmul.f32 %v3218_v57, %v3218_v57  ;;  %v4185_v50 = vpop.f32.mrb[6].mxu1 }
 0x252   : > { %v4094_v13 = vpack.c.bf16 %v4185_v50, %v4184_v7  ;;  %v3221_v29 = vpop.f32.mrb[7].mxu1  ;;  %v3486_v14 = vmul.f32 %v4185_v50, %v4185_v50 }
 0x253   : > { %v3514_v53 = vadd.f32 %v3513_v37, %v3483_v5  ;;  %v4089_v56 = vpack.c.bf16 %v3221_v29, %v3218_v57  ;;  %v3445_v9 = vadd.f32 %v3444_v60, %v3221_v29  ;;  %v3484_v42 = vmul.f32 %v3221_v29, %v3221_v29 }
 0x254   : > { %4126 = vst [vmem:[%s5930_s14 + $0x58] sm:$0xff] %v4094_v13  }
 0x255   : > { %4125 = vst [vmem:[%s5930_s14 + $0x50] sm:$0xff] %v4089_v56   ;;  %v3446_v47 = vadd.f32 %v4184_v7, %v3445_v9  ;;  %v3515_v45 = vadd.f32 %v3514_v53, %v3484_v42 }
 0x257   : > { %v3516_v49 = vadd.f32 %v3515_v45, %v3485_v6  ;;  %v3447_v0 = vadd.f32 %v4185_v50, %v3446_v47 }
 0x259   : > { %v3517_v1 = vadd.f32 %v3516_v49, %v3486_v14 }
 0x278   : > { %v4188_v43 = vpop.f32.mrb[8].mxu1 }
 0x279   : > { %v3234_v21 = vpop.f32.mrb[9].mxu1  ;;  %v3489_v11 = vmul.f32 %v4188_v43, %v4188_v43 }
 0x27a   : > { %v3448_v46 = vadd.f32 %v3447_v0, %v3234_v21  ;;  %v3487_v18 = vmul.f32 %v3234_v21, %v3234_v21  ;;  %v4189_v15 = vpop.f32.mrb[10].mxu1 }
 0x27b   : > { %v4104_v2 = vpack.c.bf16 %v4189_v15, %v4188_v43  ;;  %v3237_v26 = vpop.f32.mrb[11].mxu1  ;;  %v3490_v28 = vmul.f32 %v4189_v15, %v4189_v15 }
 0x27c   : > { %v3518_v55 = vadd.f32 %v3517_v1, %v3487_v18  ;;  %v4099_v61 = vpack.c.bf16 %v3237_v26, %v3234_v21  ;;  %v3449_v35 = vadd.f32 %v3448_v46, %v3237_v26  ;;  %v3488_v34 = vmul.f32 %v3237_v26, %v3237_v26 }
 0x27d   : > { %4128 = vst [vmem:[%s5930_s14 + $0x68] sm:$0xff] %v4104_v2  }
 0x27e   : > { %4127 = vst [vmem:[%s5930_s14 + $0x60] sm:$0xff] %v4099_v61   ;;  %v3450_v27 = vadd.f32 %v4188_v43, %v3449_v35  ;;  %v3519_v36 = vadd.f32 %v3518_v55, %v3488_v34 }
 0x280   : > { %v3520_v44 = vadd.f32 %v3519_v36, %v3489_v11  ;;  %v3451_v54 = vadd.f32 %v4189_v15, %v3450_v27 }
 0x282   : > { %v3521_v41 = vadd.f32 %v3520_v44, %v3490_v28 }
 0x29c   : > { %v4192_v51 = vpop.f32.mrb[12].mxu1 }
 0x29d   : > { %v3250_v10 = vpop.f32.mrb[13].mxu1  ;;  %v3493_v8 = vmul.f32 %v4192_v51, %v4192_v51 }
 0x29e   : > { %v3452_v31 = vadd.f32 %v3451_v54, %v3250_v10  ;;  %v3491_v3 = vmul.f32 %v3250_v10, %v3250_v10  ;;  %v4193_v19 = vpop.f32.mrb[14].mxu1 }
 0x29f   : > { %v4114_v63 = vpack.c.bf16 %v4193_v19, %v4192_v51  ;;  %v3253_v48 = vpop.f32.mrb[15].mxu1  ;;  %v3494_v40 = vmul.f32 %v4193_v19, %v4193_v19 }
 0x2a0   : > { %v3522_v4 = vadd.f32 %v3521_v41, %v3491_v3  ;;  %v4109_v17 = vpack.c.bf16 %v3253_v48, %v3250_v10  ;;  %v3453_v23 = vadd.f32 %v3452_v31, %v3253_v48  ;;  %v3492_v58 = vmul.f32 %v3253_v48, %v3253_v48 }
 0x2a1   : > { %4130 = vst [vmem:[%s5930_s14 + $0x78] sm:$0xff] %v4114_v63  }
 0x2a2   : > { %4129 = vst [vmem:[%s5930_s14 + $0x70] sm:$0xff] %v4109_v17   ;;  %v3454_v16 = vadd.f32 %v4192_v51, %v3453_v23  ;;  %v3523_v12 = vadd.f32 %v3522_v4, %v3492_v58 }
 0x2a4   : > { %v3455_v32 = vadd.f32 %v4193_v19, %v3454_v16  ;;  %v3524_v25 = vadd.f32 %v3523_v12, %v3493_v8 }
 0x2a6   : > { %v3456_v59 = vrot.slane %v3455_v32, 4  ;;  %v3525_v39 = vadd.f32 %v3524_v25, %v3494_v40 }
 0x2a8   : > { %v3457_v38 = vadd.f32 %v3456_v59, %v3455_v32  ;;  %v3526_v24 = vrot.slane %v3525_v39, 4 }
 0x2aa   : > { %v3458_v62 = vrot.slane %v3457_v38, 2  ;;  %v3527_v30 = vadd.f32 %v3526_v24, %v3525_v39 }
 0x2ac   : > { %v3459_v33 = vadd.f32 %v3458_v62, %v3457_v38  ;;  %v3528_v20 = vrot.slane %v3527_v30, 2 }
 0x2ae   : > { %v3460_v22 = vrot.slane %v3459_v33, 1  ;;  %v3529_v52 = vadd.f32 %v3528_v20, %v3527_v30 }
 0x2b0   : > { %v3461_v37 = vadd.f32 %v3460_v22, %v3459_v33  ;;  %v3530_v7 = vrot.slane %v3529_v52, 1 }
 0x2b2   : > { %3462 = vst [vmem:[%s181_s18] sm:$0x1] %v3461_v37  ;;  %v3531_v57 = vadd.f32 %v3530_v7, %v3529_v52 }
 0x2b4   : > { %3532 = vst [vmem:[%s181_s18 + $0x1] sm:$0x1] %v3531_v57 }
 0x2b5 PF: > { %s14_s12 = sadd.s32 1, %s4310_s12  }
 0x2b6   : > { %p11_p4 = scmp.ge.s32.totalorder %s14_s12, 4  }
 0x2b8   :  { %13 = sbr.rel (!%p11_p4) target bundleno = 1 (0x1), region = 72 }

// kernel: up_forward.6
= control target key start
LH: loop header
LB: loop body
LE: loop exit
PB: predicated region body
PF: predicated region fallthrough
CT: control target
= control target key end

     0   :  { %s4310_s12 = smov 0   ;;  %s5946_s0 = inlined_call_operand.vmem [shape: bf16[2,18,18,4], index: 0, kind: input, shape index: {}]   ;;  %s5947_s1 = inlined_call_operand.vmem [shape: bf16[36,128], index: 1, kind: input, shape index: {}]   ;;  %s5948_s2 = inlined_call_operand.vmem [shape: bf16[2,256,128], index: 2, kind: output, shape index: {0}]   ;;  %s5949_s3 = inlined_call_operand.vmem [shape: f32[2,2,128], index: 3, kind: output, shape index: {1}]  }
   0x1 LB: > { %s3603_s13 = sadd.s32 4294967295, %s4280_s12   ;;  %p3607_p0 = scmp.ge.s32.totalorder %s4280_s12, 1  ;;  %s4280_s12 = sphi %s4310_s12, %s14_s12  }
   0x2   : > { %p140_p1 = scmp.lt.s32.totalorder %s4280_s12, 3 }
   0x4   : > { %p141_p2 = pnand %p3607_p0, %p140_p1 }
   0x5   : > { %p168_p3 = scmp.lt.s32.totalorder (!%p141_p2), %s3603_s13, 1  ;;  %vm682_vm0 = vcmask (!%p141_p2), 1042432   ;;  %vm683_vm1 = vcmask (!%p141_p2), 1046532   ;;  %s4282_s18 = smov (!%p141_p2), 12   ;;  %vm231_vm3 = vsmask.f32 (!%p141_p2), 3328 }
   0x6   : > { %144 = sbr.rel (%p141_p2) target bundleno = 693 (0x2b5), region = 28  ;;  %vm4348_vm2 = vmor (!%p141_p2), %vm682_vm0, %vm683_vm1  ;;  %vm232_vm4 = vsmask.f32 (!%p141_p2), 7440  ;;  %s4283_s19 = smov (!%p141_p2), 20   ;;  %vm2751_vm6 = vcmask (!%p141_p2), 31744   ;;  %vm2800_vm7 = vcmask (!%p141_p2), 64512  }
   0x7   : > { %s4284_s20 = smov (!%p141_p2), 8   ;;  %vm4392_vm5 = vmor (!%p141_p2), %vm231_vm3, %vm232_vm4  ;;  %s4285_s21 = smov (!%p141_p2), 4   ;;  %vm2833_vm8 = vcmask (!%p141_p2), 97280   ;;  %vm2866_vm9 = vcmask (!%p141_p2), 130048   ;;  %vm2899_vm10 = vcmask (!%p141_p2), 162816   ;;  %vm2932_vm11 = vcmask (!%p141_p2), 195584  }
   0x8   : > { %s4286_s22 = smov (!%p141_p2), 16   ;;  %s4287_s23 = smov (!%p141_p2), 24   ;;  %vm2965_vm12 = vcmask (!%p141_p2), 228352   ;;  %vm3084_vm13 = vcmask (!%p141_p2), 1041408   ;;  %vm2998_vm14 = vcmask (!%p141_p2), 261120   ;;  %vm3051_vm15 = vcmask (!%p141_p2), 293888  }
   0x9   : > { %s4288_s24 = smov (!%p141_p2), 28   ;;  %s4289_s27 = smov (!%p141_p2), 32  }
   0xd   : > { %s5955_s13 = smov (!%p168_p3, %s3603_s13), 1 }
   0xe   : > { %s4178_s14 = smul.u32 216, %s5955_s13  ;;  %s3985_s5 = sshll.u32 %s5955_s13, 7 }
   0xf   : > { %s5885_s8 = scalar_lea.vmem %s5948_s2, %s3985_s5  ;;  %s3611_s9 = sshll.u32 %s5955_s13, 1 }
  0x10   : > { %s4324_s17 = scalar_lea.vmem %s5946_s0, %s4178_s14  ;;  %s181_s14 = scalar_lea.vmem %s5949_s3, %s3611_s9 }
  0x11   : > { %v3630_v0 = vld [vmem:[%s4324_s17 + $0x18] sm:$0xf]  ;;  %v4328_v1 = vld [vmem:[%s4324_s17 + $0x1c] sm:$0xf]  ;;  %v3628_v2 = vld [vmem:[%s4324_s17 + $0xc] sm:$0xf] }
  0x12   : > { %v880_v3 = vshll.u32 %v4328_v1, 16  ;;  %v884_v4 = vshrl.u32 %v4328_v1, 16  ;;  %v3837_v5 = vcombine.low %v3630_v0, %v4328_v1  ;;  %v871_v6 = vshrl.u32 %v3630_v0, 16  ;;  %v4335_v7 = vld [vmem:[%s4324_s17 + $0x10] sm:$0xf] }
  0x13   : > { %v874_v8 = vshll.u32 %v3630_v0, 16  ;;  %v856_v9 = vshll.u32 %v4335_v7, 16  ;;  %v860_v10 = vshrl.u32 %v4335_v7, 16  ;;  %v3836_v11 = vcombine.low %v3628_v2, %v4335_v7  ;;  %v4341_v12 = vld [vmem:[%s4324_s17 + $0x14] sm:$0x1] }
  0x14   : > { %v4343_v13 = vrot.slane %v884_v4, 4  ;;  %2305 = vrot.lane.b32.xlu1 %v3837_v5, %s4282_s18  ;;  %v873_v14 = vrot.slane %v871_v6, 4  ;;  %v847_v15 = vshrl.u32 %v3628_v2, 16  ;;  %v850_v16 = vshll.u32 %v3628_v2, 16  ;;  %v3676_v18 = vld [vmem:[%s4324_s17 + $0xc] sm:$0xe] }
  0x15   : > { %v876_v19 = vrot.slane %v874_v8, 5  ;;  %v4353_v20 = vrot.slane %v860_v10, 4  ;;  %2303 = vrot.lane.b32.xlu0 %v3836_v11, %s4282_s18  ;;  %v3692_v21 = vrot.slane %v3676_v18, 9  ;;  %v1296_v22 = vrot.slane %v4335_v7, 5  ;;  %v184_v23 = vld [vmem:[%s4324_s17 + $0x4] sm:$0xf] }
  0x16   : > { %v849_v24 = vrot.slane %v847_v15, 4  ;;  %v852_v25 = vrot.slane %v850_v16, 5  ;;  %v1299_v26 = vrot.slane %v4341_v12, 5  ;;  %v215_v27 = vld [vmem:[%s4324_s17 + $0x8] sm:$0x1]  ;;  %v687_v28 = vrot.slane %v184_v23, 5 }
  0x17   : > { %v877_v29 = vor.u32 %v876_v19, %v873_v14  ;;  %v1297_v30 = vsel %vm4348_vm2, %v3692_v21, %v1296_v22  ;;  %v1298_v31 = vrot.slane %v1296_v22, 4  ;;  %v618_v32 = vld [vmem:[%s4324_s17] sm:$0xe]  ;;  %v690_v33 = vrot.slane %v215_v27, 5  ;;  %v186_v34 = vld [vmem:[%s4324_s17 + $0x10] sm:$0xf] }
  0x18   : > { %v853_v35 = vor.u32 %v852_v25, %v849_v24  ;;  %v3612_v36 = vrot.slane %v618_v32, 9  ;;  %v689_v37 = vrot.slane %v687_v28, 4  ;;  %v216_v38 = vld [vmem:[%s4324_s17 + $0x14] sm:$0x1]  ;;  %v619_v39 = vld [vmem:[%s4324_s17 + $0xc] sm:$0xe] }
  0x19   : > { %v4366_v40 = vrot.slane %v877_v29, 4  ;;  %v1300_v41 = vsel %vm4348_vm2, %v1298_v31, %v1299_v26  ;;  %v3613_v42 = vrot.slane %v619_v39, 9  ;;  %v694_v43 = vrot.slane %v186_v34, 5  ;;  %v183_v44 = vld [vmem:[%s4324_s17] sm:$0xf] }
  0x1a   : > { %v4371_v45 = vrot.slane %v853_v35, 4  ;;  %v3868_v46 = vcombine.low %v1297_v30, %v1300_v41  ;;  %v688_v47 = vsel %vm4348_vm2, %v3612_v36, %v687_v28  ;;  %v691_v48 = vsel %vm4348_vm2, %v689_v37, %v690_v33  ;;  %v3677_v49 = vld [vmem:[%s4324_s17 + $0x18] sm:$0xe]  ;;  %v3661_v58 = vld [vmem:[%s4324_s17 + $0x20] sm:$0x1] }
  0x1b   : > { %v3820_v50 = vcombine.low %v688_v47, %v691_v48  ;;  %v695_v51 = vsel %vm4348_vm2, %v3613_v42, %v694_v43  ;;  %v696_v52 = vrot.slane %v694_v43, 4  ;;  %v697_v53 = vrot.slane %v216_v38, 5  ;;  %v185_v63 = vld [vmem:[%s4324_s17 + $0xc] sm:$0xf]  ;;  %v3710_v42 = vld [vmem:[%s4324_s17 + $0x24] sm:$0xf] }
  0x1c   : > { %2463 = vrot.lane.b32.xlu0 %v3868_v46, %s4283_s19  ;;  %v235_v54 = vshrl.u32 %v183_v44, 16  ;;  %v238_v55 = vshll.u32 %v183_v44, 16  ;;  %v244_v56 = vshll.u32 %v184_v23, 16  ;;  %v248_v57 = vshrl.u32 %v184_v23, 16 }
  0x1d   : > { %2207 = vrot.lane.b32.xlu1 %v3820_v50, %s4284_s20  ;;  %v698_v59 = vsel %vm4348_vm2, %v696_v52, %v697_v53  ;;  %v254_v60 = vshll.u32 %v215_v27, 16  ;;  %v3693_v61 = vrot.slane %v3677_v49, 9  ;;  %v1303_v62 = vrot.slane %v4328_v1, 5 }
  0x1e   : > { %v3821_v0 = vcombine.low %v695_v51, %v698_v59  ;;  %v237_v2 = vrot.slane %v235_v54, 4  ;;  %v240_v4 = vrot.slane %v238_v55, 5  ;;  %v246_v5 = vrot.slane %v244_v56, 5  ;;  %v3708_v51 = vld [vmem:[%s4324_s17 + $0x18] sm:$0xf] }
  0x1f   : > { %v250_v6 = vrot.slane %v248_v57, 4  ;;  %v256_v8 = vrot.slane %v254_v60, 5  ;;  %v1304_v10 = vsel %vm4348_vm2, %v3693_v61, %v1303_v62  ;;  %v1305_v11 = vrot.slane %v1303_v62, 4  ;;  %v4434_v62 = vld [vmem:[%s4324_s17 + $0x2c] sm:$0x1] }
  0x20   : > { %v241_v14 = vor.u32 %v240_v4, %v237_v2  ;;  %v1306_v15 = vrot.slane %v3661_v58, 5  ;;  %v259_v16 = vshrl.u32 %v185_v63, 16  ;;  %v262_v18 = vshll.u32 %v185_v63, 16 }
  0x21   : > { %2209 = vrot.lane.b32.xlu1 %v3821_v0, %s4284_s20  ;;  %v251_v21 = vor.u32 %v250_v6, %v246_v5  ;;  %v268_v22 = vshll.u32 %v186_v34, 16  ;;  %v272_v23 = vshrl.u32 %v186_v34, 16  ;;  %v278_v24 = vshll.u32 %v216_v38, 16 }
  0x22   : > { %v242_v25 = vrot.slane %v241_v14, 4  ;;  %v1307_v26 = vsel %vm4348_vm2, %v1305_v11, %v1306_v15  ;;  %v261_v27 = vrot.slane %v259_v16, 4  ;;  %v264_v28 = vrot.slane %v262_v18, 5  ;;  %v187_v14 = vld [vmem:[%s4324_s17 + $0x18] sm:$0xf] }
  0x23   : > { %v252_v29 = vrot.slane %v251_v21, 4  ;;  %v3869_v30 = vcombine.low %v1304_v10, %v1307_v26  ;;  %v270_v31 = vrot.slane %v268_v22, 5  ;;  %v274_v32 = vrot.slane %v272_v23, 4  ;;  %v4451_v26 = vld [vmem:[%s4324_s17 + $0x1c] sm:$0xf] }
  0x24   : > { %v247_v33 = vsel %vm4392_vm5, %v242_v25, %v246_v5  ;;  %v265_v35 = vor.u32 %v264_v28, %v261_v27  ;;  %v280_v36 = vrot.slane %v278_v24, 5  ;;  %v882_v34 = vrot.slane %v880_v3, 5  ;;  %v4413_v3 = vld [vmem:[%s4324_s17 + $0x28] sm:$0xf]  ;;  %v4442_v5 = vld [vmem:[%s4324_s17 + $0x20] sm:$0x1] }
  0x25   : > { %v257_v37 = vsel %vm4392_vm5, %v252_v29, %v256_v8  ;;  %2465 = vrot.lane.b32.xlu1 %v3869_v30, %s4283_s19  ;;  %v275_v38 = vor.u32 %v274_v32, %v270_v31  ;;  %v890_v39 = vshll.u32 %v3661_v58, 16  ;;  %v858_v41 = vrot.slane %v856_v9, 5  ;;  %v4455_v30 = vld [vmem:[%s4324_s17 + $0x20] sm:$0x1] }
  0x26   : > { %v3804_v43 = vcombine.low %v247_v33, %v257_v37  ;;  %v266_v44 = vrot.slane %v265_v35, 4  ;;  %v883_v46 = vsel %vm4392_vm5, %v4366_v40, %v882_v34  ;;  %v887_v1 = vor.u32 %v4343_v13, %v882_v34  ;;  %v3756_v34 = vld [vmem:[%s4324_s17 + $0x18] sm:$0xe] }
  0x27   : > { %v276_v47 = vrot.slane %v275_v38, 4  ;;  %v892_v48 = vrot.slane %v890_v39, 5  ;;  %v859_v7 = vsel %vm4392_vm5, %v4371_v45, %v858_v41  ;;  %v863_v9 = vor.u32 %v4353_v20, %v858_v41  ;;  %v4428_v20 = vld [vmem:[%s4324_s17 + $0x1c] sm:$0xf] }
  0x28   : > { %2127 = vrot.lane.b32.xlu0 %v3804_v43, %s4285_s21  ;;  %v271_v49 = vsel %vm4392_vm5, %v266_v44, %v270_v31  ;;  %v888_v40 = vrot.slane %v887_v1, 4  ;;  %v866_v13 = vshll.u32 %v4341_v12, 16  ;;  %v1480_v50 = vshrl.u32 %v3710_v42, 16 }
  0x29   : > { %v281_v52 = vsel %vm4392_vm5, %v276_v47, %v280_v36  ;;  %v864_v53 = vrot.slane %v863_v9, 4  ;;  %v1483_v54 = vshll.u32 %v3710_v42, 16  ;;  %v1493_v45 = vshrl.u32 %v4413_v3, 16  ;;  %v189_v9 = vld [vmem:[%s4324_s17 + $0x24] sm:$0xf] }
  0x2a   : > { %v3805_v55 = vcombine.low %v271_v49, %v281_v52  ;;  %v893_v56 = vsel %vm4392_vm5, %v888_v40, %v892_v48  ;;  %v868_v57 = vrot.slane %v866_v13, 5  ;;  %v1482_v58 = vrot.slane %v1480_v50, 4 }
  0x2b   : > { %v3853_v12 = vcombine.low %v883_v46, %v893_v56  ;;  %v1485_v59 = vrot.slane %v1483_v54, 5  ;;  %v3885_v60 = vcombine.low %v3710_v42, %v4413_v3  ;;  %v1456_v61 = vshrl.u32 %v3708_v51, 16 }
  0x2c   : > { %2129 = vrot.lane.b32.xlu0 %v3805_v55, %s4285_s21  ;;  %v869_v63 = vsel %vm4392_vm5, %v864_v53, %v868_v57  ;;  %v1459_v0 = vshll.u32 %v3708_v51, 16  ;;  %v1469_v2 = vshrl.u32 %v4428_v20, 16  ;;  %v3884_v4 = vcombine.low %v3708_v51, %v4428_v20  ;;  %v190_v51 = vld [vmem:[%s4324_s17 + $0x28] sm:$0xf] }
  0x2d   : > { %2385 = vrot.lane.b32.xlu1 %v3853_v12, %s4286_s22  ;;  %v3852_v6 = vcombine.low %v859_v7, %v869_v63  ;;  %v1458_v8 = vrot.slane %v1456_v61, 4  ;;  %v1486_v10 = vor.u32 %v1485_v59, %v1482_v58  ;;  %v1489_v11 = vshll.u32 %v4413_v3, 16  ;;  %v218_v58 = vld [vmem:[%s4324_s17 + $0x2c] sm:$0x1] }
  0x2e   : > { %v1461_v15 = vrot.slane %v1459_v0, 5  ;;  %v1495_v16 = vrot.slane %v1493_v45, 4  ;;  %v1499_v18 = vshll.u32 %v4434_v62, 16  ;;  %v1465_v21 = vshll.u32 %v4428_v20, 16  ;;  %v3757_v0 = vld [vmem:[%s4324_s17 + $0x24] sm:$0xe] }
  0x2f   : > { %v1487_v22 = vrot.slane %v1486_v10, 4  ;;  %v1491_v23 = vrot.slane %v1489_v11, 5  ;;  %v1471_v24 = vrot.slane %v1469_v2, 4  ;;  %v1475_v25 = vshll.u32 %v4442_v5, 16 }
  0x30   : > { %2383 = vrot.lane.b32.xlu0 %v3852_v6, %s4286_s22  ;;  %v1501_v27 = vrot.slane %v1499_v18, 5  ;;  %v1462_v28 = vor.u32 %v1461_v15, %v1458_v8  ;;  %v1467_v29 = vrot.slane %v1465_v21, 5  ;;  %v283_v31 = vshrl.u32 %v187_v14, 16  ;;  %v4213_v15 = vld [vmem:[%s5947_s1] sm:$0xff]  }
  0x31   : > { %2561 = vrot.lane.b32.xlu1 %v3885_v60, %s4287_s23  ;;  %v1492_v32 = vsel %vm4392_vm5, %v1487_v22, %v1491_v23  ;;  %v1496_v33 = vor.u32 %v1495_v16, %v1491_v23  ;;  %v1477_v35 = vrot.slane %v1475_v25, 5  ;;  %v286_v36 = vshll.u32 %v187_v14, 16  ;;  %v621_v14 = vld [vmem:[%s4324_s17 + $0x24] sm:$0xe]  ;;  %4132 = vmatprep.subr.bf16.mxu0 %v4213_v15 }
  0x32   : > { %v1463_v37 = vrot.slane %v1462_v28, 4  ;;  %v1472_v38 = vor.u32 %v1471_v24, %v1467_v29  ;;  %v285_v39 = vrot.slane %v283_v31, 4  ;;  %v292_v41 = vshll.u32 %v4451_v26, 16  ;;  %v620_v28 = vld [vmem:[%s4324_s17 + $0x18] sm:$0xe]  ;;  %4170 = vmatprep.subr.bf16.mxu1 %v4213_v15  ;;  %4133 = vmatpush3.bf16.msra.mxu0 %v4213_v15 }
  0x33   : > { %v1497_v42 = vrot.slane %v1496_v33, 4  ;;  %v288_v43 = vrot.slane %v286_v36, 5  ;;  %v296_v44 = vshrl.u32 %v4451_v26, 16  ;;  %v302_v46 = vshll.u32 %v4455_v30, 16  ;;  %4173 = vmatpush3.bf16.msra.mxu1 %v4213_v15  ;;  %v3678_v15 = vld [vmem:[%s4324_s17 + $0x24] sm:$0xe] }
  0x34   : > { %2559 = vrot.lane.b32.xlu0 %v3884_v4, %s4287_s23  ;;  %v1468_v1 = vsel %vm4392_vm5, %v1463_v37, %v1467_v29  ;;  %v1473_v47 = vrot.slane %v1472_v38, 4  ;;  %v294_v48 = vrot.slane %v292_v41, 5  ;;  %v3772_v7 = vrot.slane %v3756_v34, 9  ;;  %v4499_v37 = vld [vmem:[%s4324_s17 + $0x30] sm:$0xf]  ;;  %v4216_v38 = vld [vmem:[%s5947_s1 + $0x8] sm:$0xff]  }
  0x35   : > { %v1502_v49 = vsel %vm4392_vm5, %v1497_v42, %v1501_v27  ;;  %v289_v40 = vor.u32 %v288_v43, %v285_v39  ;;  %v298_v13 = vrot.slane %v296_v44, 4  ;;  %v304_v50 = vrot.slane %v302_v46, 5  ;;  %4134 = vmatprep.subr.bf16.mxu0 %v4216_v38  ;;  %4171 = vmatprep.subr.bf16.mxu1 %v4216_v38 }
  0x36   : > { %v3901_v52 = vcombine.low %v1492_v32, %v1502_v49  ;;  %v1478_v53 = vsel %vm4392_vm5, %v1473_v47, %v1477_v35  ;;  %v1905_v54 = vrot.slane %v4428_v20, 5  ;;  %v1908_v45 = vrot.slane %v4442_v5, 5  ;;  %v4513_v47 = vld [vmem:[%s4324_s17 + $0x34] sm:$0xf]  ;;  %4135 = vmatpush3.bf16.msra.mxu0 %v4216_v38 }
  0x37   : > { %v3900_v55 = vcombine.low %v1468_v1, %v1478_v53  ;;  %v290_v56 = vrot.slane %v289_v40, 4  ;;  %v299_v57 = vor.u32 %v298_v13, %v294_v48  ;;  %v307_v12 = vshrl.u32 %v189_v9, 16  ;;  %v3632_v40 = vld [vmem:[%s4324_s17 + $0x24] sm:$0xf]  ;;  %v4522_v13 = vld [vmem:[%s4324_s17 + $0x28] sm:$0xf]  ;;  %4174 = vmatpush3.bf16.msra.mxu1 %v4216_v38 }
  0x38   : > { %2641 = vrot.lane.b32.xlu1 %v3901_v52, %s4288_s24  ;;  %v1906_v59 = vsel %vm4348_vm2, %v3772_v7, %v1905_v54  ;;  %v1907_v60 = vrot.slane %v1905_v54, 4  ;;  %v310_v61 = vshll.u32 %v189_v9, 16  ;;  %v316_v63 = vshll.u32 %v190_v51, 16 }
  0x39   : > { %2639 = vrot.lane.b32.xlu0 %v3900_v55, %s4288_s24  ;;  %v295_v20 = vsel %vm4392_vm5, %v290_v56, %v294_v48  ;;  %v300_v2 = vrot.slane %v299_v57, 4  ;;  %v309_v4 = vrot.slane %v307_v12, 4  ;;  %v320_v5 = vshrl.u32 %v190_v51, 16  ;;  %v3663_v55 = vld [vmem:[%s4324_s17 + $0x38] sm:$0x1] }
  0x3a   : > { %v1909_v6 = vsel %vm4348_vm2, %v1907_v60, %v1908_v45  ;;  %v312_v8 = vrot.slane %v310_v61, 5  ;;  %v318_v10 = vrot.slane %v316_v63, 5  ;;  %v326_v11 = vshll.u32 %v218_v58, 16 }
  0x3b   : > { %v305_v16 = vsel %vm4392_vm5, %v300_v2, %v304_v50  ;;  %v3916_v18 = vcombine.low %v1906_v59, %v1909_v6  ;;  %v322_v21 = vrot.slane %v320_v5, 4  ;;  %v3773_v22 = vrot.slane %v3757_v0, 9  ;;  %v3662_v0 = vld [vmem:[%s4324_s17 + $0x2c] sm:$0x1] }
  0x3c   : > { %v3806_v23 = vcombine.low %v295_v20, %v305_v16  ;;  %v313_v24 = vor.u32 %v312_v8, %v309_v4  ;;  %v328_v25 = vrot.slane %v326_v11, 5  ;;  %v1912_v27 = vrot.slane %v4413_v3, 5  ;;  %v3679_v20 = vld [vmem:[%s4324_s17 + $0x30] sm:$0xe] }
  0x3d   : > { %2719 = vrot.lane.b32.xlu0 %v3916_v18, %s4289_s27  ;;  %v323_v29 = vor.u32 %v322_v21, %v318_v10  ;;  %v1915_v31 = vrot.slane %v4434_v62, 5  ;;  %v3615_v32 = vrot.slane %v621_v14, 9  ;;  %v708_v33 = vrot.slane %v190_v51, 5 }
  0x3e   : > { %2131 = vrot.lane.b32.xlu1 %v3806_v23, %s4285_s21  ;;  %v314_v35 = vrot.slane %v313_v24, 4  ;;  %v1913_v3 = vsel %vm4348_vm2, %v3773_v22, %v1912_v27  ;;  %v1914_v36 = vrot.slane %v1912_v27, 4  ;;  %v711_v34 = vrot.slane %v218_v58, 5 }
  0x3f   : > { %v324_v62 = vrot.slane %v323_v29, 4  ;;  %v709_v39 = vsel %vm4348_vm2, %v3615_v32, %v708_v33  ;;  %v710_v41 = vrot.slane %v708_v33, 4  ;;  %v3614_v42 = vrot.slane %v620_v28, 9  ;;  %v4546_v33 = vld [vmem:[%s4324_s17 + $0x3c] sm:$0xf] }
  0x40   : > { %v319_v43 = vsel %vm4392_vm5, %v314_v35, %v318_v10  ;;  %v1916_v44 = vsel %vm4348_vm2, %v1914_v36, %v1915_v31  ;;  %v701_v46 = vrot.slane %v4451_v26, 5  ;;  %v704_v1 = vrot.slane %v4455_v30, 5 }
  0x41   : > { %v329_v48 = vsel %vm4392_vm5, %v324_v62, %v328_v25  ;;  %v3917_v7 = vcombine.low %v1913_v3, %v1916_v44  ;;  %v712_v9 = vsel %vm4348_vm2, %v710_v41, %v711_v34  ;;  %v919_v49 = vshrl.u32 %v4499_v37, 16 }
  0x42   : > { %v3807_v26 = vcombine.low %v319_v43, %v329_v48  ;;  %v3823_v30 = vcombine.low %v709_v39, %v712_v9  ;;  %v702_v50 = vsel %vm4348_vm2, %v3614_v42, %v701_v46  ;;  %v703_v51 = vrot.slane %v701_v46, 4  ;;  %v4560_v43 = vld [vmem:[%s4324_s17 + $0x40] sm:$0xf]  ;;  %v3712_v9 = vld [vmem:[%s4324_s17 + $0x30] sm:$0xf] }
  0x43   : > { %2721 = vrot.lane.b32.xlu0 %v3917_v7, %s4289_s27  ;;  %v921_v52 = vrot.slane %v919_v49, 4  ;;  %v922_v53 = vshll.u32 %v4499_v37, 16  ;;  %v932_v54 = vshrl.u32 %v4513_v47, 16  ;;  %v3839_v45 = vcombine.low %v4499_v37, %v4513_v47  ;;  %v4570_v49 = vld [vmem:[%s4324_s17 + $0x34] sm:$0xf] }
  0x44   : > { %2133 = vrot.lane.b32.xlu1 %v3807_v26, %s4285_s21  ;;  %v705_v56 = vsel %vm4348_vm2, %v703_v51, %v704_v1  ;;  %v895_v57 = vshrl.u32 %v3632_v40, 16  ;;  %v898_v58 = vshll.u32 %v3632_v40, 16  ;;  %v908_v12 = vshrl.u32 %v4522_v13, 16 }
  0x45   : > { %v3822_v59 = vcombine.low %v702_v50, %v705_v56  ;;  %v924_v60 = vrot.slane %v922_v53, 5  ;;  %v3838_v61 = vcombine.low %v3632_v40, %v4522_v13  ;;  %v928_v63 = vshll.u32 %v4513_v47, 16 }
  0x46   : > { %v897_v2 = vrot.slane %v895_v57, 4  ;;  %v900_v4 = vrot.slane %v898_v58, 5  ;;  %v934_v5 = vrot.slane %v932_v54, 4  ;;  %v938_v6 = vshll.u32 %v3663_v55, 16  ;;  %v4581_v54 = vld [vmem:[%s4324_s17 + $0x44] sm:$0x1] }
  0x47   : > { %2211 = vrot.lane.b32.xlu0 %v3822_v59, %s4284_s20  ;;  %v925_v8 = vor.u32 %v924_v60, %v921_v52  ;;  %v930_v10 = vrot.slane %v928_v63, 5  ;;  %v904_v11 = vshll.u32 %v4522_v13, 16  ;;  %v910_v14 = vrot.slane %v908_v12, 4  ;;  %v4585_v58 = vld [vmem:[%s4324_s17 + $0x38] sm:$0x1] }
  0x48   : > { %2213 = vrot.lane.b32.xlu1 %v3823_v30, %s4284_s20  ;;  %v940_v16 = vrot.slane %v938_v6, 5  ;;  %v901_v18 = vor.u32 %v900_v4, %v897_v2  ;;  %v914_v21 = vshll.u32 %v3662_v0, 16  ;;  %v3695_v22 = vrot.slane %v3679_v20, 9  ;;  %v191_v63 = vld [vmem:[%s4324_s17 + $0x30] sm:$0xf] }
  0x49   : > { %v926_v23 = vrot.slane %v925_v8, 4  ;;  %v935_v24 = vor.u32 %v934_v5, %v930_v10  ;;  %v906_v25 = vrot.slane %v904_v11, 5  ;;  %v1317_v27 = vrot.slane %v4513_v47, 5  ;;  %v4596_v11 = vld [vmem:[%s4324_s17 + $0x34] sm:$0xf] }
  0x4a   : > { %v902_v28 = vrot.slane %v901_v18, 4  ;;  %v916_v29 = vrot.slane %v914_v21, 5  ;;  %v1320_v31 = vrot.slane %v3663_v55, 5  ;;  %v3694_v32 = vrot.slane %v3678_v15, 9  ;;  %v4599_v18 = vld [vmem:[%s4324_s17 + $0x38] sm:$0x1] }
  0x4b   : > { %2307 = vrot.lane.b32.xlu0 %v3838_v61, %s4282_s18  ;;  %v931_v35 = vsel %vm4392_vm5, %v926_v23, %v930_v10  ;;  %v936_v3 = vrot.slane %v935_v24, 4  ;;  %v911_v36 = vor.u32 %v910_v14, %v906_v25  ;;  %v1318_v34 = vsel %vm4348_vm2, %v3695_v22, %v1317_v27 }
  0x4c   : > { %2309 = vrot.lane.b32.xlu1 %v3839_v45, %s4282_s18  ;;  %v907_v37 = vsel %vm4392_vm5, %v902_v28, %v906_v25  ;;  %v1319_v38 = vrot.slane %v1317_v27, 4  ;;  %v1310_v62 = vrot.slane %v4522_v13, 5  ;;  %v1313_v39 = vrot.slane %v3662_v0, 5  ;;  %v3758_v27 = vld [vmem:[%s4324_s17 + $0x30] sm:$0xe] }
  0x4d   : > { %v941_v41 = vsel %vm4392_vm5, %v936_v3, %v940_v16  ;;  %v912_v42 = vrot.slane %v911_v36, 4  ;;  %v1528_v44 = vshrl.u32 %v4546_v33, 16  ;;  %v1531_v46 = vshll.u32 %v4546_v33, 16 }
  0x4e   : > { %v3855_v1 = vcombine.low %v931_v35, %v941_v41  ;;  %v1321_v47 = vsel %vm4348_vm2, %v1319_v38, %v1320_v31  ;;  %v1311_v48 = vsel %vm4348_vm2, %v3694_v32, %v1310_v62  ;;  %v1312_v7 = vrot.slane %v1310_v62, 4 }
  0x4f   : > { %v917_v40 = vsel %vm4392_vm5, %v912_v42, %v916_v29  ;;  %v3871_v13 = vcombine.low %v1318_v34, %v1321_v47  ;;  %v1530_v26 = vrot.slane %v1528_v44, 4  ;;  %v1533_v30 = vrot.slane %v1531_v46, 5 }
  0x50   : > { %2389 = vrot.lane.b32.xlu1 %v3855_v1, %s4286_s22  ;;  %v3854_v50 = vcombine.low %v907_v37, %v917_v40  ;;  %v1314_v51 = vsel %vm4348_vm2, %v1312_v7, %v1313_v39  ;;  %v1541_v52 = vshrl.u32 %v4560_v43, 16  ;;  %v3887_v53 = vcombine.low %v4546_v33, %v4560_v43  ;;  %v193_v39 = vld [vmem:[%s4324_s17 + $0x3c] sm:$0xf]  ;;  %v194_v1 = vld [vmem:[%s4324_s17 + $0x40] sm:$0xf] }
  0x51   : > { %v3870_v45 = vcombine.low %v1311_v48, %v1314_v51  ;;  %v1504_v55 = vshrl.u32 %v3712_v9, 16  ;;  %v1507_v56 = vshll.u32 %v3712_v9, 16  ;;  %v1517_v57 = vshrl.u32 %v4570_v49, 16 }
  0x52   : > { %2387 = vrot.lane.b32.xlu0 %v3854_v50, %s4286_s22  ;;  %v3886_v12 = vcombine.low %v3712_v9, %v4570_v49  ;;  %v1534_v59 = vor.u32 %v1533_v30, %v1530_v26  ;;  %v1537_v60 = vshll.u32 %v4560_v43, 16  ;;  %v1543_v61 = vrot.slane %v1541_v52, 4  ;;  %v220_v30 = vld [vmem:[%s4324_s17 + $0x44] sm:$0x1] }
  0x53   : > { %v1506_v0 = vrot.slane %v1504_v55, 4  ;;  %v1509_v20 = vrot.slane %v1507_v56, 5  ;;  %v1547_v2 = vshll.u32 %v4581_v54, 16  ;;  %v1513_v4 = vshll.u32 %v4570_v49, 16  ;;  %v3759_v55 = vld [vmem:[%s4324_s17 + $0x3c] sm:$0xe] }
  0x54   : > { %2469 = vrot.lane.b32.xlu1 %v3871_v13, %s4283_s19  ;;  %v1535_v5 = vrot.slane %v1534_v59, 4  ;;  %v1539_v6 = vrot.slane %v1537_v60, 5  ;;  %v1519_v8 = vrot.slane %v1517_v57, 4  ;;  %v1523_v10 = vshll.u32 %v4585_v58, 16 }
  0x55   : > { %v1549_v14 = vrot.slane %v1547_v2, 5  ;;  %v1510_v15 = vor.u32 %v1509_v20, %v1506_v0  ;;  %v1515_v16 = vrot.slane %v1513_v4, 5  ;;  %v331_v21 = vshrl.u32 %v191_v63, 16 }
  0x56   : > { %2467 = vrot.lane.b32.xlu0 %v3870_v45, %s4283_s19  ;;  %v1540_v22 = vsel %vm4392_vm5, %v1535_v5, %v1539_v6  ;;  %v1544_v23 = vor.u32 %v1543_v61, %v1539_v6  ;;  %v1525_v24 = vrot.slane %v1523_v10, 5  ;;  %v334_v25 = vshll.u32 %v191_v63, 16  ;;  %v623_v63 = vld [vmem:[%s4324_s17 + $0x3c] sm:$0xe] }
  0x57   : > { %v1511_v28 = vrot.slane %v1510_v15, 4  ;;  %v1520_v29 = vor.u32 %v1519_v8, %v1515_v16  ;;  %v333_v31 = vrot.slane %v331_v21, 4  ;;  %v340_v32 = vshll.u32 %v4596_v11, 16 }
  0x58   : > { %2565 = vrot.lane.b32.xlu1 %v3887_v53, %s4287_s23  ;;  %v1545_v33 = vrot.slane %v1544_v23, 4  ;;  %v336_v35 = vrot.slane %v334_v25, 5  ;;  %v344_v3 = vshrl.u32 %v4596_v11, 16  ;;  %v350_v36 = vshll.u32 %v4599_v18, 16 }
  0x59   : > { %v1516_v34 = vsel %vm4392_vm5, %v1511_v28, %v1515_v16  ;;  %v1521_v37 = vrot.slane %v1520_v29, 4  ;;  %v342_v38 = vrot.slane %v340_v32, 5  ;;  %v3774_v62 = vrot.slane %v3758_v27, 9 }
  0x5a   : > { %2563 = vrot.lane.b32.xlu0 %v3886_v12, %s4287_s23  ;;  %v1550_v41 = vsel %vm4392_vm5, %v1545_v33, %v1549_v14  ;;  %v337_v42 = vor.u32 %v336_v35, %v333_v31  ;;  %v346_v44 = vrot.slane %v344_v3, 4  ;;  %v352_v46 = vrot.slane %v350_v36, 5  ;;  %v622_v14 = vld [vmem:[%s4324_s17 + $0x30] sm:$0xe]  ;;  %v3639_v36 = vld [vmem:[%s4324_s17 + $0x4c] sm:$0xf] }
  0x5b   : > { %v3903_v47 = vcombine.low %v1540_v22, %v1550_v41  ;;  %v1526_v48 = vsel %vm4392_vm5, %v1521_v37, %v1525_v24  ;;  %v1919_v7 = vrot.slane %v4570_v49, 5  ;;  %v1922_v9 = vrot.slane %v4585_v58, 5  ;;  %v4659_v41 = vld [vmem:[%s4324_s17 + $0x40] sm:$0xf] }
  0x5c   : > { %v3902_v40 = vcombine.low %v1516_v34, %v1526_v48  ;;  %v338_v13 = vrot.slane %v337_v42, 4  ;;  %v347_v26 = vor.u32 %v346_v44, %v342_v38  ;;  %v355_v50 = vshrl.u32 %v193_v39, 16 }
  0x5d   : > { %2645 = vrot.lane.b32.xlu1 %v3903_v47, %s4288_s24  ;;  %v1920_v51 = vsel %vm4348_vm2, %v3774_v62, %v1919_v7  ;;  %v1921_v52 = vrot.slane %v1919_v7, 4  ;;  %v358_v53 = vshll.u32 %v193_v39, 16  ;;  %v364_v45 = vshll.u32 %v194_v1, 16  ;;  %v3636_v39 = vld [vmem:[%s4324_s17 + $0x3c] sm:$0xf] }
  0x5e   : > { %2643 = vrot.lane.b32.xlu0 %v3902_v40, %s4288_s24  ;;  %v343_v49 = vsel %vm4392_vm5, %v338_v13, %v342_v38  ;;  %v348_v56 = vrot.slane %v347_v26, 4  ;;  %v357_v57 = vrot.slane %v355_v50, 4  ;;  %v368_v58 = vshrl.u32 %v194_v1, 16  ;;  %v3665_v7 = vld [vmem:[%s4324_s17 + $0x50] sm:$0x1] }
  0x5f   : > { %v1923_v12 = vsel %vm4348_vm2, %v1921_v52, %v1922_v9  ;;  %v360_v59 = vrot.slane %v358_v53, 5  ;;  %v366_v60 = vrot.slane %v364_v45, 5  ;;  %v374_v61 = vshll.u32 %v220_v30, 16  ;;  %v3664_v53 = vld [vmem:[%s4324_s17 + $0x44] sm:$0x1] }
  0x60   : > { %v353_v0 = vsel %vm4392_vm5, %v348_v56, %v352_v46  ;;  %v3918_v20 = vcombine.low %v1920_v51, %v1923_v12  ;;  %v370_v2 = vrot.slane %v368_v58, 4  ;;  %v3775_v4 = vrot.slane %v3759_v55, 9  ;;  %v3681_v45 = vld [vmem:[%s4324_s17 + $0x48] sm:$0xe] }
  0x61   : > { %v3808_v5 = vcombine.low %v343_v49, %v353_v0  ;;  %v361_v6 = vor.u32 %v360_v59, %v357_v57  ;;  %v376_v8 = vrot.slane %v374_v61, 5  ;;  %v1926_v10 = vrot.slane %v4560_v43, 5  ;;  %v4641_v43 = vld [vmem:[%s4324_s17 + $0x48] sm:$0xf]  ;;  %v3680_v61 = vld [vmem:[%s4324_s17 + $0x3c] sm:$0xe] }
  0x62   : > { %2723 = vrot.lane.b32.xlu0 %v3918_v20, %s4289_s27  ;;  %v371_v15 = vor.u32 %v370_v2, %v366_v60  ;;  %v1929_v16 = vrot.slane %v4581_v54, 5  ;;  %v3617_v21 = vrot.slane %v623_v63, 9  ;;  %v722_v22 = vrot.slane %v194_v1, 5 }
  0x63   : > { %2135 = vrot.lane.b32.xlu1 %v3808_v5, %s4285_s21  ;;  %v362_v23 = vrot.slane %v361_v6, 4  ;;  %v1927_v24 = vsel %vm4348_vm2, %v3775_v4, %v1926_v10  ;;  %v1928_v25 = vrot.slane %v1926_v10, 4  ;;  %v725_v27 = vrot.slane %v220_v30, 5 }
  0x64   : > { %v372_v28 = vrot.slane %v371_v15, 4  ;;  %v723_v29 = vsel %vm4348_vm2, %v3617_v21, %v722_v22  ;;  %v724_v54 = vrot.slane %v722_v22, 4  ;;  %v3616_v31 = vrot.slane %v622_v14, 9  ;;  %v4679_v21 = vld [vmem:[%s4324_s17 + $0x54] sm:$0xf] }
  0x65   : > { %v367_v32 = vsel %vm4392_vm5, %v362_v23, %v366_v60  ;;  %v1930_v33 = vsel %vm4348_vm2, %v1928_v25, %v1929_v16  ;;  %v715_v35 = vrot.slane %v4596_v11, 5  ;;  %v718_v3 = vrot.slane %v4599_v18, 5 }
  0x66   : > { %v377_v34 = vsel %vm4392_vm5, %v372_v28, %v376_v8  ;;  %v3919_v37 = vcombine.low %v1927_v24, %v1930_v33  ;;  %v726_v38 = vsel %vm4348_vm2, %v724_v54, %v725_v27  ;;  %v967_v62 = vshrl.u32 %v4641_v43, 16 }
  0x67   : > { %v3809_v42 = vcombine.low %v367_v32, %v377_v34  ;;  %v3825_v44 = vcombine.low %v723_v29, %v726_v38  ;;  %v716_v11 = vsel %vm4348_vm2, %v3616_v31, %v715_v35  ;;  %v717_v18 = vrot.slane %v715_v35, 4  ;;  %v4693_v32 = vld [vmem:[%s4324_s17 + $0x58] sm:$0xf]  ;;  %v3716_v38 = vld [vmem:[%s4324_s17 + $0x48] sm:$0xf] }
  0x68   : > { %2725 = vrot.lane.b32.xlu0 %v3919_v37, %s4289_s27  ;;  %v969_v46 = vrot.slane %v967_v62, 4  ;;  %v970_v1 = vshll.u32 %v4641_v43, 16  ;;  %v980_v47 = vshrl.u32 %v3639_v36, 16  ;;  %v3841_v48 = vcombine.low %v4641_v43, %v3639_v36  ;;  %v4703_v62 = vld [vmem:[%s4324_s17 + $0x4c] sm:$0xf] }
  0x69   : > { %2137 = vrot.lane.b32.xlu1 %v3809_v42, %s4285_s21  ;;  %v719_v9 = vsel %vm4348_vm2, %v717_v18, %v718_v3  ;;  %v943_v40 = vshrl.u32 %v3636_v39, 16  ;;  %v946_v13 = vshll.u32 %v3636_v39, 16  ;;  %v956_v26 = vshrl.u32 %v4659_v41, 16 }
  0x6a   : > { %v3824_v30 = vcombine.low %v716_v11, %v719_v9  ;;  %v972_v50 = vrot.slane %v970_v1, 5  ;;  %v3840_v51 = vcombine.low %v3636_v39, %v4659_v41  ;;  %v976_v52 = vshll.u32 %v3639_v36, 16 }
  0x6b   : > { %v945_v55 = vrot.slane %v943_v40, 4  ;;  %v948_v49 = vrot.slane %v946_v13, 5  ;;  %v982_v56 = vrot.slane %v980_v47, 4  ;;  %v986_v57 = vshll.u32 %v3665_v7, 16  ;;  %v4714_v47 = vld [vmem:[%s4324_s17 + $0x5c] sm:$0x1] }
  0x6c   : > { %2215 = vrot.lane.b32.xlu0 %v3824_v30, %s4284_s20  ;;  %v973_v58 = vor.u32 %v972_v50, %v969_v46  ;;  %v978_v12 = vrot.slane %v976_v52, 5  ;;  %v952_v59 = vshll.u32 %v4659_v41, 16  ;;  %v958_v60 = vrot.slane %v956_v26, 4  ;;  %v4718_v13 = vld [vmem:[%s4324_s17 + $0x50] sm:$0x1] }
  0x6d   : > { %2217 = vrot.lane.b32.xlu1 %v3825_v44, %s4284_s20  ;;  %v988_v63 = vrot.slane %v986_v57, 5  ;;  %v949_v0 = vor.u32 %v948_v49, %v945_v55  ;;  %v962_v20 = vshll.u32 %v3664_v53, 16  ;;  %v3697_v2 = vrot.slane %v3681_v45, 9  ;;  %v195_v52 = vld [vmem:[%s4324_s17 + $0x48] sm:$0xf] }
  0x6e   : > { %v974_v4 = vrot.slane %v973_v58, 4  ;;  %v983_v5 = vor.u32 %v982_v56, %v978_v12  ;;  %v954_v6 = vrot.slane %v952_v59, 5  ;;  %v1331_v8 = vrot.slane %v3639_v36, 5  ;;  %v4729_v59 = vld [vmem:[%s4324_s17 + $0x4c] sm:$0xf] }
  0x6f   : > { %v950_v10 = vrot.slane %v949_v0, 4  ;;  %v964_v14 = vrot.slane %v962_v20, 5  ;;  %v1334_v15 = vrot.slane %v3665_v7, 5  ;;  %v3696_v16 = vrot.slane %v3680_v61, 9  ;;  %v4732_v0 = vld [vmem:[%s4324_s17 + $0x50] sm:$0x1] }
  0x70   : > { %2311 = vrot.lane.b32.xlu0 %v3840_v51, %s4282_s18  ;;  %v979_v22 = vsel %vm4392_vm5, %v974_v4, %v978_v12  ;;  %v984_v23 = vrot.slane %v983_v5, 4  ;;  %v959_v24 = vor.u32 %v958_v60, %v954_v6  ;;  %v1332_v25 = vsel %vm4348_vm2, %v3697_v2, %v1331_v8 }
  0x71   : > { %2313 = vrot.lane.b32.xlu1 %v3841_v48, %s4282_s18  ;;  %v955_v27 = vsel %vm4392_vm5, %v950_v10, %v954_v6  ;;  %v1333_v43 = vrot.slane %v1331_v8, 4  ;;  %v1324_v28 = vrot.slane %v4659_v41, 5  ;;  %v1327_v29 = vrot.slane %v3664_v53, 5  ;;  %v3760_v8 = vld [vmem:[%s4324_s17 + $0x48] sm:$0xe] }
  0x72   : > { %v989_v54 = vsel %vm4392_vm5, %v984_v23, %v988_v63  ;;  %v960_v31 = vrot.slane %v959_v24, 4  ;;  %v1576_v33 = vshrl.u32 %v4679_v21, 16  ;;  %v1579_v35 = vshll.u32 %v4679_v21, 16 }
  0x73   : > { %v3857_v3 = vcombine.low %v979_v22, %v989_v54  ;;  %v1335_v36 = vsel %vm4348_vm2, %v1333_v43, %v1334_v15  ;;  %v1325_v34 = vsel %vm4348_vm2, %v3696_v16, %v1324_v28  ;;  %v1326_v37 = vrot.slane %v1324_v28, 4 }
  0x74   : > { %v965_v39 = vsel %vm4392_vm5, %v960_v31, %v964_v14  ;;  %v3873_v41 = vcombine.low %v1332_v25, %v1335_v36  ;;  %v1578_v42 = vrot.slane %v1576_v33, 4  ;;  %v1581_v44 = vrot.slane %v1579_v35, 5 }
  0x75   : > { %2393 = vrot.lane.b32.xlu1 %v3857_v3, %s4286_s22  ;;  %v3856_v11 = vcombine.low %v955_v27, %v965_v39  ;;  %v1328_v18 = vsel %vm4348_vm2, %v1326_v37, %v1327_v29  ;;  %v1589_v46 = vshrl.u32 %v4693_v32, 16  ;;  %v3889_v1 = vcombine.low %v4679_v21, %v4693_v32  ;;  %v197_v29 = vld [vmem:[%s4324_s17 + $0x54] sm:$0xf]  ;;  %v198_v3 = vld [vmem:[%s4324_s17 + $0x58] sm:$0xf] }
  0x76   : > { %v3872_v48 = vcombine.low %v1325_v34, %v1328_v18  ;;  %v1552_v7 = vshrl.u32 %v3716_v38, 16  ;;  %v1555_v9 = vshll.u32 %v3716_v38, 16  ;;  %v1565_v40 = vshrl.u32 %v4703_v62, 16 }
  0x77   : > { %2391 = vrot.lane.b32.xlu0 %v3856_v11, %s4286_s22  ;;  %v3888_v26 = vcombine.low %v3716_v38, %v4703_v62  ;;  %v1582_v30 = vor.u32 %v1581_v44, %v1578_v42  ;;  %v1585_v50 = vshll.u32 %v4693_v32, 16  ;;  %v1591_v51 = vrot.slane %v1589_v46, 4  ;;  %v222_v44 = vld [vmem:[%s4324_s17 + $0x5c] sm:$0x1] }
  0x78   : > { %v1554_v53 = vrot.slane %v1552_v7, 4  ;;  %v1557_v45 = vrot.slane %v1555_v9, 5  ;;  %v1595_v55 = vshll.u32 %v4714_v47, 16  ;;  %v1561_v49 = vshll.u32 %v4703_v62, 16  ;;  %v3761_v7 = vld [vmem:[%s4324_s17 + $0x54] sm:$0xe] }
  0x79   : > { %2473 = vrot.lane.b32.xlu1 %v3873_v41, %s4283_s19  ;;  %v1583_v56 = vrot.slane %v1582_v30, 4  ;;  %v1587_v57 = vrot.slane %v1585_v50, 5  ;;  %v1567_v58 = vrot.slane %v1565_v40, 4  ;;  %v1571_v12 = vshll.u32 %v4718_v13, 16 }
  0x7a   : > { %v1597_v60 = vrot.slane %v1595_v55, 5  ;;  %v1558_v61 = vor.u32 %v1557_v45, %v1554_v53  ;;  %v1563_v63 = vrot.slane %v1561_v49, 5  ;;  %v379_v20 = vshrl.u32 %v195_v52, 16 }
  0x7b   : > { %2471 = vrot.lane.b32.xlu0 %v3872_v48, %s4283_s19  ;;  %v1588_v2 = vsel %vm4392_vm5, %v1583_v56, %v1587_v57  ;;  %v1592_v4 = vor.u32 %v1591_v51, %v1587_v57  ;;  %v1573_v5 = vrot.slane %v1571_v12, 5  ;;  %v382_v6 = vshll.u32 %v195_v52, 16  ;;  %v625_v52 = vld [vmem:[%s4324_s17 + $0x54] sm:$0xe] }
  0x7c   : > { %v1559_v10 = vrot.slane %v1558_v61, 4  ;;  %v1568_v14 = vor.u32 %v1567_v58, %v1563_v63  ;;  %v381_v15 = vrot.slane %v379_v20, 4  ;;  %v388_v16 = vshll.u32 %v4729_v59, 16 }
  0x7d   : > { %2569 = vrot.lane.b32.xlu1 %v3889_v1, %s4287_s23  ;;  %v1593_v21 = vrot.slane %v1592_v4, 4  ;;  %v384_v22 = vrot.slane %v382_v6, 5  ;;  %v392_v23 = vshrl.u32 %v4729_v59, 16  ;;  %v398_v24 = vshll.u32 %v4732_v0, 16 }
  0x7e   : > { %v1564_v25 = vsel %vm4392_vm5, %v1559_v10, %v1563_v63  ;;  %v1569_v27 = vrot.slane %v1568_v14, 4  ;;  %v390_v43 = vrot.slane %v388_v16, 5  ;;  %v3776_v28 = vrot.slane %v3760_v8, 9  ;;  %v4774_v10 = vld [vmem:[%s4324_s17 + $0x60] sm:$0xf] }
  0x7f   : > { %2567 = vrot.lane.b32.xlu0 %v3888_v26, %s4287_s23  ;;  %v1598_v54 = vsel %vm4392_vm5, %v1593_v21, %v1597_v60  ;;  %v385_v31 = vor.u32 %v384_v22, %v381_v15  ;;  %v394_v33 = vrot.slane %v392_v23, 4  ;;  %v400_v35 = vrot.slane %v398_v24, 5  ;;  %v624_v60 = vld [vmem:[%s4324_s17 + $0x48] sm:$0xe] }
  0x80   : > { %v3905_v36 = vcombine.low %v1588_v2, %v1598_v54  ;;  %v1574_v34 = vsel %vm4392_vm5, %v1569_v27, %v1573_v5  ;;  %v1933_v37 = vrot.slane %v4703_v62, 5  ;;  %v1936_v38 = vrot.slane %v4718_v13, 5  ;;  %v3640_v54 = vld [vmem:[%s4324_s17 + $0x54] sm:$0xf] }
  0x81   : > { %v3904_v39 = vcombine.low %v1564_v25, %v1574_v34  ;;  %v386_v41 = vrot.slane %v385_v31, 4  ;;  %v395_v42 = vor.u32 %v394_v33, %v390_v43  ;;  %v403_v11 = vshrl.u32 %v197_v29, 16  ;;  %v4787_v25 = vld [vmem:[%s4324_s17 + $0x64] sm:$0xf]  ;;  %v4796_v31 = vld [vmem:[%s4324_s17 + $0x58] sm:$0xf] }
  0x82   : > { %2649 = vrot.lane.b32.xlu1 %v3905_v36, %s4288_s24  ;;  %v1934_v18 = vsel %vm4348_vm2, %v3776_v28, %v1933_v37  ;;  %v1935_v46 = vrot.slane %v1933_v37, 4  ;;  %v406_v1 = vshll.u32 %v197_v29, 16  ;;  %v412_v48 = vshll.u32 %v198_v3, 16 }
  0x83   : > { %2647 = vrot.lane.b32.xlu0 %v3904_v39, %s4288_s24  ;;  %v391_v62 = vsel %vm4392_vm5, %v386_v41, %v390_v43  ;;  %v396_v9 = vrot.slane %v395_v42, 4  ;;  %v405_v40 = vrot.slane %v403_v11, 4  ;;  %v416_v13 = vshrl.u32 %v198_v3, 16 }
  0x84   : > { %v1937_v26 = vsel %vm4348_vm2, %v1935_v46, %v1936_v38  ;;  %v408_v30 = vrot.slane %v406_v1, 5  ;;  %v414_v50 = vrot.slane %v412_v48, 5  ;;  %v422_v51 = vshll.u32 %v222_v44, 16  ;;  %v3667_v38 = vld [vmem:[%s4324_s17 + $0x68] sm:$0x1] }
  0x85   : > { %v401_v53 = vsel %vm4392_vm5, %v396_v9, %v400_v35  ;;  %v3920_v45 = vcombine.low %v1934_v18, %v1937_v26  ;;  %v418_v55 = vrot.slane %v416_v13, 4  ;;  %v3777_v49 = vrot.slane %v3761_v7, 9  ;;  %v3666_v7 = vld [vmem:[%s4324_s17 + $0x5c] sm:$0x1] }
  0x86   : > { %v3810_v56 = vcombine.low %v391_v62, %v401_v53  ;;  %v409_v57 = vor.u32 %v408_v30, %v405_v40  ;;  %v424_v58 = vrot.slane %v422_v51, 5  ;;  %v1940_v12 = vrot.slane %v4693_v32, 5  ;;  %v4778_v16 = vpop.permute.xlu1 %2305  ;;  %v3683_v62 = vld [vmem:[%s4324_s17 + $0x60] sm:$0xe] }
  0x87   : > { %2727 = vrot.lane.b32.xlu0 %v3920_v45, %s4289_s27  ;;  %v419_v61 = vor.u32 %v418_v55, %v414_v50  ;;  %v1943_v63 = vrot.slane %v4714_v47, 5  ;;  %v3619_v20 = vrot.slane %v625_v52, 9  ;;  %v736_v2 = vrot.slane %v198_v3, 5  ;;  %v4810_v11 = vpop.permute.xlu0 %2303  ;;  %v3682_v45 = vld [vmem:[%s4324_s17 + $0x54] sm:$0xe] }
  0x88   : > { %2139 = vrot.lane.b32.xlu1 %v3810_v56, %s4285_s21  ;;  %v410_v4 = vrot.slane %v409_v57, 4  ;;  %v1941_v5 = vsel %vm4348_vm2, %v3777_v49, %v1940_v12  ;;  %v1942_v6 = vrot.slane %v1940_v12, 4  ;;  %v739_v8 = vrot.slane %v222_v44, 5 }
  0x89   : > { %v420_v32 = vrot.slane %v419_v61, 4  ;;  %v737_v14 = vsel %vm4348_vm2, %v3619_v20, %v736_v2  ;;  %v738_v47 = vrot.slane %v736_v2, 4  ;;  %v3618_v15 = vrot.slane %v624_v60, 9 }
  0x8a   : > { %v415_v21 = vsel %vm4392_vm5, %v410_v4, %v414_v50  ;;  %v1944_v22 = vsel %vm4348_vm2, %v1942_v6, %v1943_v63  ;;  %v729_v23 = vrot.slane %v4729_v59, 5  ;;  %v732_v24 = vrot.slane %v4732_v0, 5  ;;  %v4826_v6 = vld [vmem:[%s4324_s17 + $0x6c] sm:$0xf] }
  0x8b   : > { %v425_v27 = vsel %vm4392_vm5, %v420_v32, %v424_v58  ;;  %v3921_v43 = vcombine.low %v1941_v5, %v1944_v22  ;;  %v740_v28 = vsel %vm4348_vm2, %v738_v47, %v739_v8  ;;  %v1015_v29 = vshrl.u32 %v4774_v10, 16 }
  0x8c   : > { %v3811_v33 = vcombine.low %v415_v21, %v425_v27  ;;  %v3827_v35 = vcombine.low %v737_v14, %v740_v28  ;;  %v730_v59 = vsel %vm4348_vm2, %v3618_v15, %v729_v23  ;;  %v731_v0 = vrot.slane %v729_v23, 4  ;;  %v4842_v27 = vld [vmem:[%s4324_s17 + $0x70] sm:$0xf] }
  0x8d   : > { %2729 = vrot.lane.b32.xlu0 %v3921_v43, %s4289_s27  ;;  %v1017_v3 = vrot.slane %v1015_v29, 4  ;;  %v1018_v36 = vshll.u32 %v4774_v10, 16  ;;  %v1028_v34 = vshrl.u32 %v4787_v25, 16  ;;  %v3843_v37 = vcombine.low %v4774_v10, %v4787_v25 }
  0x8e   : > { %2141 = vrot.lane.b32.xlu1 %v3811_v33, %s4285_s21  ;;  %v733_v39 = vsel %vm4348_vm2, %v731_v0, %v732_v24  ;;  %v991_v41 = vshrl.u32 %v3640_v54, 16  ;;  %v994_v42 = vshll.u32 %v3640_v54, 16  ;;  %v1004_v44 = vshrl.u32 %v4796_v31, 16  ;;  %v4828_v8 = vpop.permute.xlu0 %2463 }
  0x8f   : > { %v3826_v18 = vcombine.low %v730_v59, %v733_v39  ;;  %v1020_v46 = vrot.slane %v1018_v36, 5  ;;  %v3842_v1 = vcombine.low %v3640_v54, %v4796_v31  ;;  %v1024_v48 = vshll.u32 %v4787_v25, 16  ;;  %v4816_v9 = vpop.permute.xlu1 %2207  ;;  %v4854_v59 = vld [vmem:[%s4324_s17 + $0x64] sm:$0xf] }
  0x90   : > { %v993_v40 = vrot.slane %v991_v41, 4  ;;  %v996_v13 = vrot.slane %v994_v42, 5  ;;  %v1030_v26 = vrot.slane %v1028_v34, 4  ;;  %v1034_v30 = vshll.u32 %v3667_v38, 16 }
  0x91   : > { %2219 = vrot.lane.b32.xlu0 %v3826_v18, %s4284_s20  ;;  %v1021_v50 = vor.u32 %v1020_v46, %v1017_v3  ;;  %v1026_v51 = vrot.slane %v1024_v48, 5  ;;  %v1000_v52 = vshll.u32 %v4796_v31, 16  ;;  %v1006_v53 = vrot.slane %v1004_v44, 4  ;;  %v4867_v44 = vld [vmem:[%s4324_s17 + $0x74] sm:$0x1] }
  0x92   : > { %2221 = vrot.lane.b32.xlu1 %v3827_v35, %s4284_s20  ;;  %v1036_v55 = vrot.slane %v1034_v30, 5  ;;  %v997_v49 = vor.u32 %v996_v13, %v993_v40  ;;  %v1010_v56 = vshll.u32 %v3666_v7, 16  ;;  %v3699_v57 = vrot.slane %v3683_v62, 9  ;;  %v4851_v35 = vld [vmem:[%s4324_s17 + $0x60] sm:$0xf] }
  0x93   : > { %v1022_v58 = vrot.slane %v1021_v50, 4  ;;  %v1031_v12 = vor.u32 %v1030_v26, %v1026_v51  ;;  %v1002_v60 = vrot.slane %v1000_v52, 5  ;;  %v1345_v61 = vrot.slane %v4787_v25, 5  ;;  %v4823_v63 = vpop.permute.xlu1 %2209  ;;  %v4873_v62 = vld [vmem:[%s4324_s17 + $0x68] sm:$0x1] }
  0x94   : > { %v998_v20 = vrot.slane %v997_v49, 4  ;;  %v1012_v2 = vrot.slane %v1010_v56, 5  ;;  %v1348_v4 = vrot.slane %v3667_v38, 5  ;;  %v3698_v5 = vrot.slane %v3682_v45, 9 }
  0x95   : > { %2315 = vrot.lane.b32.xlu0 %v3842_v1, %s4282_s18  ;;  %v1027_v10 = vsel %vm4392_vm5, %v1022_v58, %v1026_v51  ;;  %v1032_v32 = vrot.slane %v1031_v12, 4  ;;  %v1007_v14 = vor.u32 %v1006_v53, %v1002_v60  ;;  %v1346_v47 = vsel %vm4348_vm2, %v3699_v57, %v1345_v61 }
  0x96   : > { %2317 = vrot.lane.b32.xlu1 %v3843_v37, %s4282_s18  ;;  %v1003_v15 = vsel %vm4392_vm5, %v998_v20, %v1002_v60  ;;  %v1347_v21 = vrot.slane %v1345_v61, 4  ;;  %v1338_v22 = vrot.slane %v4796_v31, 5  ;;  %v1341_v23 = vrot.slane %v3666_v7, 5  ;;  %v4246_v61 = vld [vmem:[%s4324_s17 + $0x4] sm:$0xf] }
  0x97   : > { %v1037_v24 = vsel %vm4392_vm5, %v1032_v32, %v1036_v55  ;;  %v1008_v25 = vrot.slane %v1007_v14, 4  ;;  %v1624_v43 = vshrl.u32 %v4826_v6, 16  ;;  %v1627_v28 = vshll.u32 %v4826_v6, 16  ;;  %v4858_v37 = vpop.permute.xlu1 %2465  ;;  %v4247_v20 = vld [vmem:[%s4324_s17] sm:$0xf] }
  0x98   : > { %v3859_v29 = vcombine.low %v1027_v10, %v1037_v24  ;;  %v1349_v54 = vsel %vm4348_vm2, %v1347_v21, %v1348_v4  ;;  %v1339_v33 = vsel %vm4348_vm2, %v3698_v5, %v1338_v22  ;;  %v1340_v31 = vrot.slane %v1338_v22, 4  ;;  %v199_v4 = vld [vmem:[%s4324_s17 + $0x60] sm:$0xf]  ;;  %v4894_v14 = vld [vmem:[%s4324_s17 + $0x64] sm:$0xf] }
  0x99   : > { %v1013_v0 = vsel %vm4392_vm5, %v1008_v25, %v1012_v2  ;;  %v3875_v3 = vcombine.low %v1346_v47, %v1349_v54  ;;  %v1626_v36 = vrot.slane %v1624_v43, 4  ;;  %v1629_v34 = vrot.slane %v1627_v28, 5  ;;  %v4898_v22 = vld [vmem:[%s4324_s17 + $0x68] sm:$0x1] }
  0x9a   : > { %2397 = vrot.lane.b32.xlu1 %v3859_v29, %s4286_s22  ;;  %v3858_v38 = vcombine.low %v1003_v15, %v1013_v0  ;;  %v1342_v39 = vsel %vm4348_vm2, %v1340_v31, %v1341_v23  ;;  %v1637_v41 = vshrl.u32 %v4842_v27, 16  ;;  %v3891_v42 = vcombine.low %v4826_v6, %v4842_v27  ;;  %v2128_v18 = vpop.permute.xlu0 %2127 }
  0x9b   : > { %v3874_v46 = vcombine.low %v1339_v33, %v1342_v39  ;;  %v1600_v1 = vshrl.u32 %v4851_v35, 16  ;;  %v1603_v48 = vshll.u32 %v4851_v35, 16  ;;  %v1613_v7 = vshrl.u32 %v4854_v59, 16 }
  0x9c   : > { %2395 = vrot.lane.b32.xlu0 %v3858_v38, %s4286_s22  ;;  %v3890_v40 = vcombine.low %v4851_v35, %v4854_v59  ;;  %v1630_v13 = vor.u32 %v1629_v34, %v1626_v36  ;;  %v1633_v26 = vshll.u32 %v4842_v27, 16  ;;  %v1639_v30 = vrot.slane %v1637_v41, 4  ;;  %v3762_v35 = vld [vmem:[%s4324_s17 + $0x60] sm:$0xe] }
  0x9d   : > { %v1602_v50 = vrot.slane %v1600_v1, 4  ;;  %v1605_v51 = vrot.slane %v1603_v48, 5  ;;  %v1643_v52 = vshll.u32 %v4867_v44, 16  ;;  %v1609_v53 = vshll.u32 %v4854_v59, 16 }
  0x9e   : > { %2477 = vrot.lane.b32.xlu1 %v3875_v3, %s4283_s19  ;;  %v1631_v45 = vrot.slane %v1630_v13, 4  ;;  %v1635_v55 = vrot.slane %v1633_v26, 5  ;;  %v1615_v49 = vrot.slane %v1613_v7, 4  ;;  %v1619_v56 = vshll.u32 %v4873_v62, 16  ;;  %v4883_v57 = vpop.permute.xlu0 %2129 }
  0x9f   : > { %v1645_v58 = vrot.slane %v1643_v52, 5  ;;  %v1606_v12 = vor.u32 %v1605_v51, %v1602_v50  ;;  %v1611_v60 = vrot.slane %v1609_v53, 5  ;;  %v3788_v2 = vcombine.low %v4247_v20, %v4246_v61  ;;  %v4888_v5 = vpop.permute.xlu1 %2385  ;;  %v4248_v51 = vld [vmem:[%s4324_s17 + $0x10] sm:$0xf]  ;;  %v4249_v52 = vld [vmem:[%s4324_s17 + $0xc] sm:$0xf] }
  0xa0   : > { %2475 = vrot.lane.b32.xlu0 %v3874_v46, %s4283_s19  ;;  %v1636_v6 = vsel %vm4392_vm5, %v1631_v45, %v1635_v55  ;;  %v1640_v10 = vor.u32 %v1639_v30, %v1635_v55  ;;  %v1621_v32 = vrot.slane %v1619_v56, 5  ;;  %v427_v25 = vshrl.u32 %v199_v4, 16  ;;  %v4922_v46 = vld [vmem:[%s4324_s17 + $0x70] sm:$0xf] }
  0xa1   : > { %v1607_v47 = vrot.slane %v1606_v12, 4  ;;  %v1616_v15 = vor.u32 %v1615_v49, %v1611_v60  ;;  %v2754_v21 = vsel %vm2751_vm6, %v3788_v2, %v2128_v18  ;;  %v430_v43 = vshll.u32 %v199_v4, 16  ;;  %v201_v18 = vld [vmem:[%s4324_s17 + $0x6c] sm:$0xf] }
  0xa2   : > { %2573 = vrot.lane.b32.xlu1 %v3891_v42, %s4287_s23  ;;  %v1641_v23 = vrot.slane %v1640_v10, 4  ;;  %v4903_v24 = vsel %vm2800_vm7, %v2754_v21, %v4816_v9  ;;  %v4905_v28 = vpop.permute.xlu0 %2383  ;;  %v436_v33 = vshll.u32 %v4894_v14, 16  ;;  %v440_v31 = vshrl.u32 %v4894_v14, 16 }
  0xa3   : > { %v1612_v29 = vsel %vm4392_vm5, %v1607_v47, %v1611_v60  ;;  %v1617_v54 = vrot.slane %v1616_v15, 4  ;;  %v429_v0 = vrot.slane %v427_v25, 4  ;;  %v432_v3 = vrot.slane %v430_v43, 5  ;;  %v4916_v34 = vpop.permute.xlu1 %2561 }
  0xa4   : > { %2571 = vrot.lane.b32.xlu0 %v3890_v40, %s4287_s23  ;;  %v1646_v9 = vsel %vm4392_vm5, %v1641_v23, %v1645_v58  ;;  %v446_v36 = vshll.u32 %v4898_v22, 16  ;;  %v438_v41 = vrot.slane %v436_v33, 5  ;;  %v442_v42 = vrot.slane %v440_v31, 4 }
  0xa5   : > { %v3907_v38 = vcombine.low %v1636_v6, %v1646_v9  ;;  %v1622_v39 = vsel %vm4392_vm5, %v1617_v54, %v1621_v32  ;;  %v433_v48 = vor.u32 %v432_v3, %v429_v0  ;;  %v3778_v40 = vrot.slane %v3762_v35, 9  ;;  %v3763_v6 = vld [vmem:[%s4324_s17 + $0x6c] sm:$0xe] }
  0xa6   : > { %v3906_v1 = vcombine.low %v1612_v29, %v1622_v39  ;;  %v448_v7 = vrot.slane %v446_v36, 5  ;;  %v4924_v13 = vpop.permute.xlu0 %2559  ;;  %v443_v26 = vor.u32 %v442_v42, %v438_v41  ;;  %v1947_v30 = vrot.slane %v4854_v59, 5  ;;  %v627_v35 = vld [vmem:[%s4324_s17 + $0x6c] sm:$0xe] }
  0xa7   : > { %2653 = vrot.lane.b32.xlu1 %v3907_v38, %s4288_s24  ;;  %v1950_v50 = vrot.slane %v4873_v62, 5  ;;  %v3789_v53 = vcombine.low %v4249_v52, %v4248_v51  ;;  %v434_v45 = vrot.slane %v433_v48, 4  ;;  %v451_v55 = vshrl.u32 %v201_v18, 16  ;;  %v224_v62 = vld [vmem:[%s4324_s17 + $0x74] sm:$0x1] }
  0xa8   : > { %2651 = vrot.lane.b32.xlu0 %v3906_v1, %s4288_s24  ;;  %v454_v49 = vshll.u32 %v201_v18, 16  ;;  %v460_v56 = vshll.u32 %v4922_v46, 16  ;;  %v444_v58 = vrot.slane %v443_v26, 4  ;;  %v1948_v12 = vsel %vm4348_vm2, %v3778_v40, %v1947_v30 }
  0xa9   : > { %v1949_v60 = vrot.slane %v1947_v30, 4  ;;  %v2757_v59 = vsel %vm2751_vm6, %v3789_v53, %v4883_v57  ;;  %v439_v61 = vsel %vm4392_vm5, %v434_v45, %v438_v41  ;;  %v453_v2 = vrot.slane %v451_v55, 4  ;;  %v3646_v55 = vld [vmem:[%s4324_s17 + $0x78] sm:$0xf] }
  0xaa   : > { %v2804_v20 = vsel %vm2800_vm7, %v2757_v59, %v4823_v63  ;;  %v456_v4 = vrot.slane %v454_v49, 5  ;;  %v4943_v10 = vpop.permute.xlu1 %2641  ;;  %v449_v32 = vsel %vm4392_vm5, %v444_v58, %v448_v7  ;;  %v462_v57 = vrot.slane %v460_v56, 5  ;;  %v3644_v58 = vld [vmem:[%s4324_s17 + $0x6c] sm:$0xf] }
  0xab   : > { %v1951_v47 = vsel %vm4348_vm2, %v1949_v60, %v1950_v50  ;;  %v464_v15 = vshrl.u32 %v4922_v46, 16  ;;  %v4950_v21 = vpop.permute.xlu0 %2639  ;;  %v3812_v23 = vcombine.low %v439_v61, %v449_v32  ;;  %v470_v43 = vshll.u32 %v224_v62, 16 }
  0xac   : > { %v3922_v25 = vcombine.low %v1948_v12, %v1951_v47  ;;  %v457_v63 = vor.u32 %v456_v4, %v453_v2  ;;  %v3779_v54 = vrot.slane %v3763_v6, 9  ;;  %v1954_v33 = vrot.slane %v4842_v27, 5  ;;  %v626_v27 = vld [vmem:[%s4324_s17 + $0x60] sm:$0xe] }
  0xad   : > { %v466_v29 = vrot.slane %v464_v15, 4  ;;  %v1957_v31 = vrot.slane %v4867_v44, 5  ;;  %2143 = vrot.lane.b32.xlu1 %v3812_v23, %s4285_s21  ;;  %v472_v0 = vrot.slane %v470_v43, 5  ;;  %v2837_v39 = vsel %vm2833_vm8, %v2804_v20, %v4778_v16  ;;  %v5015_v23 = vld [vmem:[%s4324_s17 + $0x80] sm:$0x1] }
  0xae   : > { %2731 = vrot.lane.b32.xlu0 %v3922_v25, %s4289_s27  ;;  %v458_v9 = vrot.slane %v457_v63, 4  ;;  %v1955_v36 = vsel %vm4348_vm2, %v3779_v54, %v1954_v33  ;;  %v1956_v38 = vrot.slane %v1954_v33, 4  ;;  %v2870_v42 = vsel %vm2866_vm9, %v2837_v39, %v4888_v5  ;;  %v5020_v63 = vld [vmem:[%s4324_s17 + $0x74] sm:$0x1] }
  0xaf   : > { %v467_v3 = vor.u32 %v466_v29, %v462_v57  ;;  %v4962_v41 = vpop.permute.xlu0 %2719  ;;  %v2835_v18 = vsel %vm2833_vm8, %v4903_v24, %v4810_v11  ;;  %v3621_v1 = vrot.slane %v627_v35, 9  ;;  %v750_v26 = vrot.slane %v4922_v46, 5 }
  0xb0   : > { %v463_v44 = vsel %vm4392_vm5, %v458_v9, %v462_v57  ;;  %v4971_v48 = vpop.permute.xlu1 %2131  ;;  %v1958_v16 = vsel %vm4348_vm2, %v1956_v38, %v1957_v31  ;;  %v2868_v40 = vsel %vm2866_vm9, %v2835_v18, %v4905_v28  ;;  %v753_v5 = vrot.slane %v224_v62, 5 }
  0xb1   : > { %v468_v7 = vrot.slane %v467_v3, 4  ;;  %v3923_v30 = vcombine.low %v1955_v36, %v1958_v16  ;;  %v3620_v50 = vrot.slane %v626_v27, 9  ;;  %v743_v11 = vrot.slane %v4894_v14, 5  ;;  %v4989_v14 = vld [vmem:[%s4324_s17 + $0x7c] sm:$0xf] }
  0xb2   : > { %v751_v51 = vsel %vm4348_vm2, %v3621_v1, %v750_v26  ;;  %v752_v52 = vrot.slane %v750_v26, 4  ;;  %v746_v53 = vrot.slane %v4898_v22, 5  ;;  %v2903_v56 = vsel %vm2899_vm10, %v2870_v42, %v4858_v37  ;;  %v4997_v22 = vld [vmem:[%s4324_s17 + $0x70] sm:$0xf]  ;;  %v4250_v26 = vld [vmem:[%s4324_s17 + $0x18] sm:$0xf] }
  0xb3   : > { %v473_v24 = vsel %vm4392_vm5, %v468_v7, %v472_v0  ;;  %2733 = vrot.lane.b32.xlu0 %v3923_v30, %s4289_s27  ;;  %v744_v46 = vsel %vm4348_vm2, %v3620_v50, %v743_v11  ;;  %v745_v45 = vrot.slane %v743_v11, 4  ;;  %v2936_v62 = vsel %vm2932_vm11, %v2903_v56, %v4916_v34  ;;  %v4218_v36 = vld [vmem:[%s5947_s1 + $0x10] ss:$0 sps:$4 sm:$0x33]   ;;  %v4251_v30 = vld [vmem:[%s4324_s17 + $0x1c] sm:$0xf] }
  0xb4   : > { %v3813_v28 = vcombine.low %v463_v44, %v473_v24  ;;  %v754_v49 = vsel %vm4348_vm2, %v752_v52, %v753_v5  ;;  %v2901_v61 = vsel %vm2899_vm10, %v2868_v40, %v4828_v8  ;;  %v1063_v2 = vshrl.u32 %v3646_v55, 16  ;;  %v3685_v44 = vld [vmem:[%s4324_s17 + $0x78] sm:$0xe]  ;;  %v3684_v50 = vld [vmem:[%s4324_s17 + $0x6c] sm:$0xe]  ;;  %4176 = vmatprep.subr.msk.bf16.mxu0 %vm3084_vm13, %v4218_v36  ;;  %4177 = vmatprep.subr.msk.bf16.mxu1 %vm3084_vm13, %v4218_v36 }
  0xb5   : > { %v4999_v12 = vpop.permute.xlu0 %2721  ;;  %v3829_v60 = vcombine.low %v751_v51, %v754_v49  ;;  %v747_v59 = vsel %vm4348_vm2, %v745_v45, %v746_v53  ;;  %v1066_v4 = vshll.u32 %v3646_v55, 16  ;;  %v1076_v6 = vshrl.u32 %v4989_v14, 16 }
  0xb6   : > { %2145 = vrot.lane.b32.xlu1 %v3813_v28, %s4285_s21  ;;  %v5008_v37 = vpop.permute.xlu1 %2133  ;;  %v3828_v20 = vcombine.low %v744_v46, %v747_v59  ;;  %v2934_v32 = vsel %vm2932_vm11, %v2901_v61, %v4924_v13  ;;  %v1039_v47 = vshrl.u32 %v3644_v58, 16  ;;  %v1042_v57 = vshll.u32 %v3644_v58, 16 }
  0xb7   : > { %v1052_v15 = vshrl.u32 %v4997_v22, 16  ;;  %v1065_v8 = vrot.slane %v1063_v2, 4  ;;  %v1068_v34 = vrot.slane %v1066_v4, 5  ;;  %v3844_v25 = vcombine.low %v3644_v58, %v4997_v22 }
  0xb8   : > { %2223 = vrot.lane.b32.xlu0 %v3828_v20, %s4284_s20  ;;  %v3845_v13 = vcombine.low %v3646_v55, %v4989_v14  ;;  %v1041_v29 = vrot.slane %v1039_v47, 4  ;;  %v1044_v54 = vrot.slane %v1042_v57, 5  ;;  %v5028_v33 = vsel %vm2965_vm12, %v2936_v62, %v4943_v10 }
  0xb9   : > { %v5022_v43 = vpop.permute.xlu0 %2211  ;;  %v1069_v35 = vor.u32 %v1068_v34, %v1065_v8  ;;  %v1072_v9 = vshll.u32 %v4989_v14, 16  ;;  %v1078_v0 = vrot.slane %v1076_v6, 4  ;;  %v1082_v3 = vshll.u32 %v5015_v23, 16  ;;  %v5072_v6 = vld [vmem:[%s4324_s17 + $0x84] sm:$0xf] }
  0xba   : > { %2225 = vrot.lane.b32.xlu1 %v3829_v60, %s4284_s20  ;;  %v5030_v31 = vpop.permute.xlu1 %2213  ;;  %v1045_v38 = vor.u32 %v1044_v54, %v1041_v29  ;;  %v1048_v39 = vshll.u32 %v4997_v22, 16  ;;  %v1054_v10 = vrot.slane %v1052_v15, 4  ;;  %v1058_v27 = vshll.u32 %v5020_v63, 16  ;;  %v5079_v15 = vld [vmem:[%s4324_s17 + $0x88] sm:$0xf] }
  0xbb   : > { %v2967_v42 = vsel %vm2965_vm12, %v2934_v32, %v4950_v21  ;;  %v1070_v18 = vrot.slane %v1069_v35, 4  ;;  %v1074_v1 = vrot.slane %v1072_v9, 5  ;;  %v1084_v7 = vrot.slane %v1082_v3, 5  ;;  %v4252_v54 = vld [vmem:[%s4324_s17 + $0x24] sm:$0xf] }
  0xbc   : > { %2319 = vrot.lane.b32.xlu0 %v3844_v25, %s4282_s18  ;;  %v1046_v16 = vrot.slane %v1045_v38, 4  ;;  %v1050_v40 = vrot.slane %v1048_v39, 5  ;;  %v3790_v5 = vcombine.low %v4250_v26, %v4251_v30  ;;  %v1060_v52 = vrot.slane %v1058_v27, 5  ;;  %v4253_v35 = vld [vmem:[%s4324_s17 + $0x28] sm:$0xf] }
  0xbd   : > { %v5049_v24 = vpop.permute.xlu0 %2307  ;;  %v1075_v51 = vsel %vm4392_vm5, %v1070_v18, %v1074_v1  ;;  %v1079_v21 = vor.u32 %v1078_v0, %v1074_v1  ;;  %v3701_v53 = vrot.slane %v3685_v44, 9  ;;  %v1359_v45 = vrot.slane %v4989_v14, 5  ;;  %v5123_v26 = vld [vmem:[%s4324_s17 + $0x80] sm:$0x1] }
  0xbe   : > { %2321 = vrot.lane.b32.xlu1 %v3845_v13, %s4282_s18  ;;  %v5047_v11 = vpop.permute.xlu1 %2309  ;;  %v1051_v28 = vsel %vm4392_vm5, %v1046_v16, %v1050_v40  ;;  %v1055_v46 = vor.u32 %v1054_v10, %v1050_v40  ;;  %v1362_v55 = vrot.slane %v5015_v23, 5  ;;  %v3700_v56 = vrot.slane %v3684_v50, 9  ;;  %v5082_v23 = vld [vmem:[%s4324_s17 + $0x78] sm:$0xf]  ;;  %v5093_v13 = vld [vmem:[%s4324_s17 + $0x7c] sm:$0xf] }
  0xbf   : > { %v1080_v49 = vrot.slane %v1079_v21, 4  ;;  %v1352_v58 = vrot.slane %v4997_v22, 5  ;;  %v1355_v60 = vrot.slane %v5020_v63, 5  ;;  %v1360_v62 = vsel %vm4348_vm2, %v3701_v53, %v1359_v45 }
  0xc0   : > { %v1056_v59 = vrot.slane %v1055_v46, 4  ;;  %v1361_v61 = vrot.slane %v1359_v45, 4  ;;  %v3000_v4 = vsel %vm2998_vm14, %v2967_v42, %v4962_v41  ;;  %v2760_v41 = vsel %vm2751_vm6, %v3790_v5, %v4971_v48  ;;  %v5113_v42 = vld [vmem:[%s4324_s17 + $0x8c] sm:$0x1]  ;;  %v203_v46 = vld [vmem:[%s4324_s17 + $0x78] sm:$0xf] }
  0xc1   : > { %v1085_v14 = vsel %vm4392_vm5, %v1080_v49, %v1084_v7  ;;  %v1353_v2 = vsel %vm4348_vm2, %v3700_v56, %v1352_v58  ;;  %v1354_v22 = vrot.slane %v1352_v58, 4  ;;  %4138 = vmatprep.mubr.msk.bf16.mxu0 %vm3051_vm15, %v3000_v4  ;;  %v3086_v63 = vsel %vm3084_vm13, %v4218_v36, 0  ;;  %v5139_v56 = vld [vmem:[%s4324_s17 + $0x7c] sm:$0xf] }
  0xc2   : > { %v5063_v20 = vpop.permute.xlu1 %2389  ;;  %v3861_v32 = vcombine.low %v1075_v51, %v1085_v14  ;;  %v1061_v47 = vsel %vm4392_vm5, %v1056_v59, %v1060_v52  ;;  %v1363_v57 = vsel %vm4348_vm2, %v1361_v61, %v1362_v55  ;;  %4137 = vmatpush3.bf16.msra.mxu0 %v3086_v63  ;;  %v3791_v9 = vcombine.low %v4252_v54, %v4253_v35 }
  0xc3   : > { %v3860_v34 = vcombine.low %v1051_v28, %v1061_v47  ;;  %v1356_v25 = vsel %vm4348_vm2, %v1354_v22, %v1355_v60  ;;  %v3877_v29 = vcombine.low %v1360_v62, %v1363_v57  ;;  %v3002_v48 = vsel %vm2998_vm14, %v5028_v33, %v4999_v12  ;;  %4175 = vmatpush3.bf16.msra.mxu1 %v3086_v63  ;;  %v5147_v22 = vld [vmem:[%s4324_s17 + $0x80] sm:$0x1] }
  0xc4   : > { %v5084_v8 = vpop.permute.xlu0 %2387  ;;  %2401 = vrot.lane.b32.xlu1 %v3861_v32, %s4286_s22  ;;  %v1672_v0 = vshrl.u32 %v5072_v6, 16  ;;  %v3876_v36 = vcombine.low %v1353_v2, %v1356_v25  ;;  %v1675_v38 = vshll.u32 %v5072_v6, 16  ;;  %v1685_v39 = vshrl.u32 %v5079_v15, 16 }
  0xc5   : > { %2399 = vrot.lane.b32.xlu0 %v3860_v34, %s4286_s22  ;;  %v1648_v10 = vshrl.u32 %v5082_v23, 16  ;;  %v3893_v44 = vcombine.low %v5072_v6, %v5079_v15  ;;  %v1651_v12 = vshll.u32 %v5082_v23, 16  ;;  %v1661_v33 = vshrl.u32 %v5093_v13, 16  ;;  %4139 = vmatmul.mubr.msk.bf16.vlgmr.msra.gmra.mrb[0].mxu0 %vm3051_vm15, %v3002_v48 }
  0xc6   : > { %v5102_v3 = vpop.permute.xlu1 %2469  ;;  %v1674_v27 = vrot.slane %v1672_v0, 4  ;;  %v2763_v1 = vsel %vm2751_vm6, %v3791_v9, %v5008_v37  ;;  %v1677_v7 = vrot.slane %v1675_v38, 5  ;;  %v3892_v40 = vcombine.low %v5082_v23, %v5093_v13  ;;  %v3764_v23 = vld [vmem:[%s4324_s17 + $0x78] sm:$0xe] }
  0xc7   : > { %v1650_v16 = vrot.slane %v1648_v10, 4  ;;  %v1653_v30 = vrot.slane %v1651_v12, 5  ;;  %v2808_v5 = vsel %vm2800_vm7, %v2763_v1, %v5030_v31  ;;  %v1681_v50 = vshll.u32 %v5079_v15, 16  ;;  %v206_v1 = vld [vmem:[%s4324_s17 + $0x88] sm:$0xf] }
  0xc8   : > { %v5115_v18 = vpop.permute.xlu0 %2467  ;;  %2481 = vrot.lane.b32.xlu1 %v3877_v29, %s4283_s19  ;;  %v1687_v37 = vrot.slane %v1685_v39, 4  ;;  %v1678_v21 = vor.u32 %v1677_v7, %v1674_v27  ;;  %v1691_v52 = vshll.u32 %v5113_v42, 16  ;;  %v1657_v53 = vshll.u32 %v5093_v13, 16 }
  0xc9   : > { %2479 = vrot.lane.b32.xlu0 %v3876_v36, %s4283_s19  ;;  %v1663_v28 = vrot.slane %v1661_v33, 4  ;;  %v2806_v45 = vsel %vm2800_vm7, %v2760_v41, %v5022_v43  ;;  %v1683_v55 = vrot.slane %v1681_v50, 5  ;;  %v1654_v31 = vor.u32 %v1653_v30, %v1650_v16  ;;  %v205_v33 = vld [vmem:[%s4324_s17 + $0x84] sm:$0xf] }
  0xca   : > { %v5129_v51 = vpop.permute.xlu1 %2565  ;;  %v1667_v49 = vshll.u32 %v5123_v26, 16  ;;  %v1679_v60 = vrot.slane %v1678_v21, 4  ;;  %v1693_v59 = vrot.slane %v1691_v52, 5  ;;  %v1659_v62 = vrot.slane %v1657_v53, 5 }
  0xcb   : > { %v2841_v61 = vsel %vm2833_vm8, %v2808_v5, %v5047_v11  ;;  %v1688_v14 = vor.u32 %v1687_v37, %v1683_v55  ;;  %v1655_v2 = vrot.slane %v1654_v31, 4  ;;  %v475_v4 = vshrl.u32 %v203_v46, 16  ;;  %v5172_v5 = vld [vmem:[%s4324_s17 + $0x8c] sm:$0x1] }
  0xcc   : > { %v5141_v58 = vpop.permute.xlu0 %2563  ;;  %2577 = vrot.lane.b32.xlu1 %v3893_v44, %s4287_s23  ;;  %v1669_v43 = vrot.slane %v1667_v49, 5  ;;  %v1684_v6 = vsel %vm4392_vm5, %v1679_v60, %v1683_v55  ;;  %v1664_v32 = vor.u32 %v1663_v28, %v1659_v62  ;;  %v478_v47 = vshll.u32 %v203_v46, 16 }
  0xcd   : > { %2575 = vrot.lane.b32.xlu0 %v3892_v40, %s4287_s23  ;;  %v484_v57 = vshll.u32 %v5139_v56, 16  ;;  %v1689_v11 = vrot.slane %v1688_v14, 4  ;;  %v1660_v41 = vsel %vm4392_vm5, %v1655_v2, %v1659_v62  ;;  %v477_v25 = vrot.slane %v475_v4, 4  ;;  %v629_v14 = vld [vmem:[%s4324_s17 + $0x84] sm:$0xe] }
  0xce   : > { %v488_v63 = vshrl.u32 %v5139_v56, 16  ;;  %v1665_v54 = vrot.slane %v1664_v32, 4  ;;  %v480_v35 = vrot.slane %v478_v47, 5  ;;  %v494_v48 = vshll.u32 %v5147_v22, 16 }
  0xcf   : > { %v5154_v34 = vpop.permute.xlu1 %2645  ;;  %v486_v9 = vrot.slane %v484_v57, 5  ;;  %v1694_v0 = vsel %vm4392_vm5, %v1689_v11, %v1693_v59  ;;  %v3780_v38 = vrot.slane %v3764_v23, 9  ;;  %v1961_v39 = vrot.slane %v5093_v13, 5  ;;  %v628_v11 = vld [vmem:[%s4324_s17 + $0x78] sm:$0xe] }
  0xd0   : > { %v5159_v29 = vpop.permute.xlu0 %2643  ;;  %v490_v36 = vrot.slane %v488_v63, 4  ;;  %v3909_v10 = vcombine.low %v1684_v6, %v1694_v0  ;;  %v1670_v27 = vsel %vm4392_vm5, %v1665_v54, %v1669_v43  ;;  %v2839_v44 = vsel %vm2833_vm8, %v2806_v45, %v5049_v24 }
  0xd1   : > { %v481_v12 = vor.u32 %v480_v35, %v477_v25  ;;  %v3908_v7 = vcombine.low %v1660_v41, %v1670_v27  ;;  %v496_v40 = vrot.slane %v494_v48, 5  ;;  %v1963_v30 = vrot.slane %v1961_v39, 4 }
  0xd2   : > { %v491_v16 = vor.u32 %v490_v36, %v486_v9  ;;  %2657 = vrot.lane.b32.xlu1 %v3909_v10, %s4288_s24  ;;  %v1962_v37 = vsel %vm4348_vm2, %v3780_v38, %v1961_v39  ;;  %v1964_v24 = vrot.slane %v5123_v26, 5  ;;  %v2874_v21 = vsel %vm2866_vm9, %v2841_v61, %v5063_v20  ;;  %v3765_v20 = vld [vmem:[%s4324_s17 + $0x84] sm:$0xe] }
  0xd3   : > { %v482_v13 = vrot.slane %v481_v12, 4  ;;  %2655 = vrot.lane.b32.xlu0 %v3908_v7, %s4288_s24  ;;  %v499_v28 = vshrl.u32 %v205_v33, 16  ;;  %v502_v46 = vshll.u32 %v205_v33, 16  ;;  %v508_v45 = vshll.u32 %v206_v1, 16  ;;  %v5218_v12 = vld [vmem:[%s4324_s17 + $0x90] sm:$0xf] }
  0xd4   : > { %v5174_v50 = vpop.permute.xlu0 %2723  ;;  %v492_v53 = vrot.slane %v491_v16, 4  ;;  %v1965_v31 = vsel %vm4348_vm2, %v1963_v30, %v1964_v24  ;;  %v512_v49 = vshrl.u32 %v206_v1, 16  ;;  %v518_v26 = vshll.u32 %v5172_v5, 16  ;;  %v3648_v30 = vld [vmem:[%s4324_s17 + $0x84] sm:$0xf] }
  0xd5   : > { %v5182_v52 = vpop.permute.xlu1 %2135  ;;  %v487_v55 = vsel %vm4392_vm5, %v482_v13, %v486_v9  ;;  %v3924_v59 = vcombine.low %v1962_v37, %v1965_v31  ;;  %v501_v62 = vrot.slane %v499_v28, 4  ;;  %v504_v61 = vrot.slane %v502_v46, 5 }
  0xd6   : > { %v497_v60 = vsel %vm4392_vm5, %v492_v53, %v496_v40  ;;  %v2872_v43 = vsel %vm2866_vm9, %v2839_v44, %v5084_v8  ;;  %v510_v4 = vrot.slane %v508_v45, 5  ;;  %v514_v6 = vrot.slane %v512_v49, 4  ;;  %v5227_v40 = vld [vmem:[%s4324_s17 + $0x94] sm:$0xf]  ;;  %v5243_v45 = vld [vmem:[%s4324_s17 + $0x88] sm:$0xf] }
  0xd7   : > { %v3814_v2 = vcombine.low %v487_v55, %v497_v60  ;;  %2735 = vrot.lane.b32.xlu0 %v3924_v59, %s4289_s27  ;;  %v505_v32 = vor.u32 %v504_v61, %v501_v62  ;;  %v3781_v47 = vrot.slane %v3765_v20, 9  ;;  %v1968_v57 = vrot.slane %v5079_v15, 5  ;;  %v5252_v59 = vld [vmem:[%s4324_s17 + $0x98] sm:$0x1] }
  0xd8   : > { %v1971_v23 = vrot.slane %v5113_v42, 5  ;;  %v515_v25 = vor.u32 %v514_v6, %v510_v4  ;;  %v520_v63 = vrot.slane %v518_v26, 5  ;;  %v2907_v8 = vsel %vm2899_vm10, %v2874_v21, %v5102_v3 }
  0xd9   : > { %2147 = vrot.lane.b32.xlu1 %v3814_v2, %s4285_s21  ;;  %v3623_v54 = vrot.slane %v629_v14, 9  ;;  %v506_v9 = vrot.slane %v505_v32, 4  ;;  %v1969_v15 = vsel %vm4348_vm2, %v3781_v47, %v1968_v57  ;;  %v1970_v48 = vrot.slane %v1968_v57, 4 }
  0xda   : > { %v5200_v41 = vpop.permute.xlu0 %2725  ;;  %v764_v42 = vrot.slane %v206_v1, 5  ;;  %v516_v0 = vrot.slane %v515_v25, 4  ;;  %v767_v36 = vrot.slane %v5172_v5, 5  ;;  %v3622_v38 = vrot.slane %v628_v11, 9 }
  0xdb   : > { %v5205_v35 = vpop.permute.xlu1 %2137  ;;  %v757_v39 = vrot.slane %v5139_v56, 5  ;;  %v511_v3 = vsel %vm4392_vm5, %v506_v9, %v510_v4  ;;  %v1972_v10 = vsel %vm4348_vm2, %v1970_v48, %v1971_v23  ;;  %v2905_v56 = vsel %vm2899_vm10, %v2872_v43, %v5115_v18  ;;  %v5263_v4 = vld [vmem:[%s4324_s17 + $0x8c] sm:$0x1] }
  0xdc   : > { %v765_v27 = vsel %vm4348_vm2, %v3623_v54, %v764_v42  ;;  %v766_v44 = vrot.slane %v764_v42, 4  ;;  %v521_v1 = vsel %vm4392_vm5, %v516_v0, %v520_v63  ;;  %v3925_v7 = vcombine.low %v1969_v15, %v1972_v10 }
  0xdd   : > { %v759_v16 = vrot.slane %v757_v39, 4  ;;  %v3815_v13 = vcombine.low %v511_v3, %v521_v1  ;;  %v758_v24 = vsel %vm4348_vm2, %v3622_v38, %v757_v39  ;;  %v760_v21 = vrot.slane %v5147_v22, 5  ;;  %v3686_v39 = vld [vmem:[%s4324_s17 + $0x84] sm:$0xe] }
  0xde   : > { %v5220_v33 = vpop.permute.xlu0 %2215  ;;  %v768_v37 = vsel %vm4348_vm2, %v766_v44, %v767_v36  ;;  %2737 = vrot.lane.b32.xlu0 %v3925_v7, %s4289_s27  ;;  %v2940_v18 = vsel %vm2932_vm11, %v2907_v8, %v5129_v51  ;;  %v1111_v28 = vshrl.u32 %v5218_v12, 16  ;;  %v1114_v46 = vshll.u32 %v5218_v12, 16  ;;  %v4254_v44 = vld [vmem:[%s4324_s17 + $0x30] sm:$0xf] }
  0xdf   : > { %v5230_v5 = vpop.permute.xlu1 %2217  ;;  %v3831_v53 = vcombine.low %v765_v27, %v768_v37  ;;  %2149 = vrot.lane.b32.xlu1 %v3815_v13, %s4285_s21  ;;  %v761_v55 = vsel %vm4348_vm2, %v759_v16, %v760_v21  ;;  %v2938_v22 = vsel %vm2932_vm11, %v2905_v56, %v5141_v58  ;;  %v1124_v31 = vshrl.u32 %v5227_v40, 16 }
  0xe0   : > { %v1087_v49 = vshrl.u32 %v3648_v30, 16  ;;  %v3830_v26 = vcombine.low %v758_v24, %v761_v55  ;;  %v1113_v51 = vrot.slane %v1111_v28, 4  ;;  %v1116_v20 = vrot.slane %v1114_v46, 5 }
  0xe1   : > { %v1090_v60 = vshll.u32 %v3648_v30, 16  ;;  %v3847_v14 = vcombine.low %v5218_v12, %v5227_v40  ;;  %v1100_v43 = vshrl.u32 %v5243_v45, 16  ;;  %v3846_v58 = vcombine.low %v3648_v30, %v5243_v45  ;;  %v4255_v12 = vld [vmem:[%s4324_s17 + $0x34] sm:$0xf] }
  0xe2   : > { %v5256_v61 = vpop.permute.xlu0 %2311  ;;  %v1089_v2 = vrot.slane %v1087_v49, 4  ;;  %2227 = vrot.lane.b32.xlu0 %v3830_v26, %s4284_s20  ;;  %v2971_v32 = vsel %vm2965_vm12, %v2938_v22, %v5159_v29  ;;  %v1117_v47 = vor.u32 %v1116_v20, %v1113_v51  ;;  %v1120_v57 = vshll.u32 %v5227_v40, 16  ;;  %v3687_v29 = vld [vmem:[%s4324_s17 + $0x90] sm:$0xe]  ;;  %v4256_v22 = vld [vmem:[%s4324_s17 + $0x3c] sm:$0xf] }
  0xe3   : > { %v5254_v62 = vpop.permute.xlu1 %2313  ;;  %v1092_v6 = vrot.slane %v1090_v60, 5  ;;  %2229 = vrot.lane.b32.xlu1 %v3831_v53, %s4284_s20  ;;  %v1126_v23 = vrot.slane %v1124_v31, 4  ;;  %v1130_v11 = vshll.u32 %v5252_v59, 16  ;;  %v1096_v25 = vshll.u32 %v5243_v45, 16  ;;  %v4257_v31 = vld [vmem:[%s4324_s17 + $0x40] sm:$0xf] }
  0xe4   : > { %v1102_v63 = vrot.slane %v1100_v43, 4  ;;  %v1118_v8 = vrot.slane %v1117_v47, 4  ;;  %v1122_v54 = vrot.slane %v1120_v57, 5  ;;  %v1106_v15 = vshll.u32 %v5263_v4, 16  ;;  %v3730_v51 = vld [vmem:[%s4324_s17 + $0x9c] sm:$0xf] }
  0xe5   : > { %v1093_v9 = vor.u32 %v1092_v6, %v1089_v2  ;;  %v2973_v42 = vsel %vm2965_vm12, %v2940_v18, %v5154_v34  ;;  %v1132_v0 = vrot.slane %v1130_v11, 5  ;;  %v1098_v36 = vrot.slane %v1096_v25, 5  ;;  %v5308_v20 = vld [vmem:[%s4324_s17 + $0xa0] sm:$0xf]  ;;  %v3728_v43 = vld [vmem:[%s4324_s17 + $0x90] sm:$0xf] }
  0xe6   : > { %v3004_v38 = vsel %vm2998_vm14, %v2971_v32, %v5174_v50  ;;  %2323 = vrot.lane.b32.xlu0 %v3846_v58, %s4282_s18  ;;  %v1123_v3 = vsel %vm4392_vm5, %v1118_v8, %v1122_v54  ;;  %v1127_v10 = vor.u32 %v1126_v23, %v1122_v54  ;;  %v3792_v1 = vcombine.low %v4254_v44, %v4255_v12  ;;  %v5320_v58 = vld [vmem:[%s4324_s17 + $0x94] sm:$0xf] }
  0xe7   : > { %v5274_v48 = vpop.permute.xlu1 %2393  ;;  %v1094_v27 = vrot.slane %v1093_v9, 4  ;;  %4142 = vmatprep.mubr.msk.bf16.mxu0 %vm3051_vm15, %v3004_v38  ;;  %2325 = vrot.lane.b32.xlu1 %v3847_v14, %s4282_s18  ;;  %v1103_v34 = vor.u32 %v1102_v63, %v1098_v36  ;;  %v1108_v50 = vrot.slane %v1106_v15, 5  ;;  %v3703_v56 = vrot.slane %v3687_v29, 9  ;;  %v5336_v9 = vld [vmem:[%s4324_s17 + $0xa4] sm:$0x1] }
  0xe8   : > { %v1373_v16 = vrot.slane %v5227_v40, 5  ;;  %v1128_v30 = vrot.slane %v1127_v10, 4  ;;  %v1376_v37 = vrot.slane %v5252_v59, 5  ;;  %v3702_v24 = vrot.slane %v3686_v39, 9 }
  0xe9   : > { %v5287_v7 = vpop.permute.xlu0 %2391  ;;  %v1099_v13 = vsel %vm4392_vm5, %v1094_v27, %v1098_v36  ;;  %v1104_v53 = vrot.slane %v1103_v34, 4  ;;  %v1366_v40 = vrot.slane %v5243_v45, 5  ;;  %v1369_v55 = vrot.slane %v5263_v4, 5  ;;  %v5342_v36 = vld [vmem:[%s4324_s17 + $0x98] sm:$0x1] }
  0xea   : > { %v1374_v18 = vsel %vm4348_vm2, %v3703_v56, %v1373_v16  ;;  %v1375_v28 = vrot.slane %v1373_v16, 4  ;;  %v1133_v46 = vsel %vm4392_vm5, %v1128_v30, %v1132_v0  ;;  %v3793_v49 = vcombine.low %v4256_v22, %v4257_v31  ;;  %v207_v30 = vld [vmem:[%s4324_s17 + $0x90] sm:$0xf]  ;;  %v5366_v31 = vld [vmem:[%s4324_s17 + $0x98] sm:$0x1] }
  0xeb   : > { %v5294_v21 = vpop.permute.xlu1 %2473  ;;  %v3006_v26 = vsel %vm2998_vm14, %v2973_v42, %v5200_v41  ;;  %v3863_v59 = vcombine.low %v1123_v3, %v1133_v46  ;;  %v1109_v45 = vsel %vm4392_vm5, %v1104_v53, %v1108_v50  ;;  %v2766_v14 = vsel %vm2751_vm6, %v3792_v1, %v5182_v52 }
  0xec   : > { %v1377_v2 = vsel %vm4348_vm2, %v1375_v28, %v1376_v37  ;;  %4143 = vmatmul.mubr.msk.bf16.gmra.mrb[4].mxu0 %vm3051_vm15, %v3006_v26  ;;  %v3862_v41 = vcombine.low %v1099_v13, %v1109_v45  ;;  %v1367_v6 = vsel %vm4348_vm2, %v3702_v24, %v1366_v40  ;;  %v1368_v32 = vrot.slane %v1366_v40, 4  ;;  %v5361_v28 = vld [vmem:[%s4324_s17 + $0x94] sm:$0xf] }
  0xed   : > { %v5310_v60 = vpop.permute.xlu0 %2471  ;;  %v3879_v4 = vcombine.low %v1374_v18, %v1377_v2  ;;  %2405 = vrot.lane.b32.xlu1 %v3863_v59, %s4286_s22  ;;  %v2769_v52 = vsel %vm2751_vm6, %v3793_v49, %v5205_v35  ;;  %v1720_v57 = vshrl.u32 %v3730_v51, 16  ;;  %v1723_v23 = vshll.u32 %v3730_v51, 16  ;;  %v3766_v2 = vld [vmem:[%s4324_s17 + $0x90] sm:$0xe] }
  0xee   : > { %v1733_v11 = vshrl.u32 %v5308_v20, 16  ;;  %2403 = vrot.lane.b32.xlu0 %v3862_v41, %s4286_s22  ;;  %v1370_v25 = vsel %vm4348_vm2, %v1368_v32, %v1369_v55  ;;  %v1696_v63 = vshrl.u32 %v3728_v43, 16  ;;  %v1699_v8 = vshll.u32 %v3728_v43, 16 }
  0xef   : > { %v5325_v47 = vpop.permute.xlu1 %2569  ;;  %v1709_v54 = vshrl.u32 %v5320_v58, 16  ;;  %v3878_v29 = vcombine.low %v1367_v6, %v1370_v25  ;;  %v1722_v42 = vrot.slane %v1720_v57, 4  ;;  %v1725_v35 = vrot.slane %v1723_v23, 5 }
  0xf0   : > { %v3895_v0 = vcombine.low %v3730_v51, %v5308_v20  ;;  %v1698_v38 = vrot.slane %v1696_v63, 4  ;;  %v1701_v39 = vrot.slane %v1699_v8, 5  ;;  %v3894_v3 = vcombine.low %v3728_v43, %v5320_v58 }
  0xf1   : > { %v5338_v15 = vpop.permute.xlu0 %2567  ;;  %v2812_v10 = vsel %vm2800_vm7, %v2769_v52, %v5230_v5  ;;  %2485 = vrot.lane.b32.xlu1 %v3879_v4, %s4283_s19  ;;  %v1726_v27 = vor.u32 %v1725_v35, %v1722_v42  ;;  %v1729_v44 = vshll.u32 %v5308_v20, 16  ;;  %v1735_v12 = vrot.slane %v1733_v11, 4 }
  0xf2   : > { %v1739_v1 = vshll.u32 %v5336_v9, 16  ;;  %2483 = vrot.lane.b32.xlu0 %v3878_v29, %s4283_s19  ;;  %v1702_v50 = vor.u32 %v1701_v39, %v1698_v38  ;;  %v1705_v56 = vshll.u32 %v5320_v58, 16  ;;  %v1711_v16 = vrot.slane %v1709_v54, 4  ;;  %v209_v38 = vld [vmem:[%s4324_s17 + $0x9c] sm:$0xf] }
  0xf3   : > { %v1715_v5 = vshll.u32 %v5342_v36, 16  ;;  %v2810_v37 = vsel %vm2800_vm7, %v2766_v14, %v5220_v33  ;;  %v1727_v24 = vrot.slane %v1726_v27, 4  ;;  %v1731_v53 = vrot.slane %v1729_v44, 5  ;;  %v210_v39 = vld [vmem:[%s4324_s17 + $0xa0] sm:$0xf] }
  0xf4   : > { %v5350_v34 = vpop.permute.xlu1 %2649  ;;  %v1741_v18 = vrot.slane %v1739_v1, 5  ;;  %v1703_v40 = vrot.slane %v1702_v50, 4  ;;  %v1707_v46 = vrot.slane %v1705_v56, 5  ;;  %v2845_v22 = vsel %vm2833_vm8, %v2812_v10, %v5254_v62 }
  0xf5   : > { %v5356_v13 = vpop.permute.xlu0 %2647  ;;  %v1717_v55 = vrot.slane %v1715_v5, 5  ;;  %2581 = vrot.lane.b32.xlu1 %v3895_v0, %s4287_s23  ;;  %v1736_v49 = vor.u32 %v1735_v12, %v1731_v53  ;;  %v2843_v33 = vsel %vm2833_vm8, %v2810_v37, %v5256_v61  ;;  %v523_v26 = vshrl.u32 %v207_v30, 16  ;;  %v5394_v12 = vld [vmem:[%s4324_s17 + $0xa4] sm:$0x1] }
  0xf6   : > { %v526_v51 = vshll.u32 %v207_v30, 16  ;;  %2579 = vrot.lane.b32.xlu0 %v3894_v3, %s4287_s23  ;;  %v1732_v59 = vsel %vm4392_vm5, %v1727_v24, %v1731_v53  ;;  %v1712_v45 = vor.u32 %v1711_v16, %v1707_v46  ;;  %v532_v14 = vshll.u32 %v5361_v28, 16 }
  0xf7   : > { %v536_v62 = vshrl.u32 %v5361_v28, 16  ;;  %v1737_v41 = vrot.slane %v1736_v49, 4  ;;  %v525_v4 = vrot.slane %v523_v26, 4  ;;  %v542_v61 = vshll.u32 %v5366_v31, 16 }
  0xf8   : > { %v528_v6 = vrot.slane %v526_v51, 5  ;;  %v1708_v52 = vsel %vm4392_vm5, %v1703_v40, %v1707_v46  ;;  %v1713_v57 = vrot.slane %v1712_v45, 4  ;;  %v534_v23 = vrot.slane %v532_v14, 5  ;;  %v3767_v46 = vld [vmem:[%s4324_s17 + $0x9c] sm:$0xe] }
  0xf9   : > { %v5377_v43 = vpop.permute.xlu0 %2727  ;;  %v538_v11 = vrot.slane %v536_v62, 4  ;;  %v1742_v25 = vsel %vm4392_vm5, %v1737_v41, %v1741_v18  ;;  %v544_v8 = vrot.slane %v542_v61, 5  ;;  %v3782_v54 = vrot.slane %v3766_v2, 9  ;;  %v631_v51 = vld [vmem:[%s4324_s17 + $0x9c] sm:$0xe] }
  0xfa   : > { %v5380_v32 = vpop.permute.xlu1 %2139  ;;  %v529_v63 = vor.u32 %v528_v6, %v525_v4  ;;  %v3911_v29 = vcombine.low %v1732_v59, %v1742_v25  ;;  %v1718_v42 = vsel %vm4392_vm5, %v1713_v57, %v1717_v55  ;;  %v1975_v0 = vrot.slane %v5320_v58, 5 }
  0xfb   : > { %v539_v35 = vor.u32 %v538_v11, %v534_v23  ;;  %v3910_v3 = vcombine.low %v1708_v52, %v1718_v42  ;;  %v774_v27 = vrot.slane %v5366_v31, 5  ;;  %v1978_v44 = vrot.slane %v5342_v36, 5  ;;  %v630_v52 = vld [vmem:[%s4324_s17 + $0x90] sm:$0xe] }
  0xfc   : > { %v530_v10 = vrot.slane %v529_v63, 4  ;;  %2661 = vrot.lane.b32.xlu1 %v3911_v29, %s4288_s24  ;;  %v1976_v50 = vsel %vm4348_vm2, %v3782_v54, %v1975_v0  ;;  %v1977_v56 = vrot.slane %v1975_v0, 4  ;;  %v2878_v58 = vsel %vm2866_vm9, %v2845_v22, %v5274_v48 }
  0xfd   : > { %v540_v1 = vrot.slane %v539_v35, 4  ;;  %2659 = vrot.lane.b32.xlu0 %v3910_v3, %s4288_s24  ;;  %v547_v5 = vshrl.u32 %v209_v38, 16  ;;  %v550_v30 = vshll.u32 %v209_v38, 16  ;;  %v556_v37 = vshll.u32 %v210_v39, 16  ;;  %v5435_v35 = vld [vmem:[%s4324_s17 + $0xa8] sm:$0xf] }
  0xfe   : > { %v535_v36 = vsel %vm4392_vm5, %v530_v10, %v534_v23  ;;  %v1979_v18 = vsel %vm4348_vm2, %v1977_v56, %v1978_v44  ;;  %v560_v48 = vshrl.u32 %v210_v39, 16  ;;  %v566_v40 = vshll.u32 %v5394_v12, 16  ;;  %v5444_v3 = vld [vmem:[%s4324_s17 + $0xac] sm:$0xf] }
  0xff   : > { %v5401_v16 = vpop.permute.xlu0 %2729  ;;  %v545_v53 = vsel %vm4392_vm5, %v540_v1, %v544_v8  ;;  %v3926_v22 = vcombine.low %v1976_v50, %v1979_v18  ;;  %v549_v49 = vrot.slane %v547_v5, 4  ;;  %v552_v26 = vrot.slane %v550_v30, 5  ;;  %v3652_v50 = vld [vmem:[%s4324_s17 + $0x9c] sm:$0xf]  ;;  %v5461_v30 = vld [vmem:[%s4324_s17 + $0xa0] sm:$0xf] }
 0x100   : > { %v5406_v24 = vpop.permute.xlu1 %2141  ;;  %v3816_v55 = vcombine.low %v535_v36, %v545_v53  ;;  %v2876_v59 = vsel %vm2866_vm9, %v2843_v33, %v5287_v7  ;;  %v558_v45 = vrot.slane %v556_v37, 5  ;;  %v562_v14 = vrot.slane %v560_v48, 4 }
 0x101   : > { %v568_v62 = vrot.slane %v566_v40, 5  ;;  %2739 = vrot.lane.b32.xlu0 %v3926_v22, %s4289_s27  ;;  %v553_v41 = vor.u32 %v552_v26, %v549_v49  ;;  %v3783_v4 = vrot.slane %v3767_v46, 9  ;;  %v1982_v6 = vrot.slane %v5308_v20, 5  ;;  %v5474_v22 = vld [vmem:[%s4324_s17 + $0xb0] sm:$0x1] }
 0x102   : > { %2151 = vrot.lane.b32.xlu1 %v3816_v55, %s4285_s21  ;;  %v1985_v61 = vrot.slane %v5336_v9, 5  ;;  %v563_v7 = vor.u32 %v562_v14, %v558_v45  ;;  %v781_v33 = vrot.slane %v5394_v12, 5  ;;  %v2911_v23 = vsel %vm2899_vm10, %v2878_v58, %v5294_v21 }
 0x103   : > { %v5417_v2 = vpop.permute.xlu0 %2219  ;;  %v3625_v11 = vrot.slane %v631_v51, 9  ;;  %v554_v25 = vrot.slane %v553_v41, 4  ;;  %v1983_v63 = vsel %vm4348_vm2, %v3783_v4, %v1982_v6  ;;  %v1984_v8 = vrot.slane %v1982_v6, 4  ;;  %v5482_v51 = vld [vmem:[%s4324_s17 + $0xa4] sm:$0x1] }
 0x104   : > { %v5424_v57 = vpop.permute.xlu1 %2221  ;;  %v778_v20 = vrot.slane %v210_v39, 5  ;;  %v564_v54 = vrot.slane %v563_v7, 4  ;;  %v2909_v9 = vsel %vm2899_vm10, %v2876_v59, %v5310_v60  ;;  %v3624_v29 = vrot.slane %v630_v52, 9 }
 0x105   : > { %v771_v42 = vrot.slane %v5361_v28, 5  ;;  %v559_v21 = vsel %vm4392_vm5, %v554_v25, %v558_v45  ;;  %v1986_v0 = vsel %vm4348_vm2, %v1984_v8, %v1985_v61  ;;  %v2944_v36 = vsel %vm2932_vm11, %v2911_v23, %v5325_v47 }
 0x106   : > { %v779_v38 = vsel %vm4348_vm2, %v3625_v11, %v778_v20  ;;  %v780_v39 = vrot.slane %v778_v20, 4  ;;  %v569_v28 = vsel %vm4392_vm5, %v564_v54, %v568_v62  ;;  %v3927_v44 = vcombine.low %v1983_v63, %v1986_v0  ;;  %v3689_v11 = vld [vmem:[%s4324_s17 + $0xa8] sm:$0xe] }
 0x107   : > { %v5448_v60 = vpop.permute.xlu0 %2315  ;;  %v772_v12 = vsel %vm4348_vm2, %v3624_v29, %v771_v42  ;;  %v773_v1 = vrot.slane %v771_v42, 4  ;;  %v3817_v56 = vcombine.low %v559_v21, %v569_v28  ;;  %v1159_v5 = vshrl.u32 %v5435_v35, 16  ;;  %v4258_v42 = vld [vmem:[%s4324_s17 + $0x48] sm:$0xf] }
 0x108   : > { %v5446_v10 = vpop.permute.xlu1 %2317  ;;  %v782_v58 = vsel %vm4348_vm2, %v780_v39, %v781_v33  ;;  %2741 = vrot.lane.b32.xlu0 %v3927_v44, %s4289_s27  ;;  %v2942_v53 = vsel %vm2932_vm11, %v2909_v9, %v5338_v15  ;;  %v1162_v18 = vshll.u32 %v5435_v35, 16  ;;  %v1172_v48 = vshrl.u32 %v5444_v3, 16 }
 0x109   : > { %v775_v37 = vsel %vm4348_vm2, %v773_v1, %v774_v27  ;;  %2153 = vrot.lane.b32.xlu1 %v3817_v56, %s4285_s21  ;;  %v3833_v47 = vcombine.low %v779_v38, %v782_v58  ;;  %v1161_v46 = vrot.slane %v1159_v5, 4  ;;  %v1135_v55 = vshrl.u32 %v3652_v50, 16  ;;  %v3688_v38 = vld [vmem:[%s4324_s17 + $0x9c] sm:$0xe] }
 0x10a   : > { %v3832_v40 = vcombine.low %v772_v12, %v775_v37  ;;  %v1164_v49 = vrot.slane %v1162_v18, 5  ;;  %v3849_v27 = vcombine.low %v5435_v35, %v5444_v3  ;;  %v1138_v26 = vshll.u32 %v3652_v50, 16  ;;  %v4259_v35 = vld [vmem:[%s4324_s17 + $0x4c] sm:$0xf] }
 0x10b   : > { %v1148_v15 = vshrl.u32 %v5461_v30, 16  ;;  %v1137_v59 = vrot.slane %v1135_v55, 4  ;;  %v3848_v45 = vcombine.low %v3652_v50, %v5461_v30  ;;  %v2977_v14 = vsel %vm2965_vm12, %v2944_v36, %v5350_v34 }
 0x10c   : > { %v5476_v31 = vpop.permute.xlu1 %2397  ;;  %v1168_v62 = vshll.u32 %v5444_v3, 16  ;;  %2231 = vrot.lane.b32.xlu0 %v3832_v40, %s4284_s20  ;;  %v1140_v4 = vrot.slane %v1138_v26, 5  ;;  %v1165_v6 = vor.u32 %v1164_v49, %v1161_v46  ;;  %v1174_v61 = vrot.slane %v1172_v48, 4  ;;  %v4260_v49 = vld [vmem:[%s4324_s17 + $0x54] sm:$0xf] }
 0x10d   : > { %v1178_v52 = vshll.u32 %v5474_v22, 16  ;;  %2233 = vrot.lane.b32.xlu1 %v3833_v47, %s4284_s20  ;;  %v1144_v33 = vshll.u32 %v5461_v30, 16  ;;  %v1150_v34 = vrot.slane %v1148_v15, 4  ;;  %v1154_v23 = vshll.u32 %v5482_v51, 16  ;;  %v5534_v15 = vld [vmem:[%s4324_s17 + $0xb8] sm:$0xf] }
 0x10e   : > { %v5488_v41 = vpop.permute.xlu0 %2395  ;;  %v1170_v7 = vrot.slane %v1168_v62, 5  ;;  %v2975_v63 = vsel %vm2965_vm12, %v2942_v53, %v5356_v13  ;;  %v1166_v8 = vrot.slane %v1165_v6, 4  ;;  %v1141_v54 = vor.u32 %v1140_v4, %v1137_v59  ;;  %v5519_v53 = vld [vmem:[%s4324_s17 + $0xb4] sm:$0xf]  ;;  %v3732_v4 = vld [vmem:[%s4324_s17 + $0xa8] sm:$0xf] }
 0x10f   : > { %v1180_v20 = vrot.slane %v1178_v52, 5  ;;  %v1146_v29 = vrot.slane %v1144_v33, 5  ;;  %v3794_v21 = vcombine.low %v4258_v42, %v4259_v35  ;;  %v3008_v0 = vsel %vm2998_vm14, %v2975_v63, %v5377_v43  ;;  %v5545_v6 = vld [vmem:[%s4324_s17 + $0xac] sm:$0xf]  ;;  %v5570_v35 = vld [vmem:[%s4324_s17 + $0xb0] sm:$0x1] }
 0x110   : > { %v5496_v25 = vpop.permute.xlu1 %2477  ;;  %v1175_v9 = vor.u32 %v1174_v61, %v1170_v7  ;;  %2327 = vrot.lane.b32.xlu0 %v3848_v45, %s4282_s18  ;;  %v1171_v13 = vsel %vm4392_vm5, %v1166_v8, %v1170_v7  ;;  %v1142_v28 = vrot.slane %v1141_v54, 4  ;;  %v1156_v44 = vrot.slane %v1154_v23, 5  ;;  %4146 = vmatprep.mubr.msk.bf16.mxu0 %vm3051_vm15, %v3008_v0 }
 0x111   : > { %v3705_v12 = vrot.slane %v3689_v11, 9  ;;  %2329 = vrot.lane.b32.xlu1 %v3849_v27, %s4282_s18  ;;  %v1151_v50 = vor.u32 %v1150_v34, %v1146_v29  ;;  %v1387_v43 = vrot.slane %v5444_v3, 5  ;;  %v1390_v56 = vrot.slane %v5474_v22, 5  ;;  %v4261_v27 = vld [vmem:[%s4324_s17 + $0x58] sm:$0xf] }
 0x112   : > { %v5505_v39 = vpop.permute.xlu0 %2475  ;;  %v1176_v1 = vrot.slane %v1175_v9, 4  ;;  %v1147_v58 = vsel %vm4392_vm5, %v1142_v28, %v1146_v29  ;;  %v3704_v36 = vrot.slane %v3688_v38, 9  ;;  %v1380_v5 = vrot.slane %v5461_v30, 5 }
 0x113   : > { %v1383_v37 = vrot.slane %v5482_v51, 5  ;;  %v1152_v48 = vrot.slane %v1151_v50, 4  ;;  %v1388_v3 = vsel %vm4348_vm2, %v3705_v12, %v1387_v43  ;;  %v1389_v47 = vrot.slane %v1387_v43, 4 }
 0x114   : > { %v1181_v18 = vsel %vm4392_vm5, %v1176_v1, %v1180_v20  ;;  %v5525_v40 = vpop.permute.xlu1 %2573  ;;  %v1381_v30 = vsel %vm4348_vm2, %v3704_v36, %v1380_v5  ;;  %v1382_v22 = vrot.slane %v1380_v5, 4  ;;  %v3795_v26 = vcombine.low %v4260_v49, %v4261_v27  ;;  %v5560_v20 = vld [vmem:[%s4324_s17 + $0xbc] sm:$0x1]  ;;  %v5586_v5 = vld [vmem:[%s4324_s17 + $0xac] sm:$0xf] }
 0x115   : > { %v3865_v55 = vcombine.low %v1171_v13, %v1181_v18  ;;  %v1157_v51 = vsel %vm4392_vm5, %v1152_v48, %v1156_v44  ;;  %v1391_v59 = vsel %vm4348_vm2, %v1389_v47, %v1390_v56  ;;  %v3010_v45 = vsel %vm2998_vm14, %v2977_v14, %v5401_v16 }
 0x116   : > { %v5527_v46 = vpop.permute.xlu0 %2571  ;;  %v1768_v62 = vshrl.u32 %v5519_v53, 16  ;;  %v3864_v61 = vcombine.low %v1147_v58, %v1157_v51  ;;  %v2772_v52 = vsel %vm2751_vm6, %v3794_v21, %v5380_v32  ;;  %v3881_v7 = vcombine.low %v1388_v3, %v1391_v59  ;;  %4147 = vmatmul.mubr.msk.bf16.gmra.mrb[8].mxu0 %vm3051_vm15, %v3010_v45 }
 0x117   : > { %2409 = vrot.lane.b32.xlu1 %v3865_v55, %s4286_s22  ;;  %v1384_v33 = vsel %vm4348_vm2, %v1382_v22, %v1383_v37  ;;  %v2775_v34 = vsel %vm2751_vm6, %v3795_v26, %v5406_v24  ;;  %v1771_v14 = vshll.u32 %v5519_v53, 16  ;;  %v1781_v23 = vshrl.u32 %v5534_v15, 16 }
 0x118   : > { %v1770_v16 = vrot.slane %v1768_v62, 4  ;;  %2407 = vrot.lane.b32.xlu0 %v3864_v61, %s4286_s22  ;;  %v3880_v11 = vcombine.low %v1381_v30, %v1384_v33  ;;  %v1744_v63 = vshrl.u32 %v3732_v4, 16  ;;  %v1747_v32 = vshll.u32 %v3732_v4, 16  ;;  %v5592_v30 = vld [vmem:[%s4324_s17 + $0xb0] sm:$0x1] }
 0x119   : > { %v1757_v8 = vshrl.u32 %v5545_v6, 16  ;;  %v1773_v24 = vrot.slane %v1771_v14, 5  ;;  %v3897_v9 = vcombine.low %v5519_v53, %v5534_v15  ;;  %v3896_v29 = vcombine.low %v3732_v4, %v5545_v6  ;;  %v5572_v21 = vpop.permute.xlu1 %2653 }
 0x11a   : > { %v5562_v54 = vpop.permute.xlu0 %2651  ;;  %v2816_v42 = vsel %vm2800_vm7, %v2775_v34, %v5424_v57  ;;  %v1746_v0 = vrot.slane %v1744_v63, 4  ;;  %v1749_v38 = vrot.slane %v1747_v32, 5  ;;  %v1777_v13 = vshll.u32 %v5534_v15, 16  ;;  %v5579_v57 = vld [vmem:[%s4324_s17 + $0xa8] sm:$0xf] }
 0x11b   : > { %2489 = vrot.lane.b32.xlu1 %v3881_v7, %s4283_s19  ;;  %v1783_v28 = vrot.slane %v1781_v23, 4  ;;  %v1774_v44 = vor.u32 %v1773_v24, %v1770_v16  ;;  %v1787_v12 = vshll.u32 %v5560_v20, 16  ;;  %v1753_v1 = vshll.u32 %v5545_v6, 16 }
 0x11c   : > { %v1759_v50 = vrot.slane %v1757_v8, 4  ;;  %2487 = vrot.lane.b32.xlu0 %v3880_v11, %s4283_s19  ;;  %v2814_v43 = vsel %vm2800_vm7, %v2772_v52, %v5417_v2  ;;  %v1779_v56 = vrot.slane %v1777_v13, 5  ;;  %v1750_v58 = vor.u32 %v1749_v38, %v1746_v0 }
 0x11d   : > { %v1763_v36 = vshll.u32 %v5570_v35, 16  ;;  %v1775_v37 = vrot.slane %v1774_v44, 4  ;;  %v1789_v53 = vrot.slane %v1787_v12, 5  ;;  %v1755_v18 = vrot.slane %v1753_v1, 5 }
 0x11e   : > { %v2849_v48 = vsel %vm2833_vm8, %v2816_v42, %v5446_v10  ;;  %v1784_v3 = vor.u32 %v1783_v28, %v1779_v56  ;;  %v1751_v47 = vrot.slane %v1750_v58, 4  ;;  %v571_v2 = vshrl.u32 %v5579_v57, 16  ;;  %v3768_v10 = vld [vmem:[%s4324_s17 + $0xa8] sm:$0xe]  ;;  %v5623_v28 = vld [vmem:[%s4324_s17 + $0xbc] sm:$0x1] }
 0x11f   : > { %2585 = vrot.lane.b32.xlu1 %v3897_v9, %s4287_s23  ;;  %v1765_v55 = vrot.slane %v1763_v36, 5  ;;  %v1780_v49 = vsel %vm4392_vm5, %v1775_v37, %v1779_v56  ;;  %v1760_v27 = vor.u32 %v1759_v50, %v1755_v18  ;;  %v574_v26 = vshll.u32 %v5579_v57, 16  ;;  %v5602_v59 = vpop.permute.xlu1 %2143  ;;  %v5617_v9 = vld [vmem:[%s4324_s17 + $0xb4] sm:$0xf] }
 0x120   : > { %v5595_v22 = vpop.permute.xlu0 %2731  ;;  %v580_v51 = vshll.u32 %v5586_v5, 16  ;;  %2583 = vrot.lane.b32.xlu0 %v3896_v29, %s4287_s23  ;;  %v1785_v45 = vrot.slane %v1784_v3, 4  ;;  %v1756_v62 = vsel %vm4392_vm5, %v1751_v47, %v1755_v18  ;;  %v573_v4 = vrot.slane %v571_v2, 4  ;;  %v5620_v29 = vld [vmem:[%s4324_s17 + $0xb8] sm:$0xf] }
 0x121   : > { %v584_v61 = vshrl.u32 %v5586_v5, 16  ;;  %v1761_v52 = vrot.slane %v1760_v27, 4  ;;  %v576_v7 = vrot.slane %v574_v26, 5  ;;  %v590_v34 = vshll.u32 %v5592_v30, 16  ;;  %v3769_v18 = vld [vmem:[%s4324_s17 + $0xb4] sm:$0xe] }
 0x122   : > { %v582_v33 = vrot.slane %v580_v51, 5  ;;  %v1790_v16 = vsel %vm4392_vm5, %v1785_v45, %v1789_v53  ;;  %v3784_v23 = vrot.slane %v3768_v10, 9  ;;  %v1989_v11 = vrot.slane %v5545_v6, 5  ;;  %v633_v2 = vld [vmem:[%s4324_s17 + $0xb4] sm:$0xe] }
 0x123   : > { %v586_v14 = vrot.slane %v584_v61, 4  ;;  %v3913_v63 = vcombine.low %v1780_v49, %v1790_v16  ;;  %v1766_v32 = vsel %vm4392_vm5, %v1761_v52, %v1765_v55  ;;  %v2847_v8 = vsel %vm2833_vm8, %v2814_v43, %v5448_v60  ;;  %v632_v52 = vld [vmem:[%s4324_s17 + $0xa8] sm:$0xe] }
 0x124   : > { %v577_v24 = vor.u32 %v576_v7, %v573_v4  ;;  %v3912_v42 = vcombine.low %v1756_v62, %v1766_v32  ;;  %v592_v38 = vrot.slane %v590_v34, 5  ;;  %v1991_v13 = vrot.slane %v1989_v11, 4 }
 0x125   : > { %v587_v0 = vor.u32 %v586_v14, %v582_v33  ;;  %v5625_v44 = vpop.permute.xlu0 %2733  ;;  %2665 = vrot.lane.b32.xlu1 %v3913_v63, %s4288_s24  ;;  %v1990_v60 = vsel %vm4348_vm2, %v3784_v23, %v1989_v11  ;;  %v1992_v12 = vrot.slane %v5570_v35, 5  ;;  %v2882_v1 = vsel %vm2866_vm9, %v2849_v48, %v5476_v31 }
 0x126   : > { %v578_v6 = vrot.slane %v577_v24, 4  ;;  %2663 = vrot.lane.b32.xlu0 %v3912_v42, %s4288_s24  ;;  %v595_v56 = vshrl.u32 %v5617_v9, 16  ;;  %v598_v58 = vshll.u32 %v5617_v9, 16  ;;  %v604_v36 = vshll.u32 %v5620_v29, 16 }
 0x127   : > { %v588_v43 = vrot.slane %v587_v0, 4  ;;  %v1993_v35 = vsel %vm4348_vm2, %v1991_v13, %v1992_v12  ;;  %v608_v31 = vshrl.u32 %v5620_v29, 16  ;;  %v614_v53 = vshll.u32 %v5623_v28, 16  ;;  %v5681_v12 = vld [vmem:[%s4324_s17 + $0xc4] sm:$0xf] }
 0x128   : > { %v5633_v50 = vpop.permute.xlu1 %2145  ;;  %v583_v37 = vsel %vm4392_vm5, %v578_v6, %v582_v33  ;;  %v3928_v3 = vcombine.low %v1990_v60, %v1993_v35  ;;  %v597_v47 = vrot.slane %v595_v56, 4  ;;  %v600_v55 = vrot.slane %v598_v58, 5 }
 0x129   : > { %v593_v48 = vsel %vm4392_vm5, %v588_v43, %v592_v38  ;;  %v2880_v27 = vsel %vm2866_vm9, %v2847_v8, %v5488_v41  ;;  %v606_v26 = vrot.slane %v604_v36, 5  ;;  %v610_v51 = vrot.slane %v608_v31, 4  ;;  %v5674_v38 = vld [vmem:[%s4324_s17 + $0xc0] sm:$0xf] }
 0x12a   : > { %v3818_v49 = vcombine.low %v583_v37, %v593_v48  ;;  %2743 = vrot.lane.b32.xlu0 %v3928_v3, %s4289_s27  ;;  %v601_v45 = vor.u32 %v600_v55, %v597_v47  ;;  %v3785_v62 = vrot.slane %v3769_v18, 9  ;;  %v1996_v4 = vrot.slane %v5534_v15, 5  ;;  %v5657_v7 = vpop.permute.xlu0 %2223  ;;  %v5699_v48 = vld [vmem:[%s4324_s17 + $0xb8] sm:$0xf] }
 0x12b   : > { %v1999_v61 = vrot.slane %v5560_v20, 5  ;;  %v611_v33 = vor.u32 %v610_v51, %v606_v26  ;;  %v616_v41 = vrot.slane %v614_v53, 5  ;;  %v2915_v34 = vsel %vm2899_vm10, %v2882_v1, %v5496_v25  ;;  %v3656_v1 = vld [vmem:[%s4324_s17 + $0xb4] sm:$0xf] }
 0x12c   : > { %v5651_v10 = vpop.permute.xlu1 %2225  ;;  %2155 = vrot.lane.b32.xlu1 %v3818_v49, %s4285_s21  ;;  %v3627_v16 = vrot.slane %v633_v2, 9  ;;  %v602_v14 = vrot.slane %v601_v45, 4  ;;  %v1997_v23 = vsel %vm4348_vm2, %v3785_v62, %v1996_v4  ;;  %v1998_v15 = vrot.slane %v1996_v4, 4 }
 0x12d   : > { %v792_v20 = vrot.slane %v5620_v29, 5  ;;  %v612_v11 = vrot.slane %v611_v33, 4  ;;  %v795_v63 = vrot.slane %v5623_v28, 5  ;;  %v3626_v32 = vrot.slane %v632_v52, 9 }
 0x12e   : > { %v785_v8 = vrot.slane %v5586_v5, 5  ;;  %v607_v24 = vsel %vm4392_vm5, %v602_v14, %v606_v26  ;;  %v2000_v25 = vsel %vm4348_vm2, %v1998_v15, %v1999_v61  ;;  %v2913_v28 = vsel %vm2899_vm10, %v2880_v27, %v5505_v39  ;;  %v5691_v35 = vpop.permute.xlu0 %2319  ;;  %v3675_v26 = vld [vmem:[%s4324_s17 + $0xc8] sm:$0x1]  ;;  %v5713_v61 = vld [vmem:[%s4324_s17 + $0xbc] sm:$0x1] }
 0x12f   : > { %v793_v42 = vsel %vm4348_vm2, %v3627_v16, %v792_v20  ;;  %v794_v0 = vrot.slane %v792_v20, 4  ;;  %v617_v13 = vsel %vm4392_vm5, %v612_v11, %v616_v41  ;;  %v3929_v6 = vcombine.low %v1997_v23, %v2000_v25 }
 0x130   : > { %v787_v60 = vrot.slane %v785_v8, 4  ;;  %v5684_v43 = vpop.permute.xlu1 %2321  ;;  %v3819_v56 = vcombine.low %v607_v24, %v617_v13  ;;  %v786_v36 = vsel %vm4348_vm2, %v3626_v32, %v785_v8  ;;  %v788_v37 = vrot.slane %v5592_v30, 5  ;;  %v3691_v8 = vld [vmem:[%s4324_s17 + $0xc0] sm:$0xe] }
 0x131   : > { %v796_v58 = vsel %vm4348_vm2, %v794_v0, %v795_v63  ;;  %2745 = vrot.lane.b32.xlu0 %v3929_v6, %s4289_s27  ;;  %v2948_v31 = vsel %vm2932_vm11, %v2915_v34, %v5525_v40  ;;  %v1207_v53 = vshrl.u32 %v5674_v38, 16  ;;  %v1210_v18 = vshll.u32 %v5674_v38, 16  ;;  %v3690_v0 = vld [vmem:[%s4324_s17 + $0xb4] sm:$0xe] }
 0x132   : > { %v3835_v39 = vcombine.low %v793_v42, %v796_v58  ;;  %2157 = vrot.lane.b32.xlu1 %v3819_v56, %s4285_s21  ;;  %v789_v30 = vsel %vm4348_vm2, %v787_v60, %v788_v37  ;;  %v2946_v3 = vsel %vm2932_vm11, %v2913_v28, %v5527_v46  ;;  %v1220_v47 = vshrl.u32 %v5681_v12, 16  ;;  %v4262_v28 = vld [vmem:[%s4324_s17 + $0x60] sm:$0xf]  ;;  %v4263_v60 = vld [vmem:[%s4324_s17 + $0x64] sm:$0xf] }
 0x133   : > { %v1183_v55 = vshrl.u32 %v3656_v1, 16  ;;  %v3834_v2 = vcombine.low %v786_v36, %v789_v30  ;;  %v1209_v40 = vrot.slane %v1207_v53, 4  ;;  %v1212_v49 = vrot.slane %v1210_v18, 5 }
 0x134   : > { %v1186_v27 = vshll.u32 %v3656_v1, 16  ;;  %v3851_v51 = vcombine.low %v5674_v38, %v5681_v12  ;;  %v1196_v62 = vshrl.u32 %v5699_v48, 16  ;;  %v3850_v4 = vcombine.low %v3656_v1, %v5699_v48 }
 0x135   : > { %v1185_v45 = vrot.slane %v1183_v55, 4  ;;  %2235 = vrot.lane.b32.xlu0 %v3834_v2, %s4284_s20  ;;  %v2979_v52 = vsel %vm2965_vm12, %v2946_v3, %v5562_v54  ;;  %v1213_v33 = vor.u32 %v1212_v49, %v1209_v40  ;;  %v1216_v41 = vshll.u32 %v5681_v12, 16 }
 0x136   : > { %v1188_v46 = vrot.slane %v1186_v27, 5  ;;  %v5719_v34 = vpop.permute.xlu1 %2401  ;;  %2237 = vrot.lane.b32.xlu1 %v3835_v39, %s4284_s20  ;;  %v1222_v16 = vrot.slane %v1220_v47, 4  ;;  %v1226_v14 = vshll.u32 %v3675_v26, 16  ;;  %v1192_v23 = vshll.u32 %v5699_v48, 16  ;;  %v3738_v27 = vld [vmem:[%s4324_s17 + $0xcc] sm:$0xf] }
 0x137   : > { %v1198_v15 = vrot.slane %v1196_v62, 4  ;;  %v5723_v20 = vpop.permute.xlu0 %2399  ;;  %v1214_v11 = vrot.slane %v1213_v33, 4  ;;  %v1218_v63 = vrot.slane %v1216_v41, 5  ;;  %v1202_v32 = vshll.u32 %v5713_v61, 16  ;;  %v4264_v62 = vld [vmem:[%s4324_s17 + $0x6c] sm:$0xf] }
 0x138   : > { %v1189_v54 = vor.u32 %v1188_v46, %v1185_v45  ;;  %v2981_v24 = vsel %vm2965_vm12, %v2948_v31, %v5572_v21  ;;  %v1194_v25 = vrot.slane %v1192_v23, 5  ;;  %v3012_v42 = vsel %vm2998_vm14, %v2979_v52, %v5595_v22  ;;  %v3736_v52 = vld [vmem:[%s4324_s17 + $0xc0] sm:$0xf]  ;;  %v5766_v33 = vld [vmem:[%s4324_s17 + $0xc4] sm:$0xf] }
 0x139   : > { %2331 = vrot.lane.b32.xlu0 %v3850_v4, %s4282_s18  ;;  %v1223_v38 = vor.u32 %v1222_v16, %v1218_v63  ;;  %v1228_v13 = vrot.slane %v1226_v14, 5  ;;  %v3796_v1 = vcombine.low %v4262_v28, %v4263_v60  ;;  %4150 = vmatprep.mubr.msk.bf16.mxu0 %vm3051_vm15, %v3012_v42  ;;  %v1204_v58 = vrot.slane %v1202_v32, 5  ;;  %v4265_v4 = vld [vmem:[%s4324_s17 + $0x70] sm:$0xf] }
 0x13a   : > { %v1190_v6 = vrot.slane %v1189_v54, 4  ;;  %v5736_v56 = vpop.permute.xlu1 %2481  ;;  %2333 = vrot.lane.b32.xlu1 %v3851_v51, %s4282_s18  ;;  %v1199_v21 = vor.u32 %v1198_v15, %v1194_v25  ;;  %v3707_v36 = vrot.slane %v3691_v8, 9  ;;  %v1401_v22 = vrot.slane %v5681_v12, 5 }
 0x13b   : > { %v5740_v37 = vpop.permute.xlu0 %2479  ;;  %v1219_v39 = vsel %vm4392_vm5, %v1214_v11, %v1218_v63  ;;  %v1224_v31 = vrot.slane %v1223_v38, 4  ;;  %v1404_v53 = vrot.slane %v3675_v26, 5  ;;  %v3706_v18 = vrot.slane %v3690_v0, 9  ;;  %v5756_v26 = vld [vmem:[%s4324_s17 + $0xd0] sm:$0xf] }
 0x13c   : > { %v1195_v30 = vsel %vm4392_vm5, %v1190_v6, %v1194_v25  ;;  %v1200_v3 = vrot.slane %v1199_v21, 4  ;;  %v1403_v47 = vrot.slane %v1401_v22, 4  ;;  %v1394_v55 = vrot.slane %v5699_v48, 5  ;;  %v3755_v25 = vld [vmem:[%s4324_s17 + $0xd4] sm:$0x1] }
 0x13d   : > { %v1229_v12 = vsel %vm4392_vm5, %v1224_v31, %v1228_v13  ;;  %v1402_v2 = vsel %vm4348_vm2, %v3707_v36, %v1401_v22  ;;  %v1397_v40 = vrot.slane %v5713_v61, 5  ;;  %v3014_v49 = vsel %vm2998_vm14, %v2981_v24, %v5625_v44  ;;  %v3754_v6 = vld [vmem:[%s4324_s17 + $0xc8] sm:$0x1] }
 0x13e   : > { %v3867_v51 = vcombine.low %v1219_v39, %v1229_v12  ;;  %v1205_v45 = vsel %vm4392_vm5, %v1200_v3, %v1204_v58  ;;  %v1405_v48 = vsel %vm4348_vm2, %v1403_v47, %v1404_v53  ;;  %v3797_v46 = vcombine.low %v4264_v62, %v4265_v4  ;;  %4151 = vmatmul.mubr.msk.bf16.gmra.mrb[12].mxu0 %vm3051_vm15, %v3014_v49  ;;  %v5773_v14 = vpop.permute.xlu1 %2577  ;;  %v3770_v49 = vld [vmem:[%s4324_s17 + $0xc0] sm:$0xe] }
 0x13f   : > { %v3866_v61 = vcombine.low %v1195_v30, %v1205_v45  ;;  %v2778_v44 = vsel %vm2751_vm6, %v3796_v1, %v5602_v59  ;;  %v1395_v41 = vsel %vm4348_vm2, %v3706_v18, %v1394_v55  ;;  %v1396_v16 = vrot.slane %v1394_v55, 4  ;;  %v5775_v23 = vpop.permute.xlu0 %2575  ;;  %v3771_v30 = vld [vmem:[%s4324_s17 + $0xcc] sm:$0xe] }
 0x140   : > { %2413 = vrot.lane.b32.xlu1 %v3867_v51, %s4286_s22  ;;  %v3883_v15 = vcombine.low %v1402_v2, %v1405_v48  ;;  %v1816_v11 = vshrl.u32 %v3738_v27, 16  ;;  %v1819_v63 = vshll.u32 %v3738_v27, 16  ;;  %v1829_v54 = vshrl.u32 %v5756_v26, 16 }
 0x141   : > { %2411 = vrot.lane.b32.xlu0 %v3866_v61, %s4286_s22  ;;  %v1398_v59 = vsel %vm4348_vm2, %v1396_v16, %v1397_v40  ;;  %v1792_v32 = vshrl.u32 %v3736_v52, 16  ;;  %v1795_v8 = vshll.u32 %v3736_v52, 16  ;;  %v1805_v24 = vshrl.u32 %v5766_v33, 16 }
 0x142   : > { %v3882_v42 = vcombine.low %v1395_v41, %v1398_v59  ;;  %v2781_v0 = vsel %vm2751_vm6, %v3797_v46, %v5633_v50  ;;  %v1818_v38 = vrot.slane %v1816_v11, 4  ;;  %v1821_v13 = vrot.slane %v1819_v63, 5 }
 0x143   : > { %v3899_v28 = vcombine.low %v3738_v27, %v5756_v26  ;;  %v1794_v60 = vrot.slane %v1792_v32, 4  ;;  %v1797_v1 = vrot.slane %v1795_v8, 5  ;;  %v3898_v21 = vcombine.low %v3736_v52, %v5766_v33 }
 0x144   : > { %2493 = vrot.lane.b32.xlu1 %v3883_v15, %s4283_s19  ;;  %v1822_v58 = vor.u32 %v1821_v13, %v1818_v38  ;;  %v1825_v36 = vshll.u32 %v5756_v26, 16  ;;  %v1831_v22 = vrot.slane %v1829_v54, 4  ;;  %v1835_v39 = vshll.u32 %v3755_v25, 16  ;;  %v2658_v3 = vpop.permute.xlu1 %2657 }
 0x145   : > { %2491 = vrot.lane.b32.xlu0 %v3882_v42, %s4283_s19  ;;  %v1798_v50 = vor.u32 %v1797_v1, %v1794_v60  ;;  %v1801_v31 = vshll.u32 %v5766_v33, 16  ;;  %v1807_v53 = vrot.slane %v1805_v24, 4  ;;  %v1811_v18 = vshll.u32 %v3754_v6, 16  ;;  %v2656_v47 = vpop.permute.xlu0 %2655 }
 0x146   : > { %v2820_v55 = vsel %vm2800_vm7, %v2781_v0, %v5651_v10  ;;  %v2818_v12 = vsel %vm2800_vm7, %v2778_v44, %v5657_v7  ;;  %v1823_v2 = vrot.slane %v1822_v58, 4  ;;  %v1827_v40 = vrot.slane %v1825_v36, 5 }
 0x147   : > { %v1837_v27 = vrot.slane %v1835_v39, 5  ;;  %v1799_v51 = vrot.slane %v1798_v50, 4  ;;  %v1803_v45 = vrot.slane %v1801_v31, 5  ;;  %v2853_v48 = vsel %vm2833_vm8, %v2820_v55, %v5684_v43  ;;  %v4267_v55 = vld [vmem:[%s4324_s17 + $0x7c] sm:$0xf] }
 0x148   : > { %2589 = vrot.lane.b32.xlu1 %v3899_v28, %s4287_s23  ;;  %v1832_v62 = vor.u32 %v1831_v22, %v1827_v40  ;;  %v1813_v4 = vrot.slane %v1811_v18, 5  ;;  %v3787_v46 = vrot.slane %v3771_v30, 9  ;;  %v2010_v52 = vrot.slane %v5756_v26, 5 }
 0x149   : > { %2587 = vrot.lane.b32.xlu0 %v3898_v21, %s4287_s23  ;;  %v1808_v10 = vor.u32 %v1807_v53, %v1803_v45  ;;  %v2851_v7 = vsel %vm2833_vm8, %v2818_v12, %v5691_v35  ;;  %v2013_v61 = vrot.slane %v3755_v25, 5  ;;  %v3786_v44 = vrot.slane %v3770_v49, 9  ;;  %v2736_v11 = vpop.permute.xlu0 %2735 }
 0x14a   : > { %v1828_v41 = vsel %vm4392_vm5, %v1823_v2, %v1827_v40  ;;  %v1833_v16 = vrot.slane %v1832_v62, 4  ;;  %v2012_v43 = vrot.slane %v2010_v52, 4  ;;  %v2003_v15 = vrot.slane %v5766_v33, 5  ;;  %v4268_v62 = vld [vmem:[%s4324_s17 + $0x84] sm:$0xf] }
 0x14b   : > { %v1804_v63 = vsel %vm4392_vm5, %v1799_v51, %v1803_v45  ;;  %v1809_v26 = vrot.slane %v1808_v10, 4  ;;  %v2011_v54 = vsel %vm4348_vm2, %v3787_v46, %v2010_v52  ;;  %v2006_v59 = vrot.slane %v3754_v6, 5  ;;  %v2148_v32 = vpop.permute.xlu1 %2147 }
 0x14c   : > { %v1838_v35 = vsel %vm4392_vm5, %v1833_v16, %v1837_v27  ;;  %v2014_v8 = vsel %vm4348_vm2, %v2012_v43, %v2013_v61  ;;  %v2005_v24 = vrot.slane %v2003_v15, 4  ;;  %v2886_v33 = vsel %vm2866_vm9, %v2853_v48, %v5719_v34 }
 0x14d   : > { %v3915_v25 = vcombine.low %v1828_v41, %v1838_v35  ;;  %v1814_v42 = vsel %vm4392_vm5, %v1809_v26, %v1813_v4  ;;  %v2004_v0 = vsel %vm4348_vm2, %v3786_v44, %v2003_v15  ;;  %v2884_v38 = vsel %vm2866_vm9, %v2851_v7, %v5723_v20  ;;  %v4269_v4 = vld [vmem:[%s4324_s17 + $0x88] sm:$0xf] }
 0x14e   : > { %v3914_v13 = vcombine.low %v1804_v63, %v1814_v42  ;;  %v2007_v6 = vsel %vm4348_vm2, %v2005_v24, %v2006_v59  ;;  %v2919_v28 = vsel %vm2899_vm10, %v2886_v33, %v5736_v56  ;;  %v2917_v34 = vsel %vm2899_vm10, %v2884_v38, %v5740_v37 }
 0x14f   : > { %2669 = vrot.lane.b32.xlu1 %v3915_v25, %s4288_s24  ;;  %v3931_v19 = vcombine.low %v2011_v54, %v2014_v8  ;;  %v2952_v60 = vsel %vm2932_vm11, %v2919_v28, %v5773_v14  ;;  %v2950_v1 = vsel %vm2932_vm11, %v2917_v34, %v5775_v23  ;;  %v3930_v20 = vcombine.low %v2004_v0, %v2007_v6  ;;  %v4270_v28 = vld [vmem:[%s4324_s17 + $0x90] sm:$0xf]  ;;  %v4271_v34 = vld [vmem:[%s4324_s17 + $0x94] sm:$0xf] }
 0x150   : > { %2667 = vrot.lane.b32.xlu0 %v3914_v13, %s4288_s24  ;;  %v2985_v17 = vsel %vm2965_vm12, %v2952_v60, %v2658_v3  ;;  %v2983_v21 = vsel %vm2965_vm12, %v2950_v1, %v2656_v47  ;;  %v2738_v56 = vpop.permute.xlu0 %2737  ;;  %v3802_v14 = vcombine.low %v5579_v57, %v5586_v5  ;;  %v3803_v23 = vcombine.low %v5617_v9, %v5620_v29  ;;  %v4266_v47 = vld [vmem:[%s4324_s17 + $0x78] sm:$0xf] }
 0x151   : > { %v3016_v58 = vsel %vm2998_vm14, %v2983_v21, %v2736_v11  ;;  %v2150_v37 = vpop.permute.xlu1 %2149  ;;  %v3018_v36 = vsel %vm2998_vm14, %v2985_v17, %v2738_v56  ;;  %v3798_v12 = vcombine.low %v4266_v47, %v4267_v55  ;;  %v3799_v46 = vcombine.low %v4268_v62, %v4269_v4  ;;  %v4272_v21 = vld [vmem:[%s4324_s17 + $0x9c] sm:$0xf]  ;;  %v4273_v56 = vld [vmem:[%s4324_s17 + $0xa0] sm:$0xf] }
 0x152   : > { %4154 = vmatprep.mubr.msk.bf16.mxu1 %vm3051_vm15, %v3016_v58  ;;  %v3801_v58 = vcombine.low %v4272_v21, %v4273_v56 }
 0x153   : > { %2749 = vrot.lane.b32.xlu1 %v3931_v19, %s4289_s27  ;;  %4155 = vmatmul.mubr.msk.bf16.vlgmr.msra.gmra.mrb[0].mxu1 %vm3051_vm15, %v3018_v36  ;;  %v2784_v49 = vsel %vm2751_vm6, %v3798_v12, %v2148_v32  ;;  %v2787_v41 = vsel %vm2751_vm6, %v3799_v46, %v2150_v37  ;;  %v3800_v19 = vcombine.low %v4270_v28, %v4271_v34 }
 0x154   : > { %2747 = vrot.lane.b32.xlu0 %v3930_v20, %s4289_s27  ;;  %v2228_v22 = vpop.permute.xlu0 %2227 }
 0x155   : > { %v2230_v39 = vpop.permute.xlu1 %2229  ;;  %v2822_v27 = vsel %vm2800_vm7, %v2784_v49, %v2228_v22 }
 0x156   : > { %v2824_v43 = vsel %vm2800_vm7, %v2787_v41, %v2230_v39 }
 0x158   : > { %v2324_v31 = vpop.permute.xlu0 %2323 }
 0x159   : > { %v2326_v50 = vpop.permute.xlu1 %2325  ;;  %v2855_v51 = vsel %vm2833_vm8, %v2822_v27, %v2324_v31 }
 0x15a   : > { %v2857_v11 = vsel %vm2833_vm8, %v2824_v43, %v2326_v50 }
 0x15f   : > { %v2406_v53 = vpop.permute.xlu1 %2405 }
 0x160   : > { %v2404_v18 = vpop.permute.xlu0 %2403  ;;  %v2890_v63 = vsel %vm2866_vm9, %v2857_v11, %v2406_v53 }
 0x161   : > { %v2888_v52 = vsel %vm2866_vm9, %v2855_v51, %v2404_v18 }
 0x163   : > { %v2486_v30 = vpop.permute.xlu1 %2485 }
 0x164   : > { %v2484_v3 = vpop.permute.xlu0 %2483  ;;  %v2923_v26 = vsel %vm2899_vm10, %v2890_v63, %v2486_v30 }
 0x165   : > { %v2921_v10 = vsel %vm2899_vm10, %v2888_v52, %v2484_v3 }
 0x167   : > { %v2582_v2 = vpop.permute.xlu1 %2581 }
 0x168   : > { %v2580_v40 = vpop.permute.xlu0 %2579  ;;  %v2956_v54 = vsel %vm2932_vm11, %v2923_v26, %v2582_v2 }
 0x169   : > { %v2954_v7 = vsel %vm2932_vm11, %v2921_v10, %v2580_v40 }
 0x16e   : > { %v2662_v45 = vpop.permute.xlu1 %2661 }
 0x16f   : > { %v2660_v48 = vpop.permute.xlu0 %2659  ;;  %v2989_v59 = vsel %vm2965_vm12, %v2956_v54, %v2662_v45 }
 0x170   : > { %v2987_v61 = vsel %vm2965_vm12, %v2954_v7, %v2660_v48 }
 0x173   : > { %v2740_v44 = vpop.permute.xlu0 %2739 }
 0x174   : > { %v3020_v16 = vsel %vm2998_vm14, %v2987_v61, %v2740_v44  ;;  %v2152_v15 = vpop.permute.xlu1 %2151 }
 0x175   : > { %4158 = vmatprep.mubr.msk.bf16.mxu1 %vm3051_vm15, %v3020_v16  ;;  %v2790_v20 = vsel %vm2751_vm6, %v3800_v19, %v2152_v15 }
 0x17a   : > { %v2742_v32 = vpop.permute.xlu0 %2741 }
 0x17b   : > { %v2154_v35 = vpop.permute.xlu1 %2153  ;;  %v3022_v8 = vsel %vm2998_vm14, %v2989_v59, %v2742_v32 }
 0x17c   : > { %4159 = vmatmul.mubr.msk.bf16.gmra.mrb[4].mxu1 %vm3051_vm15, %v3022_v8  ;;  %v2793_v3 = vsel %vm2751_vm6, %v3801_v58, %v2154_v35 }
 0x17e   : > { %v2232_v24 = vpop.permute.xlu0 %2231 }
 0x17f   : > { %v2234_v33 = vpop.permute.xlu1 %2233  ;;  %v2826_v17 = vsel %vm2800_vm7, %v2790_v20, %v2232_v24 }
 0x180   : > { %v2828_v48 = vsel %vm2800_vm7, %v2793_v3, %v2234_v33 }
 0x182   : > { %v2328_v42 = vpop.permute.xlu0 %2327 }
 0x183   : > { %v2330_v25 = vpop.permute.xlu1 %2329  ;;  %v2859_v37 = vsel %vm2833_vm8, %v2826_v17, %v2328_v42 }
 0x184   : > { %v2861_v4 = vsel %vm2833_vm8, %v2828_v48, %v2330_v25 }
 0x189   : > { %v2410_v0 = vpop.permute.xlu1 %2409 }
 0x18a   : > { %v2408_v38 = vpop.permute.xlu0 %2407  ;;  %v2894_v7 = vsel %vm2866_vm9, %v2861_v4, %v2410_v0 }
 0x18b   : > { %v2892_v39 = vsel %vm2866_vm9, %v2859_v37, %v2408_v38 }
 0x18d   : > { %v2490_v13 = vpop.permute.xlu1 %2489 }
 0x18e   : > { %v2488_v6 = vpop.permute.xlu0 %2487  ;;  %v2927_v61 = vsel %vm2899_vm10, %v2894_v7, %v2490_v13 }
 0x18f   : > { %v2925_v31 = vsel %vm2899_vm10, %v2892_v39, %v2488_v6 }
 0x191   : > { %v2586_v60 = vpop.permute.xlu1 %2585 }
 0x192   : > { %v2584_v1 = vpop.permute.xlu0 %2583  ;;  %v2960_v43 = vsel %vm2932_vm11, %v2927_v61, %v2586_v60 }
 0x193   : > { %v2958_v18 = vsel %vm2932_vm11, %v2925_v31, %v2584_v1 }
 0x197   : > { %v2666_v36 = vpop.permute.xlu1 %2665 }
 0x198   : > { %v2664_v22 = vpop.permute.xlu0 %2663  ;;  %v4140_v50 = vpop.f32.mrb[0].mxu0  ;;  %v2993_v15 = vsel %vm2965_vm12, %v2960_v43, %v2666_v36 }
 0x199   : > { %v3122_v53 = vpop.f32.mrb[1].mxu0  ;;  %v2991_v47 = vsel %vm2965_vm12, %v2958_v18, %v2664_v22  ;;  %v3449_v46 = vmul.f32 %v4140_v50, %v4140_v50 }
 0x19a   : > { %v4141_v30 = vpop.f32.mrb[2].mxu0  ;;  %v3447_v12 = vmul.f32 %v3122_v53, %v3122_v53 }
 0x19b   : > { %v4026_v2 = vpack.c.bf16 %v4141_v30, %v4140_v50  ;;  %v3125_v40 = vpop.f32.mrb[3].mxu0  ;;  %v3450_v44 = vmul.f32 %v4141_v30, %v4141_v30 }
 0x19c   : > { %v2744_v55 = vpop.permute.xlu0 %2743  ;;  %v4021_v27 = vpack.c.bf16 %v3125_v40, %v3122_v53  ;;  %v3409_v51 = vadd.f32 %v3125_v40, %v3122_v53  ;;  %v3448_v45 = vmul.f32 %v3125_v40, %v3125_v40 }
 0x19d   : > { %v3024_v49 = vsel %vm2998_vm14, %v2991_v47, %v2744_v55  ;;  %4098 = vst [vmem:[%s5885_s8 + $0x8] sm:$0xff] %v4026_v2  }
 0x19e   : > { %v2156_v62 = vpop.permute.xlu1 %2155  ;;  %4162 = vmatprep.mubr.msk.bf16.mxu1 %vm3051_vm15, %v3024_v49  ;;  %4022 = vst [vmem:[%s5885_s8] sm:$0xff] %v4021_v27   ;;  %v3410_v52 = vadd.f32 %v4140_v50, %v3409_v51  ;;  %v3479_v10 = vadd.f32 %v3448_v45, %v3447_v12 }
 0x19f   : > { %v2796_v6 = vsel %vm2751_vm6, %v3802_v14, %v2156_v62 }
 0x1a0   : > { %v3480_v41 = vadd.f32 %v3479_v10, %v3449_v46  ;;  %v3411_v16 = vadd.f32 %v4141_v30, %v3410_v52 }
 0x1a2   : > { %v3481_v63 = vadd.f32 %v3480_v41, %v3450_v44 }
 0x1a3   : > { %v2746_v11 = vpop.permute.xlu0 %2745 }
 0x1a4   : > { %v2158_v26 = vpop.permute.xlu1 %2157  ;;  %v3026_v54 = vsel %vm2998_vm14, %v2993_v15, %v2746_v11 }
 0x1a5   : > { %4163 = vmatmul.mubr.msk.bf16.gmra.mrb[8].mxu1 %vm3051_vm15, %v3026_v54  ;;  %v2799_v28 = vsel %vm2751_vm6, %v3803_v23, %v2158_v26 }
 0x1a7   : > { %v2236_v59 = vpop.permute.xlu0 %2235 }
 0x1a8   : > { %v2238_v32 = vpop.permute.xlu1 %2237  ;;  %v2830_v60 = vsel %vm2800_vm7, %v2796_v6, %v2236_v59 }
 0x1a9   : > { %v2832_v19 = vsel %vm2800_vm7, %v2799_v28, %v2238_v32 }
 0x1ab   : > { %v2332_v8 = vpop.permute.xlu0 %2331 }
 0x1ac   : > { %v2334_v35 = vpop.permute.xlu1 %2333  ;;  %v2863_v57 = vsel %vm2833_vm8, %v2830_v60, %v2332_v8 }
 0x1ad   : > { %v2865_v21 = vsel %vm2833_vm8, %v2832_v19, %v2334_v35 }
 0x1b2   : > { %v2414_v24 = vpop.permute.xlu1 %2413 }
 0x1b3   : > { %v2412_v33 = vpop.permute.xlu0 %2411  ;;  %v2898_v9 = vsel %vm2866_vm9, %v2865_v21, %v2414_v24 }
 0x1b4   : > { %v2896_v36 = vsel %vm2866_vm9, %v2863_v57, %v2412_v33 }
 0x1b6   : > { %v2494_v25 = vpop.permute.xlu1 %2493 }
 0x1b7   : > { %v2492_v42 = vpop.permute.xlu0 %2491  ;;  %v2931_v22 = vsel %vm2899_vm10, %v2898_v9, %v2494_v25 }
 0x1b8   : > { %v2929_v50 = vsel %vm2899_vm10, %v2896_v36, %v2492_v42 }
 0x1ba   : > { %v2590_v0 = vpop.permute.xlu1 %2589 }
 0x1bb   : > { %v2588_v38 = vpop.permute.xlu0 %2587  ;;  %v2964_v31 = vsel %vm2932_vm11, %v2931_v22, %v2590_v0 }
 0x1bc   : > { %v2962_v18 = vsel %vm2932_vm11, %v2929_v50, %v2588_v38 }
 0x1bf   : > { %v4144_v13 = vpop.f32.mrb[4].mxu0 }
 0x1c0   : > { %v3138_v34 = vpop.f32.mrb[5].mxu0  ;;  %v3453_v47 = vmul.f32 %v4144_v13, %v4144_v13 }
 0x1c1   : > { %v3412_v1 = vadd.f32 %v3411_v16, %v3138_v34  ;;  %v3451_v20 = vmul.f32 %v3138_v34, %v3138_v34  ;;  %v4145_v17 = vpop.f32.mrb[6].mxu0  ;;  %v2670_v5 = vpop.permute.xlu1 %2669 }
 0x1c2   : > { %v4036_v14 = vpack.c.bf16 %v4145_v17, %v4144_v13  ;;  %v3141_v56 = vpop.f32.mrb[7].mxu0  ;;  %v2668_v29 = vpop.permute.xlu0 %2667  ;;  %v2997_v30 = vsel %vm2965_vm12, %v2964_v31, %v2670_v5  ;;  %v3454_v51 = vmul.f32 %v4145_v17, %v4145_v17 }
 0x1c3   : > { %v3482_v23 = vadd.f32 %v3481_v63, %v3451_v20  ;;  %v4031_v58 = vpack.c.bf16 %v3141_v56, %v3138_v34  ;;  %v3413_v37 = vadd.f32 %v3412_v1, %v3141_v56  ;;  %v3452_v39 = vmul.f32 %v3141_v56, %v3141_v56 }
 0x1c4   : > { %4100 = vst [vmem:[%s5885_s8 + $0x18] sm:$0xff] %v4036_v14   ;;  %v2995_v12 = vsel %vm2965_vm12, %v2962_v18, %v2668_v29 }
 0x1c5   : > { %4099 = vst [vmem:[%s5885_s8 + $0x10] sm:$0xff] %v4031_v58   ;;  %v3414_v53 = vadd.f32 %v4144_v13, %v3413_v37  ;;  %v2750_v3 = vpop.permute.xlu1 %2749  ;;  %v3483_v55 = vadd.f32 %v3482_v23, %v3452_v39 }
 0x1c6   : > { %v3030_v2 = vsel %vm2998_vm14, %v2997_v30, %v2750_v3  ;;  %v2748_v40 = vpop.permute.xlu0 %2747 }
 0x1c7   : > { %v3415_v49 = vadd.f32 %v4145_v17, %v3414_v53  ;;  %v3028_v27 = vsel %vm2998_vm14, %v2995_v12, %v2748_v40  ;;  %v3484_v45 = vadd.f32 %v3483_v55, %v3453_v47 }
 0x1c8   : > { %4166 = vmatprep.mubr.msk.bf16.mxu1 %vm3051_vm15, %v3028_v27 }
 0x1c9   : > { %4167 = vmatmul.mubr.msk.bf16.gmra.mrb[12].mxu1 %vm3051_vm15, %v3030_v2  ;;  %v3485_v48 = vadd.f32 %v3484_v45, %v3454_v51 }
 0x1e9   : > { %v4148_v62 = vpop.f32.mrb[8].mxu0 }
 0x1ea   : > { %v3154_v4 = vpop.f32.mrb[9].mxu0  ;;  %v3457_v15 = vmul.f32 %v4148_v62, %v4148_v62 }
 0x1eb   : > { %v3416_v46 = vadd.f32 %v3415_v49, %v3154_v4  ;;  %v3455_v52 = vmul.f32 %v3154_v4, %v3154_v4  ;;  %v4149_v10 = vpop.f32.mrb[10].mxu0 }
 0x1ec   : > { %v4046_v7 = vpack.c.bf16 %v4149_v10, %v4148_v62  ;;  %v3157_v61 = vpop.f32.mrb[11].mxu0  ;;  %v3458_v26 = vmul.f32 %v4149_v10, %v4149_v10 }
 0x1ed   : > { %v3486_v44 = vadd.f32 %v3485_v48, %v3455_v52  ;;  %v4041_v41 = vpack.c.bf16 %v3157_v61, %v3154_v4  ;;  %v3417_v16 = vadd.f32 %v3416_v46, %v3157_v61  ;;  %v3456_v43 = vmul.f32 %v3157_v61, %v3157_v61 }
 0x1ee   : > { %4102 = vst [vmem:[%s5885_s8 + $0x28] sm:$0xff] %v4046_v7  }
 0x1ef   : > { %4101 = vst [vmem:[%s5885_s8 + $0x20] sm:$0xff] %v4041_v41   ;;  %v3418_v11 = vadd.f32 %v4148_v62, %v3417_v16  ;;  %v3487_v63 = vadd.f32 %v3486_v44, %v3456_v43 }
 0x1f1   : > { %v3488_v54 = vadd.f32 %v3487_v63, %v3457_v15  ;;  %v3419_v59 = vadd.f32 %v4149_v10, %v3418_v11 }
 0x1f3   : > { %v3489_v32 = vadd.f32 %v3488_v54, %v3458_v26 }
 0x211   : > { %v4152_v35 = vpop.f32.mrb[12].mxu0 }
 0x212   : > { %v3170_v8 = vpop.f32.mrb[13].mxu0  ;;  %v3461_v34 = vmul.f32 %v4152_v35, %v4152_v35 }
 0x213   : > { %v3420_v24 = vadd.f32 %v3419_v59, %v3170_v8  ;;  %v3459_v33 = vmul.f32 %v3170_v8, %v3170_v8  ;;  %v4153_v25 = vpop.f32.mrb[14].mxu0 }
 0x214   : > { %v4056_v42 = vpack.c.bf16 %v4153_v25, %v4152_v35  ;;  %v3173_v0 = vpop.f32.mrb[15].mxu0  ;;  %v3462_v1 = vmul.f32 %v4153_v25, %v4153_v25 }
 0x215   : > { %v3490_v38 = vadd.f32 %v3489_v32, %v3459_v33  ;;  %v4051_v13 = vpack.c.bf16 %v3173_v0, %v3170_v8  ;;  %v3421_v6 = vadd.f32 %v3420_v24, %v3173_v0  ;;  %v3460_v28 = vmul.f32 %v3173_v0, %v3173_v0 }
 0x216   : > { %4104 = vst [vmem:[%s5885_s8 + $0x38] sm:$0xff] %v4056_v42  }
 0x217   : > { %4103 = vst [vmem:[%s5885_s8 + $0x30] sm:$0xff] %v4051_v13   ;;  %v3422_v19 = vadd.f32 %v4152_v35, %v3421_v6  ;;  %v3491_v60 = vadd.f32 %v3490_v38, %v3460_v28 }
 0x219   : > { %v3492_v20 = vadd.f32 %v3491_v60, %v3461_v34  ;;  %v3423_v17 = vadd.f32 %v4153_v25, %v3422_v19 }
 0x21b   : > { %v3493_v21 = vadd.f32 %v3492_v20, %v3462_v1 }
 0x226   : > { %v4156_v57 = vpop.f32.mrb[0].mxu1 }
 0x227   : > { %v3186_v5 = vpop.f32.mrb[1].mxu1  ;;  %v3465_v39 = vmul.f32 %v4156_v57, %v4156_v57 }
 0x228   : > { %v3424_v14 = vadd.f32 %v3423_v17, %v3186_v5  ;;  %v3463_v56 = vmul.f32 %v3186_v5, %v3186_v5  ;;  %v4157_v9 = vpop.f32.mrb[2].mxu1 }
 0x229   : > { %v4066_v29 = vpack.c.bf16 %v4157_v9, %v4156_v57  ;;  %v3189_v23 = vpop.f32.mrb[3].mxu1  ;;  %v3466_v53 = vmul.f32 %v4157_v9, %v4157_v9 }
 0x22a   : > { %v3494_v58 = vadd.f32 %v3493_v21, %v3463_v56  ;;  %v4061_v37 = vpack.c.bf16 %v3189_v23, %v3186_v5  ;;  %v3425_v36 = vadd.f32 %v3424_v14, %v3189_v23  ;;  %v3464_v22 = vmul.f32 %v3189_v23, %v3189_v23 }
 0x22b   : > { %4106 = vst [vmem:[%s5885_s8 + $0x48] sm:$0xff] %v4066_v29  }
 0x22c   : > { %4105 = vst [vmem:[%s5885_s8 + $0x40] sm:$0xff] %v4061_v37   ;;  %v3426_v50 = vadd.f32 %v4156_v57, %v3425_v36  ;;  %v3495_v31 = vadd.f32 %v3494_v58, %v3464_v22 }
 0x22e   : > { %v3496_v18 = vadd.f32 %v3495_v31, %v3465_v39  ;;  %v3427_v30 = vadd.f32 %v4157_v9, %v3426_v50 }
 0x230   : > { %v3497_v3 = vadd.f32 %v3496_v18, %v3466_v53 }
 0x24f   : > { %v4160_v47 = vpop.f32.mrb[4].mxu1 }
 0x250   : > { %v3202_v55 = vpop.f32.mrb[5].mxu1  ;;  %v3469_v4 = vmul.f32 %v4160_v47, %v4160_v47 }
 0x251   : > { %v3428_v12 = vadd.f32 %v3427_v30, %v3202_v55  ;;  %v3467_v2 = vmul.f32 %v3202_v55, %v3202_v55  ;;  %v4161_v40 = vpop.f32.mrb[6].mxu1 }
 0x252   : > { %v4076_v49 = vpack.c.bf16 %v4161_v40, %v4160_v47  ;;  %v3205_v27 = vpop.f32.mrb[7].mxu1  ;;  %v3470_v10 = vmul.f32 %v4161_v40, %v4161_v40 }
 0x253   : > { %v3498_v51 = vadd.f32 %v3497_v3, %v3467_v2  ;;  %v4071_v45 = vpack.c.bf16 %v3205_v27, %v3202_v55  ;;  %v3429_v48 = vadd.f32 %v3428_v12, %v3205_v27  ;;  %v3468_v62 = vmul.f32 %v3205_v27, %v3205_v27 }
 0x254   : > { %4108 = vst [vmem:[%s5885_s8 + $0x58] sm:$0xff] %v4076_v49  }
 0x255   : > { %4107 = vst [vmem:[%s5885_s8 + $0x50] sm:$0xff] %v4071_v45   ;;  %v3430_v46 = vadd.f32 %v4160_v47, %v3429_v48  ;;  %v3499_v52 = vadd.f32 %v3498_v51, %v3468_v62 }
 0x257   : > { %v3500_v7 = vadd.f32 %v3499_v52, %v3469_v4  ;;  %v3431_v61 = vadd.f32 %v4161_v40, %v3430_v46 }
 0x259   : > { %v3501_v44 = vadd.f32 %v3500_v7, %v3470_v10 }
 0x278   : > { %v4164_v41 = vpop.f32.mrb[8].mxu1 }
 0x279   : > { %v3218_v16 = vpop.f32.mrb[9].mxu1  ;;  %v3473_v8 = vmul.f32 %v4164_v41, %v4164_v41 }
 0x27a   : > { %v3432_v43 = vadd.f32 %v3431_v61, %v3218_v16  ;;  %v3471_v15 = vmul.f32 %v3218_v16, %v3218_v16  ;;  %v4165_v11 = vpop.f32.mrb[10].mxu1 }
 0x27b   : > { %v4086_v63 = vpack.c.bf16 %v4165_v11, %v4164_v41  ;;  %v3221_v26 = vpop.f32.mrb[11].mxu1  ;;  %v3474_v25 = vmul.f32 %v4165_v11, %v4165_v11 }
 0x27c   : > { %v3502_v54 = vadd.f32 %v3501_v44, %v3471_v15  ;;  %v4081_v59 = vpack.c.bf16 %v3221_v26, %v3218_v16  ;;  %v3433_v32 = vadd.f32 %v3432_v43, %v3221_v26  ;;  %v3472_v35 = vmul.f32 %v3221_v26, %v3221_v26 }
 0x27d   : > { %4110 = vst [vmem:[%s5885_s8 + $0x68] sm:$0xff] %v4086_v63  }
 0x27e   : > { %4109 = vst [vmem:[%s5885_s8 + $0x60] sm:$0xff] %v4081_v59   ;;  %v3434_v24 = vadd.f32 %v4164_v41, %v3433_v32  ;;  %v3503_v33 = vadd.f32 %v3502_v54, %v3472_v35 }
 0x280   : > { %v3504_v42 = vadd.f32 %v3503_v33, %v3473_v8  ;;  %v3435_v0 = vadd.f32 %v4165_v11, %v3434_v24 }
 0x282   : > { %v3505_v38 = vadd.f32 %v3504_v42, %v3474_v25 }
 0x29c   : > { %v4168_v13 = vpop.f32.mrb[12].mxu1 }
 0x29d   : > { %v3234_v6 = vpop.f32.mrb[13].mxu1  ;;  %v3477_v5 = vmul.f32 %v4168_v13, %v4168_v13 }
 0x29e   : > { %v3436_v28 = vadd.f32 %v3435_v0, %v3234_v6  ;;  %v3475_v34 = vmul.f32 %v3234_v6, %v3234_v6  ;;  %v4169_v19 = vpop.f32.mrb[14].mxu1 }
 0x29f   : > { %v4096_v60 = vpack.c.bf16 %v4169_v19, %v4168_v13  ;;  %v3237_v1 = vpop.f32.mrb[15].mxu1  ;;  %v3478_v9 = vmul.f32 %v4169_v19, %v4169_v19 }
 0x2a0   : > { %v3506_v20 = vadd.f32 %v3505_v38, %v3475_v34  ;;  %v4091_v17 = vpack.c.bf16 %v3237_v1, %v3234_v6  ;;  %v3437_v21 = vadd.f32 %v3436_v28, %v3237_v1  ;;  %v3476_v57 = vmul.f32 %v3237_v1, %v3237_v1 }
 0x2a1   : > { %4112 = vst [vmem:[%s5885_s8 + $0x78] sm:$0xff] %v4096_v60  }
 0x2a2   : > { %4111 = vst [vmem:[%s5885_s8 + $0x70] sm:$0xff] %v4091_v17   ;;  %v3438_v14 = vadd.f32 %v4168_v13, %v3437_v21  ;;  %v3507_v56 = vadd.f32 %v3506_v20, %v3476_v57 }
 0x2a4   : > { %v3439_v29 = vadd.f32 %v4169_v19, %v3438_v14  ;;  %v3508_v23 = vadd.f32 %v3507_v56, %v3477_v5 }
 0x2a6   : > { %v3440_v58 = vrot.slane %v3439_v29, 4  ;;  %v3509_v37 = vadd.f32 %v3508_v23, %v3478_v9 }
 0x2a8   : > { %v3441_v36 = vadd.f32 %v3440_v58, %v3439_v29  ;;  %v3510_v22 = vrot.slane %v3509_v37, 4 }
 0x2aa   : > { %v3442_v39 = vrot.slane %v3441_v36, 2  ;;  %v3511_v50 = vadd.f32 %v3510_v22, %v3509_v37 }
 0x2ac   : > { %v3443_v31 = vadd.f32 %v3442_v39, %v3441_v36  ;;  %v3512_v53 = vrot.slane %v3511_v50, 2 }
 0x2ae   : > { %v3444_v18 = vrot.slane %v3443_v31, 1  ;;  %v3513_v30 = vadd.f32 %v3512_v53, %v3511_v50 }
 0x2b0   : > { %v3445_v3 = vadd.f32 %v3444_v18, %v3443_v31  ;;  %v3514_v47 = vrot.slane %v3513_v30, 1 }
 0x2b2   : > { %3446 = vst [vmem:[%s181_s14] sm:$0x1] %v3445_v3  ;;  %v3515_v55 = vadd.f32 %v3514_v47, %v3513_v30 }
 0x2b4   : > { %3516 = vst [vmem:[%s181_s14 + $0x1] sm:$0x1] %v3515_v55 }
 0x2b5 PF: > { %s14_s12 = sadd.s32 1, %s4280_s12  }
 0x2b6   : > { %p11_p4 = scmp.ge.s32.totalorder %s14_s12, 4  }
 0x2b8   :  { %13 = sbr.rel (!%p11_p4) target bundleno = 1 (0x1), region = 72 }

</bundles_post_ra>
